<compile_context>
chip_gen: v7x
topology: tpu7x:2x2x1
jax: 0.10.0
libtpu: 0.0.40
codegen_flags: <defaults>
</compile_context>

<pallas_src>
import functools

import jax
import jax.numpy as jnp
from jax.experimental import pallas as pl
from jax.experimental.pallas import tpu as pltpu


# ---------------------------------------------------------------------------
# VMEM budget: ~3/4 of physical (~96 MiB on v5e/v6e, ~48 MiB on v7x).
# ---------------------------------------------------------------------------
@functools.lru_cache(maxsize=None)
def _vmem_limit_bytes():
    try:
        cap = int(pltpu.get_tpu_info().vmem_capacity_bytes)
    except Exception:
        return 64 * 1024 * 1024                     # conservative fallback
    return max(32 * 1024 * 1024, min(100 * 1024 * 1024, cap * 3 // 4))


# ---------------------------------------------------------------------------
# Pallas kernels
# ---------------------------------------------------------------------------
def _conv_kernel(w_ref, aux_ref, x_ref, o_ref, *, offsets, m_rows, n_valid,
                 use_norm):
    """One conv layer (+ optional InstanceNorm) + LeakyReLU(0.2).

    w_ref  : (n_off, Kc, TCout) bf16  - per-tap-offset weight slabs
    aux_ref: (M, 1) f32 valid-column mask     if use_norm
             (1, Cout) f32 bias               otherwise
    x_ref  : (1, S, Kc) bf16 - padded feature map, spatially flattened
    o_ref  : (1, M, TCout)   - dense output rows (garbage cols sliced later)
    """
    acc = None
    for o, off in enumerate(offsets):
        lhs = x_ref[0, off:off + m_rows, :]                      # [M, Kc] bf16
        part = jnp.dot(lhs, w_ref[o], preferred_element_type=jnp.float32)
        acc = part if acc is None else acc + part                # [M, TCout] f32

    if use_norm:
        # InstanceNorm2d(affine=False, eps=1e-5): two-pass masked mean/var over
        # the n_valid real spatial positions.  (Bias is skipped: IN subtracts
        # the per-channel mean, so a constant bias is a no-op.)
        mask = aux_ref[...]                                      # [M, 1]
        inv_n = 1.0 / n_valid
        mu = jnp.sum(acc * mask, axis=0, keepdims=True) * inv_n  # [1, TCout]
        d = (acc - mu) * mask
        var = jnp.sum(d * d, axis=0, keepdims=True) * inv_n
        y = (acc - mu) * jax.lax.rsqrt(var + 1e-5)
    else:
        y = acc + aux_ref[...]                                   # bias

    y = jnp.where(y >= 0.0, y, 0.2 * y)                          # LeakyReLU(0.2)
    o_ref[0] = y.astype(o_ref.dtype)


def _pool_kernel(w_ref, b_ref, mask_ref, x_ref, o_ref, *, offsets, m_rows,
                 n_valid):
    """Final Conv2d(512->1, k4, s1, p1) fused with the global average pool.

    avgpool(conv(x)) is linear: masked per-tap spatial sums of the input are
    computed first ([1, C] each) and contracted with the matching weight row.
    No patch slab, no N=1 matmul, no whole-slab f32 cast.
    """
    mask = mask_ref[...]                                         # [M, 1]
    c = w_ref.shape[1]
    acc = jnp.zeros((1, c), jnp.float32)
    for o, off in enumerate(offsets):
        sl = x_ref[0, off:off + m_rows, :].astype(jnp.float32)   # [M, C]
        s = jnp.sum(sl * mask, axis=0, keepdims=True)            # [1, C]
        acc = acc + s * w_ref[o:o + 1, :].astype(jnp.float32)
    val = jnp.sum(acc, axis=1, keepdims=True) * (1.0 / n_valid) + b_ref[...]
    o_ref[0] = val


# ---------------------------------------------------------------------------
# pallas_call wrappers
# ---------------------------------------------------------------------------
def conv_layer_pallas(x_nhwc, w, b, *, stride, use_norm):
    """x_nhwc: [B, H, W, Cin] bf16 (valid).  Returns [B, Ho, Wo, Cout] bf16."""
    B, H, W, Cin = x_nhwc.shape
    Cout = w.shape[0]

    xp = jnp.pad(x_nhwc, ((0, 0), (1, 1), (1, 1), (0, 0)))       # padding=1
    if stride == 2:
        assert H % 2 == 0 and W % 2 == 0, "stride-2 layers need even H, W"
        Ho, Wo = H // 2, W // 2
        Hg, Wg = (H + 2) // 2, (W + 2) // 2
        # space-to-depth (pure permutation, ~1x traffic): a stride-2 4x4 conv
        # == a stride-1 2x2 conv on the [Hg, Wg, 4*Cin] polyphase grid.
        xg = xp.reshape(B, Hg, 2, Wg, 2, Cin)
        xg = xg.transpose(0, 1, 3, 2, 4, 5).reshape(B, Hg, Wg, 4 * Cin)
        Kc = 4 * Cin
        offsets = tuple(a * Wg + bb for a in range(2) for bb in range(2))
        # weight -> [4, 4*Cin, Cout]: tap offsets (a,b) outer, lanes (r,q,ci).
        w6 = w.reshape(Cout, Cin, 2, 2, 2, 2)                    # (co,ci,a,r,b,q)
        wmat = w6.transpose(2, 4, 3, 5, 1, 0).reshape(4, Kc, Cout)
    else:
        Ho, Wo = H - 1, W - 1
        Hg, Wg = H + 2, W + 2
        xg = xp
        Kc = Cin
        offsets = tuple(kh * Wg + kw for kh in range(4) for kw in range(4))
        wmat = w.transpose(2, 3, 1, 0).reshape(16, Kc, Cout)     # (kh,kw,ci,co)

    # Flatten spatial; one extra zero grid-row so the last tap-offset slice of
    # the garbage columns never reads out of bounds.
    M = Ho * Wg
    xs = xg.reshape(B, Hg * Wg, Kc)
    xs = jnp.pad(xs, ((0, 0), (0, Wg), (0, 0)))
    S = Hg * Wg + Wg

    n_off = len(offsets)
    n_ct = 2 if Cout >= 256 else 1        # keep both v7x TCs busy at tiny batch
    tc = Cout // n_ct

    if use_norm:
        cols = jnp.arange(M, dtype=jnp.int32) % Wg
        aux = (cols < Wo).astype(jnp.float32).reshape(M, 1)      # valid-col mask
        aux_spec = pl.BlockSpec((M, 1), lambda bb, c: (0, 0))
    else:
        aux = b.reshape(1, Cout).astype(jnp.float32)
        aux_spec = pl.BlockSpec((1, tc), lambda bb, c: (0, c))

    kernel = functools.partial(_conv_kernel, offsets=offsets, m_rows=M,
                               n_valid=Ho * Wo, use_norm=use_norm)

    out = pl.pallas_call(
        kernel,
        out_shape=jax.ShapeDtypeStruct((B, M, Cout), jnp.bfloat16),
        grid=(B, n_ct),
        in_specs=[
            pl.BlockSpec((n_off, Kc, tc), lambda bb, c: (0, 0, c)),
            aux_spec,
            pl.BlockSpec((1, S, Kc), lambda bb, c: (bb, 0, 0)),
        ],
        out_specs=pl.BlockSpec((1, M, tc), lambda bb, c: (bb, 0, c)),
        compiler_params=pltpu.CompilerParams(
            dimension_semantics=("parallel", "parallel"),
            vmem_limit_bytes=_vmem_limit_bytes(),
        ),
    )(wmat.astype(jnp.bfloat16), aux, xs)

    # Drop garbage columns of the dense rows -> valid NHWC.
    return out.reshape(B, Ho, Wg, Cout)[:, :, :Wo, :]


def pool_layer_pallas(h_nhwc, w, b):
    """h_nhwc: [B, H, W, 512] bf16.  Returns [B, 1] f32."""
    B, H, W, C = h_nhwc.shape
    Ho, Wo = H - 1, W - 1
    Hg, Wg = H + 2, W + 2
    xp = jnp.pad(h_nhwc, ((0, 0), (1, 1), (1, 1), (0, 0)))
    M = Ho * Wg
    xs = xp.reshape(B, Hg * Wg, C)
    xs = jnp.pad(xs, ((0, 0), (0, Wg), (0, 0)))
    S = Hg * Wg + Wg
    offsets = tuple(kh * Wg + kw for kh in range(4) for kw in range(4))

    cols = jnp.arange(M, dtype=jnp.int32) % Wg
    mask = (cols < Wo).astype(jnp.float32).reshape(M, 1)
    wmat = w.reshape(C, 4, 4).transpose(1, 2, 0).reshape(16, C)   # (kh,kw,ci)
    bias = b.reshape(1, 1).astype(jnp.float32)

    kernel = functools.partial(_pool_kernel, offsets=offsets, m_rows=M,
                               n_valid=Ho * Wo)
    out = pl.pallas_call(
        kernel,
        out_shape=jax.ShapeDtypeStruct((B, 1, 1), jnp.float32),
        grid=(B,),
        in_specs=[
            pl.BlockSpec((16, C), lambda bb: (0, 0)),
            pl.BlockSpec((1, 1), lambda bb: (0, 0)),
            pl.BlockSpec((M, 1), lambda bb: (0, 0)),
            pl.BlockSpec((1, S, C), lambda bb: (bb, 0, 0)),
        ],
        out_specs=pl.BlockSpec((1, 1, 1), lambda bb: (bb, 0, 0)),
        compiler_params=pltpu.CompilerParams(
            dimension_semantics=("parallel",),
            vmem_limit_bytes=_vmem_limit_bytes(),
        ),
    )(wmat.astype(jnp.bfloat16), bias, mask, xs)
    return out.reshape(B, 1)


# ---------------------------------------------------------------------------
# Discriminator forward
# ---------------------------------------------------------------------------
# (stride, instance_norm) for the first four conv layers
_LAYER_CFG = [
    (2, False),   # Conv(in,64,k4,s2,p1)  + LeakyReLU
    (2, True),    # Conv(64,128,s2)       + IN + LeakyReLU
    (2, True),    # Conv(128,256,s2)      + IN + LeakyReLU
    (1, True),    # Conv(256,512,s1)      + IN + LeakyReLU
]


def discriminator_forward(x, params):
    # NCHW -> NHWC once; activations stored bf16 (IN-normalized, O(1) values).
    h = jnp.transpose(x, (0, 2, 3, 1)).astype(jnp.bfloat16)
    for (w, b), (stride, use_norm) in zip(params[:4], _LAYER_CFG):
        h = conv_layer_pallas(h, w, b, stride=stride, use_norm=use_norm)
    w5, b5 = params[4]
    return pool_layer_pallas(h, w5, b5)                          # [B, 1]


# ---------------------------------------------------------------------------
# Pure-JAX references.  quantize=True mirrors the kernel's bf16 operand /
# f32-accumulate / bf16 activation-storage scheme (tight check);
# quantize=False is the original full-f32 module semantics (loose check).
# ---------------------------------------------------------------------------
def reference_forward(x, params, *, quantize):
    cast = (lambda a: a.astype(jnp.bfloat16)) if quantize else (lambda a: a)
    cfg = [(s, n, True) for s, n in _LAYER_CFG] + [(1, False, False)]
    h = cast(x)
    for li, ((w, b), (stride, use_norm, leaky)) in enumerate(zip(params, cfg)):
        y = jax.lax.conv_general_dilated(
            cast(h), cast(w), (stride, stride), ((1, 1), (1, 1)),
            dimension_numbers=("NCHW", "OIHW", "NCHW"),
            preferred_element_type=jnp.float32,
        ) + b.astype(jnp.float32)[None, :, None, None]
        if use_norm:
            mu = jnp.mean(y, axis=(2, 3), keepdims=True)
            var = jnp.mean((y - mu) ** 2, axis=(2, 3), keepdims=True)
            y = (y - mu) * jax.lax.rsqrt(var + 1e-5)
        if leaky:
            y = jnp.where(y >= 0.0, y, 0.2 * y)
        h = cast(y) if li < 4 else y
    return jnp.mean(h, axis=(2, 3)).reshape(h.shape[0], -1)


# ---------------------------------------------------------------------------
# Parameter init (deterministic, synthetic)
# ---------------------------------------------------------------------------
def init_params(key, input_nc):
    channels = [input_nc, 64, 128, 256, 512, 1]
    params = []
    for li in range(5):
        cin, cout = channels[li], channels[li + 1]
        key, kw, kb = jax.random.split(key, 3)
        w = 0.02 * jax.random.normal(kw, (cout, cin, 4, 4), dtype=jnp.float32)
        b = 0.01 * jax.random.normal(kb, (cout,), dtype=jnp.float32)
        params.append((w, b))
    return params


if __name__ == "__main__":
    key = jax.random.PRNGKey(0)
    k_x, k_p = jax.random.split(key)

    B, input_nc, H, W = 2, 3, 32, 32   # smallest clean spatial size for 3 stride-2 stages
    x = jax.random.normal(k_x, (B, input_nc, H, W), dtype=jnp.float32)
    params = init_params(k_p, input_nc)

    fwd = jax.jit(discriminator_forward)
    out = jax.block_until_ready(fwd(x, params))
    assert out.shape == (B, 1), out.shape

    ref_q = jax.block_until_ready(reference_forward(x, params, quantize=True))
    ref_f = jax.block_until_ready(reference_forward(x, params, quantize=False))
    # Tight check vs bf16-matched reference; loose check vs original f32 module.
    assert jnp.allclose(out, ref_q, atol=2e-2, rtol=2e-2), (out, ref_q)
    assert jnp.allclose(out, ref_f, atol=2e-1, rtol=2e-1), (out, ref_f)

    print("KERNEL_OK")
</pallas_src>

<mosaic_0001>
module attributes {stable_mosaic.version = 11 : i64} {
  func.func @_conv_kernel(%arg0: i32, %arg1: i32, %arg2: memref<4x12x64xbf16, #tpu.memory_space<vmem>>, %arg3: memref<1x64xf32, #tpu.memory_space<vmem>>, %arg4: memref<1x306x12xbf16, #tpu.memory_space<vmem>>, %arg5: memref<1x272x64xbf16, #tpu.memory_space<vmem>>) attributes {dimension_semantics = [#tpu.dimension_semantics<parallel>, #tpu.dimension_semantics<parallel>], iteration_bounds = array<i64: 2, 1>, scalar_prefetch = 0 : i64, scratch_operands = 0 : i64, tpu.core_type = #tpu.core_type<tc>, window_params = [{transform_indices = @transform_0, window_bounds = array<i64: 4, 12, 64>}, {transform_indices = @transform_1, window_bounds = array<i64: 1, 64>}, {transform_indices = @transform_2, window_bounds = array<i64: 1, 306, 12>}, {transform_indices = @transform_3, window_bounds = array<i64: 1, 272, 64>}]} {
    %c0 = arith.constant 0 : index
    %c0_0 = arith.constant 0 : index
    %c0_1 = arith.constant 0 : index
    %0 = vector.load %arg4[%c0, %c0_0, %c0_1] : memref<1x306x12xbf16, #tpu.memory_space<vmem>>, vector<1x272x12xbf16>
    %1 = vector.shape_cast %0 : vector<1x272x12xbf16> to vector<272x12xbf16>
    %c0_2 = arith.constant 0 : index
    %c0_3 = arith.constant 0 : index
    %c0_4 = arith.constant 0 : index
    %2 = vector.load %arg2[%c0_2, %c0_3, %c0_4] : memref<4x12x64xbf16, #tpu.memory_space<vmem>>, vector<1x12x64xbf16>
    %3 = vector.shape_cast %2 : vector<1x12x64xbf16> to vector<12x64xbf16>
    %cst = arith.constant dense<0.000000e+00> : vector<272x64xf32>
    %4 = tpu.matmul %1, %3, %cst {dimension_numbers = #tpu.dot_dimension_numbers<[1], [0], [0], [1], [0, 0, 1, 1], [], []>} : vector<272x12xbf16>, vector<12x64xbf16>, vector<272x64xf32> -> vector<272x64xf32>
    %c0_5 = arith.constant 0 : index
    %c1 = arith.constant 1 : index
    %c0_6 = arith.constant 0 : index
    %5 = vector.load %arg4[%c0_5, %c1, %c0_6] : memref<1x306x12xbf16, #tpu.memory_space<vmem>>, vector<1x272x12xbf16>
    %6 = vector.shape_cast %5 : vector<1x272x12xbf16> to vector<272x12xbf16>
    %c1_7 = arith.constant 1 : index
    %c0_8 = arith.constant 0 : index
    %c0_9 = arith.constant 0 : index
    %7 = vector.load %arg2[%c1_7, %c0_8, %c0_9] : memref<4x12x64xbf16, #tpu.memory_space<vmem>>, vector<1x12x64xbf16>
    %8 = vector.shape_cast %7 : vector<1x12x64xbf16> to vector<12x64xbf16>
    %cst_10 = arith.constant dense<0.000000e+00> : vector<272x64xf32>
    %9 = tpu.matmul %6, %8, %cst_10 {dimension_numbers = #tpu.dot_dimension_numbers<[1], [0], [0], [1], [0, 0, 1, 1], [], []>} : vector<272x12xbf16>, vector<12x64xbf16>, vector<272x64xf32> -> vector<272x64xf32>
    %10 = arith.addf %4, %9 : vector<272x64xf32>
    %c0_11 = arith.constant 0 : index
    %c17 = arith.constant 17 : index
    %c0_12 = arith.constant 0 : index
    %11 = vector.load %arg4[%c0_11, %c17, %c0_12] : memref<1x306x12xbf16, #tpu.memory_space<vmem>>, vector<1x272x12xbf16>
    %12 = vector.shape_cast %11 : vector<1x272x12xbf16> to vector<272x12xbf16>
    %c2 = arith.constant 2 : index
    %c0_13 = arith.constant 0 : index
    %c0_14 = arith.constant 0 : index
    %13 = vector.load %arg2[%c2, %c0_13, %c0_14] : memref<4x12x64xbf16, #tpu.memory_space<vmem>>, vector<1x12x64xbf16>
    %14 = vector.shape_cast %13 : vector<1x12x64xbf16> to vector<12x64xbf16>
    %cst_15 = arith.constant dense<0.000000e+00> : vector<272x64xf32>
    %15 = tpu.matmul %12, %14, %cst_15 {dimension_numbers = #tpu.dot_dimension_numbers<[1], [0], [0], [1], [0, 0, 1, 1], [], []>} : vector<272x12xbf16>, vector<12x64xbf16>, vector<272x64xf32> -> vector<272x64xf32>
    %16 = arith.addf %10, %15 : vector<272x64xf32>
    %c0_16 = arith.constant 0 : index
    %c18 = arith.constant 18 : index
    %c0_17 = arith.constant 0 : index
    %17 = vector.load %arg4[%c0_16, %c18, %c0_17] : memref<1x306x12xbf16, #tpu.memory_space<vmem>>, vector<1x272x12xbf16>
    %18 = vector.shape_cast %17 : vector<1x272x12xbf16> to vector<272x12xbf16>
    %c3 = arith.constant 3 : index
    %c0_18 = arith.constant 0 : index
    %c0_19 = arith.constant 0 : index
    %19 = vector.load %arg2[%c3, %c0_18, %c0_19] : memref<4x12x64xbf16, #tpu.memory_space<vmem>>, vector<1x12x64xbf16>
    %20 = vector.shape_cast %19 : vector<1x12x64xbf16> to vector<12x64xbf16>
    %cst_20 = arith.constant dense<0.000000e+00> : vector<272x64xf32>
    %21 = tpu.matmul %18, %20, %cst_20 {dimension_numbers = #tpu.dot_dimension_numbers<[1], [0], [0], [1], [0, 0, 1, 1], [], []>} : vector<272x12xbf16>, vector<12x64xbf16>, vector<272x64xf32> -> vector<272x64xf32>
    %22 = arith.addf %16, %21 : vector<272x64xf32>
    %c0_21 = arith.constant 0 : index
    %c0_22 = arith.constant 0 : index
    %23 = vector.load %arg3[%c0_21, %c0_22] : memref<1x64xf32, #tpu.memory_space<vmem>>, vector<1x64xf32>
    %24 = vector.broadcast %23 : vector<1x64xf32> to vector<272x64xf32>
    %25 = arith.addf %22, %24 : vector<272x64xf32>
    %cst_23 = arith.constant 0.000000e+00 : f32
    %26 = vector.broadcast %cst_23 : f32 to vector<272x64xf32>
    %27 = arith.cmpf oge, %25, %26 : vector<272x64xf32>
    %cst_24 = arith.constant 2.000000e-01 : f32
    %28 = vector.broadcast %cst_24 : f32 to vector<272x64xf32>
    %29 = arith.mulf %28, %25 : vector<272x64xf32>
    %30 = arith.select %27, %25, %29 : vector<272x64xi1>, vector<272x64xf32>
    %31 = arith.truncf %30 : vector<272x64xf32> to vector<272x64xbf16>
    %c0_25 = arith.constant 0 : index
    %c0_26 = arith.constant 0 : index
    %c0_27 = arith.constant 0 : index
    %32 = vector.load %arg5[%c0_25, %c0_26, %c0_27] : memref<1x272x64xbf16, #tpu.memory_space<vmem>>, vector<1x272x64xbf16>
    %33 = vector.shape_cast %32 : vector<1x272x64xbf16> to vector<272x64xbf16>
    %34 = vector.shape_cast %31 : vector<272x64xbf16> to vector<1x272x64xbf16>
    tpu.vector_store %arg5[%c0_25, %c0_26, %c0_27], %34 {strides = array<i32>} : memref<1x272x64xbf16, #tpu.memory_space<vmem>>, vector<1x272x64xbf16>,
    return
  }
  func.func @transform_0(%arg0: i32, %arg1: i32) -> (i32, i32, i32) {
    %c0_i32 = arith.constant 0 : i32
    %c0_i32_0 = arith.constant 0 : i32
    %c0_i32_1 = arith.constant 0 : i32
    return %c0_i32, %c0_i32_0, %arg1 : i32, i32, i32
  }
  func.func @transform_1(%arg0: i32, %arg1: i32) -> (i32, i32) {
    %c0_i32 = arith.constant 0 : i32
    %c0_i32_0 = arith.constant 0 : i32
    return %c0_i32, %arg1 : i32, i32
  }
  func.func @transform_2(%arg0: i32, %arg1: i32) -> (i32, i32, i32) {
    %c0_i32 = arith.constant 0 : i32
    %c0_i32_0 = arith.constant 0 : i32
    %c0_i32_1 = arith.constant 0 : i32
    return %arg0, %c0_i32, %c0_i32_0 : i32, i32, i32
  }
  func.func @transform_3(%arg0: i32, %arg1: i32) -> (i32, i32, i32) {
    %c0_i32 = arith.constant 0 : i32
    %c0_i32_0 = arith.constant 0 : i32
    return %arg0, %c0_i32, %arg1 : i32, i32, i32
  }
}

module attributes {stable_mosaic.version = 11 : i64} {
  func.func @_conv_kernel(%arg0: i32, %arg1: i32, %arg2: memref<4x256x128xbf16, #tpu.memory_space<vmem>>, %arg3: memref<72x1xf32, #tpu.memory_space<vmem>>, %arg4: memref<1x90x256xbf16, #tpu.memory_space<vmem>>, %arg5: memref<1x72x128xbf16, #tpu.memory_space<vmem>>) attributes {dimension_semantics = [#tpu.dimension_semantics<parallel>, #tpu.dimension_semantics<parallel>], iteration_bounds = array<i64: 2, 1>, scalar_prefetch = 0 : i64, scratch_operands = 0 : i64, tpu.core_type = #tpu.core_type<tc>, window_params = [{transform_indices = @transform_0, window_bounds = array<i64: 4, 256, 128>}, {pipeline_mode = #tpu.pipeline_mode<synchronous>, transform_indices = @transform_1, window_bounds = array<i64: 72, 1>}, {transform_indices = @transform_2, window_bounds = array<i64: 1, 90, 256>}, {transform_indices = @transform_3, window_bounds = array<i64: 1, 72, 128>}]} {
    %c0 = arith.constant 0 : index
    %c0_0 = arith.constant 0 : index
    %c0_1 = arith.constant 0 : index
    %0 = vector.load %arg4[%c0, %c0_0, %c0_1] : memref<1x90x256xbf16, #tpu.memory_space<vmem>>, vector<1x72x256xbf16>
    %1 = vector.shape_cast %0 : vector<1x72x256xbf16> to vector<72x256xbf16>
    %c0_2 = arith.constant 0 : index
    %c0_3 = arith.constant 0 : index
    %c0_4 = arith.constant 0 : index
    %2 = vector.load %arg2[%c0_2, %c0_3, %c0_4] : memref<4x256x128xbf16, #tpu.memory_space<vmem>>, vector<1x256x128xbf16>
    %3 = vector.shape_cast %2 : vector<1x256x128xbf16> to vector<256x128xbf16>
    %cst = arith.constant dense<0.000000e+00> : vector<72x128xf32>
    %4 = tpu.matmul %1, %3, %cst {dimension_numbers = #tpu.dot_dimension_numbers<[1], [0], [0], [1], [0, 0, 1, 1], [], []>} : vector<72x256xbf16>, vector<256x128xbf16>, vector<72x128xf32> -> vector<72x128xf32>
    %c0_5 = arith.constant 0 : index
    %c1 = arith.constant 1 : index
    %c0_6 = arith.constant 0 : index
    %5 = vector.load %arg4[%c0_5, %c1, %c0_6] : memref<1x90x256xbf16, #tpu.memory_space<vmem>>, vector<1x72x256xbf16>
    %6 = vector.shape_cast %5 : vector<1x72x256xbf16> to vector<72x256xbf16>
    %c1_7 = arith.constant 1 : index
    %c0_8 = arith.constant 0 : index
    %c0_9 = arith.constant 0 : index
    %7 = vector.load %arg2[%c1_7, %c0_8, %c0_9] : memref<4x256x128xbf16, #tpu.memory_space<vmem>>, vector<1x256x128xbf16>
    %8 = vector.shape_cast %7 : vector<1x256x128xbf16> to vector<256x128xbf16>
    %cst_10 = arith.constant dense<0.000000e+00> : vector<72x128xf32>
    %9 = tpu.matmul %6, %8, %cst_10 {dimension_numbers = #tpu.dot_dimension_numbers<[1], [0], [0], [1], [0, 0, 1, 1], [], []>} : vector<72x256xbf16>, vector<256x128xbf16>, vector<72x128xf32> -> vector<72x128xf32>
    %10 = arith.addf %4, %9 : vector<72x128xf32>
    %c0_11 = arith.constant 0 : index
    %c9 = arith.constant 9 : index
    %c0_12 = arith.constant 0 : index
    %11 = vector.load %arg4[%c0_11, %c9, %c0_12] : memref<1x90x256xbf16, #tpu.memory_space<vmem>>, vector<1x72x256xbf16>
    %12 = vector.shape_cast %11 : vector<1x72x256xbf16> to vector<72x256xbf16>
    %c2 = arith.constant 2 : index
    %c0_13 = arith.constant 0 : index
    %c0_14 = arith.constant 0 : index
    %13 = vector.load %arg2[%c2, %c0_13, %c0_14] : memref<4x256x128xbf16, #tpu.memory_space<vmem>>, vector<1x256x128xbf16>
    %14 = vector.shape_cast %13 : vector<1x256x128xbf16> to vector<256x128xbf16>
    %cst_15 = arith.constant dense<0.000000e+00> : vector<72x128xf32>
    %15 = tpu.matmul %12, %14, %cst_15 {dimension_numbers = #tpu.dot_dimension_numbers<[1], [0], [0], [1], [0, 0, 1, 1], [], []>} : vector<72x256xbf16>, vector<256x128xbf16>, vector<72x128xf32> -> vector<72x128xf32>
    %16 = arith.addf %10, %15 : vector<72x128xf32>
    %c0_16 = arith.constant 0 : index
    %c10 = arith.constant 10 : index
    %c0_17 = arith.constant 0 : index
    %17 = vector.load %arg4[%c0_16, %c10, %c0_17] : memref<1x90x256xbf16, #tpu.memory_space<vmem>>, vector<1x72x256xbf16>
    %18 = vector.shape_cast %17 : vector<1x72x256xbf16> to vector<72x256xbf16>
    %c3 = arith.constant 3 : index
    %c0_18 = arith.constant 0 : index
    %c0_19 = arith.constant 0 : index
    %19 = vector.load %arg2[%c3, %c0_18, %c0_19] : memref<4x256x128xbf16, #tpu.memory_space<vmem>>, vector<1x256x128xbf16>
    %20 = vector.shape_cast %19 : vector<1x256x128xbf16> to vector<256x128xbf16>
    %cst_20 = arith.constant dense<0.000000e+00> : vector<72x128xf32>
    %21 = tpu.matmul %18, %20, %cst_20 {dimension_numbers = #tpu.dot_dimension_numbers<[1], [0], [0], [1], [0, 0, 1, 1], [], []>} : vector<72x256xbf16>, vector<256x128xbf16>, vector<72x128xf32> -> vector<72x128xf32>
    %22 = arith.addf %16, %21 : vector<72x128xf32>
    %c0_21 = arith.constant 0 : index
    %c0_22 = arith.constant 0 : index
    %23 = vector.load %arg3[%c0_21, %c0_22] : memref<72x1xf32, #tpu.memory_space<vmem>>, vector<72x1xf32>
    %24 = vector.broadcast %23 : vector<72x1xf32> to vector<72x128xf32>
    %25 = arith.mulf %22, %24 : vector<72x128xf32>
    %cst_23 = arith.constant dense<0.000000e+00> : vector<128xf32>
    %26 = vector.multi_reduction <add>, %25, %cst_23 [0] : vector<72x128xf32> to vector<128xf32>
    %27 = vector.shape_cast %26 : vector<128xf32> to vector<1x128xf32>
    %cst_24 = arith.constant 1.562500e-02 : f32
    %28 = vector.broadcast %cst_24 : f32 to vector<1x128xf32>
    %29 = arith.mulf %27, %28 : vector<1x128xf32>
    %30 = vector.broadcast %29 : vector<1x128xf32> to vector<72x128xf32>
    %31 = arith.subf %22, %30 : vector<72x128xf32>
    %32 = vector.broadcast %23 : vector<72x1xf32> to vector<72x128xf32>
    %33 = arith.mulf %31, %32 : vector<72x128xf32>
    %34 = arith.mulf %33, %33 : vector<72x128xf32>
    %cst_25 = arith.constant dense<0.000000e+00> : vector<128xf32>
    %35 = vector.multi_reduction <add>, %34, %cst_25 [0] : vector<72x128xf32> to vector<128xf32>
    %36 = vector.shape_cast %35 : vector<128xf32> to vector<1x128xf32>
    %cst_26 = arith.constant 1.562500e-02 : f32
    %37 = vector.broadcast %cst_26 : f32 to vector<1x128xf32>
    %38 = arith.mulf %36, %37 : vector<1x128xf32>
    %39 = vector.broadcast %29 : vector<1x128xf32> to vector<72x128xf32>
    %40 = arith.subf %22, %39 : vector<72x128xf32>
    %cst_27 = arith.constant 9.99999974E-6 : f32
    %41 = vector.broadcast %cst_27 : f32 to vector<1x128xf32>
    %42 = arith.addf %38, %41 : vector<1x128xf32>
    %43 = math.rsqrt %42 : vector<1x128xf32>
    %44 = vector.broadcast %43 : vector<1x128xf32> to vector<72x128xf32>
    %45 = arith.mulf %40, %44 : vector<72x128xf32>
    %cst_28 = arith.constant 0.000000e+00 : f32
    %46 = vector.broadcast %cst_28 : f32 to vector<72x128xf32>
    %47 = arith.cmpf oge, %45, %46 : vector<72x128xf32>
    %cst_29 = arith.constant 2.000000e-01 : f32
    %48 = vector.broadcast %cst_29 : f32 to vector<72x128xf32>
    %49 = arith.mulf %48, %45 : vector<72x128xf32>
    %50 = arith.select %47, %45, %49 : vector<72x128xi1>, vector<72x128xf32>
    %51 = arith.truncf %50 : vector<72x128xf32> to vector<72x128xbf16>
    %c0_30 = arith.constant 0 : index
    %c0_31 = arith.constant 0 : index
    %c0_32 = arith.constant 0 : index
    %52 = vector.load %arg5[%c0_30, %c0_31, %c0_32] : memref<1x72x128xbf16, #tpu.memory_space<vmem>>, vector<1x72x128xbf16>
    %53 = vector.shape_cast %52 : vector<1x72x128xbf16> to vector<72x128xbf16>
    %54 = vector.shape_cast %51 : vector<72x128xbf16> to vector<1x72x128xbf16>
    tpu.vector_store %arg5[%c0_30, %c0_31, %c0_32], %54 {strides = array<i32>} : memref<1x72x128xbf16, #tpu.memory_space<vmem>>, vector<1x72x128xbf16>,
    return
  }
  func.func @transform_0(%arg0: i32, %arg1: i32) -> (i32, i32, i32) {
    %c0_i32 = arith.constant 0 : i32
    %c0_i32_0 = arith.constant 0 : i32
    %c0_i32_1 = arith.constant 0 : i32
    return %c0_i32, %c0_i32_0, %arg1 : i32, i32, i32
  }
  func.func @transform_1(%arg0: i32, %arg1: i32) -> (i32, i32) {
    %c0_i32 = arith.constant 0 : i32
    %c0_i32_0 = arith.constant 0 : i32
    %c0_i32_1 = arith.constant 0 : i32
    return %c0_i32, %c0_i32_0 : i32, i32
  }
  func.func @transform_2(%arg0: i32, %arg1: i32) -> (i32, i32, i32) {
    %c0_i32 = arith.constant 0 : i32
    %c0_i32_0 = arith.constant 0 : i32
    %c0_i32_1 = arith.constant 0 : i32
    return %arg0, %c0_i32, %c0_i32_0 : i32, i32, i32
  }
  func.func @transform_3(%arg0: i32, %arg1: i32) -> (i32, i32, i32) {
    %c0_i32 = arith.constant 0 : i32
    %c0_i32_0 = arith.constant 0 : i32
    return %arg0, %c0_i32, %arg1 : i32, i32, i32
  }
}

module attributes {stable_mosaic.version = 11 : i64} {
  func.func @_conv_kernel(%arg0: i32, %arg1: i32, %arg2: memref<4x512x128xbf16, #tpu.memory_space<vmem>>, %arg3: memref<20x1xf32, #tpu.memory_space<vmem>>, %arg4: memref<1x30x512xbf16, #tpu.memory_space<vmem>>, %arg5: memref<1x20x128xbf16, #tpu.memory_space<vmem>>) attributes {dimension_semantics = [#tpu.dimension_semantics<parallel>, #tpu.dimension_semantics<parallel>], iteration_bounds = array<i64: 2, 2>, scalar_prefetch = 0 : i64, scratch_operands = 0 : i64, tpu.core_type = #tpu.core_type<tc>, window_params = [{transform_indices = @transform_0, window_bounds = array<i64: 4, 512, 128>}, {pipeline_mode = #tpu.pipeline_mode<synchronous>, transform_indices = @transform_1, window_bounds = array<i64: 20, 1>}, {transform_indices = @transform_2, window_bounds = array<i64: 1, 30, 512>}, {transform_indices = @transform_3, window_bounds = array<i64: 1, 20, 128>}]} {
    %c0 = arith.constant 0 : index
    %c0_0 = arith.constant 0 : index
    %c0_1 = arith.constant 0 : index
    %0 = vector.load %arg4[%c0, %c0_0, %c0_1] : memref<1x30x512xbf16, #tpu.memory_space<vmem>>, vector<1x20x512xbf16>
    %1 = vector.shape_cast %0 : vector<1x20x512xbf16> to vector<20x512xbf16>
    %c0_2 = arith.constant 0 : index
    %c0_3 = arith.constant 0 : index
    %c0_4 = arith.constant 0 : index
    %2 = vector.load %arg2[%c0_2, %c0_3, %c0_4] : memref<4x512x128xbf16, #tpu.memory_space<vmem>>, vector<1x512x128xbf16>
    %3 = vector.shape_cast %2 : vector<1x512x128xbf16> to vector<512x128xbf16>
    %cst = arith.constant dense<0.000000e+00> : vector<20x128xf32>
    %4 = tpu.matmul %1, %3, %cst {dimension_numbers = #tpu.dot_dimension_numbers<[1], [0], [0], [1], [0, 0, 1, 1], [], []>} : vector<20x512xbf16>, vector<512x128xbf16>, vector<20x128xf32> -> vector<20x128xf32>
    %c0_5 = arith.constant 0 : index
    %c1 = arith.constant 1 : index
    %c0_6 = arith.constant 0 : index
    %5 = vector.load %arg4[%c0_5, %c1, %c0_6] : memref<1x30x512xbf16, #tpu.memory_space<vmem>>, vector<1x20x512xbf16>
    %6 = vector.shape_cast %5 : vector<1x20x512xbf16> to vector<20x512xbf16>
    %c1_7 = arith.constant 1 : index
    %c0_8 = arith.constant 0 : index
    %c0_9 = arith.constant 0 : index
    %7 = vector.load %arg2[%c1_7, %c0_8, %c0_9] : memref<4x512x128xbf16, #tpu.memory_space<vmem>>, vector<1x512x128xbf16>
    %8 = vector.shape_cast %7 : vector<1x512x128xbf16> to vector<512x128xbf16>
    %cst_10 = arith.constant dense<0.000000e+00> : vector<20x128xf32>
    %9 = tpu.matmul %6, %8, %cst_10 {dimension_numbers = #tpu.dot_dimension_numbers<[1], [0], [0], [1], [0, 0, 1, 1], [], []>} : vector<20x512xbf16>, vector<512x128xbf16>, vector<20x128xf32> -> vector<20x128xf32>
    %10 = arith.addf %4, %9 : vector<20x128xf32>
    %c0_11 = arith.constant 0 : index
    %c5 = arith.constant 5 : index
    %c0_12 = arith.constant 0 : index
    %11 = vector.load %arg4[%c0_11, %c5, %c0_12] : memref<1x30x512xbf16, #tpu.memory_space<vmem>>, vector<1x20x512xbf16>
    %12 = vector.shape_cast %11 : vector<1x20x512xbf16> to vector<20x512xbf16>
    %c2 = arith.constant 2 : index
    %c0_13 = arith.constant 0 : index
    %c0_14 = arith.constant 0 : index
    %13 = vector.load %arg2[%c2, %c0_13, %c0_14] : memref<4x512x128xbf16, #tpu.memory_space<vmem>>, vector<1x512x128xbf16>
    %14 = vector.shape_cast %13 : vector<1x512x128xbf16> to vector<512x128xbf16>
    %cst_15 = arith.constant dense<0.000000e+00> : vector<20x128xf32>
    %15 = tpu.matmul %12, %14, %cst_15 {dimension_numbers = #tpu.dot_dimension_numbers<[1], [0], [0], [1], [0, 0, 1, 1], [], []>} : vector<20x512xbf16>, vector<512x128xbf16>, vector<20x128xf32> -> vector<20x128xf32>
    %16 = arith.addf %10, %15 : vector<20x128xf32>
    %c0_16 = arith.constant 0 : index
    %c6 = arith.constant 6 : index
    %c0_17 = arith.constant 0 : index
    %17 = vector.load %arg4[%c0_16, %c6, %c0_17] : memref<1x30x512xbf16, #tpu.memory_space<vmem>>, vector<1x20x512xbf16>
    %18 = vector.shape_cast %17 : vector<1x20x512xbf16> to vector<20x512xbf16>
    %c3 = arith.constant 3 : index
    %c0_18 = arith.constant 0 : index
    %c0_19 = arith.constant 0 : index
    %19 = vector.load %arg2[%c3, %c0_18, %c0_19] : memref<4x512x128xbf16, #tpu.memory_space<vmem>>, vector<1x512x128xbf16>
    %20 = vector.shape_cast %19 : vector<1x512x128xbf16> to vector<512x128xbf16>
    %cst_20 = arith.constant dense<0.000000e+00> : vector<20x128xf32>
    %21 = tpu.matmul %18, %20, %cst_20 {dimension_numbers = #tpu.dot_dimension_numbers<[1], [0], [0], [1], [0, 0, 1, 1], [], []>} : vector<20x512xbf16>, vector<512x128xbf16>, vector<20x128xf32> -> vector<20x128xf32>
    %22 = arith.addf %16, %21 : vector<20x128xf32>
    %c0_21 = arith.constant 0 : index
    %c0_22 = arith.constant 0 : index
    %23 = vector.load %arg3[%c0_21, %c0_22] : memref<20x1xf32, #tpu.memory_space<vmem>>, vector<20x1xf32>
    %24 = vector.broadcast %23 : vector<20x1xf32> to vector<20x128xf32>
    %25 = arith.mulf %22, %24 : vector<20x128xf32>
    %cst_23 = arith.constant dense<0.000000e+00> : vector<128xf32>
    %26 = vector.multi_reduction <add>, %25, %cst_23 [0] : vector<20x128xf32> to vector<128xf32>
    %27 = vector.shape_cast %26 : vector<128xf32> to vector<1x128xf32>
    %cst_24 = arith.constant 6.250000e-02 : f32
    %28 = vector.broadcast %cst_24 : f32 to vector<1x128xf32>
    %29 = arith.mulf %27, %28 : vector<1x128xf32>
    %30 = vector.broadcast %29 : vector<1x128xf32> to vector<20x128xf32>
    %31 = arith.subf %22, %30 : vector<20x128xf32>
    %32 = vector.broadcast %23 : vector<20x1xf32> to vector<20x128xf32>
    %33 = arith.mulf %31, %32 : vector<20x128xf32>
    %34 = arith.mulf %33, %33 : vector<20x128xf32>
    %cst_25 = arith.constant dense<0.000000e+00> : vector<128xf32>
    %35 = vector.multi_reduction <add>, %34, %cst_25 [0] : vector<20x128xf32> to vector<128xf32>
    %36 = vector.shape_cast %35 : vector<128xf32> to vector<1x128xf32>
    %cst_26 = arith.constant 6.250000e-02 : f32
    %37 = vector.broadcast %cst_26 : f32 to vector<1x128xf32>
    %38 = arith.mulf %36, %37 : vector<1x128xf32>
    %39 = vector.broadcast %29 : vector<1x128xf32> to vector<20x128xf32>
    %40 = arith.subf %22, %39 : vector<20x128xf32>
    %cst_27 = arith.constant 9.99999974E-6 : f32
    %41 = vector.broadcast %cst_27 : f32 to vector<1x128xf32>
    %42 = arith.addf %38, %41 : vector<1x128xf32>
    %43 = math.rsqrt %42 : vector<1x128xf32>
    %44 = vector.broadcast %43 : vector<1x128xf32> to vector<20x128xf32>
    %45 = arith.mulf %40, %44 : vector<20x128xf32>
    %cst_28 = arith.constant 0.000000e+00 : f32
    %46 = vector.broadcast %cst_28 : f32 to vector<20x128xf32>
    %47 = arith.cmpf oge, %45, %46 : vector<20x128xf32>
    %cst_29 = arith.constant 2.000000e-01 : f32
    %48 = vector.broadcast %cst_29 : f32 to vector<20x128xf32>
    %49 = arith.mulf %48, %45 : vector<20x128xf32>
    %50 = arith.select %47, %45, %49 : vector<20x128xi1>, vector<20x128xf32>
    %51 = arith.truncf %50 : vector<20x128xf32> to vector<20x128xbf16>
    %c0_30 = arith.constant 0 : index
    %c0_31 = arith.constant 0 : index
    %c0_32 = arith.constant 0 : index
    %52 = vector.load %arg5[%c0_30, %c0_31, %c0_32] : memref<1x20x128xbf16, #tpu.memory_space<vmem>>, vector<1x20x128xbf16>
    %53 = vector.shape_cast %52 : vector<1x20x128xbf16> to vector<20x128xbf16>
    %54 = vector.shape_cast %51 : vector<20x128xbf16> to vector<1x20x128xbf16>
    tpu.vector_store %arg5[%c0_30, %c0_31, %c0_32], %54 {strides = array<i32>} : memref<1x20x128xbf16, #tpu.memory_space<vmem>>, vector<1x20x128xbf16>,
    return
  }
  func.func @transform_0(%arg0: i32, %arg1: i32) -> (i32, i32, i32) {
    %c0_i32 = arith.constant 0 : i32
    %c0_i32_0 = arith.constant 0 : i32
    %c0_i32_1 = arith.constant 0 : i32
    return %c0_i32, %c0_i32_0, %arg1 : i32, i32, i32
  }
  func.func @transform_1(%arg0: i32, %arg1: i32) -> (i32, i32) {
    %c0_i32 = arith.constant 0 : i32
    %c0_i32_0 = arith.constant 0 : i32
    %c0_i32_1 = arith.constant 0 : i32
    return %c0_i32, %c0_i32_0 : i32, i32
  }
  func.func @transform_2(%arg0: i32, %arg1: i32) -> (i32, i32, i32) {
    %c0_i32 = arith.constant 0 : i32
    %c0_i32_0 = arith.constant 0 : i32
    %c0_i32_1 = arith.constant 0 : i32
    return %arg0, %c0_i32, %c0_i32_0 : i32, i32, i32
  }
  func.func @transform_3(%arg0: i32, %arg1: i32) -> (i32, i32, i32) {
    %c0_i32 = arith.constant 0 : i32
    %c0_i32_0 = arith.constant 0 : i32
    return %arg0, %c0_i32, %arg1 : i32, i32, i32
  }
}

module attributes {stable_mosaic.version = 11 : i64} {
  func.func @_conv_kernel(%arg0: i32, %arg1: i32, %arg2: memref<16x256x256xbf16, #tpu.memory_space<vmem>>, %arg3: memref<18x1xf32, #tpu.memory_space<vmem>>, %arg4: memref<1x42x256xbf16, #tpu.memory_space<vmem>>, %arg5: memref<1x18x256xbf16, #tpu.memory_space<vmem>>) attributes {dimension_semantics = [#tpu.dimension_semantics<parallel>, #tpu.dimension_semantics<parallel>], iteration_bounds = array<i64: 2, 2>, scalar_prefetch = 0 : i64, scratch_operands = 0 : i64, tpu.core_type = #tpu.core_type<tc>, window_params = [{transform_indices = @transform_0, window_bounds = array<i64: 16, 256, 256>}, {pipeline_mode = #tpu.pipeline_mode<synchronous>, transform_indices = @transform_1, window_bounds = array<i64: 18, 1>}, {transform_indices = @transform_2, window_bounds = array<i64: 1, 42, 256>}, {transform_indices = @transform_3, window_bounds = array<i64: 1, 18, 256>}]} {
    %c0 = arith.constant 0 : index
    %c0_0 = arith.constant 0 : index
    %c0_1 = arith.constant 0 : index
    %0 = vector.load %arg4[%c0, %c0_0, %c0_1] : memref<1x42x256xbf16, #tpu.memory_space<vmem>>, vector<1x18x256xbf16>
    %1 = vector.shape_cast %0 : vector<1x18x256xbf16> to vector<18x256xbf16>
    %c0_2 = arith.constant 0 : index
    %c0_3 = arith.constant 0 : index
    %c0_4 = arith.constant 0 : index
    %2 = vector.load %arg2[%c0_2, %c0_3, %c0_4] : memref<16x256x256xbf16, #tpu.memory_space<vmem>>, vector<1x256x256xbf16>
    %3 = vector.shape_cast %2 : vector<1x256x256xbf16> to vector<256x256xbf16>
    %cst = arith.constant dense<0.000000e+00> : vector<18x256xf32>
    %4 = tpu.matmul %1, %3, %cst {dimension_numbers = #tpu.dot_dimension_numbers<[1], [0], [0], [1], [0, 0, 1, 1], [], []>} : vector<18x256xbf16>, vector<256x256xbf16>, vector<18x256xf32> -> vector<18x256xf32>
    %c0_5 = arith.constant 0 : index
    %c1 = arith.constant 1 : index
    %c0_6 = arith.constant 0 : index
    %5 = vector.load %arg4[%c0_5, %c1, %c0_6] : memref<1x42x256xbf16, #tpu.memory_space<vmem>>, vector<1x18x256xbf16>
    %6 = vector.shape_cast %5 : vector<1x18x256xbf16> to vector<18x256xbf16>
    %c1_7 = arith.constant 1 : index
    %c0_8 = arith.constant 0 : index
    %c0_9 = arith.constant 0 : index
    %7 = vector.load %arg2[%c1_7, %c0_8, %c0_9] : memref<16x256x256xbf16, #tpu.memory_space<vmem>>, vector<1x256x256xbf16>
    %8 = vector.shape_cast %7 : vector<1x256x256xbf16> to vector<256x256xbf16>
    %cst_10 = arith.constant dense<0.000000e+00> : vector<18x256xf32>
    %9 = tpu.matmul %6, %8, %cst_10 {dimension_numbers = #tpu.dot_dimension_numbers<[1], [0], [0], [1], [0, 0, 1, 1], [], []>} : vector<18x256xbf16>, vector<256x256xbf16>, vector<18x256xf32> -> vector<18x256xf32>
    %10 = arith.addf %4, %9 : vector<18x256xf32>
    %c0_11 = arith.constant 0 : index
    %c2 = arith.constant 2 : index
    %c0_12 = arith.constant 0 : index
    %11 = vector.load %arg4[%c0_11, %c2, %c0_12] : memref<1x42x256xbf16, #tpu.memory_space<vmem>>, vector<1x18x256xbf16>
    %12 = vector.shape_cast %11 : vector<1x18x256xbf16> to vector<18x256xbf16>
    %c2_13 = arith.constant 2 : index
    %c0_14 = arith.constant 0 : index
    %c0_15 = arith.constant 0 : index
    %13 = vector.load %arg2[%c2_13, %c0_14, %c0_15] : memref<16x256x256xbf16, #tpu.memory_space<vmem>>, vector<1x256x256xbf16>
    %14 = vector.shape_cast %13 : vector<1x256x256xbf16> to vector<256x256xbf16>
    %cst_16 = arith.constant dense<0.000000e+00> : vector<18x256xf32>
    %15 = tpu.matmul %12, %14, %cst_16 {dimension_numbers = #tpu.dot_dimension_numbers<[1], [0], [0], [1], [0, 0, 1, 1], [], []>} : vector<18x256xbf16>, vector<256x256xbf16>, vector<18x256xf32> -> vector<18x256xf32>
    %16 = arith.addf %10, %15 : vector<18x256xf32>
    %c0_17 = arith.constant 0 : index
    %c3 = arith.constant 3 : index
    %c0_18 = arith.constant 0 : index
    %17 = vector.load %arg4[%c0_17, %c3, %c0_18] : memref<1x42x256xbf16, #tpu.memory_space<vmem>>, vector<1x18x256xbf16>
    %18 = vector.shape_cast %17 : vector<1x18x256xbf16> to vector<18x256xbf16>
    %c3_19 = arith.constant 3 : index
    %c0_20 = arith.constant 0 : index
    %c0_21 = arith.constant 0 : index
    %19 = vector.load %arg2[%c3_19, %c0_20, %c0_21] : memref<16x256x256xbf16, #tpu.memory_space<vmem>>, vector<1x256x256xbf16>
    %20 = vector.shape_cast %19 : vector<1x256x256xbf16> to vector<256x256xbf16>
    %cst_22 = arith.constant dense<0.000000e+00> : vector<18x256xf32>
    %21 = tpu.matmul %18, %20, %cst_22 {dimension_numbers = #tpu.dot_dimension_numbers<[1], [0], [0], [1], [0, 0, 1, 1], [], []>} : vector<18x256xbf16>, vector<256x256xbf16>, vector<18x256xf32> -> vector<18x256xf32>
    %22 = arith.addf %16, %21 : vector<18x256xf32>
    %c0_23 = arith.constant 0 : index
    %c6 = arith.constant 6 : index
    %c0_24 = arith.constant 0 : index
    %23 = vector.load %arg4[%c0_23, %c6, %c0_24] : memref<1x42x256xbf16, #tpu.memory_space<vmem>>, vector<1x18x256xbf16>
    %24 = vector.shape_cast %23 : vector<1x18x256xbf16> to vector<18x256xbf16>
    %c4 = arith.constant 4 : index
    %c0_25 = arith.constant 0 : index
    %c0_26 = arith.constant 0 : index
    %25 = vector.load %arg2[%c4, %c0_25, %c0_26] : memref<16x256x256xbf16, #tpu.memory_space<vmem>>, vector<1x256x256xbf16>
    %26 = vector.shape_cast %25 : vector<1x256x256xbf16> to vector<256x256xbf16>
    %cst_27 = arith.constant dense<0.000000e+00> : vector<18x256xf32>
    %27 = tpu.matmul %24, %26, %cst_27 {dimension_numbers = #tpu.dot_dimension_numbers<[1], [0], [0], [1], [0, 0, 1, 1], [], []>} : vector<18x256xbf16>, vector<256x256xbf16>, vector<18x256xf32> -> vector<18x256xf32>
    %28 = arith.addf %22, %27 : vector<18x256xf32>
    %c0_28 = arith.constant 0 : index
    %c7 = arith.constant 7 : index
    %c0_29 = arith.constant 0 : index
    %29 = vector.load %arg4[%c0_28, %c7, %c0_29] : memref<1x42x256xbf16, #tpu.memory_space<vmem>>, vector<1x18x256xbf16>
    %30 = vector.shape_cast %29 : vector<1x18x256xbf16> to vector<18x256xbf16>
    %c5 = arith.constant 5 : index
    %c0_30 = arith.constant 0 : index
    %c0_31 = arith.constant 0 : index
    %31 = vector.load %arg2[%c5, %c0_30, %c0_31] : memref<16x256x256xbf16, #tpu.memory_space<vmem>>, vector<1x256x256xbf16>
    %32 = vector.shape_cast %31 : vector<1x256x256xbf16> to vector<256x256xbf16>
    %cst_32 = arith.constant dense<0.000000e+00> : vector<18x256xf32>
    %33 = tpu.matmul %30, %32, %cst_32 {dimension_numbers = #tpu.dot_dimension_numbers<[1], [0], [0], [1], [0, 0, 1, 1], [], []>} : vector<18x256xbf16>, vector<256x256xbf16>, vector<18x256xf32> -> vector<18x256xf32>
    %34 = arith.addf %28, %33 : vector<18x256xf32>
    %c0_33 = arith.constant 0 : index
    %c8 = arith.constant 8 : index
    %c0_34 = arith.constant 0 : index
    %35 = vector.load %arg4[%c0_33, %c8, %c0_34] : memref<1x42x256xbf16, #tpu.memory_space<vmem>>, vector<1x18x256xbf16>
    %36 = vector.shape_cast %35 : vector<1x18x256xbf16> to vector<18x256xbf16>
    %c6_35 = arith.constant 6 : index
    %c0_36 = arith.constant 0 : index
    %c0_37 = arith.constant 0 : index
    %37 = vector.load %arg2[%c6_35, %c0_36, %c0_37] : memref<16x256x256xbf16, #tpu.memory_space<vmem>>, vector<1x256x256xbf16>
    %38 = vector.shape_cast %37 : vector<1x256x256xbf16> to vector<256x256xbf16>
    %cst_38 = arith.constant dense<0.000000e+00> : vector<18x256xf32>
    %39 = tpu.matmul %36, %38, %cst_38 {dimension_numbers = #tpu.dot_dimension_numbers<[1], [0], [0], [1], [0, 0, 1, 1], [], []>} : vector<18x256xbf16>, vector<256x256xbf16>, vector<18x256xf32> -> vector<18x256xf32>
    %40 = arith.addf %34, %39 : vector<18x256xf32>
    %c0_39 = arith.constant 0 : index
    %c9 = arith.constant 9 : index
    %c0_40 = arith.constant 0 : index
    %41 = vector.load %arg4[%c0_39, %c9, %c0_40] : memref<1x42x256xbf16, #tpu.memory_space<vmem>>, vector<1x18x256xbf16>
    %42 = vector.shape_cast %41 : vector<1x18x256xbf16> to vector<18x256xbf16>
    %c7_41 = arith.constant 7 : index
    %c0_42 = arith.constant 0 : index
    %c0_43 = arith.constant 0 : index
    %43 = vector.load %arg2[%c7_41, %c0_42, %c0_43] : memref<16x256x256xbf16, #tpu.memory_space<vmem>>, vector<1x256x256xbf16>
    %44 = vector.shape_cast %43 : vector<1x256x256xbf16> to vector<256x256xbf16>
    %cst_44 = arith.constant dense<0.000000e+00> : vector<18x256xf32>
    %45 = tpu.matmul %42, %44, %cst_44 {dimension_numbers = #tpu.dot_dimension_numbers<[1], [0], [0], [1], [0, 0, 1, 1], [], []>} : vector<18x256xbf16>, vector<256x256xbf16>, vector<18x256xf32> -> vector<18x256xf32>
    %46 = arith.addf %40, %45 : vector<18x256xf32>
    %c0_45 = arith.constant 0 : index
    %c12 = arith.constant 12 : index
    %c0_46 = arith.constant 0 : index
    %47 = vector.load %arg4[%c0_45, %c12, %c0_46] : memref<1x42x256xbf16, #tpu.memory_space<vmem>>, vector<1x18x256xbf16>
    %48 = vector.shape_cast %47 : vector<1x18x256xbf16> to vector<18x256xbf16>
    %c8_47 = arith.constant 8 : index
    %c0_48 = arith.constant 0 : index
    %c0_49 = arith.constant 0 : index
    %49 = vector.load %arg2[%c8_47, %c0_48, %c0_49] : memref<16x256x256xbf16, #tpu.memory_space<vmem>>, vector<1x256x256xbf16>
    %50 = vector.shape_cast %49 : vector<1x256x256xbf16> to vector<256x256xbf16>
    %cst_50 = arith.constant dense<0.000000e+00> : vector<18x256xf32>
    %51 = tpu.matmul %48, %50, %cst_50 {dimension_numbers = #tpu.dot_dimension_numbers<[1], [0], [0], [1], [0, 0, 1, 1], [], []>} : vector<18x256xbf16>, vector<256x256xbf16>, vector<18x256xf32> -> vector<18x256xf32>
    %52 = arith.addf %46, %51 : vector<18x256xf32>
    %c0_51 = arith.constant 0 : index
    %c13 = arith.constant 13 : index
    %c0_52 = arith.constant 0 : index
    %53 = vector.load %arg4[%c0_51, %c13, %c0_52] : memref<1x42x256xbf16, #tpu.memory_space<vmem>>, vector<1x18x256xbf16>
    %54 = vector.shape_cast %53 : vector<1x18x256xbf16> to vector<18x256xbf16>
    %c9_53 = arith.constant 9 : index
    %c0_54 = arith.constant 0 : index
    %c0_55 = arith.constant 0 : index
    %55 = vector.load %arg2[%c9_53, %c0_54, %c0_55] : memref<16x256x256xbf16, #tpu.memory_space<vmem>>, vector<1x256x256xbf16>
    %56 = vector.shape_cast %55 : vector<1x256x256xbf16> to vector<256x256xbf16>
    %cst_56 = arith.constant dense<0.000000e+00> : vector<18x256xf32>
    %57 = tpu.matmul %54, %56, %cst_56 {dimension_numbers = #tpu.dot_dimension_numbers<[1], [0], [0], [1], [0, 0, 1, 1], [], []>} : vector<18x256xbf16>, vector<256x256xbf16>, vector<18x256xf32> -> vector<18x256xf32>
    %58 = arith.addf %52, %57 : vector<18x256xf32>
    %c0_57 = arith.constant 0 : index
    %c14 = arith.constant 14 : index
    %c0_58 = arith.constant 0 : index
    %59 = vector.load %arg4[%c0_57, %c14, %c0_58] : memref<1x42x256xbf16, #tpu.memory_space<vmem>>, vector<1x18x256xbf16>
    %60 = vector.shape_cast %59 : vector<1x18x256xbf16> to vector<18x256xbf16>
    %c10 = arith.constant 10 : index
    %c0_59 = arith.constant 0 : index
    %c0_60 = arith.constant 0 : index
    %61 = vector.load %arg2[%c10, %c0_59, %c0_60] : memref<16x256x256xbf16, #tpu.memory_space<vmem>>, vector<1x256x256xbf16>
    %62 = vector.shape_cast %61 : vector<1x256x256xbf16> to vector<256x256xbf16>
    %cst_61 = arith.constant dense<0.000000e+00> : vector<18x256xf32>
    %63 = tpu.matmul %60, %62, %cst_61 {dimension_numbers = #tpu.dot_dimension_numbers<[1], [0], [0], [1], [0, 0, 1, 1], [], []>} : vector<18x256xbf16>, vector<256x256xbf16>, vector<18x256xf32> -> vector<18x256xf32>
    %64 = arith.addf %58, %63 : vector<18x256xf32>
    %c0_62 = arith.constant 0 : index
    %c15 = arith.constant 15 : index
    %c0_63 = arith.constant 0 : index
    %65 = vector.load %arg4[%c0_62, %c15, %c0_63] : memref<1x42x256xbf16, #tpu.memory_space<vmem>>, vector<1x18x256xbf16>
    %66 = vector.shape_cast %65 : vector<1x18x256xbf16> to vector<18x256xbf16>
    %c11 = arith.constant 11 : index
    %c0_64 = arith.constant 0 : index
    %c0_65 = arith.constant 0 : index
    %67 = vector.load %arg2[%c11, %c0_64, %c0_65] : memref<16x256x256xbf16, #tpu.memory_space<vmem>>, vector<1x256x256xbf16>
    %68 = vector.shape_cast %67 : vector<1x256x256xbf16> to vector<256x256xbf16>
    %cst_66 = arith.constant dense<0.000000e+00> : vector<18x256xf32>
    %69 = tpu.matmul %66, %68, %cst_66 {dimension_numbers = #tpu.dot_dimension_numbers<[1], [0], [0], [1], [0, 0, 1, 1], [], []>} : vector<18x256xbf16>, vector<256x256xbf16>, vector<18x256xf32> -> vector<18x256xf32>
    %70 = arith.addf %64, %69 : vector<18x256xf32>
    %c0_67 = arith.constant 0 : index
    %c18 = arith.constant 18 : index
    %c0_68 = arith.constant 0 : index
    %71 = vector.load %arg4[%c0_67, %c18, %c0_68] : memref<1x42x256xbf16, #tpu.memory_space<vmem>>, vector<1x18x256xbf16>
    %72 = vector.shape_cast %71 : vector<1x18x256xbf16> to vector<18x256xbf16>
    %c12_69 = arith.constant 12 : index
    %c0_70 = arith.constant 0 : index
    %c0_71 = arith.constant 0 : index
    %73 = vector.load %arg2[%c12_69, %c0_70, %c0_71] : memref<16x256x256xbf16, #tpu.memory_space<vmem>>, vector<1x256x256xbf16>
    %74 = vector.shape_cast %73 : vector<1x256x256xbf16> to vector<256x256xbf16>
    %cst_72 = arith.constant dense<0.000000e+00> : vector<18x256xf32>
    %75 = tpu.matmul %72, %74, %cst_72 {dimension_numbers = #tpu.dot_dimension_numbers<[1], [0], [0], [1], [0, 0, 1, 1], [], []>} : vector<18x256xbf16>, vector<256x256xbf16>, vector<18x256xf32> -> vector<18x256xf32>
    %76 = arith.addf %70, %75 : vector<18x256xf32>
    %c0_73 = arith.constant 0 : index
    %c19 = arith.constant 19 : index
    %c0_74 = arith.constant 0 : index
    %77 = vector.load %arg4[%c0_73, %c19, %c0_74] : memref<1x42x256xbf16, #tpu.memory_space<vmem>>, vector<1x18x256xbf16>
    %78 = vector.shape_cast %77 : vector<1x18x256xbf16> to vector<18x256xbf16>
    %c13_75 = arith.constant 13 : index
    %c0_76 = arith.constant 0 : index
    %c0_77 = arith.constant 0 : index
    %79 = vector.load %arg2[%c13_75, %c0_76, %c0_77] : memref<16x256x256xbf16, #tpu.memory_space<vmem>>, vector<1x256x256xbf16>
    %80 = vector.shape_cast %79 : vector<1x256x256xbf16> to vector<256x256xbf16>
    %cst_78 = arith.constant dense<0.000000e+00> : vector<18x256xf32>
    %81 = tpu.matmul %78, %80, %cst_78 {dimension_numbers = #tpu.dot_dimension_numbers<[1], [0], [0], [1], [0, 0, 1, 1], [], []>} : vector<18x256xbf16>, vector<256x256xbf16>, vector<18x256xf32> -> vector<18x256xf32>
    %82 = arith.addf %76, %81 : vector<18x256xf32>
    %c0_79 = arith.constant 0 : index
    %c20 = arith.constant 20 : index
    %c0_80 = arith.constant 0 : index
    %83 = vector.load %arg4[%c0_79, %c20, %c0_80] : memref<1x42x256xbf16, #tpu.memory_space<vmem>>, vector<1x18x256xbf16>
    %84 = vector.shape_cast %83 : vector<1x18x256xbf16> to vector<18x256xbf16>
    %c14_81 = arith.constant 14 : index
    %c0_82 = arith.constant 0 : index
    %c0_83 = arith.constant 0 : index
    %85 = vector.load %arg2[%c14_81, %c0_82, %c0_83] : memref<16x256x256xbf16, #tpu.memory_space<vmem>>, vector<1x256x256xbf16>
    %86 = vector.shape_cast %85 : vector<1x256x256xbf16> to vector<256x256xbf16>
    %cst_84 = arith.constant dense<0.000000e+00> : vector<18x256xf32>
    %87 = tpu.matmul %84, %86, %cst_84 {dimension_numbers = #tpu.dot_dimension_numbers<[1], [0], [0], [1], [0, 0, 1, 1], [], []>} : vector<18x256xbf16>, vector<256x256xbf16>, vector<18x256xf32> -> vector<18x256xf32>
    %88 = arith.addf %82, %87 : vector<18x256xf32>
    %c0_85 = arith.constant 0 : index
    %c21 = arith.constant 21 : index
    %c0_86 = arith.constant 0 : index
    %89 = vector.load %arg4[%c0_85, %c21, %c0_86] : memref<1x42x256xbf16, #tpu.memory_space<vmem>>, vector<1x18x256xbf16>
    %90 = vector.shape_cast %89 : vector<1x18x256xbf16> to vector<18x256xbf16>
    %c15_87 = arith.constant 15 : index
    %c0_88 = arith.constant 0 : index
    %c0_89 = arith.constant 0 : index
    %91 = vector.load %arg2[%c15_87, %c0_88, %c0_89] : memref<16x256x256xbf16, #tpu.memory_space<vmem>>, vector<1x256x256xbf16>
    %92 = vector.shape_cast %91 : vector<1x256x256xbf16> to vector<256x256xbf16>
    %cst_90 = arith.constant dense<0.000000e+00> : vector<18x256xf32>
    %93 = tpu.matmul %90, %92, %cst_90 {dimension_numbers = #tpu.dot_dimension_numbers<[1], [0], [0], [1], [0, 0, 1, 1], [], []>} : vector<18x256xbf16>, vector<256x256xbf16>, vector<18x256xf32> -> vector<18x256xf32>
    %94 = arith.addf %88, %93 : vector<18x256xf32>
    %c0_91 = arith.constant 0 : index
    %c0_92 = arith.constant 0 : index
    %95 = vector.load %arg3[%c0_91, %c0_92] : memref<18x1xf32, #tpu.memory_space<vmem>>, vector<18x1xf32>
    %96 = vector.broadcast %95 : vector<18x1xf32> to vector<18x256xf32>
    %97 = arith.mulf %94, %96 : vector<18x256xf32>
    %cst_93 = arith.constant dense<0.000000e+00> : vector<256xf32>
    %98 = vector.multi_reduction <add>, %97, %cst_93 [0] : vector<18x256xf32> to vector<256xf32>
    %99 = vector.shape_cast %98 : vector<256xf32> to vector<1x256xf32>
    %cst_94 = arith.constant 0.111111112 : f32
    %100 = vector.broadcast %cst_94 : f32 to vector<1x256xf32>
    %101 = arith.mulf %99, %100 : vector<1x256xf32>
    %102 = vector.broadcast %101 : vector<1x256xf32> to vector<18x256xf32>
    %103 = arith.subf %94, %102 : vector<18x256xf32>
    %104 = vector.broadcast %95 : vector<18x1xf32> to vector<18x256xf32>
    %105 = arith.mulf %103, %104 : vector<18x256xf32>
    %106 = arith.mulf %105, %105 : vector<18x256xf32>
    %cst_95 = arith.constant dense<0.000000e+00> : vector<256xf32>
    %107 = vector.multi_reduction <add>, %106, %cst_95 [0] : vector<18x256xf32> to vector<256xf32>
    %108 = vector.shape_cast %107 : vector<256xf32> to vector<1x256xf32>
    %cst_96 = arith.constant 0.111111112 : f32
    %109 = vector.broadcast %cst_96 : f32 to vector<1x256xf32>
    %110 = arith.mulf %108, %109 : vector<1x256xf32>
    %111 = vector.broadcast %101 : vector<1x256xf32> to vector<18x256xf32>
    %112 = arith.subf %94, %111 : vector<18x256xf32>
    %cst_97 = arith.constant 9.99999974E-6 : f32
    %113 = vector.broadcast %cst_97 : f32 to vector<1x256xf32>
    %114 = arith.addf %110, %113 : vector<1x256xf32>
    %115 = math.rsqrt %114 : vector<1x256xf32>
    %116 = vector.broadcast %115 : vector<1x256xf32> to vector<18x256xf32>
    %117 = arith.mulf %112, %116 : vector<18x256xf32>
    %cst_98 = arith.constant 0.000000e+00 : f32
    %118 = vector.broadcast %cst_98 : f32 to vector<18x256xf32>
    %119 = arith.cmpf oge, %117, %118 : vector<18x256xf32>
    %cst_99 = arith.constant 2.000000e-01 : f32
    %120 = vector.broadcast %cst_99 : f32 to vector<18x256xf32>
    %121 = arith.mulf %120, %117 : vector<18x256xf32>
    %122 = arith.select %119, %117, %121 : vector<18x256xi1>, vector<18x256xf32>
    %123 = arith.truncf %122 : vector<18x256xf32> to vector<18x256xbf16>
    %c0_100 = arith.constant 0 : index
    %c0_101 = arith.constant 0 : index
    %c0_102 = arith.constant 0 : index
    %124 = vector.load %arg5[%c0_100, %c0_101, %c0_102] : memref<1x18x256xbf16, #tpu.memory_space<vmem>>, vector<1x18x256xbf16>
    %125 = vector.shape_cast %124 : vector<1x18x256xbf16> to vector<18x256xbf16>
    %126 = vector.shape_cast %123 : vector<18x256xbf16> to vector<1x18x256xbf16>
    tpu.vector_store %arg5[%c0_100, %c0_101, %c0_102], %126 {strides = array<i32>} : memref<1x18x256xbf16, #tpu.memory_space<vmem>>, vector<1x18x256xbf16>,
    return
  }
  func.func @transform_0(%arg0: i32, %arg1: i32) -> (i32, i32, i32) {
    %c0_i32 = arith.constant 0 : i32
    %c0_i32_0 = arith.constant 0 : i32
    %c0_i32_1 = arith.constant 0 : i32
    return %c0_i32, %c0_i32_0, %arg1 : i32, i32, i32
  }
  func.func @transform_1(%arg0: i32, %arg1: i32) -> (i32, i32) {
    %c0_i32 = arith.constant 0 : i32
    %c0_i32_0 = arith.constant 0 : i32
    %c0_i32_1 = arith.constant 0 : i32
    return %c0_i32, %c0_i32_0 : i32, i32
  }
  func.func @transform_2(%arg0: i32, %arg1: i32) -> (i32, i32, i32) {
    %c0_i32 = arith.constant 0 : i32
    %c0_i32_0 = arith.constant 0 : i32
    %c0_i32_1 = arith.constant 0 : i32
    return %arg0, %c0_i32, %c0_i32_0 : i32, i32, i32
  }
  func.func @transform_3(%arg0: i32, %arg1: i32) -> (i32, i32, i32) {
    %c0_i32 = arith.constant 0 : i32
    %c0_i32_0 = arith.constant 0 : i32
    return %arg0, %c0_i32, %arg1 : i32, i32, i32
  }
}

module attributes {stable_mosaic.version = 11 : i64} {
  func.func @_pool_kernel(%arg0: i32, %arg1: memref<16x512xbf16, #tpu.memory_space<vmem>>, %arg2: memref<1x1xf32, #tpu.memory_space<vmem>>, %arg3: memref<10x1xf32, #tpu.memory_space<vmem>>, %arg4: memref<1x30x512xbf16, #tpu.memory_space<vmem>>, %arg5: memref<1x1x1xf32, #tpu.memory_space<vmem>>) attributes {dimension_semantics = [#tpu.dimension_semantics<parallel>], iteration_bounds = array<i64: 2>, scalar_prefetch = 0 : i64, scratch_operands = 0 : i64, tpu.core_type = #tpu.core_type<tc>, window_params = [{pipeline_mode = #tpu.pipeline_mode<synchronous>, transform_indices = @transform_0, window_bounds = array<i64: 16, 512>}, {pipeline_mode = #tpu.pipeline_mode<synchronous>, transform_indices = @transform_1, window_bounds = array<i64: 1, 1>}, {pipeline_mode = #tpu.pipeline_mode<synchronous>, transform_indices = @transform_2, window_bounds = array<i64: 10, 1>}, {transform_indices = @transform_3, window_bounds = array<i64: 1, 30, 512>}, {transform_indices = @transform_4, window_bounds = array<i64: 1, 1, 1>}]} {
    %c0 = arith.constant 0 : index
    %c0_0 = arith.constant 0 : index
    %0 = vector.load %arg3[%c0, %c0_0] : memref<10x1xf32, #tpu.memory_space<vmem>>, vector<10x1xf32>
    %cst = arith.constant 0.000000e+00 : f32
    %1 = vector.broadcast %cst : f32 to vector<1x512xf32>
    %c0_1 = arith.constant 0 : index
    %c0_2 = arith.constant 0 : index
    %c0_3 = arith.constant 0 : index
    %2 = vector.load %arg4[%c0_1, %c0_2, %c0_3] : memref<1x30x512xbf16, #tpu.memory_space<vmem>>, vector<1x10x512xbf16>
    %3 = vector.shape_cast %2 : vector<1x10x512xbf16> to vector<10x512xbf16>
    %4 = arith.extf %3 : vector<10x512xbf16> to vector<10x512xf32>
    %5 = vector.broadcast %0 : vector<10x1xf32> to vector<10x512xf32>
    %6 = arith.mulf %4, %5 : vector<10x512xf32>
    %cst_4 = arith.constant dense<0.000000e+00> : vector<512xf32>
    %7 = vector.multi_reduction <add>, %6, %cst_4 [0] : vector<10x512xf32> to vector<512xf32>
    %8 = vector.shape_cast %7 : vector<512xf32> to vector<1x512xf32>
    %c0_5 = arith.constant 0 : index
    %c0_6 = arith.constant 0 : index
    %9 = vector.load %arg1[%c0_5, %c0_6] : memref<16x512xbf16, #tpu.memory_space<vmem>>, vector<1x512xbf16>
    %10 = arith.extf %9 : vector<1x512xbf16> to vector<1x512xf32>
    %11 = arith.mulf %8, %10 : vector<1x512xf32>
    %12 = arith.addf %1, %11 : vector<1x512xf32>
    %c0_7 = arith.constant 0 : index
    %c1 = arith.constant 1 : index
    %c0_8 = arith.constant 0 : index
    %13 = vector.load %arg4[%c0_7, %c1, %c0_8] : memref<1x30x512xbf16, #tpu.memory_space<vmem>>, vector<1x10x512xbf16>
    %14 = vector.shape_cast %13 : vector<1x10x512xbf16> to vector<10x512xbf16>
    %15 = arith.extf %14 : vector<10x512xbf16> to vector<10x512xf32>
    %16 = vector.broadcast %0 : vector<10x1xf32> to vector<10x512xf32>
    %17 = arith.mulf %15, %16 : vector<10x512xf32>
    %cst_9 = arith.constant dense<0.000000e+00> : vector<512xf32>
    %18 = vector.multi_reduction <add>, %17, %cst_9 [0] : vector<10x512xf32> to vector<512xf32>
    %19 = vector.shape_cast %18 : vector<512xf32> to vector<1x512xf32>
    %c1_10 = arith.constant 1 : index
    %c0_11 = arith.constant 0 : index
    %20 = vector.load %arg1[%c1_10, %c0_11] : memref<16x512xbf16, #tpu.memory_space<vmem>>, vector<1x512xbf16>
    %21 = arith.extf %20 : vector<1x512xbf16> to vector<1x512xf32>
    %22 = arith.mulf %19, %21 : vector<1x512xf32>
    %23 = arith.addf %12, %22 : vector<1x512xf32>
    %c0_12 = arith.constant 0 : index
    %c2 = arith.constant 2 : index
    %c0_13 = arith.constant 0 : index
    %24 = vector.load %arg4[%c0_12, %c2, %c0_13] : memref<1x30x512xbf16, #tpu.memory_space<vmem>>, vector<1x10x512xbf16>
    %25 = vector.shape_cast %24 : vector<1x10x512xbf16> to vector<10x512xbf16>
    %26 = arith.extf %25 : vector<10x512xbf16> to vector<10x512xf32>
    %27 = vector.broadcast %0 : vector<10x1xf32> to vector<10x512xf32>
    %28 = arith.mulf %26, %27 : vector<10x512xf32>
    %cst_14 = arith.constant dense<0.000000e+00> : vector<512xf32>
    %29 = vector.multi_reduction <add>, %28, %cst_14 [0] : vector<10x512xf32> to vector<512xf32>
    %30 = vector.shape_cast %29 : vector<512xf32> to vector<1x512xf32>
    %c2_15 = arith.constant 2 : index
    %c0_16 = arith.constant 0 : index
    %31 = vector.load %arg1[%c2_15, %c0_16] : memref<16x512xbf16, #tpu.memory_space<vmem>>, vector<1x512xbf16>
    %32 = arith.extf %31 : vector<1x512xbf16> to vector<1x512xf32>
    %33 = arith.mulf %30, %32 : vector<1x512xf32>
    %34 = arith.addf %23, %33 : vector<1x512xf32>
    %c0_17 = arith.constant 0 : index
    %c3 = arith.constant 3 : index
    %c0_18 = arith.constant 0 : index
    %35 = vector.load %arg4[%c0_17, %c3, %c0_18] : memref<1x30x512xbf16, #tpu.memory_space<vmem>>, vector<1x10x512xbf16>
    %36 = vector.shape_cast %35 : vector<1x10x512xbf16> to vector<10x512xbf16>
    %37 = arith.extf %36 : vector<10x512xbf16> to vector<10x512xf32>
    %38 = vector.broadcast %0 : vector<10x1xf32> to vector<10x512xf32>
    %39 = arith.mulf %37, %38 : vector<10x512xf32>
    %cst_19 = arith.constant dense<0.000000e+00> : vector<512xf32>
    %40 = vector.multi_reduction <add>, %39, %cst_19 [0] : vector<10x512xf32> to vector<512xf32>
    %41 = vector.shape_cast %40 : vector<512xf32> to vector<1x512xf32>
    %c3_20 = arith.constant 3 : index
    %c0_21 = arith.constant 0 : index
    %42 = vector.load %arg1[%c3_20, %c0_21] : memref<16x512xbf16, #tpu.memory_space<vmem>>, vector<1x512xbf16>
    %43 = arith.extf %42 : vector<1x512xbf16> to vector<1x512xf32>
    %44 = arith.mulf %41, %43 : vector<1x512xf32>
    %45 = arith.addf %34, %44 : vector<1x512xf32>
    %c0_22 = arith.constant 0 : index
    %c5 = arith.constant 5 : index
    %c0_23 = arith.constant 0 : index
    %46 = vector.load %arg4[%c0_22, %c5, %c0_23] : memref<1x30x512xbf16, #tpu.memory_space<vmem>>, vector<1x10x512xbf16>
    %47 = vector.shape_cast %46 : vector<1x10x512xbf16> to vector<10x512xbf16>
    %48 = arith.extf %47 : vector<10x512xbf16> to vector<10x512xf32>
    %49 = vector.broadcast %0 : vector<10x1xf32> to vector<10x512xf32>
    %50 = arith.mulf %48, %49 : vector<10x512xf32>
    %cst_24 = arith.constant dense<0.000000e+00> : vector<512xf32>
    %51 = vector.multi_reduction <add>, %50, %cst_24 [0] : vector<10x512xf32> to vector<512xf32>
    %52 = vector.shape_cast %51 : vector<512xf32> to vector<1x512xf32>
    %c4 = arith.constant 4 : index
    %c0_25 = arith.constant 0 : index
    %53 = vector.load %arg1[%c4, %c0_25] : memref<16x512xbf16, #tpu.memory_space<vmem>>, vector<1x512xbf16>
    %54 = arith.extf %53 : vector<1x512xbf16> to vector<1x512xf32>
    %55 = arith.mulf %52, %54 : vector<1x512xf32>
    %56 = arith.addf %45, %55 : vector<1x512xf32>
    %c0_26 = arith.constant 0 : index
    %c6 = arith.constant 6 : index
    %c0_27 = arith.constant 0 : index
    %57 = vector.load %arg4[%c0_26, %c6, %c0_27] : memref<1x30x512xbf16, #tpu.memory_space<vmem>>, vector<1x10x512xbf16>
    %58 = vector.shape_cast %57 : vector<1x10x512xbf16> to vector<10x512xbf16>
    %59 = arith.extf %58 : vector<10x512xbf16> to vector<10x512xf32>
    %60 = vector.broadcast %0 : vector<10x1xf32> to vector<10x512xf32>
    %61 = arith.mulf %59, %60 : vector<10x512xf32>
    %cst_28 = arith.constant dense<0.000000e+00> : vector<512xf32>
    %62 = vector.multi_reduction <add>, %61, %cst_28 [0] : vector<10x512xf32> to vector<512xf32>
    %63 = vector.shape_cast %62 : vector<512xf32> to vector<1x512xf32>
    %c5_29 = arith.constant 5 : index
    %c0_30 = arith.constant 0 : index
    %64 = vector.load %arg1[%c5_29, %c0_30] : memref<16x512xbf16, #tpu.memory_space<vmem>>, vector<1x512xbf16>
    %65 = arith.extf %64 : vector<1x512xbf16> to vector<1x512xf32>
    %66 = arith.mulf %63, %65 : vector<1x512xf32>
    %67 = arith.addf %56, %66 : vector<1x512xf32>
    %c0_31 = arith.constant 0 : index
    %c7 = arith.constant 7 : index
    %c0_32 = arith.constant 0 : index
    %68 = vector.load %arg4[%c0_31, %c7, %c0_32] : memref<1x30x512xbf16, #tpu.memory_space<vmem>>, vector<1x10x512xbf16>
    %69 = vector.shape_cast %68 : vector<1x10x512xbf16> to vector<10x512xbf16>
    %70 = arith.extf %69 : vector<10x512xbf16> to vector<10x512xf32>
    %71 = vector.broadcast %0 : vector<10x1xf32> to vector<10x512xf32>
    %72 = arith.mulf %70, %71 : vector<10x512xf32>
    %cst_33 = arith.constant dense<0.000000e+00> : vector<512xf32>
    %73 = vector.multi_reduction <add>, %72, %cst_33 [0] : vector<10x512xf32> to vector<512xf32>
    %74 = vector.shape_cast %73 : vector<512xf32> to vector<1x512xf32>
    %c6_34 = arith.constant 6 : index
    %c0_35 = arith.constant 0 : index
    %75 = vector.load %arg1[%c6_34, %c0_35] : memref<16x512xbf16, #tpu.memory_space<vmem>>, vector<1x512xbf16>
    %76 = arith.extf %75 : vector<1x512xbf16> to vector<1x512xf32>
    %77 = arith.mulf %74, %76 : vector<1x512xf32>
    %78 = arith.addf %67, %77 : vector<1x512xf32>
    %c0_36 = arith.constant 0 : index
    %c8 = arith.constant 8 : index
    %c0_37 = arith.constant 0 : index
    %79 = vector.load %arg4[%c0_36, %c8, %c0_37] : memref<1x30x512xbf16, #tpu.memory_space<vmem>>, vector<1x10x512xbf16>
    %80 = vector.shape_cast %79 : vector<1x10x512xbf16> to vector<10x512xbf16>
    %81 = arith.extf %80 : vector<10x512xbf16> to vector<10x512xf32>
    %82 = vector.broadcast %0 : vector<10x1xf32> to vector<10x512xf32>
    %83 = arith.mulf %81, %82 : vector<10x512xf32>
    %cst_38 = arith.constant dense<0.000000e+00> : vector<512xf32>
    %84 = vector.multi_reduction <add>, %83, %cst_38 [0] : vector<10x512xf32> to vector<512xf32>
    %85 = vector.shape_cast %84 : vector<512xf32> to vector<1x512xf32>
    %c7_39 = arith.constant 7 : index
    %c0_40 = arith.constant 0 : index
    %86 = vector.load %arg1[%c7_39, %c0_40] : memref<16x512xbf16, #tpu.memory_space<vmem>>, vector<1x512xbf16>
    %87 = arith.extf %86 : vector<1x512xbf16> to vector<1x512xf32>
    %88 = arith.mulf %85, %87 : vector<1x512xf32>
    %89 = arith.addf %78, %88 : vector<1x512xf32>
    %c0_41 = arith.constant 0 : index
    %c10 = arith.constant 10 : index
    %c0_42 = arith.constant 0 : index
    %90 = vector.load %arg4[%c0_41, %c10, %c0_42] : memref<1x30x512xbf16, #tpu.memory_space<vmem>>, vector<1x10x512xbf16>
    %91 = vector.shape_cast %90 : vector<1x10x512xbf16> to vector<10x512xbf16>
    %92 = arith.extf %91 : vector<10x512xbf16> to vector<10x512xf32>
    %93 = vector.broadcast %0 : vector<10x1xf32> to vector<10x512xf32>
    %94 = arith.mulf %92, %93 : vector<10x512xf32>
    %cst_43 = arith.constant dense<0.000000e+00> : vector<512xf32>
    %95 = vector.multi_reduction <add>, %94, %cst_43 [0] : vector<10x512xf32> to vector<512xf32>
    %96 = vector.shape_cast %95 : vector<512xf32> to vector<1x512xf32>
    %c8_44 = arith.constant 8 : index
    %c0_45 = arith.constant 0 : index
    %97 = vector.load %arg1[%c8_44, %c0_45] : memref<16x512xbf16, #tpu.memory_space<vmem>>, vector<1x512xbf16>
    %98 = arith.extf %97 : vector<1x512xbf16> to vector<1x512xf32>
    %99 = arith.mulf %96, %98 : vector<1x512xf32>
    %100 = arith.addf %89, %99 : vector<1x512xf32>
    %c0_46 = arith.constant 0 : index
    %c11 = arith.constant 11 : index
    %c0_47 = arith.constant 0 : index
    %101 = vector.load %arg4[%c0_46, %c11, %c0_47] : memref<1x30x512xbf16, #tpu.memory_space<vmem>>, vector<1x10x512xbf16>
    %102 = vector.shape_cast %101 : vector<1x10x512xbf16> to vector<10x512xbf16>
    %103 = arith.extf %102 : vector<10x512xbf16> to vector<10x512xf32>
    %104 = vector.broadcast %0 : vector<10x1xf32> to vector<10x512xf32>
    %105 = arith.mulf %103, %104 : vector<10x512xf32>
    %cst_48 = arith.constant dense<0.000000e+00> : vector<512xf32>
    %106 = vector.multi_reduction <add>, %105, %cst_48 [0] : vector<10x512xf32> to vector<512xf32>
    %107 = vector.shape_cast %106 : vector<512xf32> to vector<1x512xf32>
    %c9 = arith.constant 9 : index
    %c0_49 = arith.constant 0 : index
    %108 = vector.load %arg1[%c9, %c0_49] : memref<16x512xbf16, #tpu.memory_space<vmem>>, vector<1x512xbf16>
    %109 = arith.extf %108 : vector<1x512xbf16> to vector<1x512xf32>
    %110 = arith.mulf %107, %109 : vector<1x512xf32>
    %111 = arith.addf %100, %110 : vector<1x512xf32>
    %c0_50 = arith.constant 0 : index
    %c12 = arith.constant 12 : index
    %c0_51 = arith.constant 0 : index
    %112 = vector.load %arg4[%c0_50, %c12, %c0_51] : memref<1x30x512xbf16, #tpu.memory_space<vmem>>, vector<1x10x512xbf16>
    %113 = vector.shape_cast %112 : vector<1x10x512xbf16> to vector<10x512xbf16>
    %114 = arith.extf %113 : vector<10x512xbf16> to vector<10x512xf32>
    %115 = vector.broadcast %0 : vector<10x1xf32> to vector<10x512xf32>
    %116 = arith.mulf %114, %115 : vector<10x512xf32>
    %cst_52 = arith.constant dense<0.000000e+00> : vector<512xf32>
    %117 = vector.multi_reduction <add>, %116, %cst_52 [0] : vector<10x512xf32> to vector<512xf32>
    %118 = vector.shape_cast %117 : vector<512xf32> to vector<1x512xf32>
    %c10_53 = arith.constant 10 : index
    %c0_54 = arith.constant 0 : index
    %119 = vector.load %arg1[%c10_53, %c0_54] : memref<16x512xbf16, #tpu.memory_space<vmem>>, vector<1x512xbf16>
    %120 = arith.extf %119 : vector<1x512xbf16> to vector<1x512xf32>
    %121 = arith.mulf %118, %120 : vector<1x512xf32>
    %122 = arith.addf %111, %121 : vector<1x512xf32>
    %c0_55 = arith.constant 0 : index
    %c13 = arith.constant 13 : index
    %c0_56 = arith.constant 0 : index
    %123 = vector.load %arg4[%c0_55, %c13, %c0_56] : memref<1x30x512xbf16, #tpu.memory_space<vmem>>, vector<1x10x512xbf16>
    %124 = vector.shape_cast %123 : vector<1x10x512xbf16> to vector<10x512xbf16>
    %125 = arith.extf %124 : vector<10x512xbf16> to vector<10x512xf32>
    %126 = vector.broadcast %0 : vector<10x1xf32> to vector<10x512xf32>
    %127 = arith.mulf %125, %126 : vector<10x512xf32>
    %cst_57 = arith.constant dense<0.000000e+00> : vector<512xf32>
    %128 = vector.multi_reduction <add>, %127, %cst_57 [0] : vector<10x512xf32> to vector<512xf32>
    %129 = vector.shape_cast %128 : vector<512xf32> to vector<1x512xf32>
    %c11_58 = arith.constant 11 : index
    %c0_59 = arith.constant 0 : index
    %130 = vector.load %arg1[%c11_58, %c0_59] : memref<16x512xbf16, #tpu.memory_space<vmem>>, vector<1x512xbf16>
    %131 = arith.extf %130 : vector<1x512xbf16> to vector<1x512xf32>
    %132 = arith.mulf %129, %131 : vector<1x512xf32>
    %133 = arith.addf %122, %132 : vector<1x512xf32>
    %c0_60 = arith.constant 0 : index
    %c15 = arith.constant 15 : index
    %c0_61 = arith.constant 0 : index
    %134 = vector.load %arg4[%c0_60, %c15, %c0_61] : memref<1x30x512xbf16, #tpu.memory_space<vmem>>, vector<1x10x512xbf16>
    %135 = vector.shape_cast %134 : vector<1x10x512xbf16> to vector<10x512xbf16>
    %136 = arith.extf %135 : vector<10x512xbf16> to vector<10x512xf32>
    %137 = vector.broadcast %0 : vector<10x1xf32> to vector<10x512xf32>
    %138 = arith.mulf %136, %137 : vector<10x512xf32>
    %cst_62 = arith.constant dense<0.000000e+00> : vector<512xf32>
    %139 = vector.multi_reduction <add>, %138, %cst_62 [0] : vector<10x512xf32> to vector<512xf32>
    %140 = vector.shape_cast %139 : vector<512xf32> to vector<1x512xf32>
    %c12_63 = arith.constant 12 : index
    %c0_64 = arith.constant 0 : index
    %141 = vector.load %arg1[%c12_63, %c0_64] : memref<16x512xbf16, #tpu.memory_space<vmem>>, vector<1x512xbf16>
    %142 = arith.extf %141 : vector<1x512xbf16> to vector<1x512xf32>
    %143 = arith.mulf %140, %142 : vector<1x512xf32>
    %144 = arith.addf %133, %143 : vector<1x512xf32>
    %c0_65 = arith.constant 0 : index
    %c16 = arith.constant 16 : index
    %c0_66 = arith.constant 0 : index
    %145 = vector.load %arg4[%c0_65, %c16, %c0_66] : memref<1x30x512xbf16, #tpu.memory_space<vmem>>, vector<1x10x512xbf16>
    %146 = vector.shape_cast %145 : vector<1x10x512xbf16> to vector<10x512xbf16>
    %147 = arith.extf %146 : vector<10x512xbf16> to vector<10x512xf32>
    %148 = vector.broadcast %0 : vector<10x1xf32> to vector<10x512xf32>
    %149 = arith.mulf %147, %148 : vector<10x512xf32>
    %cst_67 = arith.constant dense<0.000000e+00> : vector<512xf32>
    %150 = vector.multi_reduction <add>, %149, %cst_67 [0] : vector<10x512xf32> to vector<512xf32>
    %151 = vector.shape_cast %150 : vector<512xf32> to vector<1x512xf32>
    %c13_68 = arith.constant 13 : index
    %c0_69 = arith.constant 0 : index
    %152 = vector.load %arg1[%c13_68, %c0_69] : memref<16x512xbf16, #tpu.memory_space<vmem>>, vector<1x512xbf16>
    %153 = arith.extf %152 : vector<1x512xbf16> to vector<1x512xf32>
    %154 = arith.mulf %151, %153 : vector<1x512xf32>
    %155 = arith.addf %144, %154 : vector<1x512xf32>
    %c0_70 = arith.constant 0 : index
    %c17 = arith.constant 17 : index
    %c0_71 = arith.constant 0 : index
    %156 = vector.load %arg4[%c0_70, %c17, %c0_71] : memref<1x30x512xbf16, #tpu.memory_space<vmem>>, vector<1x10x512xbf16>
    %157 = vector.shape_cast %156 : vector<1x10x512xbf16> to vector<10x512xbf16>
    %158 = arith.extf %157 : vector<10x512xbf16> to vector<10x512xf32>
    %159 = vector.broadcast %0 : vector<10x1xf32> to vector<10x512xf32>
    %160 = arith.mulf %158, %159 : vector<10x512xf32>
    %cst_72 = arith.constant dense<0.000000e+00> : vector<512xf32>
    %161 = vector.multi_reduction <add>, %160, %cst_72 [0] : vector<10x512xf32> to vector<512xf32>
    %162 = vector.shape_cast %161 : vector<512xf32> to vector<1x512xf32>
    %c14 = arith.constant 14 : index
    %c0_73 = arith.constant 0 : index
    %163 = vector.load %arg1[%c14, %c0_73] : memref<16x512xbf16, #tpu.memory_space<vmem>>, vector<1x512xbf16>
    %164 = arith.extf %163 : vector<1x512xbf16> to vector<1x512xf32>
    %165 = arith.mulf %162, %164 : vector<1x512xf32>
    %166 = arith.addf %155, %165 : vector<1x512xf32>
    %c0_74 = arith.constant 0 : index
    %c18 = arith.constant 18 : index
    %c0_75 = arith.constant 0 : index
    %167 = vector.load %arg4[%c0_74, %c18, %c0_75] : memref<1x30x512xbf16, #tpu.memory_space<vmem>>, vector<1x10x512xbf16>
    %168 = vector.shape_cast %167 : vector<1x10x512xbf16> to vector<10x512xbf16>
    %169 = arith.extf %168 : vector<10x512xbf16> to vector<10x512xf32>
    %170 = vector.broadcast %0 : vector<10x1xf32> to vector<10x512xf32>
    %171 = arith.mulf %169, %170 : vector<10x512xf32>
    %cst_76 = arith.constant dense<0.000000e+00> : vector<512xf32>
    %172 = vector.multi_reduction <add>, %171, %cst_76 [0] : vector<10x512xf32> to vector<512xf32>
    %173 = vector.shape_cast %172 : vector<512xf32> to vector<1x512xf32>
    %c15_77 = arith.constant 15 : index
    %c0_78 = arith.constant 0 : index
    %174 = vector.load %arg1[%c15_77, %c0_78] : memref<16x512xbf16, #tpu.memory_space<vmem>>, vector<1x512xbf16>
    %175 = arith.extf %174 : vector<1x512xbf16> to vector<1x512xf32>
    %176 = arith.mulf %173, %175 : vector<1x512xf32>
    %177 = arith.addf %166, %176 : vector<1x512xf32>
    %cst_79 = arith.constant dense<0.000000e+00> : vector<1xf32>
    %178 = vector.multi_reduction <add>, %177, %cst_79 [1] : vector<1x512xf32> to vector<1xf32>
    %179 = vector.shape_cast %178 : vector<1xf32> to vector<1x1xf32>
    %cst_80 = arith.constant 2.500000e-01 : f32
    %180 = vector.broadcast %cst_80 : f32 to vector<1x1xf32>
    %181 = arith.mulf %179, %180 : vector<1x1xf32>
    %c0_81 = arith.constant 0 : index
    %c0_82 = arith.constant 0 : index
    %182 = vector.load %arg2[%c0_81, %c0_82] : memref<1x1xf32, #tpu.memory_space<vmem>>, vector<1x1xf32>
    %183 = arith.addf %181, %182 : vector<1x1xf32>
    %c0_83 = arith.constant 0 : index
    %c0_84 = arith.constant 0 : index
    %c0_85 = arith.constant 0 : index
    %184 = vector.load %arg5[%c0_83, %c0_84, %c0_85] : memref<1x1x1xf32, #tpu.memory_space<vmem>>, vector<1x1x1xf32>
    %185 = vector.shape_cast %184 : vector<1x1x1xf32> to vector<1x1xf32>
    %186 = vector.shape_cast %183 : vector<1x1xf32> to vector<1x1x1xf32>
    tpu.vector_store %arg5[%c0_83, %c0_84, %c0_85], %186 {strides = array<i32>} : memref<1x1x1xf32, #tpu.memory_space<vmem>>, vector<1x1x1xf32>,
    return
  }
  func.func @transform_0(%arg0: i32) -> (i32, i32) {
    %c0_i32 = arith.constant 0 : i32
    %c0_i32_0 = arith.constant 0 : i32
    %c0_i32_1 = arith.constant 0 : i32
    return %c0_i32, %c0_i32_0 : i32, i32
  }
  func.func @transform_1(%arg0: i32) -> (i32, i32) {
    %c0_i32 = arith.constant 0 : i32
    %c0_i32_0 = arith.constant 0 : i32
    %c0_i32_1 = arith.constant 0 : i32
    return %c0_i32, %c0_i32_0 : i32, i32
  }
  func.func @transform_2(%arg0: i32) -> (i32, i32) {
    %c0_i32 = arith.constant 0 : i32
    %c0_i32_0 = arith.constant 0 : i32
    %c0_i32_1 = arith.constant 0 : i32
    return %c0_i32, %c0_i32_0 : i32, i32
  }
  func.func @transform_3(%arg0: i32) -> (i32, i32, i32) {
    %c0_i32 = arith.constant 0 : i32
    %c0_i32_0 = arith.constant 0 : i32
    %c0_i32_1 = arith.constant 0 : i32
    return %arg0, %c0_i32, %c0_i32_0 : i32, i32, i32
  }
  func.func @transform_4(%arg0: i32) -> (i32, i32, i32) {
    %c0_i32 = arith.constant 0 : i32
    %c0_i32_0 = arith.constant 0 : i32
    %c0_i32_1 = arith.constant 0 : i32
    return %arg0, %c0_i32, %c0_i32_0 : i32, i32, i32
  }
}

</mosaic_0001>

<bundles_post_ra>
// kernel: discriminator_forward.5
= control target key start
LH: loop header
LB: loop body
LE: loop exit
PB: predicated region body
PF: predicated region fallthrough
CT: control target
= control target key end

     0   :  { %8 = vsyncpa [#allocation3], 0  ;;  %s3885_s0 = inlined_call_operand.hbm [shape: bf16[4,12,64], index: 0, kind: input, shape index: {}]   ;;  %s3886_s1 = inlined_call_operand.hbm [shape: f32[1,64], index: 1, kind: input, shape index: {}]   ;;  %s3887_s2 = inlined_call_operand.hbm [shape: bf16[2,306,12], index: 2, kind: input, shape index: {}]   ;;  %s3888_s3 = inlined_call_operand.hbm [shape: bf16[2,272,64], index: 3, kind: output, shape index: {}]  }
   0x1   :  { %9 = vsyncpa [#allocation6], 0 }
   0x2   :  { %10 = vsyncpa [#allocation4], 0 }
   0x3   :  { %12 = vsyncpa [#allocation4 + $0x1], 0  ;;  %s3107_s12 = smov 0   ;;  %s3109_s13 = smov 0  }
   0x4   :  { %s3111_s14 = smov 0   ;;  %s3113_s15 = smov 0  }
   0x5   :  { %s3115_s16 = smov 0   ;;  %s3117_s17 = smov 0  }
   0x6 LB: > { %s3138_s18 = sadd.s32 4294967295, %s3075_s17   ;;  %s2222_s19 = sadd.s32 4294967294, %s3075_s17   ;;  %s3075_s17 = sphi %s3117_s17, %s18_s17   ;;  %s3071_s16 = sphi %s3115_s16, %s3913_s16   ;;  %s3067_s15 = sphi %s3113_s15, %s3912_s15   ;;  %s3063_s14 = sphi %s3111_s14, %s3911_s14   ;;  %s3059_s13 = sphi %s3109_s13, %s3910_s13   ;;  %s3055_s12 = sphi %s3107_s12, %s3909_s12  }
   0x7   : > { %p96_p0 = scmp.ne.s32.totalorder %s3063_s14, %s3059_s13  ;;  %p97_p1 = scmp.eq.s32.totalorder %s3075_s17, 0 }
   0x8   : > { %p102_p2 = scmp.ne.s32.totalorder %s3059_s13, %s3055_s12  ;;  %p3889_p3 = scmp.eq.s32.totalorder %s3138_s18, 0 }
   0x9   : > { %p128_p4 = scmp.eq.s32.totalorder %s3138_s18, 1  ;;  %p3148_p5 = por %p97_p1, %p96_p0 }
   0xa   : > { %p134_p6 = scmp.eq.s32.totalorder %s2222_s19, 1  ;;  %p3154_p7 = por %p3889_p3, %p102_p2 }
   0xb   : > { %p3158_p8 = por %p128_p4, %p96_p0  ;;  %p2223_p10 = scmp.ge.s32.totalorder %s3075_s17, 1 }
   0xc   : > { %s3894_s21 = scalar_select %p3154_p7, 1, 0 }
   0xd   : > { %s3895_s22 = scalar_select %p3158_p8, 1, 0 }
   0xe   : > { %p3162_p9 = por %p134_p6, %p102_p2  ;;  %p141_p11 = scmp.lt.s32.totalorder %s3075_s17, 3 }
   0xf   : > { %s3077_s25 = smov [#allocation2]   ;;  %p2798_p1 = scmp.lt.s32.totalorder %s3075_s17, 2 }
  0x10   : > { %s3896_s23 = scalar_select %p3162_p9, 1, 0 }
  0x11   : > { %p3168_p12 = pnand %p2223_p10, %p141_p11  ;;  %s155_s26 = sshll.u32 %s3077_s25, 4  ;;  %s3172_s26 = int_to_ptr.vmem [resolvable:$true] %s155_s26 }
  0x12   : > { %s3078_s28 = smov [#allocation5]   ;;  %p3186_p4 = pnand %p2798_p1, %p3148_p5 }
  0x13   : > { %p2781_p13 = pneg %p3168_p12  ;;  %s171_s29 = sshll.u32 %s3078_s28, 4  ;;  %s3190_s29 = int_to_ptr.vmem [resolvable:$true] %s171_s29 }
  0x14   : > { %s2899_s6 = scalar_lea.hbm %s3885_s0, 512 }
  0x15   : > { %p3180_p2 = pnand %p2781_p13, %p3889_p3  ;;  %p2900_p6 = scmp.ne.s32.totalorder %s3885_s0, %s2899_s6 }
  0x16   : > { %p2906_p5 = scmp.lt.u32.totalorder %s2899_s6, %s3885_s0 }
  0x17   : > { %p2901_p10 = pneg %p3180_p2 }
  0x19   : > { %p2902_p11 = pnand %p2901_p10, %p2900_p6 }
  0x1b   : > { %p2903_p13 = pneg %p2902_p11 }
  0x1d   : > { %p2908_p1 = pnand %p2906_p5, %p2903_p13 }
  0x1f   : > { %2911 = shalt.err (!%p2908_p1)
}
  0x20   : > { %s2912_s11 = scalar_lea.vmem %s3172_s26, 512  ;;  %p2920_p8 = scmp.lt.s32.totalorder %s3172_s26, %s3172_s26 }
  0x21   : > { %p2913_p0 = scmp.ne.s32.totalorder %s3172_s26, %s2912_s11  ;;  %p2921_p6 = scmp.lt.s32.totalorder %s2912_s11, %s2912_s11 }
  0x23   : > { %p2915_p3 = pnand %p2913_p0, %p2901_p10  ;;  %p2922_p11 = por %p2921_p6, %p2920_p8 }
  0x25   : > { %p2916_p9 = pneg %p2915_p3 }
  0x27   : > { %p2923_p7 = pnand %p2922_p11, %p2916_p9 }
  0x29   : > { %2926 = shalt.err (!%p2923_p7)
}
  0x2a   : > { %s3892_s19 = smov 64   ;;  %s3080_s20 = smov 4  }
  0x2b   : > { %2784 = dma.hbm_to_vmem [thread:$0]  (!%p3180_p2), %s3885_s0, 512, %s3172_s26, [#allocation3], %s3892_s19, %s3892_s19, %s3080_s20  }
  0x2c   : > { %s2927_s6 = scalar_lea.hbm %s3886_s1, 16 }
  0x2d   : > { %p2928_p3 = scmp.ne.s32.totalorder %s3886_s1, %s2927_s6  ;;  %p2934_p9 = scmp.lt.u32.totalorder %s2927_s6, %s3886_s1 }
  0x2f   : > { %p2930_p7 = pnand %p2928_p3, %p2901_p10 }
  0x31   : > { %p2931_p8 = pneg %p2930_p7 }
  0x33   : > { %p2936_p0 = pnand %p2934_p9, %p2931_p8 }
  0x35   : > { %2939 = shalt.err (!%p2936_p0)
}
  0x36   : > { %s2940_s26 = scalar_lea.vmem %s3190_s29, 16  ;;  %s2947_s11 = scalar_lea.vmem %s3190_s29, 32 }
  0x37   : > { %p2941_p13 = scmp.ne.s32.totalorder %s3190_s29, %s2940_s26  ;;  %p2948_p6 = scmp.lt.s32.totalorder %s3190_s29, %s3190_s29 }
  0x38   : > { %p2949_p11 = scmp.lt.s32.totalorder %s2947_s11, %s2940_s26 }
  0x39   : > { %p2943_p5 = pnand %p2941_p13, %p2901_p10 }
  0x3a   : > { %p2950_p3 = por %p2949_p11, %p2948_p6 }
  0x3b   : > { %p2944_p1 = pneg %p2943_p5 }
  0x3d   : > { %p2951_p7 = pnand %p2950_p3, %p2944_p1 }
  0x3f   : > { %2954 = shalt.err (!%p2951_p7)
}
  0x40   : > { %2787 = dma.hbm_to_vmem [thread:$0]  (!%p3180_p2), %s3886_s1, 16, %s3190_s29, [#allocation6]  }
  0x41   : > { %s30_s4 = sadd.s32 1, %s3071_s16  ;;  %s182_s5 = sand.u32 1, %s3075_s17  }
  0x42   : > { %p32_p10 = scmp.ge.s32.totalorder %s30_s4, 2  ;;  %s184_s6 = sand.u32 1, %s3063_s14  }
  0x43   : > { %s2765_s7 = smul.u32 2496, %s3071_s16  ;;  %s89_s27 = sadd.s32 1, %s3063_s14 }
  0x44   : > { %s3915_s4 = smov (%p32_p10, %s30_s4), 0  ;;  %s2764_s8 = smul.u32 156, %s184_s6 }
  0x45   : > { %s86_s9 = ssub.s32 %s3071_s16, %s3915_s4  ;;  %s3260_s11 = scalar_lea.hbm %s3887_s2, %s2765_s7 }
  0x46   : > { %p87_p8 = scmp.eq.s32.totalorder %s86_s9, 0  ;;  %s186_s29 = scalar_lea.vmem [#allocation7], %s2764_s8 }
  0x47   : > { %s193_s25 = sshll.u32 %s186_s29, 4  ;;  %s3267_s19 = scalar_lea.sflag [#allocation3], %s182_s5  ;;  %s3265_s25 = int_to_ptr.vmem [resolvable:$true] %s193_s25 }
  0x48   : > { %s3263_s28 = scalar_select %p87_p8, %s3063_s14, %s89_s27  }
  0x49   : > { %s2955_s6 = scalar_lea.hbm %s3260_s11, 2496  ;;  %p2957_p9 = pneg %p3186_p4 }
  0x4a   : > { %p2956_p2 = scmp.ne.s32.totalorder %s3260_s11, %s2955_s6  ;;  %s2960_s10 = scalar_lea.hbm %s3887_s2, 4992 }
  0x4b   : > { %p2961_p5 = scmp.lt.u32.totalorder %s3260_s11, %s3887_s2  ;;  %p2962_p1 = scmp.lt.u32.totalorder %s2960_s10, %s2955_s6 }
  0x4c   : > { %p2958_p0 = pnand %p2957_p9, %p2956_p2  ;;  %p2964_p11 = scmp.lt.u32.totalorder %s2955_s6, %s3260_s11 }
  0x4d   : > { %p2963_p6 = por %p2962_p1, %p2961_p5 }
  0x4e   : > { %p2959_p13 = pneg %p2958_p0 }
  0x4f   : > { %p2965_p3 = por %p2964_p11, %p2963_p6 }
  0x51   : > { %p2966_p7 = pnand %p2965_p3, %p2959_p13 }
  0x53   : > { %2969 = shalt.err (!%p2966_p7)
}
  0x54   : > { %s2970_s5 = scalar_lea.vmem %s3265_s25, 2496  ;;  %s3081_s27 = smov [#allocation7]  }
  0x55   : > { %p2971_p10 = scmp.ne.s32.totalorder %s3265_s25, %s2970_s5  ;;  %s2975_s29 = sshll.u32 %s3081_s27, 4  ;;  %s2976_s29 = int_to_ptr.vmem [resolvable:$false] %s2975_s29 }
  0x56   : > { %s2977_s7 = scalar_lea.vmem %s2976_s29, 4992  ;;  %p2978_p0 = scmp.lt.s32.totalorder %s3265_s25, %s2976_s29 }
  0x57   : > { %p2973_p8 = pnand %p2971_p10, %p2957_p9  ;;  %p2979_p5 = scmp.lt.s32.totalorder %s2977_s7, %s2970_s5 }
  0x59   : > { %p2974_p2 = pneg %p2973_p8  ;;  %p2980_p1 = por %p2979_p5, %p2978_p0 }
  0x5b   : > { %p2981_p6 = pnand %p2980_p1, %p2974_p2 }
  0x5d   : > { %2984 = shalt.err (!%p2981_p6)
}
  0x5e   : > { %s3900_s6 = smov 64   ;;  %205 = sbr.rel (%p3168_p12) target bundleno = 623 (0x26f), region = 32 }
  0x5f   : > { %2791 = dma.hbm_to_vmem [thread:$0]  (!%p3186_p4), %s3260_s11, 2496, %s3265_s25, %s3267_s19, %s3900_s6, %s3900_s6, %s3080_s20  }
  0x60   : > { %p3901_p9 = scmp.eq.s32.totalorder (!%p3168_p12), %s3138_s18, 0 }
  0x65   : > { %3038 = dma.done.wait (%p3901_p9), [#allocation3], 512   ;;  %p3902_p13 = pmov %p3901_p9 }
  0x66   : > { %p3903_p11 = pmov %p3901_p9 }
  0x67   : > { %3040 = vsyncadd (%p3902_p13), [#allocation3], 4294966784 }
  0x68   : > { %3042 = dma.done.wait (%p3903_p11), [#allocation6], 16   ;;  %p3904_p3 = pmov %p3901_p9 }
  0x69   : > { %s215_s30 = sand.u32 1, %s3138_s18   ;;  %s3310_s19 = sand.u32 1, %s3059_s13  }
  0x6a   : > { %3044 = vsyncadd (%p3904_p3), [#allocation6], 4294967280  ;;  %s2766_s24 = smul.u32 156, %s3310_s19  ;;  %s216_s20 = scalar_lea.sflag [#allocation3], %s215_s30 }
  0x6b   : > { %p3905_p12 = scmp.ne.s32.totalorder %s3894_s21, 0 }
  0x6c   : > { %s3313_s11 = scalar_lea.vmem [#allocation7], %s2766_s24 }
  0x6d   : > { %3046 = dma.done.wait (%p3905_p12), %s216_s20, 2496  }
  0x6e   : > { %3048 = vsyncadd (%p3905_p12), %s216_s20, 4294964800  ;;  %v3082_v0 = vmov 0.0   ;;  %vm3083_vm0 = vmmov 0   ;;  %vm569_vm1 = vcmask 1045504   ;;  %vm517_vm2 = vcmask 97280   ;;  %v2860_v4 = vld [vmem:[%s3313_s11] sm:$0xff]  }
  0x6f   : > { %2484 = vmatprep.subr.bf16.mxu0 %v3082_v0  ;;  %2554 = vmatprep.subr.bf16.mxu1 %v3082_v0  ;;  %vm371_vm3 = vsmask.f32 7424  ;;  %v2858_v1 = vld [vmem:[#allocation2 + $0x8] sm:$0x3f]   ;;  %v2859_v2 = vld [vmem:[#allocation2] sm:$0x3f]  }
  0x70   : > { %2556 = vmatprep.mubr.msk.bf16.mxu1 %vm3083_vm0, %v3082_v0  ;;  %2486 = vmatprep.mubr.msk.bf16.mxu0 %vm3083_vm0, %v3082_v0  ;;  %v571_v3 = vsel %vm569_vm1, %v2858_v1, 0  ;;  %v782_v5 = vsel %vm569_vm1, %v2859_v2, 0  ;;  %v2861_v6 = vld [vmem:[%s3313_s11 + $0x8] sm:$0xff]   ;;  %v373_v7 = vshrl.u32 %v2860_v4, 16  ;;  %v375_v8 = vshll.u32 %v2860_v4, 16  ;;  %v2864_v11 = vld [vmem:[%s3313_s11 + $0x10] sm:$0xff]  }
  0x71   : > { %2485 = vmatpush3.bf16.msra.mxu0 %v571_v3  ;;  %2555 = vmatpush3.bf16.msra.mxu1 %v782_v5  ;;  %v380_v9 = vshll.u32 %v2861_v6, 16  ;;  %v2862_v10 = vld [vmem:[#allocation2 + $0x10] sm:$0x3f]   ;;  %v2863_v13 = vld [vmem:[#allocation2 + $0x18] sm:$0x3f]   ;;  %v384_v15 = vshrl.u32 %v2861_v6, 16 }
  0x72   : > { %2624 = vmatprep.subr.bf16.mxu0 %v3082_v0  ;;  %2694 = vmatprep.subr.bf16.mxu1 %v3082_v0  ;;  %v377_v12 = vrot.slane %v375_v8, 1  ;;  %v1581_v17 = vsel %vm569_vm1, %v2863_v13, 0  ;;  %v388_v18 = vshll.u32 %v2864_v11, 16  ;;  %v1276_v19 = vsel %vm569_vm1, %v2862_v10, 0  ;;  %v2865_v23 = vld [vmem:[%s3313_s11 + $0x18] sm:$0xff]   ;;  %v2866_v29 = vld [vmem:[%s3313_s11 + $0x20] sm:$0xff]  }
  0x73   : > { %v382_v14 = vrot.slane %v380_v9, 1  ;;  %v392_v25 = vshrl.u32 %v2864_v11, 16  ;;  %v396_v26 = vshll.u32 %v2865_v23, 16  ;;  %v400_v31 = vshrl.u32 %v2865_v23, 16  ;;  %v2867_v35 = vld [vmem:[%s3313_s11 + $0x28] sm:$0xff]   ;;  %v2868_v39 = vld [vmem:[%s3313_s11 + $0x30] sm:$0xff]  }
  0x74   : > { %2557 = vmatmul.mubr.msk.bf16.vlgmr.msra.gmra.mrb[0].mxu1 %vm517_vm2, %v2860_v4  ;;  %v378_v16 = vor.u32 %v377_v12, %v373_v7  ;;  %v390_v22 = vrot.slane %v388_v18, 1  ;;  %v404_v32 = vshll.u32 %v2866_v29, 16  ;;  %v408_v37 = vshrl.u32 %v2866_v29, 16  ;;  %v2869_v47 = vld [vmem:[%s3313_s11 + $0x38] sm:$0xff]   ;;  %v2870_v53 = vld [vmem:[%s3313_s11 + $0x40] sm:$0xff]   ;;  %v2871_v59 = vld [vmem:[%s3313_s11 + $0x48] sm:$0xff]  }
  0x75   : > { %2560 = vmatprep.mubr.msk.bf16.mxu1 %vm3083_vm0, %v3082_v0  ;;  %2695 = vmatpush3.bf16.msra.mxu1 %v1581_v17  ;;  %v386_v21 = vor.u32 %v384_v15, %v382_v14  ;;  %v398_v28 = vrot.slane %v396_v26, 1  ;;  %v412_v38 = vshll.u32 %v2867_v35, 16  ;;  %v416_v42 = vshrl.u32 %v2867_v35, 16  ;;  %v2872_v2 = vld [vmem:[%s3313_s11 + $0x50] sm:$0xff]   ;;  %v2873_v8 = vld [vmem:[%s3313_s11 + $0x58] sm:$0xff]   ;;  %s2767_s18 = smul.u32 136, %s3310_s19 }
  0x76   : > { %v383_v20 = vsel %vm371_vm3, %v378_v16, %v382_v14  ;;  %v394_v27 = vor.u32 %v392_v25, %v390_v22  ;;  %v406_v34 = vrot.slane %v404_v32, 1  ;;  %v420_v43 = vshll.u32 %v2868_v39, 16  ;;  %v2874_v14 = vld [vmem:[%s3313_s11 + $0x60] sm:$0xff]   ;;  %v2876_v26 = vld [vmem:[%s3313_s11 + $0x70] sm:$0xff]   ;;  %v2877_v32 = vld [vmem:[%s3313_s11 + $0x78] sm:$0xff]   ;;  %s2768_s25 = smul.u32 2176, %s3067_s15 }
  0x77   : > { %2487 = vmatmul.mubr.msk.bf16.vlgmr.msra.gmra.mrb[0].mxu0 %vm517_vm2, %v383_v20  ;;  %v391_v24 = vsel %vm371_vm3, %v386_v21, %v390_v22  ;;  %v402_v33 = vor.u32 %v400_v31, %v398_v28  ;;  %v414_v41 = vrot.slane %v412_v38, 1  ;;  %v424_v49 = vshrl.u32 %v2868_v39, 16  ;;  %v2875_v20 = vld [vmem:[%s3313_s11 + $0x68] sm:$0xff]   ;;  %v2878_v38 = vld [vmem:[%s3313_s11 + $0x80] sm:$0xff]   ;;  %s3697_s21 = scalar_lea.vmem [#allocation8], %s2767_s18  ;;  %s2101_s15 = scalar_lea.sflag [#allocation4], %s3310_s19 }
  0x78   : > { %2625 = vmatpush3.bf16.msra.mxu0 %v1276_v19  ;;  %2490 = vmatprep.mubr.msk.bf16.mxu0 %vm3083_vm0, %v3082_v0  ;;  %v399_v30 = vsel %vm371_vm3, %v394_v27, %v398_v28  ;;  %v410_v40 = vor.u32 %v408_v37, %v406_v34  ;;  %v422_v46 = vrot.slane %v420_v43, 1  ;;  %v428_v50 = vshll.u32 %v2869_v47, 16  ;;  %s2115_s9 = sshll.u32 %s3697_s21, 4  ;;  %s3830_s26 = scalar_lea.hbm %s3888_s3, %s2768_s25  ;;  %s3832_s9 = int_to_ptr.vmem [resolvable:$true] %s2115_s9 }
  0x79   : > { %v407_v36 = vsel %vm371_vm3, %v402_v33, %v406_v34  ;;  %v418_v45 = vor.u32 %v416_v42, %v414_v41  ;;  %v432_v55 = vshrl.u32 %v2869_v47, 16  ;;  %v436_v56 = vshll.u32 %v2870_v53, 16  ;;  %s2985_s5 = scalar_lea.vmem %s3832_s9, 2176  ;;  %p3906_p7 = scmp.ne.s32.totalorder %s3895_s22, 0 }
  0x7a   : > { %v415_v44 = vsel %vm371_vm3, %v410_v40, %v414_v41  ;;  %v426_v51 = vor.u32 %v424_v49, %v422_v46  ;;  %v430_v52 = vrot.slane %v428_v50, 1  ;;  %v440_v61 = vshrl.u32 %v2870_v53, 16  ;;  %p2986_p4 = scmp.ne.s32.totalorder %s3832_s9, %s2985_s5  ;;  %s3084_s27 = smov [#allocation8]  }
  0x7b   : > { %v423_v48 = vsel %vm371_vm3, %v418_v45, %v422_v46  ;;  %v438_v58 = vrot.slane %v436_v56, 1  ;;  %v444_v62 = vshll.u32 %v2871_v59, 16  ;;  %v448_v4 = vshrl.u32 %v2871_v59, 16  ;;  %v953_v45 = vld [vmem:[%s3313_s11 + $0x8] sm:$0xf]  ;;  %s2989_s29 = sshll.u32 %s3084_s27, 4  ;;  %s2990_s29 = int_to_ptr.vmem [resolvable:$false] %s2989_s29 }
  0x7c   : > { %2561 = vmatmul.mubr.msk.bf16.gmra.mrb[4].mxu1 %vm517_vm2, %v2861_v6  ;;  %v431_v54 = vsel %vm371_vm3, %v426_v51, %v430_v52  ;;  %v434_v57 = vor.u32 %v432_v55, %v430_v52  ;;  %v452_v5 = vshll.u32 %v2872_v2, 16  ;;  %v456_v10 = vshrl.u32 %v2872_v2, 16  ;;  %v954_v46 = vld [vmem:[%s3313_s11 + $0xc] sm:$0xf]  ;;  %v1481_v51 = vld [vmem:[%s3313_s11 + $0x8] sm:$0xe]  ;;  %p2987_p10 = pnand %p2986_p4, %p3906_p7  ;;  %p2992_p2 = scmp.lt.s32.totalorder %s3832_s9, %s2990_s29 }
  0x7d   : > { %2564 = vmatprep.mubr.msk.bf16.mxu1 %vm3083_vm0, %v3082_v0  ;;  %v442_v63 = vor.u32 %v440_v61, %v438_v58  ;;  %v446_v1 = vrot.slane %v444_v62, 1  ;;  %v464_v16 = vshrl.u32 %v2873_v8, 16  ;;  %v468_v17 = vshll.u32 %v2874_v14, 16  ;;  %v2881_v52 = vld [vmem:[%s3313_s11 + $0x10] sm:$0xff]   ;;  %s2991_s7 = scalar_lea.vmem %s2990_s29, 4352 }
  0x7e   : > { %v439_v60 = vsel %vm371_vm3, %v434_v57, %v438_v58  ;;  %v454_v7 = vrot.slane %v452_v5, 1  ;;  %v472_v22 = vshrl.u32 %v2874_v14, 16  ;;  %v480_v28 = vshrl.u32 %v2875_v20, 16  ;;  %p2988_p8 = pneg %p2987_p10  ;;  %p2993_p0 = scmp.lt.s32.totalorder %s2991_s7, %s2985_s5 }
  0x7f   : > { %2491 = vmatmul.mubr.msk.bf16.gmra.mrb[4].mxu0 %vm517_vm2, %v391_v24  ;;  %v447_v3 = vsel %vm371_vm3, %v442_v63, %v446_v1  ;;  %v450_v6 = vor.u32 %v448_v4, %v446_v1  ;;  %v470_v19 = vrot.slane %v468_v17, 1  ;;  %v488_v34 = vshrl.u32 %v2876_v26, 16 }
  0x80   : > { %2494 = vmatprep.mubr.msk.bf16.mxu0 %vm3083_vm0, %v3082_v0  ;;  %v458_v12 = vor.u32 %v456_v10, %v454_v7  ;;  %v496_v40 = vshrl.u32 %v2877_v32, 16  ;;  %v500_v41 = vshll.u32 %v2878_v38, 16  ;;  %v2285_v50 = vcombine.low %v953_v45, %v954_v46  ;;  %p2994_p5 = por %p2993_p0, %p2992_p2 }
  0x81   : > { %v455_v9 = vsel %vm371_vm3, %v450_v6, %v454_v7  ;;  %v474_v24 = vor.u32 %v472_v22, %v470_v19  ;;  %v2321_v55 = vcombine.low %v1481_v51, %v954_v46  ;;  %v1490_v57 = vrot.slane %v2881_v52, 1  ;;  %v2889_v51 = vld [vmem:[%s3313_s11 + $0x48] sm:$0xff]  }
  0x82   : > { %v502_v43 = vrot.slane %v500_v41, 1  ;;  %v1082_v56 = vshll.u32 %v2285_v50, 16  ;;  %v1080_v58 = vshrl.u32 %v2285_v50, 16  ;;  %v1087_v62 = vshll.u32 %v2881_v52, 16  ;;  %p2995_p1 = pnand %p2994_p5, %p2988_p8 }
  0x83   : > { %vm1488_vm4 = vcmask 1046528   ;;  %v1091_v6 = vshrl.u32 %v2881_v52, 16  ;;  %vm2065_vm6 = vcmask 519168  }
  0x84   : > { %2565 = vmatmul.mubr.msk.bf16.gmra.mrb[8].mxu1 %vm517_vm2, %v2864_v11  ;;  %v460_v11 = vshll.u32 %v2873_v8, 16  ;;  %v1084_v61 = vrot.slane %v1082_v56, 1 }
  0x85   : > { %2568 = vmatprep.mubr.msk.bf16.mxu1 %vm3083_vm0, %v3082_v0 }
  0x86   : > { %v462_v13 = vrot.slane %v460_v11, 1  ;;  %v1085_v1 = vor.u32 %v1084_v61, %v1080_v58  ;;  %v2884_v11 = vld [vmem:[%s3313_s11 + $0x20] sm:$0xff]  }
  0x87   : > { %2495 = vmatmul.mubr.msk.bf16.gmra.mrb[8].mxu0 %vm517_vm2, %v399_v30  ;;  %v1107_v22 = vshrl.u32 %v2884_v11, 16 }
  0x88   : > { %2498 = vmatprep.mubr.msk.bf16.mxu0 %vm3083_vm0, %v3082_v0  ;;  %v463_v15 = vsel %vm371_vm3, %v458_v12, %v462_v13  ;;  %v466_v18 = vor.u32 %v464_v16, %v462_v13  ;;  %v1494_v13 = vrot.slane %v2884_v11, 1 }
  0x8a   : > { %v471_v21 = vsel %vm371_vm3, %v466_v18, %v470_v19  ;;  %v2885_v19 = vld [vmem:[%s3313_s11 + $0x28] sm:$0xff]  }
  0x8c   : > { %2569 = vmatmul.mubr.msk.bf16.gmra.mrb[12].mxu1 %vm517_vm2, %v2865_v23  ;;  %v476_v23 = vshll.u32 %v2875_v20, 16 }
  0x8d   : > { %2572 = vmatprep.mubr.msk.bf16.mxu1 %vm3083_vm0, %v3082_v0 }
  0x8e   : > { %v478_v25 = vrot.slane %v476_v23, 1  ;;  %v1111_v23 = vshll.u32 %v2885_v19, 16 }
  0x8f   : > { %2499 = vmatmul.mubr.msk.bf16.gmra.mrb[12].mxu0 %vm517_vm2, %v407_v36 }
  0x90   : > { %2502 = vmatprep.mubr.msk.bf16.mxu0 %vm3083_vm0, %v3082_v0  ;;  %v479_v27 = vsel %vm371_vm3, %v474_v24, %v478_v25  ;;  %v482_v30 = vor.u32 %v480_v28, %v478_v25 }
  0x94   : > { %2573 = vmatmul.mubr.msk.bf16.gmra.mrb[16].mxu1 %vm517_vm2, %v2866_v29  ;;  %v484_v29 = vshll.u32 %v2876_v26, 16 }
  0x95   : > { %2576 = vmatprep.mubr.msk.bf16.mxu1 %vm3083_vm0, %v3082_v0 }
  0x96   : > { %v486_v31 = vrot.slane %v484_v29, 1 }
  0x97   : > { %2503 = vmatmul.mubr.msk.bf16.gmra.mrb[16].mxu0 %vm517_vm2, %v415_v44  ;;  %v2879_v44 = vld [vmem:[%s3313_s11 + $0x88] ss:$0 sps:$4 sm:$0x11]  }
  0x98   : > { %2506 = vmatprep.mubr.msk.bf16.mxu0 %vm3083_vm0, %v3082_v0  ;;  %v487_v33 = vsel %vm371_vm3, %v482_v30, %v486_v31  ;;  %v490_v36 = vor.u32 %v488_v34, %v486_v31  ;;  %v508_v49 = vshll.u32 %v2879_v44, 16  ;;  %v1115_v30 = vshrl.u32 %v2885_v19, 16 }
  0x9c   : > { %2577 = vmatmul.mubr.msk.bf16.gmra.mrb[20].mxu1 %vm517_vm2, %v2867_v35  ;;  %v492_v35 = vshll.u32 %v2877_v32, 16 }
  0x9d   : > { %2580 = vmatprep.mubr.msk.bf16.mxu1 %vm3083_vm0, %v3082_v0 }
  0x9e   : > { %v494_v37 = vrot.slane %v492_v35, 1  ;;  %v2887_v35 = vld [vmem:[%s3313_s11 + $0x38] sm:$0xff]  }
  0x9f   : > { %2507 = vmatmul.mubr.msk.bf16.gmra.mrb[20].mxu0 %vm517_vm2, %v423_v48  ;;  %v504_v48 = vshrl.u32 %v2878_v38, 16  ;;  %v1131_v46 = vshrl.u32 %v2887_v35, 16 }
  0xa0   : > { %2510 = vmatprep.mubr.msk.bf16.mxu0 %vm3083_vm0, %v3082_v0  ;;  %v498_v42 = vor.u32 %v496_v40, %v494_v37 }
  0xa4   : > { %2581 = vmatmul.mubr.msk.bf16.gmra.mrb[24].mxu1 %vm517_vm2, %v2868_v39  ;;  %v495_v39 = vsel %vm371_vm3, %v490_v36, %v494_v37  ;;  %v1500_v37 = vrot.slane %v2887_v35, 1 }
  0xa5   : > { %2584 = vmatprep.mubr.msk.bf16.mxu1 %vm3083_vm0, %v3082_v0 }
  0xa7   : > { %2511 = vmatmul.mubr.msk.bf16.gmra.mrb[24].mxu0 %vm517_vm2, %v431_v54  ;;  %v510_v54 = vrot.slane %v508_v49, 1 }
  0xa8   : > { %2514 = vmatprep.mubr.msk.bf16.mxu0 %vm3083_vm0, %v3082_v0 }
  0xac   : > { %2585 = vmatmul.mubr.msk.bf16.gmra.mrb[28].mxu1 %vm517_vm2, %v2869_v47  ;;  %v503_v47 = vsel %vm371_vm3, %v498_v42, %v502_v43 }
  0xad   : > { %2588 = vmatprep.mubr.msk.bf16.mxu1 %vm3083_vm0, %v3082_v0 }
  0xaf   : > { %2515 = vmatmul.mubr.msk.bf16.gmra.mrb[28].mxu0 %vm517_vm2, %v439_v60  ;;  %v1489_v60 = vrot.slane %v2321_v55, 1  ;;  %v1143_v55 = vshll.u32 %v2889_v51, 16 }
  0xb0   : > { %2518 = vmatprep.mubr.msk.bf16.mxu0 %vm3083_vm0, %v3082_v0 }
  0xb1   : > { %v1491_v63 = vsel %vm1488_vm4, %v1489_v60, %v1490_v57  ;;  %v1145_v58 = vrot.slane %v1143_v55, 1 }
  0xb4   : > { %2589 = vmatmul.mubr.msk.bf16.gmra.mrb[32].mxu1 %vm517_vm2, %v2870_v53  ;;  %v506_v53 = vor.u32 %v504_v48, %v502_v43  ;;  %v2888_v43 = vld [vmem:[%s3313_s11 + $0x40] sm:$0xff]  }
  0xb5   : > { %2592 = vmatprep.mubr.msk.bf16.mxu1 %vm3083_vm0, %v3082_v0  ;;  %v1502_v45 = vrot.slane %v2888_v43, 1 }
  0xb7   : > { %2519 = vmatmul.mubr.msk.bf16.gmra.mrb[32].mxu0 %vm517_vm2, %v447_v3  ;;  %v2883_v3 = vld [vmem:[%s3313_s11 + $0x18] sm:$0xff]   ;;  %v1503_v48 = vsel %vm1488_vm4, %v1500_v37, %v1502_v45 }
  0xb8   : > { %2522 = vmatprep.mubr.msk.bf16.mxu0 %vm3083_vm0, %v3082_v0  ;;  %v1492_v5 = vrot.slane %v2883_v3, 1  ;;  %v1095_v7 = vshll.u32 %v2883_v3, 16 }
  0xba   : > { %v1097_v10 = vrot.slane %v1095_v7, 1  ;;  %v1495_v16 = vsel %vm1488_vm4, %v1492_v5, %v1494_v13 }
  0xbc   : > { %2593 = vmatmul.mubr.msk.bf16.gmra.mrb[36].mxu1 %vm517_vm2, %v2871_v59  ;;  %v511_v59 = vsel %vm371_vm3, %v506_v53, %v510_v54  ;;  %v1504_v53 = vrot.slane %v2889_v51, 1  ;;  %v1139_v54 = vshrl.u32 %v2888_v43, 16 }
  0xbd   : > { %2596 = vmatprep.mubr.msk.bf16.mxu1 %vm3083_vm0, %v3082_v0 }
  0xbe   : > { %v1505_v56 = vsel %vm1488_vm4, %v1502_v45, %v1504_v53 }
  0xbf   : > { %2523 = vmatmul.mubr.msk.bf16.gmra.mrb[36].mxu0 %vm517_vm2, %v455_v9 }
  0xc0   : > { %2526 = vmatprep.mubr.msk.bf16.mxu0 %vm3083_vm0, %v3082_v0 }
  0xc4   : > { %2597 = vmatmul.mubr.msk.bf16.gmra.mrb[40].mxu1 %vm517_vm2, %v2872_v2  ;;  %v1089_v2 = vrot.slane %v1087_v62, 1  ;;  %v1147_v62 = vshrl.u32 %v2889_v51, 16 }
  0xc5   : > { %2600 = vmatprep.mubr.msk.bf16.mxu1 %vm3083_vm0, %v3082_v0 }
  0xc6   : > { %v1090_v4 = vsel %vm371_vm3, %v1085_v1, %v1089_v2  ;;  %v1093_v9 = vor.u32 %v1091_v6, %v1089_v2  ;;  %v1149_v2 = vor.u32 %v1147_v62, %v1145_v58 }
  0xc7   : > { %2527 = vmatmul.mubr.msk.bf16.gmra.mrb[40].mxu0 %vm517_vm2, %v463_v15  ;;  %v1103_v15 = vshll.u32 %v2884_v11, 16 }
  0xc8   : > { %2530 = vmatprep.mubr.msk.bf16.mxu0 %vm3083_vm0, %v3082_v0  ;;  %v1098_v12 = vsel %vm371_vm3, %v1093_v9, %v1097_v10 }
  0xc9   : > { %v1105_v18 = vrot.slane %v1103_v15, 1 }
  0xcb   : > { %v1109_v25 = vor.u32 %v1107_v22, %v1105_v18 }
  0xcc   : > { %2601 = vmatmul.mubr.msk.bf16.gmra.mrb[44].mxu1 %vm517_vm2, %v2873_v8  ;;  %v1493_v8 = vsel %vm1488_vm4, %v1490_v57, %v1492_v5 }
  0xcd   : > { %2604 = vmatprep.mubr.msk.bf16.mxu1 %vm3083_vm0, %v3082_v0 }
  0xcf   : > { %2531 = vmatmul.mubr.msk.bf16.gmra.mrb[44].mxu0 %vm517_vm2, %v471_v21  ;;  %v1496_v21 = vrot.slane %v2885_v19, 1 }
  0xd0   : > { %2534 = vmatprep.mubr.msk.bf16.mxu0 %vm3083_vm0, %v3082_v0 }
  0xd1   : > { %v1497_v24 = vsel %vm1488_vm4, %v1494_v13, %v1496_v21 }
  0xd4   : > { %2605 = vmatmul.mubr.msk.bf16.gmra.mrb[48].mxu1 %vm517_vm2, %v2874_v14  ;;  %v1099_v14 = vshrl.u32 %v2883_v3, 16 }
  0xd5   : > { %2608 = vmatprep.mubr.msk.bf16.mxu1 %vm3083_vm0, %v3082_v0 }
  0xd6   : > { %v1101_v17 = vor.u32 %v1099_v14, %v1097_v10 }
  0xd7   : > { %2535 = vmatmul.mubr.msk.bf16.gmra.mrb[48].mxu0 %vm517_vm2, %v479_v27  ;;  %v2886_v27 = vld [vmem:[%s3313_s11 + $0x30] sm:$0xff]  }
  0xd8   : > { %2538 = vmatprep.mubr.msk.bf16.mxu0 %vm3083_vm0, %v3082_v0  ;;  %v1498_v29 = vrot.slane %v2886_v27, 1  ;;  %v1119_v31 = vshll.u32 %v2886_v27, 16 }
  0xda   : > { %v1121_v34 = vrot.slane %v1119_v31, 1  ;;  %v1501_v40 = vsel %vm1488_vm4, %v1498_v29, %v1500_v37 }
  0xdc   : > { %2609 = vmatmul.mubr.msk.bf16.gmra.mrb[52].mxu1 %vm517_vm2, %v2875_v20  ;;  %v1106_v20 = vsel %vm371_vm3, %v1101_v17, %v1105_v18 }
  0xdd   : > { %2612 = vmatprep.mubr.msk.bf16.mxu1 %vm3083_vm0, %v3082_v0 }
  0xdf   : > { %2539 = vmatmul.mubr.msk.bf16.gmra.mrb[52].mxu0 %vm517_vm2, %v487_v33 }
  0xe0   : > { %2542 = vmatprep.mubr.msk.bf16.mxu0 %vm3083_vm0, %v3082_v0 }
  0xe4   : > { %2613 = vmatmul.mubr.msk.bf16.gmra.mrb[56].mxu1 %vm517_vm2, %v2876_v26  ;;  %v1113_v26 = vrot.slane %v1111_v23, 1  ;;  %v2893_v23 = vld [vmem:[%s3313_s11 + $0x68] sm:$0xff]  }
  0xe5   : > { %2616 = vmatprep.mubr.msk.bf16.mxu1 %vm3083_vm0, %v3082_v0 }
  0xe6   : > { %v1114_v28 = vsel %vm371_vm3, %v1109_v25, %v1113_v26  ;;  %v1117_v33 = vor.u32 %v1115_v30, %v1113_v26  ;;  %v1512_v30 = vrot.slane %v2893_v23, 1 }
  0xe7   : > { %2543 = vmatmul.mubr.msk.bf16.gmra.mrb[56].mxu0 %vm517_vm2, %v495_v39  ;;  %v1127_v39 = vshll.u32 %v2887_v35, 16 }
  0xe8   : > { %2546 = vmatprep.mubr.msk.bf16.mxu0 %vm3083_vm0, %v3082_v0  ;;  %v1122_v36 = vsel %vm371_vm3, %v1117_v33, %v1121_v34 }
  0xe9   : > { %v1129_v42 = vrot.slane %v1127_v39, 1 }
  0xeb   : > { %v1133_v49 = vor.u32 %v1131_v46, %v1129_v42 }
  0xec   : > { %2617 = vmatmul.mubr.msk.bf16.gmra.mrb[60].mxu1 %vm517_vm2, %v2877_v32  ;;  %v1499_v32 = vsel %vm1488_vm4, %v1496_v21, %v1498_v29 }
  0xed   : > { %2620 = vmatprep.mubr.msk.bf16.mxu1 %vm3083_vm0, %v3082_v0 }
  0xef   : > { %2547 = vmatmul.mubr.msk.bf16.gmra.mrb[60].mxu0 %vm517_vm2, %v503_v47  ;;  %v1135_v47 = vshll.u32 %v2888_v43, 16 }
  0xf0   : > { %2550 = vmatprep.mubr.msk.bf16.mxu0 %vm3083_vm0, %v3082_v0 }
  0xf1   : > { %v1137_v50 = vrot.slane %v1135_v47, 1 }
  0xf3   : > { %v1138_v52 = vsel %vm371_vm3, %v1133_v49, %v1137_v50  ;;  %v1141_v57 = vor.u32 %v1139_v54, %v1137_v50  ;;  %v1179_v49 = vshrl.u32 %v2893_v23, 16 }
  0xf4   : > { %2621 = vmatmul.mubr.msk.bf16.gmra.mrb[64].mxu1 %vm517_vm2, %v2878_v38  ;;  %v1123_v38 = vshrl.u32 %v2886_v27, 16 }
  0xf5   : > { %2696 = vmatprep.mubr.msk.bf16.mxu1 %vm3083_vm0, %v3082_v0  ;;  %v1146_v60 = vsel %vm371_vm3, %v1141_v57, %v1145_v58 }
  0xf6   : > { %v1125_v41 = vor.u32 %v1123_v38, %v1121_v34 }
  0xf7   : > { %2551 = vmatmul.mubr.msk.bf16.gmra.mrb[64].mxu0 %vm517_vm2, %v511_v59  ;;  %v2890_v59 = vld [vmem:[%s3313_s11 + $0x50] sm:$0xff]  }
  0xf8   : > { %2626 = vmatprep.mubr.msk.bf16.mxu0 %vm3083_vm0, %v3082_v0  ;;  %v1130_v44 = vsel %vm371_vm3, %v1125_v41, %v1129_v42  ;;  %v1506_v61 = vrot.slane %v2890_v59, 1  ;;  %v1155_v7 = vshrl.u32 %v2890_v59, 16  ;;  %v2894_v41 = vld [vmem:[%s3313_s11 + $0x70] sm:$0xff]  }
  0xf9   : > { %v1183_v50 = vshll.u32 %v2894_v41, 16 }
  0xfa   : > { %v1507_v1 = vsel %vm1488_vm4, %v1504_v53, %v1506_v61 }
  0xfb   : > { %v1185_v58 = vrot.slane %v1183_v50, 1 }
  0xfc   : > { %2697 = vmatmul.mubr.msk.bf16.vlgmr.msra.gmra.mrb[68].mxu1 %vm517_vm2, %v1491_v63  ;;  %v1151_v63 = vshll.u32 %v2890_v59, 16  ;;  %v2895_v59 = vld [vmem:[%s3313_s11 + $0x78] sm:$0xff]  }
  0xfd   : > { %2700 = vmatprep.mubr.msk.bf16.mxu1 %vm3083_vm0, %v3082_v0 }
  0xfe   : > { %v1153_v3 = vrot.slane %v1151_v63, 1 }
  0xff   : > { %2627 = vmatmul.mubr.msk.bf16.vlgmr.msra.gmra.mrb[68].mxu0 %vm517_vm2, %v1090_v4  ;;  %v2891_v4 = vld [vmem:[%s3313_s11 + $0x58] sm:$0xff]  }
 0x100   : > { %2630 = vmatprep.mubr.msk.bf16.mxu0 %vm3083_vm0, %v3082_v0  ;;  %v1154_v5 = vsel %vm371_vm3, %v1149_v2, %v1153_v3  ;;  %v1508_v6 = vrot.slane %v2891_v4, 1  ;;  %v1157_v10 = vor.u32 %v1155_v7, %v1153_v3  ;;  %v1163_v15 = vshrl.u32 %v2891_v4, 16 }
 0x101   : > { %v1516_v3 = vrot.slane %v2895_v59, 1 }
 0x102   : > { %v1509_v9 = vsel %vm1488_vm4, %v1506_v61, %v1508_v6 }
 0x104   : > { %2701 = vmatmul.mubr.msk.bf16.gmra.mrb[72].mxu1 %vm517_vm2, %v1493_v8  ;;  %v1159_v8 = vshll.u32 %v2891_v4, 16  ;;  %v1187_v4 = vshrl.u32 %v2894_v41, 16 }
 0x105   : > { %2704 = vmatprep.mubr.msk.bf16.mxu1 %vm3083_vm0, %v3082_v0 }
 0x106   : > { %v1161_v11 = vrot.slane %v1159_v8, 1 }
 0x107   : > { %2631 = vmatmul.mubr.msk.bf16.gmra.mrb[72].mxu0 %vm517_vm2, %v1098_v12  ;;  %v2892_v12 = vld [vmem:[%s3313_s11 + $0x60] sm:$0xff]  }
 0x108   : > { %2634 = vmatprep.mubr.msk.bf16.mxu0 %vm3083_vm0, %v3082_v0  ;;  %v1162_v13 = vsel %vm371_vm3, %v1157_v10, %v1161_v11  ;;  %v1510_v14 = vrot.slane %v2892_v12, 1  ;;  %v1165_v21 = vor.u32 %v1163_v15, %v1161_v11  ;;  %v1171_v31 = vshrl.u32 %v2892_v12, 16 }
 0x10a   : > { %v1513_v38 = vsel %vm1488_vm4, %v1510_v14, %v1512_v30 }
 0x10c   : > { %2705 = vmatmul.mubr.msk.bf16.gmra.mrb[76].mxu1 %vm517_vm2, %v1495_v16  ;;  %v1167_v16 = vshll.u32 %v2892_v12, 16  ;;  %v1189_v12 = vor.u32 %v1187_v4, %v1185_v58 }
 0x10d   : > { %2708 = vmatprep.mubr.msk.bf16.mxu1 %vm3083_vm0, %v3082_v0 }
 0x10e   : > { %v1169_v22 = vrot.slane %v1167_v16, 1 }
 0x10f   : > { %2635 = vmatmul.mubr.msk.bf16.gmra.mrb[76].mxu0 %vm517_vm2, %v1106_v20  ;;  %v1511_v20 = vsel %vm1488_vm4, %v1508_v6, %v1510_v14  ;;  %v2896_v14 = vld [vmem:[%s3313_s11 + $0x80] sm:$0xff]  }
 0x110   : > { %2638 = vmatprep.mubr.msk.bf16.mxu0 %vm3083_vm0, %v3082_v0  ;;  %v1170_v29 = vsel %vm371_vm3, %v1165_v21, %v1169_v22  ;;  %v1173_v39 = vor.u32 %v1171_v31, %v1169_v22  ;;  %v1518_v21 = vrot.slane %v2896_v14, 1  ;;  %v1195_v22 = vshrl.u32 %v2895_v59, 16 }
 0x114   : > { %2709 = vmatmul.mubr.msk.bf16.gmra.mrb[80].mxu1 %vm517_vm2, %v1497_v24 }
 0x115   : > { %2712 = vmatprep.mubr.msk.bf16.mxu1 %vm3083_vm0, %v3082_v0 }
 0x117   : > { %2639 = vmatmul.mubr.msk.bf16.gmra.mrb[80].mxu0 %vm517_vm2, %v1114_v28 }
 0x118   : > { %2642 = vmatprep.mubr.msk.bf16.mxu0 %vm3083_vm0, %v3082_v0 }
 0x11c   : > { %2713 = vmatmul.mubr.msk.bf16.gmra.mrb[84].mxu1 %vm517_vm2, %v1499_v32  ;;  %v1175_v32 = vshll.u32 %v2893_v23, 16  ;;  %v1199_v23 = vshll.u32 %v2896_v14, 16 }
 0x11d   : > { %2716 = vmatprep.mubr.msk.bf16.mxu1 %vm3083_vm0, %v3082_v0 }
 0x11f   : > { %2643 = vmatmul.mubr.msk.bf16.gmra.mrb[84].mxu0 %vm517_vm2, %v1122_v36 }
 0x120   : > { %2646 = vmatprep.mubr.msk.bf16.mxu0 %vm3083_vm0, %v3082_v0 }
 0x124   : > { %2717 = vmatmul.mubr.msk.bf16.gmra.mrb[88].mxu1 %vm517_vm2, %v1501_v40  ;;  %v1177_v40 = vrot.slane %v1175_v32, 1  ;;  %v1201_v32 = vrot.slane %v1199_v23, 1 }
 0x125   : > { %2720 = vmatprep.mubr.msk.bf16.mxu1 %vm3083_vm0, %v3082_v0 }
 0x126   : > { %v1178_v47 = vsel %vm371_vm3, %v1173_v39, %v1177_v40  ;;  %v1181_v57 = vor.u32 %v1179_v49, %v1177_v40 }
 0x127   : > { %2647 = vmatmul.mubr.msk.bf16.gmra.mrb[88].mxu0 %vm517_vm2, %v1130_v44 }
 0x128   : > { %2650 = vmatprep.mubr.msk.bf16.mxu0 %vm3083_vm0, %v3082_v0  ;;  %v1186_v2 = vsel %vm371_vm3, %v1181_v57, %v1185_v58 }
 0x12c   : > { %2721 = vmatmul.mubr.msk.bf16.gmra.mrb[92].mxu1 %vm517_vm2, %v1503_v48  ;;  %v1514_v48 = vrot.slane %v2894_v41, 1 }
 0x12d   : > { %2724 = vmatprep.mubr.msk.bf16.mxu1 %vm3083_vm0, %v3082_v0 }
 0x12e   : > { %v1517_v11 = vsel %vm1488_vm4, %v1514_v48, %v1516_v3 }
 0x12f   : > { %2651 = vmatmul.mubr.msk.bf16.gmra.mrb[92].mxu0 %vm517_vm2, %v1138_v52 }
 0x130   : > { %2654 = vmatprep.mubr.msk.bf16.mxu0 %vm3083_vm0, %v3082_v0 }
 0x134   : > { %2725 = vmatmul.mubr.msk.bf16.gmra.mrb[96].mxu1 %vm517_vm2, %v1505_v56  ;;  %v1515_v56 = vsel %vm1488_vm4, %v1512_v30, %v1514_v48  ;;  %v1519_v30 = vsel %vm1488_vm4, %v1516_v3, %v1518_v21 }
 0x135   : > { %2728 = vmatprep.mubr.msk.bf16.mxu1 %vm3083_vm0, %v3082_v0 }
 0x137   : > { %2655 = vmatmul.mubr.msk.bf16.gmra.mrb[96].mxu0 %vm517_vm2, %v1146_v60 }
 0x138   : > { %2658 = vmatprep.mubr.msk.bf16.mxu0 %vm3083_vm0, %v3082_v0 }
 0x13c   : > { %2729 = vmatmul.mubr.msk.bf16.gmra.mrb[100].mxu1 %vm517_vm2, %v1507_v1 }
 0x13d   : > { %2732 = vmatprep.mubr.msk.bf16.mxu1 %vm3083_vm0, %v3082_v0 }
 0x13f   : > { %2659 = vmatmul.mubr.msk.bf16.gmra.mrb[100].mxu0 %vm517_vm2, %v1154_v5  ;;  %v1191_v5 = vshll.u32 %v2895_v59, 16 }
 0x140   : > { %2662 = vmatprep.mubr.msk.bf16.mxu0 %vm3083_vm0, %v3082_v0 }
 0x144   : > { %2733 = vmatmul.mubr.msk.bf16.gmra.mrb[104].mxu1 %vm517_vm2, %v1509_v9 }
 0x145   : > { %2736 = vmatprep.mubr.msk.bf16.mxu1 %vm3083_vm0, %v3082_v0 }
 0x147   : > { %v818_v17 = vpop.f32.mrb[0].mxu1  ;;  %2663 = vmatmul.mubr.msk.bf16.gmra.mrb[104].mxu0 %vm517_vm2, %v1162_v13  ;;  %v1193_v13 = vrot.slane %v1191_v5, 1 }
 0x148   : > { %v2558_v18 = vpop.f32.mrb[1].mxu1  ;;  %2666 = vmatprep.mubr.msk.bf16.mxu0 %vm3083_vm0, %v3082_v0 }
 0x149   : > { %v821_v19 = vpop.f32.mrb[2].mxu1  ;;  %v1197_v31 = vor.u32 %v1195_v22, %v1193_v13 }
 0x14a   : > { %v2559_v24 = vpop.f32.mrb[3].mxu1  ;;  %v607_v25 = vpop.f32.mrb[0].mxu0 }
 0x14b   : > { %v3564_v26 = vadd.f32 %v818_v17, %v607_v25  ;;  %v2488_v27 = vpop.f32.mrb[1].mxu0  ;;  %v1202_v40 = vsel %vm371_vm3, %v1197_v31, %v1201_v32 }
 0x14c   : > { %2737 = vmatmul.mubr.msk.bf16.gmra.mrb[108].mxu1 %vm517_vm2, %v1511_v20  ;;  %v610_v28 = vpop.f32.mrb[2].mxu0  ;;  %v1194_v20 = vsel %vm371_vm3, %v1189_v12, %v1193_v13 }
 0x14d   : > { %2740 = vmatprep.mubr.msk.bf16.mxu1 %vm3083_vm0, %v3082_v0  ;;  %v3570_v33 = vadd.f32 %v821_v19, %v610_v28  ;;  %v2489_v34 = vpop.f32.mrb[3].mxu0 }
 0x14e   : > { %v2897_v34 = vld [vmem:[%s3313_s11 + $0x88] sm:$0xff]  }
 0x14f   : > { %v826_v35 = vpop.f32.mrb[4].mxu1  ;;  %2667 = vmatmul.mubr.msk.bf16.gmra.mrb[108].mxu0 %vm517_vm2, %v1170_v29  ;;  %v1520_v41 = vrot.slane %v2897_v34, 1 }
 0x150   : > { %v2562_v36 = vpop.f32.mrb[5].mxu1  ;;  %2670 = vmatprep.mubr.msk.bf16.mxu0 %vm3083_vm0, %v3082_v0 }
 0x151   : > { %v829_v37 = vpop.f32.mrb[6].mxu1  ;;  %v1521_v50 = vsel %vm1488_vm4, %v1518_v21, %v1520_v41 }
 0x152   : > { %v2563_v42 = vpop.f32.mrb[7].mxu1  ;;  %v615_v43 = vpop.f32.mrb[4].mxu0 }
 0x153   : > { %v3577_v44 = vadd.f32 %v826_v35, %v615_v43  ;;  %v2492_v45 = vpop.f32.mrb[5].mxu0  ;;  %v1203_v42 = vshrl.u32 %v2896_v14, 16  ;;  %v1207_v43 = vshll.u32 %v2897_v34, 16 }
 0x154   : > { %2741 = vmatmul.mubr.msk.bf16.gmra.mrb[112].mxu1 %vm517_vm2, %v1513_v38  ;;  %v618_v46 = vpop.f32.mrb[6].mxu0 }
 0x155   : > { %2744 = vmatprep.mubr.msk.bf16.mxu1 %vm3083_vm0, %v3082_v0  ;;  %v3583_v51 = vadd.f32 %v829_v37, %v618_v46  ;;  %v2493_v52 = vpop.f32.mrb[7].mxu0 }
 0x156   : > { %v1205_v52 = vor.u32 %v1203_v42, %v1201_v32 }
 0x157   : > { %v834_v53 = vpop.f32.mrb[8].mxu1  ;;  %2671 = vmatmul.mubr.msk.bf16.gmra.mrb[112].mxu0 %vm517_vm2, %v1178_v47 }
 0x158   : > { %v2566_v54 = vpop.f32.mrb[9].mxu1  ;;  %2674 = vmatprep.mubr.msk.bf16.mxu0 %vm3083_vm0, %v3082_v0 }
 0x159   : > { %v837_v55 = vpop.f32.mrb[10].mxu1  ;;  %v2898_v54 = vld [vmem:[%s3313_s11 + $0x90] ss:$0 sps:$4 sm:$0x11]  }
 0x15a   : > { %v2567_v60 = vpop.f32.mrb[11].mxu1  ;;  %v623_v61 = vpop.f32.mrb[8].mxu0 }
 0x15b   : > { %v3590_v62 = vadd.f32 %v834_v53, %v623_v61  ;;  %v2496_v63 = vpop.f32.mrb[9].mxu0  ;;  %v1209_v53 = vrot.slane %v1207_v43, 1  ;;  %v1522_v61 = vrot.slane %v2898_v54, 1 }
 0x15c   : > { %2745 = vmatmul.mubr.msk.bf16.gmra.mrb[116].mxu1 %vm517_vm2, %v1515_v56  ;;  %v626_v1 = vpop.f32.mrb[10].mxu0  ;;  %v1211_v63 = vshrl.u32 %v2897_v34, 16 }
 0x15d   : > { %2748 = vmatprep.mubr.msk.bf16.mxu1 %vm3083_vm0, %v3082_v0  ;;  %v3596_v6 = vadd.f32 %v837_v55, %v626_v1  ;;  %v2497_v7 = vpop.f32.mrb[11].mxu0  ;;  %v1210_v60 = vsel %vm371_vm3, %v1205_v52, %v1209_v53  ;;  %v1215_v1 = vshll.u32 %v2898_v54, 16 }
 0x15f   : > { %v842_v8 = vpop.f32.mrb[12].mxu1  ;;  %2675 = vmatmul.mubr.msk.bf16.gmra.mrb[116].mxu0 %vm517_vm2, %v1186_v2 }
 0x160   : > { %v2570_v9 = vpop.f32.mrb[13].mxu1  ;;  %2678 = vmatprep.mubr.msk.bf16.mxu0 %vm3083_vm0, %v3082_v0 }
 0x161   : > { %v845_v10 = vpop.f32.mrb[14].mxu1  ;;  %v1213_v9 = vor.u32 %v1211_v63, %v1209_v53 }
 0x162   : > { %v2571_v15 = vpop.f32.mrb[15].mxu1  ;;  %v631_v16 = vpop.f32.mrb[12].mxu0 }
 0x163   : > { %v3603_v17 = vadd.f32 %v842_v8, %v631_v16  ;;  %v2500_v18 = vpop.f32.mrb[13].mxu0  ;;  %v1523_v8 = vsel %vm1488_vm4, %v1520_v41, %v1522_v61 }
 0x164   : > { %2749 = vmatmul.mubr.msk.bf16.gmra.mrb[120].mxu1 %vm517_vm2, %v1517_v11  ;;  %v634_v19 = vpop.f32.mrb[14].mxu0 }
 0x165   : > { %2752 = vmatprep.mubr.msk.bf16.mxu1 %vm3083_vm0, %v3082_v0  ;;  %v3609_v24 = vadd.f32 %v845_v10, %v634_v19  ;;  %v2501_v25 = vpop.f32.mrb[15].mxu0  ;;  %v1217_v10 = vrot.slane %v1215_v1, 1 }
 0x167   : > { %v850_v27 = vpop.f32.mrb[16].mxu1  ;;  %2679 = vmatmul.mubr.msk.bf16.gmra.mrb[120].mxu0 %vm517_vm2, %v1194_v20  ;;  %v1218_v16 = vsel %vm371_vm3, %v1213_v9, %v1217_v10 }
 0x168   : > { %v2574_v28 = vpop.f32.mrb[17].mxu1  ;;  %2682 = vmatprep.mubr.msk.bf16.mxu0 %vm3083_vm0, %v3082_v0 }
 0x169   : > { %v853_v29 = vpop.f32.mrb[18].mxu1 }
 0x16a   : > { %v2575_v35 = vpop.f32.mrb[19].mxu1  ;;  %v639_v36 = vpop.f32.mrb[16].mxu0 }
 0x16b   : > { %v3616_v37 = vadd.f32 %v850_v27, %v639_v36  ;;  %v2504_v38 = vpop.f32.mrb[17].mxu0 }
 0x16c   : > { %2753 = vmatmul.mubr.msk.bf16.gmra.mrb[124].mxu1 %vm517_vm2, %v1519_v30  ;;  %v642_v39 = vpop.f32.mrb[18].mxu0 }
 0x16d   : > { %2756 = vmatprep.mubr.msk.bf16.mxu1 %vm3083_vm0, %v3082_v0  ;;  %v3622_v45 = vadd.f32 %v853_v29, %v642_v39  ;;  %v2505_v46 = vpop.f32.mrb[19].mxu0 }
 0x16f   : > { %v858_v47 = vpop.f32.mrb[20].mxu1  ;;  %2683 = vmatmul.mubr.msk.bf16.gmra.mrb[124].mxu0 %vm517_vm2, %v1202_v40 }
 0x170   : > { %v2578_v48 = vpop.f32.mrb[21].mxu1  ;;  %2686 = vmatprep.mubr.msk.bf16.mxu0 %vm3083_vm0, %v3082_v0 }
 0x171   : > { %v861_v49 = vpop.f32.mrb[22].mxu1 }
 0x172   : > { %v2579_v55 = vpop.f32.mrb[23].mxu1  ;;  %v647_v56 = vpop.f32.mrb[20].mxu0 }
 0x173   : > { %v3629_v57 = vadd.f32 %v858_v47, %v647_v56  ;;  %v2508_v58 = vpop.f32.mrb[21].mxu0 }
 0x174   : > { %2757 = vmatmul.mubr.msk.bf16.gmra.mrb[128].mxu1 %vm517_vm2, %v1521_v50  ;;  %v650_v59 = vpop.f32.mrb[22].mxu0 }
 0x175   : > { %2760 = vmatprep.mubr.msk.bf16.mxu1 %vm3083_vm0, %v3082_v0  ;;  %v3635_v2 = vadd.f32 %v861_v49, %v650_v59  ;;  %v2509_v3 = vpop.f32.mrb[23].mxu0 }
 0x177   : > { %v866_v4 = vpop.f32.mrb[24].mxu1  ;;  %2687 = vmatmul.mubr.msk.bf16.gmra.mrb[128].mxu0 %vm517_vm2, %v1210_v60 }
 0x178   : > { %v2582_v5 = vpop.f32.mrb[25].mxu1  ;;  %2690 = vmatprep.mubr.msk.bf16.mxu0 %vm3083_vm0, %v3082_v0 }
 0x179   : > { %v869_v7 = vpop.f32.mrb[26].mxu1 }
 0x17a   : > { %v2583_v11 = vpop.f32.mrb[27].mxu1  ;;  %v655_v12 = vpop.f32.mrb[24].mxu0 }
 0x17b   : > { %v3641_v13 = vadd.f32 %v866_v4, %v655_v12  ;;  %v2512_v14 = vpop.f32.mrb[25].mxu0 }
 0x17c   : > { %2761 = vmatmul.mubr.msk.bf16.gmra.mrb[132].mxu1 %vm517_vm2, %v1523_v8  ;;  %v658_v15 = vpop.f32.mrb[26].mxu0 }
 0x17d   : > { %v3645_v18 = vadd.f32 %v869_v7, %v658_v15  ;;  %v2513_v19 = vpop.f32.mrb[27].mxu0 }
 0x17f   : > { %v874_v20 = vpop.f32.mrb[28].mxu1  ;;  %2691 = vmatmul.mubr.msk.bf16.gmra.mrb[132].mxu0 %vm517_vm2, %v1218_v16 }
 0x180   : > { %v2586_v0 = vpop.f32.mrb[29].mxu1 }
 0x181   : > { %v877_v21 = vpop.f32.mrb[30].mxu1 }
 0x182   : > { %v2587_v22 = vpop.f32.mrb[31].mxu1  ;;  %v663_v23 = vpop.f32.mrb[28].mxu0 }
 0x183   : > { %v3648_v25 = vadd.f32 %v874_v20, %v663_v23  ;;  %v2516_v27 = vpop.f32.mrb[29].mxu0 }
 0x184   : > { %v666_v28 = vpop.f32.mrb[30].mxu0 }
 0x185   : > { %v3650_v29 = vadd.f32 %v877_v21, %v666_v28  ;;  %v2517_v30 = vpop.f32.mrb[31].mxu0 }
 0x187   : > { %v882_v31 = vpop.f32.mrb[32].mxu1 }
 0x188   : > { %v2590_v32 = vpop.f32.mrb[33].mxu1 }
 0x189   : > { %v885_v34 = vpop.f32.mrb[34].mxu1 }
 0x18a   : > { %v2591_v35 = vpop.f32.mrb[35].mxu1  ;;  %v671_v36 = vpop.f32.mrb[32].mxu0 }
 0x18b   : > { %v3652_v38 = vadd.f32 %v882_v31, %v671_v36  ;;  %v2520_v39 = vpop.f32.mrb[33].mxu0 }
 0x18c   : > { %v674_v40 = vpop.f32.mrb[34].mxu0 }
 0x18d   : > { %v3654_v41 = vadd.f32 %v885_v34, %v674_v40  ;;  %v2521_v42 = vpop.f32.mrb[35].mxu0 }
 0x18f   : > { %v890_v43 = vpop.f32.mrb[36].mxu1 }
 0x190   : > { %v2594_v46 = vpop.f32.mrb[37].mxu1 }
 0x191   : > { %v893_v47 = vpop.f32.mrb[38].mxu1 }
 0x192   : > { %v2595_v48 = vpop.f32.mrb[39].mxu1  ;;  %v679_v49 = vpop.f32.mrb[36].mxu0 }
 0x193   : > { %v3656_v50 = vadd.f32 %v890_v43, %v679_v49  ;;  %v2524_v52 = vpop.f32.mrb[37].mxu0 }
 0x194   : > { %v682_v53 = vpop.f32.mrb[38].mxu0 }
 0x195   : > { %v3658_v54 = vadd.f32 %v893_v47, %v682_v53  ;;  %v2525_v55 = vpop.f32.mrb[39].mxu0 }
 0x197   : > { %v898_v56 = vpop.f32.mrb[40].mxu1 }
 0x198   : > { %v2598_v58 = vpop.f32.mrb[41].mxu1 }
 0x199   : > { %v901_v59 = vpop.f32.mrb[42].mxu1 }
 0x19a   : > { %v2599_v60 = vpop.f32.mrb[43].mxu1  ;;  %v687_v61 = vpop.f32.mrb[40].mxu0 }
 0x19b   : > { %v3660_v63 = vadd.f32 %v898_v56, %v687_v61  ;;  %v2528_v1 = vpop.f32.mrb[41].mxu0 }
 0x19c   : > { %v690_v3 = vpop.f32.mrb[42].mxu0 }
 0x19d   : > { %v3662_v4 = vadd.f32 %v901_v59, %v690_v3  ;;  %v2529_v5 = vpop.f32.mrb[43].mxu0 }
 0x19f   : > { %v906_v7 = vpop.f32.mrb[44].mxu1 }
 0x1a0   : > { %v2602_v8 = vpop.f32.mrb[45].mxu1 }
 0x1a1   : > { %v909_v9 = vpop.f32.mrb[46].mxu1 }
 0x1a2   : > { %v2603_v10 = vpop.f32.mrb[47].mxu1  ;;  %v695_v11 = vpop.f32.mrb[44].mxu0 }
 0x1a3   : > { %v3664_v12 = vadd.f32 %v906_v7, %v695_v11  ;;  %v2532_v14 = vpop.f32.mrb[45].mxu0 }
 0x1a4   : > { %v698_v15 = vpop.f32.mrb[46].mxu0 }
 0x1a5   : > { %v3666_v16 = vadd.f32 %v909_v9, %v698_v15  ;;  %v2533_v19 = vpop.f32.mrb[47].mxu0 }
 0x1a7   : > { %v914_v20 = vpop.f32.mrb[48].mxu1 }
 0x1a8   : > { %v2606_v0 = vpop.f32.mrb[49].mxu1 }
 0x1a9   : > { %v917_v21 = vpop.f32.mrb[50].mxu1 }
 0x1aa   : > { %v2607_v22 = vpop.f32.mrb[51].mxu1  ;;  %v703_v23 = vpop.f32.mrb[48].mxu0 }
 0x1ab   : > { %v3668_v27 = vadd.f32 %v914_v20, %v703_v23  ;;  %v2536_v28 = vpop.f32.mrb[49].mxu0 }
 0x1ac   : > { %v706_v30 = vpop.f32.mrb[50].mxu0 }
 0x1ad   : > { %v3670_v31 = vadd.f32 %v917_v21, %v706_v30  ;;  %v2537_v32 = vpop.f32.mrb[51].mxu0 }
 0x1af   : > { %v922_v34 = vpop.f32.mrb[52].mxu1 }
 0x1b0   : > { %v2610_v35 = vpop.f32.mrb[53].mxu1 }
 0x1b1   : > { %v925_v36 = vpop.f32.mrb[54].mxu1 }
 0x1b2   : > { %v2611_v39 = vpop.f32.mrb[55].mxu1  ;;  %v711_v40 = vpop.f32.mrb[52].mxu0 }
 0x1b3   : > { %v3672_v42 = vadd.f32 %v922_v34, %v711_v40  ;;  %v2540_v43 = vpop.f32.mrb[53].mxu0 }
 0x1b4   : > { %v714_v46 = vpop.f32.mrb[54].mxu0 }
 0x1b5   : > { %v3674_v47 = vadd.f32 %v925_v36, %v714_v46  ;;  %v2541_v48 = vpop.f32.mrb[55].mxu0 }
 0x1b7   : > { %v930_v49 = vpop.f32.mrb[56].mxu1 }
 0x1b8   : > { %v2614_v52 = vpop.f32.mrb[57].mxu1 }
 0x1b9   : > { %v933_v53 = vpop.f32.mrb[58].mxu1  ;;  %v3689_v52 = vld [vmem:[#allocation5] ss:$0 sm:$0xff] }
 0x1ba   : > { %v2615_v55 = vpop.f32.mrb[59].mxu1  ;;  %v719_v56 = vpop.f32.mrb[56].mxu0 }
 0x1bb   : > { %v3676_v58 = vadd.f32 %v930_v49, %v719_v56  ;;  %v2544_v59 = vpop.f32.mrb[57].mxu0 }
 0x1bc   : > { %v722_v60 = vpop.f32.mrb[58].mxu0 }
 0x1bd   : > { %v3678_v61 = vadd.f32 %v933_v53, %v722_v60  ;;  %v2545_v1 = vpop.f32.mrb[59].mxu0 }
 0x1bf   : > { %v938_v3 = vpop.f32.mrb[60].mxu1 }
 0x1c0   : > { %v2618_v5 = vpop.f32.mrb[61].mxu1 }
 0x1c1   : > { %v941_v7 = vpop.f32.mrb[62].mxu1 }
 0x1c2   : > { %v2619_v8 = vpop.f32.mrb[63].mxu1  ;;  %v727_v9 = vpop.f32.mrb[60].mxu0 }
 0x1c3   : > { %v3680_v10 = vadd.f32 %v938_v3, %v727_v9  ;;  %v2548_v11 = vpop.f32.mrb[61].mxu0 }
 0x1c4   : > { %v730_v14 = vpop.f32.mrb[62].mxu0 }
 0x1c5   : > { %v3682_v15 = vadd.f32 %v941_v7, %v730_v14  ;;  %v2549_v19 = vpop.f32.mrb[63].mxu0 }
 0x1c7   : > { %v946_v20 = vpop.f32.mrb[64].mxu1 }
 0x1c8   : > { %v2622_v0 = vpop.f32.mrb[65].mxu1 }
 0x1c9   : > { %v949_v21 = vpop.f32.mrb[66].mxu1 }
 0x1ca   : > { %v2623_v22 = vpop.f32.mrb[67].mxu1  ;;  %v735_v23 = vpop.f32.mrb[64].mxu0 }
 0x1cb   : > { %v3684_v28 = vadd.f32 %v946_v20, %v735_v23  ;;  %v2552_v30 = vpop.f32.mrb[65].mxu0 }
 0x1cc   : > { %v738_v32 = vpop.f32.mrb[66].mxu0 }
 0x1cd   : > { %v3686_v34 = vadd.f32 %v949_v21, %v738_v32  ;;  %v2553_v35 = vpop.f32.mrb[67].mxu0 }
 0x1cf   : > { %v1617_v36 = vpop.f32.mrb[68].mxu1 }
 0x1d0   : > { %v2698_v39 = vpop.f32.mrb[69].mxu1 }
 0x1d1   : > { %v1620_v40 = vpop.f32.mrb[70].mxu1 }
 0x1d2   : > { %v2699_v43 = vpop.f32.mrb[71].mxu1  ;;  %v1312_v46 = vpop.f32.mrb[68].mxu0 }
 0x1d3   : > { %v1447_v48 = vadd.f32 %v1312_v46, %v3564_v26  ;;  %v2628_v49 = vpop.f32.mrb[69].mxu0 }
 0x1d4   : > { %v1315_v53 = vpop.f32.mrb[70].mxu0 }
 0x1d5   : > { %v1752_v55 = vadd.f32 %v1617_v36, %v1447_v48  ;;  %v1448_v56 = vadd.f32 %v1315_v53, %v3570_v33  ;;  %v2629_v59 = vpop.f32.mrb[71].mxu0 }
 0x1d7   : > { %v1625_v60 = vpop.f32.mrb[72].mxu1  ;;  %v1793_v1 = vadd.f32 %v3689_v52, %v1752_v55  ;;  %v1753_v3 = vadd.f32 %v1620_v40, %v1448_v56 }
 0x1d8   : > { %v2702_v5 = vpop.f32.mrb[73].mxu1 }
 0x1d9   : > { %v1628_v7 = vpop.f32.mrb[74].mxu1  ;;  %vm1827_vm5 = vcmp.ge.f32.partialorder %v1793_v1, 0.0  ;;  %v1861_v8 = vmul.f32 0.2, %v1793_v1  ;;  %v1794_v9 = vadd.f32 %v3689_v52, %v1753_v3 }
 0x1da   : > { %v2703_v26 = vpop.f32.mrb[75].mxu1  ;;  %v1320_v11 = vpop.f32.mrb[72].mxu0 }
 0x1db   : > { %v1895_v14 = vsel %vm1827_vm5, %v1793_v1, %v1861_v8  ;;  %vm1828_vm7 = vcmp.ge.f32.partialorder %v1794_v9, 0.0  ;;  %v1862_v19 = vmul.f32 0.2, %v1794_v9  ;;  %v1449_v33 = vadd.f32 %v1320_v11, %v3577_v44  ;;  %v2632_v20 = vpop.f32.mrb[73].mxu0 }
 0x1dc   : > { %v2378_v0 = vpack.c.bf16 %v1895_v14, %v1895_v14  ;;  %v1323_v21 = vpop.f32.mrb[74].mxu0 }
 0x1dd   : > { %v1896_v22 = vsel %vm1828_vm7, %v1794_v9, %v1862_v19  ;;  %v1754_v23 = vadd.f32 %v1625_v60, %v1449_v33  ;;  %v1450_v30 = vadd.f32 %v1323_v21, %v3583_v51  ;;  %v2633_v32 = vpop.f32.mrb[75].mxu0 }
 0x1de   : > { %2066 = vst.msk [vmem:[%s3697_s21] sm:$0xf] %vm2065_vm6, %v2378_v0  ;;  %v2379_v35 = vpack.c.bf16 %v1896_v22, %v1896_v22 }
 0x1df   : > { %v1633_v36 = vpop.f32.mrb[76].mxu1  ;;  %v1795_v39 = vadd.f32 %v3689_v52, %v1754_v23  ;;  %v1755_v40 = vadd.f32 %v1628_v7, %v1450_v30 }
 0x1e0   : > { %v2706_v44 = vpop.f32.mrb[77].mxu1  ;;  %2067 = vst.msk [vmem:[%s3697_s21 + $0x4] sm:$0xf] %vm2065_vm6, %v2379_v35 }
 0x1e1   : > { %v1636_v43 = vpop.f32.mrb[78].mxu1  ;;  %vm1829_vm8 = vcmp.ge.f32.partialorder %v1795_v39, 0.0  ;;  %v1863_v46 = vmul.f32 0.2, %v1795_v39  ;;  %v1796_v51 = vadd.f32 %v3689_v52, %v1755_v40 }
 0x1e2   : > { %v2707_v48 = vpop.f32.mrb[79].mxu1  ;;  %v1328_v49 = vpop.f32.mrb[76].mxu0 }
 0x1e3   : > { %v1897_v53 = vsel %vm1829_vm8, %v1795_v39, %v1863_v46  ;;  %vm1830_vm9 = vcmp.ge.f32.partialorder %v1796_v51, 0.0  ;;  %v1864_v55 = vmul.f32 0.2, %v1796_v51  ;;  %v1451_v56 = vadd.f32 %v1328_v49, %v3590_v62  ;;  %v2636_v59 = vpop.f32.mrb[77].mxu0 }
 0x1e4   : > { %v2380_v60 = vpack.c.bf16 %v1897_v53, %v1897_v53  ;;  %v1331_v1 = vpop.f32.mrb[78].mxu0 }
 0x1e5   : > { %v1898_v3 = vsel %vm1830_vm9, %v1796_v51, %v1864_v55  ;;  %v1756_v5 = vadd.f32 %v1633_v36, %v1451_v56  ;;  %v1452_v7 = vadd.f32 %v1331_v1, %v3596_v6  ;;  %v2637_v8 = vpop.f32.mrb[79].mxu0 }
 0x1e6   : > { %2068 = vst.msk [vmem:[%s3697_s21 + $0x8] sm:$0xf] %vm2065_vm6, %v2380_v60  ;;  %v2381_v9 = vpack.c.bf16 %v1898_v3, %v1898_v3 }
 0x1e7   : > { %v1641_v26 = vpop.f32.mrb[80].mxu1  ;;  %v1797_v11 = vadd.f32 %v3689_v52, %v1756_v5  ;;  %v1757_v14 = vadd.f32 %v1636_v43, %v1452_v7 }
 0x1e8   : > { %v2710_v19 = vpop.f32.mrb[81].mxu1  ;;  %2069 = vst.msk [vmem:[%s3697_s21 + $0xc] sm:$0xf] %vm2065_vm6, %v2381_v9 }
 0x1e9   : > { %v1644_v33 = vpop.f32.mrb[82].mxu1  ;;  %vm1831_vm10 = vcmp.ge.f32.partialorder %v1797_v11, 0.0  ;;  %v1865_v62 = vmul.f32 0.2, %v1797_v11  ;;  %v1798_v20 = vadd.f32 %v3689_v52, %v1757_v14 }
 0x1ea   : > { %v2711_v0 = vpop.f32.mrb[83].mxu1  ;;  %v1336_v21 = vpop.f32.mrb[80].mxu0 }
 0x1eb   : > { %v1899_v6 = vsel %vm1831_vm10, %v1797_v11, %v1865_v62  ;;  %vm1832_vm11 = vcmp.ge.f32.partialorder %v1798_v20, 0.0  ;;  %v1866_v22 = vmul.f32 0.2, %v1798_v20  ;;  %v1453_v23 = vadd.f32 %v1336_v21, %v3603_v17  ;;  %v2640_v30 = vpop.f32.mrb[81].mxu0 }
 0x1ec   : > { %v2382_v32 = vpack.c.bf16 %v1899_v6, %v1899_v6  ;;  %v1339_v35 = vpop.f32.mrb[82].mxu0 }
 0x1ed   : > { %v1900_v36 = vsel %vm1832_vm11, %v1798_v20, %v1866_v22  ;;  %v1758_v39 = vadd.f32 %v1641_v26, %v1453_v23  ;;  %v1454_v40 = vadd.f32 %v1339_v35, %v3609_v24  ;;  %v2641_v44 = vpop.f32.mrb[83].mxu0 }
 0x1ee   : > { %2070 = vst.msk [vmem:[%s3697_s21 + $0x10] sm:$0xf] %vm2065_vm6, %v2382_v32  ;;  %v2383_v43 = vpack.c.bf16 %v1900_v36, %v1900_v36 }
 0x1ef   : > { %v1649_v46 = vpop.f32.mrb[84].mxu1  ;;  %v1799_v51 = vadd.f32 %v3689_v52, %v1758_v39  ;;  %v1759_v48 = vadd.f32 %v1644_v33, %v1454_v40 }
 0x1f0   : > { %v2714_v49 = vpop.f32.mrb[85].mxu1  ;;  %2071 = vst.msk [vmem:[%s3697_s21 + $0x14] sm:$0xf] %vm2065_vm6, %v2383_v43 }
 0x1f1   : > { %v1652_v53 = vpop.f32.mrb[86].mxu1  ;;  %vm1833_vm12 = vcmp.ge.f32.partialorder %v1799_v51, 0.0  ;;  %v1867_v17 = vmul.f32 0.2, %v1799_v51  ;;  %v1800_v55 = vadd.f32 %v3689_v52, %v1759_v48 }
 0x1f2   : > { %v2715_v56 = vpop.f32.mrb[87].mxu1  ;;  %v1344_v59 = vpop.f32.mrb[84].mxu0 }
 0x1f3   : > { %v1901_v24 = vsel %vm1833_vm12, %v1799_v51, %v1867_v17  ;;  %vm1834_vm13 = vcmp.ge.f32.partialorder %v1800_v55, 0.0  ;;  %v1868_v60 = vmul.f32 0.2, %v1800_v55  ;;  %v1455_v1 = vadd.f32 %v1344_v59, %v3616_v37  ;;  %v2644_v3 = vpop.f32.mrb[85].mxu0 }
 0x1f4   : > { %v2384_v5 = vpack.c.bf16 %v1901_v24, %v1901_v24  ;;  %v1347_v7 = vpop.f32.mrb[86].mxu0 }
 0x1f5   : > { %v1902_v8 = vsel %vm1834_vm13, %v1800_v55, %v1868_v60  ;;  %v1760_v9 = vadd.f32 %v1649_v46, %v1455_v1  ;;  %v1456_v26 = vadd.f32 %v1347_v7, %v3622_v45  ;;  %v2645_v11 = vpop.f32.mrb[87].mxu0 }
 0x1f6   : > { %2072 = vst.msk [vmem:[%s3697_s21 + $0x18] sm:$0xf] %vm2065_vm6, %v2384_v5  ;;  %v2385_v14 = vpack.c.bf16 %v1902_v8, %v1902_v8 }
 0x1f7   : > { %v1657_v19 = vpop.f32.mrb[88].mxu1  ;;  %v1801_v33 = vadd.f32 %v3689_v52, %v1760_v9  ;;  %v1761_v62 = vadd.f32 %v1652_v53, %v1456_v26 }
 0x1f8   : > { %v2718_v20 = vpop.f32.mrb[89].mxu1  ;;  %2073 = vst.msk [vmem:[%s3697_s21 + $0x1c] sm:$0xf] %vm2065_vm6, %v2385_v14 }
 0x1f9   : > { %v1660_v0 = vpop.f32.mrb[90].mxu1  ;;  %vm1835_vm14 = vcmp.ge.f32.partialorder %v1801_v33, 0.0  ;;  %v1869_v37 = vmul.f32 0.2, %v1801_v33  ;;  %v1802_v21 = vadd.f32 %v3689_v52, %v1761_v62 }
 0x1fa   : > { %v2719_v6 = vpop.f32.mrb[91].mxu1  ;;  %v1352_v22 = vpop.f32.mrb[88].mxu0 }
 0x1fb   : > { %v1903_v45 = vsel %vm1835_vm14, %v1801_v33, %v1869_v37  ;;  %vm1836_vm15 = vcmp.ge.f32.partialorder %v1802_v21, 0.0  ;;  %v1870_v23 = vmul.f32 0.2, %v1802_v21  ;;  %v1457_v30 = vadd.f32 %v1352_v22, %v3629_v57  ;;  %v2648_v32 = vpop.f32.mrb[89].mxu0 }
 0x1fc   : > { %v2386_v35 = vpack.c.bf16 %v1903_v45, %v1903_v45  ;;  %v1355_v36 = vpop.f32.mrb[90].mxu0 }
 0x1fd   : > { %v1904_v39 = vsel %vm1836_vm15, %v1802_v21, %v1870_v23  ;;  %v1762_v40 = vadd.f32 %v1657_v19, %v1457_v30  ;;  %v1458_v44 = vadd.f32 %v1355_v36, %v3635_v2  ;;  %v2649_v43 = vpop.f32.mrb[91].mxu0 }
 0x1fe   : > { %2074 = vst.msk [vmem:[%s3697_s21 + $0x20] sm:$0xf] %vm2065_vm6, %v2386_v35  ;;  %v2387_v46 = vpack.c.bf16 %v1904_v39, %v1904_v39 }
 0x1ff   : > { %v1665_v51 = vpop.f32.mrb[92].mxu1  ;;  %v1803_v48 = vadd.f32 %v3689_v52, %v1762_v40  ;;  %v1763_v49 = vadd.f32 %v1660_v0, %v1458_v44 }
 0x200   : > { %v2722_v53 = vpop.f32.mrb[93].mxu1  ;;  %2075 = vst.msk [vmem:[%s3697_s21 + $0x24] sm:$0xf] %vm2065_vm6, %v2387_v46 }
 0x201   : > { %v1668_v17 = vpop.f32.mrb[94].mxu1  ;;  %vm1837_vm0 = vcmp.ge.f32.partialorder %v1803_v48, 0.0  ;;  %v1871_v57 = vmul.f32 0.2, %v1803_v48  ;;  %v1804_v55 = vadd.f32 %v3689_v52, %v1763_v49 }
 0x202   : > { %v2723_v56 = vpop.f32.mrb[95].mxu1  ;;  %v1360_v59 = vpop.f32.mrb[92].mxu0 }
 0x203   : > { %v1905_v2 = vsel %vm1837_vm0, %v1803_v48, %v1871_v57  ;;  %vm1838_vm1 = vcmp.ge.f32.partialorder %v1804_v55, 0.0  ;;  %v1872_v24 = vmul.f32 0.2, %v1804_v55  ;;  %v1459_v60 = vadd.f32 %v1360_v59, %v3641_v13  ;;  %v2652_v1 = vpop.f32.mrb[93].mxu0 }
 0x204   : > { %v2388_v3 = vpack.c.bf16 %v1905_v2, %v1905_v2  ;;  %v1363_v5 = vpop.f32.mrb[94].mxu0 }
 0x205   : > { %v1906_v7 = vsel %vm1838_vm1, %v1804_v55, %v1872_v24  ;;  %v1764_v8 = vadd.f32 %v1665_v51, %v1459_v60  ;;  %v1460_v9 = vadd.f32 %v1363_v5, %v3645_v18  ;;  %v2653_v26 = vpop.f32.mrb[95].mxu0 }
 0x206   : > { %2076 = vst.msk [vmem:[%s3697_s21 + $0x28] sm:$0xf] %vm2065_vm6, %v2388_v3  ;;  %v2389_v11 = vpack.c.bf16 %v1906_v7, %v1906_v7 }
 0x207   : > { %v1673_v14 = vpop.f32.mrb[96].mxu1  ;;  %v1805_v19 = vadd.f32 %v3689_v52, %v1764_v8  ;;  %v1765_v33 = vadd.f32 %v1668_v17, %v1460_v9 }
 0x208   : > { %v2726_v62 = vpop.f32.mrb[97].mxu1  ;;  %2077 = vst.msk [vmem:[%s3697_s21 + $0x2c] sm:$0xf] %vm2065_vm6, %v2389_v11 }
 0x209   : > { %v1676_v20 = vpop.f32.mrb[98].mxu1  ;;  %vm1839_vm2 = vcmp.ge.f32.partialorder %v1805_v19, 0.0  ;;  %v1873_v13 = vmul.f32 0.2, %v1805_v19  ;;  %v1806_v0 = vadd.f32 %v3689_v52, %v1765_v33 }
 0x20a   : > { %v2727_v37 = vpop.f32.mrb[99].mxu1  ;;  %v1368_v21 = vpop.f32.mrb[96].mxu0 }
 0x20b   : > { %v1907_v18 = vsel %vm1839_vm2, %v1805_v19, %v1873_v13  ;;  %vm1840_vm3 = vcmp.ge.f32.partialorder %v1806_v0, 0.0  ;;  %v1874_v6 = vmul.f32 0.2, %v1806_v0  ;;  %v1461_v22 = vadd.f32 %v1368_v21, %v3648_v25  ;;  %v2656_v45 = vpop.f32.mrb[97].mxu0 }
 0x20c   : > { %v2390_v23 = vpack.c.bf16 %v1907_v18, %v1907_v18  ;;  %v1371_v30 = vpop.f32.mrb[98].mxu0 }
 0x20d   : > { %v1908_v32 = vsel %vm1840_vm3, %v1806_v0, %v1874_v6  ;;  %v1766_v35 = vadd.f32 %v1673_v14, %v1461_v22  ;;  %v1462_v36 = vadd.f32 %v1371_v30, %v3650_v29  ;;  %v2657_v39 = vpop.f32.mrb[99].mxu0 }
 0x20e   : > { %2078 = vst.msk [vmem:[%s3697_s21 + $0x30] sm:$0xf] %vm2065_vm6, %v2390_v23  ;;  %v2391_v40 = vpack.c.bf16 %v1908_v32, %v1908_v32 }
 0x20f   : > { %v1681_v44 = vpop.f32.mrb[100].mxu1  ;;  %v1807_v43 = vadd.f32 %v3689_v52, %v1766_v35  ;;  %v1767_v46 = vadd.f32 %v1676_v20, %v1462_v36 }
 0x210   : > { %v2730_v51 = vpop.f32.mrb[101].mxu1  ;;  %2079 = vst.msk [vmem:[%s3697_s21 + $0x34] sm:$0xf] %vm2065_vm6, %v2391_v40 }
 0x211   : > { %v1684_v48 = vpop.f32.mrb[102].mxu1  ;;  %vm1841_vm4 = vcmp.ge.f32.partialorder %v1807_v43, 0.0  ;;  %v1875_v25 = vmul.f32 0.2, %v1807_v43  ;;  %v1808_v49 = vadd.f32 %v3689_v52, %v1767_v46 }
 0x212   : > { %v2731_v53 = vpop.f32.mrb[103].mxu1  ;;  %v1376_v17 = vpop.f32.mrb[100].mxu0 }
 0x213   : > { %v1909_v29 = vsel %vm1841_vm4, %v1807_v43, %v1875_v25  ;;  %vm1842_vm5 = vcmp.ge.f32.partialorder %v1808_v49, 0.0  ;;  %v1876_v57 = vmul.f32 0.2, %v1808_v49  ;;  %v1463_v55 = vadd.f32 %v1376_v17, %v3652_v38  ;;  %v2660_v56 = vpop.f32.mrb[101].mxu0 }
 0x214   : > { %v2392_v59 = vpack.c.bf16 %v1909_v29, %v1909_v29  ;;  %v1379_v2 = vpop.f32.mrb[102].mxu0 }
 0x215   : > { %v1910_v24 = vsel %vm1842_vm5, %v1808_v49, %v1876_v57  ;;  %v1768_v60 = vadd.f32 %v1681_v44, %v1463_v55  ;;  %v1464_v1 = vadd.f32 %v1379_v2, %v3654_v41  ;;  %v2661_v3 = vpop.f32.mrb[103].mxu0 }
 0x216   : > { %2080 = vst.msk [vmem:[%s3697_s21 + $0x38] sm:$0xf] %vm2065_vm6, %v2392_v59  ;;  %v2393_v5 = vpack.c.bf16 %v1910_v24, %v1910_v24 }
 0x217   : > { %v1689_v7 = vpop.f32.mrb[104].mxu1  ;;  %v1809_v8 = vadd.f32 %v3689_v52, %v1768_v60  ;;  %v1769_v9 = vadd.f32 %v1684_v48, %v1464_v1 }
 0x218   : > { %v2734_v26 = vpop.f32.mrb[105].mxu1  ;;  %2081 = vst.msk [vmem:[%s3697_s21 + $0x3c] sm:$0xf] %vm2065_vm6, %v2393_v5 }
 0x219   : > { %v1692_v11 = vpop.f32.mrb[106].mxu1  ;;  %vm1843_vm7 = vcmp.ge.f32.partialorder %v1809_v8, 0.0  ;;  %v1877_v38 = vmul.f32 0.2, %v1809_v8  ;;  %v1810_v14 = vadd.f32 %v3689_v52, %v1769_v9 }
 0x21a   : > { %v2735_v19 = vpop.f32.mrb[107].mxu1  ;;  %v1384_v33 = vpop.f32.mrb[104].mxu0 }
 0x21b   : > { %v1911_v41 = vsel %vm1843_vm7, %v1809_v8, %v1877_v38  ;;  %vm1844_vm8 = vcmp.ge.f32.partialorder %v1810_v14, 0.0  ;;  %v1878_v62 = vmul.f32 0.2, %v1810_v14  ;;  %v1465_v20 = vadd.f32 %v1384_v33, %v3656_v50  ;;  %v2664_v13 = vpop.f32.mrb[105].mxu0 }
 0x21c   : > { %v2394_v0 = vpack.c.bf16 %v1911_v41, %v1911_v41  ;;  %v1387_v37 = vpop.f32.mrb[106].mxu0 }
 0x21d   : > { %v1912_v21 = vsel %vm1844_vm8, %v1810_v14, %v1878_v62  ;;  %v1770_v18 = vadd.f32 %v1689_v7, %v1465_v20  ;;  %v1466_v6 = vadd.f32 %v1387_v37, %v3658_v54  ;;  %v2665_v22 = vpop.f32.mrb[107].mxu0 }
 0x21e   : > { %2082 = vst.msk [vmem:[%s3697_s21 + $0x40] sm:$0xf] %vm2065_vm6, %v2394_v0  ;;  %v2395_v45 = vpack.c.bf16 %v1912_v21, %v1912_v21 }
 0x21f   : > { %v1697_v23 = vpop.f32.mrb[108].mxu1  ;;  %v1811_v30 = vadd.f32 %v3689_v52, %v1770_v18  ;;  %v1771_v32 = vadd.f32 %v1692_v11, %v1466_v6 }
 0x220   : > { %v2738_v35 = vpop.f32.mrb[109].mxu1  ;;  %2083 = vst.msk [vmem:[%s3697_s21 + $0x44] sm:$0xf] %vm2065_vm6, %v2395_v45 }
 0x221   : > { %v1700_v36 = vpop.f32.mrb[110].mxu1  ;;  %vm1845_vm9 = vcmp.ge.f32.partialorder %v1811_v30, 0.0  ;;  %v1879_v50 = vmul.f32 0.2, %v1811_v30  ;;  %v1812_v39 = vadd.f32 %v3689_v52, %v1771_v32 }
 0x222   : > { %v2739_v40 = vpop.f32.mrb[111].mxu1  ;;  %v1392_v44 = vpop.f32.mrb[108].mxu0 }
 0x223   : > { %v1913_v54 = vsel %vm1845_vm9, %v1811_v30, %v1879_v50  ;;  %vm1846_vm10 = vcmp.ge.f32.partialorder %v1812_v39, 0.0  ;;  %v1880_v43 = vmul.f32 0.2, %v1812_v39  ;;  %v1467_v46 = vadd.f32 %v1392_v44, %v3660_v63  ;;  %v2668_v51 = vpop.f32.mrb[109].mxu0 }
 0x224   : > { %v2396_v48 = vpack.c.bf16 %v1913_v54, %v1913_v54  ;;  %v1395_v25 = vpop.f32.mrb[110].mxu0 }
 0x225   : > { %v1914_v49 = vsel %vm1846_vm10, %v1812_v39, %v1880_v43  ;;  %v1772_v53 = vadd.f32 %v1697_v23, %v1467_v46  ;;  %v1468_v17 = vadd.f32 %v1395_v25, %v3662_v4  ;;  %v2669_v29 = vpop.f32.mrb[111].mxu0 }
 0x226   : > { %2084 = vst.msk [vmem:[%s3697_s21 + $0x48] sm:$0xf] %vm2065_vm6, %v2396_v48  ;;  %v2397_v57 = vpack.c.bf16 %v1914_v49, %v1914_v49 }
 0x227   : > { %v1705_v55 = vpop.f32.mrb[112].mxu1  ;;  %v1813_v56 = vadd.f32 %v3689_v52, %v1772_v53  ;;  %v1773_v59 = vadd.f32 %v1700_v36, %v1468_v17 }
 0x228   : > { %v2742_v2 = vpop.f32.mrb[113].mxu1  ;;  %2085 = vst.msk [vmem:[%s3697_s21 + $0x4c] sm:$0xf] %vm2065_vm6, %v2397_v57 }
 0x229   : > { %v1708_v24 = vpop.f32.mrb[114].mxu1  ;;  %vm1847_vm11 = vcmp.ge.f32.partialorder %v1813_v56, 0.0  ;;  %v1881_v63 = vmul.f32 0.2, %v1813_v56  ;;  %v1814_v60 = vadd.f32 %v3689_v52, %v1773_v59 }
 0x22a   : > { %v2743_v1 = vpop.f32.mrb[115].mxu1  ;;  %v1400_v3 = vpop.f32.mrb[112].mxu0 }
 0x22b   : > { %v1915_v4 = vsel %vm1847_vm11, %v1813_v56, %v1881_v63  ;;  %vm1848_vm12 = vcmp.ge.f32.partialorder %v1814_v60, 0.0  ;;  %v1882_v5 = vmul.f32 0.2, %v1814_v60  ;;  %v1469_v7 = vadd.f32 %v1400_v3, %v3664_v12  ;;  %v2672_v8 = vpop.f32.mrb[113].mxu0 }
 0x22c   : > { %v2398_v9 = vpack.c.bf16 %v1915_v4, %v1915_v4  ;;  %v1403_v26 = vpop.f32.mrb[114].mxu0 }
 0x22d   : > { %v1916_v11 = vsel %vm1848_vm12, %v1814_v60, %v1882_v5  ;;  %v1774_v38 = vadd.f32 %v1705_v55, %v1469_v7  ;;  %v1470_v14 = vadd.f32 %v1403_v26, %v3666_v16  ;;  %v2673_v19 = vpop.f32.mrb[115].mxu0 }
 0x22e   : > { %2086 = vst.msk [vmem:[%s3697_s21 + $0x50] sm:$0xf] %vm2065_vm6, %v2398_v9  ;;  %v2399_v33 = vpack.c.bf16 %v1916_v11, %v1916_v11 }
 0x22f   : > { %v1713_v41 = vpop.f32.mrb[116].mxu1  ;;  %v1815_v62 = vadd.f32 %v3689_v52, %v1774_v38  ;;  %v1775_v20 = vadd.f32 %v1708_v24, %v1470_v14 }
 0x230   : > { %v2746_v13 = vpop.f32.mrb[117].mxu1  ;;  %2087 = vst.msk [vmem:[%s3697_s21 + $0x54] sm:$0xf] %vm2065_vm6, %v2399_v33 }
 0x231   : > { %v1716_v0 = vpop.f32.mrb[118].mxu1  ;;  %vm1849_vm13 = vcmp.ge.f32.partialorder %v1815_v62, 0.0  ;;  %v1883_v12 = vmul.f32 0.2, %v1815_v62  ;;  %v1816_v37 = vadd.f32 %v3689_v52, %v1775_v20 }
 0x232   : > { %v2747_v21 = vpop.f32.mrb[119].mxu1  ;;  %v1408_v18 = vpop.f32.mrb[116].mxu0 }
 0x233   : > { %v1917_v16 = vsel %vm1849_vm13, %v1815_v62, %v1883_v12  ;;  %vm1850_vm14 = vcmp.ge.f32.partialorder %v1816_v37, 0.0  ;;  %v1884_v6 = vmul.f32 0.2, %v1816_v37  ;;  %v1471_v22 = vadd.f32 %v1408_v18, %v3668_v27  ;;  %v2676_v45 = vpop.f32.mrb[117].mxu0 }
 0x234   : > { %v2400_v23 = vpack.c.bf16 %v1917_v16, %v1917_v16  ;;  %v1411_v30 = vpop.f32.mrb[118].mxu0 }
 0x235   : > { %v1918_v32 = vsel %vm1850_vm14, %v1816_v37, %v1884_v6  ;;  %v1776_v35 = vadd.f32 %v1713_v41, %v1471_v22  ;;  %v1472_v36 = vadd.f32 %v1411_v30, %v3670_v31  ;;  %v2677_v50 = vpop.f32.mrb[119].mxu0 }
 0x236   : > { %2088 = vst.msk [vmem:[%s3697_s21 + $0x58] sm:$0xf] %vm2065_vm6, %v2400_v23  ;;  %v2401_v39 = vpack.c.bf16 %v1918_v32, %v1918_v32 }
 0x237   : > { %v1721_v40 = vpop.f32.mrb[120].mxu1  ;;  %v1817_v44 = vadd.f32 %v3689_v52, %v1776_v35  ;;  %v1777_v54 = vadd.f32 %v1716_v0, %v1472_v36 }
 0x238   : > { %v2750_v43 = vpop.f32.mrb[121].mxu1  ;;  %2089 = vst.msk [vmem:[%s3697_s21 + $0x5c] sm:$0xf] %vm2065_vm6, %v2401_v39 }
 0x239   : > { %v1724_v46 = vpop.f32.mrb[122].mxu1  ;;  %vm1851_vm15 = vcmp.ge.f32.partialorder %v1817_v44, 0.0  ;;  %v1885_v27 = vmul.f32 0.2, %v1817_v44  ;;  %v1818_v51 = vadd.f32 %v3689_v52, %v1777_v54 }
 0x23a   : > { %v2751_v48 = vpop.f32.mrb[123].mxu1  ;;  %v1416_v25 = vpop.f32.mrb[120].mxu0 }
 0x23b   : > { %v1919_v31 = vsel %vm1851_vm15, %v1817_v44, %v1885_v27  ;;  %vm1852_vm0 = vcmp.ge.f32.partialorder %v1818_v51, 0.0  ;;  %v1886_v49 = vmul.f32 0.2, %v1818_v51  ;;  %v1473_v53 = vadd.f32 %v1416_v25, %v3672_v42  ;;  %v2680_v17 = vpop.f32.mrb[121].mxu0 }
 0x23c   : > { %v2402_v29 = vpack.c.bf16 %v1919_v31, %v1919_v31  ;;  %v1419_v57 = vpop.f32.mrb[122].mxu0 }
 0x23d   : > { %v1920_v55 = vsel %vm1852_vm0, %v1818_v51, %v1886_v49  ;;  %v1778_v56 = vadd.f32 %v1721_v40, %v1473_v53  ;;  %v1474_v59 = vadd.f32 %v1419_v57, %v3674_v47  ;;  %v2681_v2 = vpop.f32.mrb[123].mxu0 }
 0x23e   : > { %2090 = vst.msk [vmem:[%s3697_s21 + $0x60] sm:$0xf] %vm2065_vm6, %v2402_v29  ;;  %v2403_v24 = vpack.c.bf16 %v1920_v55, %v1920_v55 }
 0x23f   : > { %v1729_v63 = vpop.f32.mrb[124].mxu1  ;;  %v1819_v60 = vadd.f32 %v3689_v52, %v1778_v56  ;;  %v1779_v1 = vadd.f32 %v1724_v46, %v1474_v59 }
 0x240   : > { %v2754_v3 = vpop.f32.mrb[125].mxu1  ;;  %2091 = vst.msk [vmem:[%s3697_s21 + $0x64] sm:$0xf] %vm2065_vm6, %v2403_v24 }
 0x241   : > { %v1732_v4 = vpop.f32.mrb[126].mxu1  ;;  %vm1853_vm1 = vcmp.ge.f32.partialorder %v1819_v60, 0.0  ;;  %v1887_v42 = vmul.f32 0.2, %v1819_v60  ;;  %v1820_v5 = vadd.f32 %v3689_v52, %v1779_v1 }
 0x242   : > { %v2755_v7 = vpop.f32.mrb[127].mxu1  ;;  %v1424_v8 = vpop.f32.mrb[124].mxu0 }
 0x243   : > { %v1921_v47 = vsel %vm1853_vm1, %v1819_v60, %v1887_v42  ;;  %vm1854_vm2 = vcmp.ge.f32.partialorder %v1820_v5, 0.0  ;;  %v1888_v9 = vmul.f32 0.2, %v1820_v5  ;;  %v1475_v26 = vadd.f32 %v1424_v8, %v3676_v58  ;;  %v2684_v11 = vpop.f32.mrb[125].mxu0 }
 0x244   : > { %v2404_v38 = vpack.c.bf16 %v1921_v47, %v1921_v47  ;;  %v1427_v14 = vpop.f32.mrb[126].mxu0 }
 0x245   : > { %v1922_v19 = vsel %vm1854_vm2, %v1820_v5, %v1888_v9  ;;  %v1780_v33 = vadd.f32 %v1729_v63, %v1475_v26  ;;  %v1476_v41 = vadd.f32 %v1427_v14, %v3678_v61  ;;  %v2685_v62 = vpop.f32.mrb[127].mxu0 }
 0x246   : > { %2092 = vst.msk [vmem:[%s3697_s21 + $0x68] sm:$0xf] %vm2065_vm6, %v2404_v38  ;;  %v2405_v20 = vpack.c.bf16 %v1922_v19, %v1922_v19 }
 0x247   : > { %v1737_v13 = vpop.f32.mrb[128].mxu1  ;;  %v1821_v0 = vadd.f32 %v3689_v52, %v1780_v33  ;;  %v1781_v12 = vadd.f32 %v1732_v4, %v1476_v41 }
 0x248   : > { %v2758_v37 = vpop.f32.mrb[129].mxu1  ;;  %2093 = vst.msk [vmem:[%s3697_s21 + $0x6c] sm:$0xf] %vm2065_vm6, %v2405_v20 }
 0x249   : > { %v1740_v21 = vpop.f32.mrb[130].mxu1  ;;  %vm1855_vm3 = vcmp.ge.f32.partialorder %v1821_v0, 0.0  ;;  %v1889_v58 = vmul.f32 0.2, %v1821_v0  ;;  %v1822_v18 = vadd.f32 %v3689_v52, %v1781_v12 }
 0x24a   : > { %v2759_v16 = vpop.f32.mrb[131].mxu1  ;;  %v1432_v6 = vpop.f32.mrb[128].mxu0 }
 0x24b   : > { %v1923_v61 = vsel %vm1855_vm3, %v1821_v0, %v1889_v58  ;;  %vm1856_vm4 = vcmp.ge.f32.partialorder %v1822_v18, 0.0  ;;  %v1890_v22 = vmul.f32 0.2, %v1822_v18  ;;  %v1477_v45 = vadd.f32 %v1432_v6, %v3680_v10  ;;  %v2688_v23 = vpop.f32.mrb[129].mxu0 }
 0x24c   : > { %v2406_v30 = vpack.c.bf16 %v1923_v61, %v1923_v61  ;;  %v1435_v32 = vpop.f32.mrb[130].mxu0 }
 0x24d   : > { %v1924_v35 = vsel %vm1856_vm4, %v1822_v18, %v1890_v22  ;;  %v1782_v36 = vadd.f32 %v1737_v13, %v1477_v45  ;;  %v1478_v50 = vadd.f32 %v1435_v32, %v3682_v15  ;;  %v2689_v39 = vpop.f32.mrb[131].mxu0 }
 0x24e   : > { %2094 = vst.msk [vmem:[%s3697_s21 + $0x70] sm:$0xf] %vm2065_vm6, %v2406_v30  ;;  %v2407_v40 = vpack.c.bf16 %v1924_v35, %v1924_v35 }
 0x24f   : > { %v1745_v44 = vpop.f32.mrb[132].mxu1  ;;  %v1823_v54 = vadd.f32 %v3689_v52, %v1782_v36  ;;  %v1783_v43 = vadd.f32 %v1740_v21, %v1478_v50 }
 0x250   : > { %v2762_v46 = vpop.f32.mrb[133].mxu1  ;;  %2095 = vst.msk [vmem:[%s3697_s21 + $0x74] sm:$0xf] %vm2065_vm6, %v2407_v40 }
 0x251   : > { %v1748_v27 = vpop.f32.mrb[134].mxu1  ;;  %vm1857_vm5 = vcmp.ge.f32.partialorder %v1823_v54, 0.0  ;;  %v1891_v10 = vmul.f32 0.2, %v1823_v54  ;;  %v1824_v51 = vadd.f32 %v3689_v52, %v1783_v43 }
 0x252   : > { %v2763_v48 = vpop.f32.mrb[135].mxu1  ;;  %v1440_v25 = vpop.f32.mrb[132].mxu0 }
 0x253   : > { %v1925_v15 = vsel %vm1857_vm5, %v1823_v54, %v1891_v10  ;;  %vm1858_vm7 = vcmp.ge.f32.partialorder %v1824_v51, 0.0  ;;  %v1892_v31 = vmul.f32 0.2, %v1824_v51  ;;  %v1479_v49 = vadd.f32 %v1440_v25, %v3684_v28  ;;  %v2692_v53 = vpop.f32.mrb[133].mxu0 }
 0x254   : > { %v2408_v17 = vpack.c.bf16 %v1925_v15, %v1925_v15  ;;  %v1443_v29 = vpop.f32.mrb[134].mxu0 }
 0x255   : > { %v1926_v57 = vsel %vm1858_vm7, %v1824_v51, %v1892_v31  ;;  %v1784_v55 = vadd.f32 %v1745_v44, %v1479_v49  ;;  %v1480_v56 = vadd.f32 %v1443_v29, %v3686_v34  ;;  %v2693_v59 = vpop.f32.mrb[135].mxu0 }
 0x256   : > { %2096 = vst.msk [vmem:[%s3697_s21 + $0x78] sm:$0xf] %vm2065_vm6, %v2408_v17  ;;  %v2409_v2 = vpack.c.bf16 %v1926_v57, %v1926_v57 }
 0x257   : > { %v1825_v24 = vadd.f32 %v3689_v52, %v1784_v55  ;;  %v1785_v63 = vadd.f32 %v1748_v27, %v1480_v56 }
 0x258   : > { %2097 = vst.msk [vmem:[%s3697_s21 + $0x7c] sm:$0xf] %vm2065_vm6, %v2409_v2 }
 0x259   : > { %vm1859_vm8 = vcmp.ge.f32.partialorder %v1825_v24, 0.0  ;;  %v1893_v28 = vmul.f32 0.2, %v1825_v24  ;;  %v1826_v60 = vadd.f32 %v3689_v52, %v1785_v63 }
 0x25b   : > { %v1927_v34 = vsel %vm1859_vm8, %v1825_v24, %v1893_v28  ;;  %vm1860_vm9 = vcmp.ge.f32.partialorder %v1826_v60, 0.0  ;;  %v1894_v1 = vmul.f32 0.2, %v1826_v60 }
 0x25c   : > { %v2410_v3 = vpack.c.bf16 %v1927_v34, %v1927_v34 }
 0x25d   : > { %v1928_v4 = vsel %vm1860_vm9, %v1826_v60, %v1894_v1 }
 0x25e   : > { %2098 = vst.msk [vmem:[%s3697_s21 + $0x80] sm:$0xf] %vm2065_vm6, %v2410_v3  ;;  %v2411_v52 = vpack.c.bf16 %v1928_v4, %v1928_v4 }
 0x260   : > { %2099 = vst.msk [vmem:[%s3697_s21 + $0x84] sm:$0xf] %vm2065_vm6, %v2411_v52 }
 0x261   : > { %2998 = shalt.err (!%p2995_p1)
}
 0x262   : > { %s2999_s6 = scalar_lea.hbm %s3830_s26, 2176  ;;  %s3003_s20 = scalar_lea.hbm %s3888_s3, 4352 }
 0x263   : > { %p3000_p6 = scmp.ne.s32.totalorder %s3830_s26, %s2999_s6  ;;  %p3004_p11 = scmp.lt.u32.totalorder %s3830_s26, %s3888_s3 }
 0x264   : > { %p3005_p3 = scmp.lt.u32.totalorder %s3003_s20, %s2999_s6  ;;  %p3007_p4 = scmp.lt.u32.totalorder %s2999_s6, %s3830_s26 }
 0x265   : > { %p3001_p9 = pnand %p3000_p6, %p3906_p7 }
 0x266   : > { %p3006_p12 = por %p3005_p3, %p3004_p11 }
 0x267   : > { %p3002_p13 = pneg %p3001_p9 }
 0x268   : > { %p3008_p10 = por %p3007_p4, %p3006_p12 }
 0x26a   : > { %p3009_p8 = pnand %p3008_p10, %p3002_p13 }
 0x26c   : > { %3012 = shalt.err (!%p3009_p8)
}
 0x26d   : > { %s3085_s21 = smov 64   ;;  %s3086_s25 = smov 4  }
 0x26e   : > { %2779 = dma.vmem_to_hbm [thread:$0]  (%p3906_p7), %s3832_s9, 2176, %s3830_s26, %s2101_s15, %s3085_s21, %s3085_s21, %s3086_s25  }
 0x26f PF: > { %s2130_s10 = sand.u32 1, %s3055_s12   ;;  %p3907_p2 = scmp.ne.s32.totalorder %s3896_s23, 0 }
 0x270   : > { %p3908_p0 = scmp.ge.s32.totalorder %s3075_s17, 2  ;;  %s2131_s8 = scalar_lea.sflag [#allocation4], %s2130_s10 }
 0x272   : > { %p2793_p5 = pnand %p3908_p0, %p3907_p2 }
 0x274   : > { %3050 = dma.done.wait (!%p2793_p5), %s2131_s8, 2176  }
 0x275   : > { %3052 = vsyncadd (!%p2793_p5), %s2131_s8, 4294965120  ;;  %s18_s17 = sadd.s32 1, %s3075_s17   ;;  %s3909_s12 = smov %s3059_s13 }
 0x276   : > { %p15_p1 = scmp.ge.s32.totalorder %s18_s17, 4   ;;  %s3910_s13 = smov %s3063_s14 }
 0x277   : > { %s3911_s14 = smov %s3263_s28  ;;  %s3912_s15 = smov %s3071_s16 }
 0x278   : > { %s3913_s16 = smov %s3915_s4  ;;  %17 = sbr.rel (!%p15_p1) target bundleno = 6 (0x6), region = 89 }
 0x27f   :  { %2136 = vsyncpa [#allocation3], 1 }
 0x280   :  { %2138 = vsyncpa [#allocation3 + $0x1], 1 }
 0x281   :  { %2139 = vsyncpa [#allocation6], 1 }
 0x282   :  { %2140 = vsyncpa [#allocation4], 1 }
 0x283   :  { %2142 = vsyncpa [#allocation4 + $0x1], 1 }

// kernel: discriminator_forward.6
= control target key start
LH: loop header
LB: loop body
LE: loop exit
PB: predicated region body
PF: predicated region fallthrough
CT: control target
= control target key end

     0   :  { %8 = vsyncpa [#allocation3], 0  ;;  %s2894_s0 = inlined_call_operand.hbm [shape: bf16[4,256,128], index: 0, kind: input, shape index: {}]   ;;  %s2895_s1 = inlined_call_operand.hbm [shape: f32[72,1], index: 1, kind: input, shape index: {}]   ;;  %s2896_s2 = inlined_call_operand.hbm [shape: bf16[2,90,256], index: 2, kind: input, shape index: {}]   ;;  %s2897_s3 = inlined_call_operand.hbm [shape: bf16[2,72,128], index: 3, kind: output, shape index: {}]  }
   0x1   :  { %9 = vsyncpa [#allocation6], 0 }
   0x2   :  { %10 = vsyncpa [#allocation4], 0 }
   0x3   :  { %12 = vsyncpa [#allocation4 + $0x1], 0  ;;  %s2429_s12 = smov 0   ;;  %s2431_s13 = smov 0  }
   0x4   :  { %s2433_s14 = smov 0   ;;  %s2435_s15 = smov 0  }
   0x5   :  { %s2437_s16 = smov 0   ;;  %s2439_s17 = smov 0  }
   0x6 LB: > { %s2460_s18 = sadd.s32 4294967295, %s2396_s17   ;;  %s1707_s19 = sadd.s32 4294967294, %s2396_s17   ;;  %s2396_s17 = sphi %s2439_s17, %s18_s17   ;;  %s2392_s16 = sphi %s2437_s16, %s2924_s16   ;;  %s2388_s15 = sphi %s2435_s15, %s2923_s15   ;;  %s2384_s14 = sphi %s2433_s14, %s2922_s14   ;;  %s2380_s13 = sphi %s2431_s13, %s2921_s13   ;;  %s2376_s12 = sphi %s2429_s12, %s2920_s12  }
   0x7   : > { %p91_p0 = scmp.ne.s32.totalorder %s2384_s14, %s2380_s13  ;;  %p92_p1 = scmp.eq.s32.totalorder %s2396_s17, 0 }
   0x8   : > { %p97_p2 = scmp.ne.s32.totalorder %s2380_s13, %s2376_s12  ;;  %p2898_p3 = scmp.eq.s32.totalorder %s2460_s18, 0 }
   0x9   : > { %p123_p4 = scmp.eq.s32.totalorder %s2460_s18, 1  ;;  %p2470_p5 = por %p92_p1, %p91_p0 }
   0xa   : > { %p129_p6 = scmp.eq.s32.totalorder %s1707_s19, 1  ;;  %p2476_p7 = por %p2898_p3, %p97_p2 }
   0xb   : > { %p2480_p8 = por %p123_p4, %p91_p0  ;;  %p1708_p10 = scmp.ge.s32.totalorder %s2396_s17, 1 }
   0xc   : > { %s2903_s21 = scalar_select %p2476_p7, 1, 0 }
   0xd   : > { %s2904_s22 = scalar_select %p2480_p8, 1, 0 }
   0xe   : > { %p2484_p9 = por %p129_p6, %p97_p2  ;;  %p136_p11 = scmp.lt.s32.totalorder %s2396_s17, 3 }
   0xf   : > { %s2398_s25 = smov [#allocation2]   ;;  %p2066_p1 = scmp.lt.s32.totalorder %s2396_s17, 2 }
  0x10   : > { %s2905_s23 = scalar_select %p2484_p9, 1, 0 }
  0x11   : > { %p2490_p12 = pnand %p1708_p10, %p136_p11  ;;  %s150_s26 = sshll.u32 %s2398_s25, 4  ;;  %s2494_s26 = int_to_ptr.vmem [resolvable:$true] %s150_s26 }
  0x12   : > { %s2399_s28 = smov [#allocation5]   ;;  %p2508_p4 = pnand %p2066_p1, %p2470_p5 }
  0x13   : > { %s2906_s24 = scalar_select %p2490_p12, 1, 0 }
  0x14   : > { %p2049_p13 = pneg %p2490_p12  ;;  %s163_s29 = sshll.u32 %s2399_s28, 4  ;;  %s2512_s29 = int_to_ptr.vmem [resolvable:$true] %s163_s29 }
  0x15   : > { %s2220_s6 = scalar_lea.hbm %s2894_s0, 8192 }
  0x16   : > { %p2502_p2 = pnand %p2049_p13, %p2898_p3  ;;  %p2221_p6 = scmp.ne.s32.totalorder %s2894_s0, %s2220_s6 }
  0x17   : > { %p2227_p5 = scmp.lt.u32.totalorder %s2220_s6, %s2894_s0 }
  0x18   : > { %p2222_p10 = pneg %p2502_p2 }
  0x1a   : > { %p2223_p11 = pnand %p2222_p10, %p2221_p6 }
  0x1c   : > { %p2224_p13 = pneg %p2223_p11 }
  0x1e   : > { %p2229_p1 = pnand %p2227_p5, %p2224_p13 }
  0x20   : > { %2232 = shalt.err (!%p2229_p1)
}
  0x21   : > { %s2233_s11 = scalar_lea.vmem %s2494_s26, 8192  ;;  %p2241_p8 = scmp.lt.s32.totalorder %s2494_s26, %s2494_s26 }
  0x22   : > { %p2234_p0 = scmp.ne.s32.totalorder %s2494_s26, %s2233_s11  ;;  %p2242_p6 = scmp.lt.s32.totalorder %s2233_s11, %s2233_s11 }
  0x24   : > { %p2236_p3 = pnand %p2234_p0, %p2222_p10  ;;  %p2243_p11 = por %p2242_p6, %p2241_p8 }
  0x26   : > { %p2237_p9 = pneg %p2236_p3 }
  0x28   : > { %p2244_p7 = pnand %p2243_p11, %p2237_p9 }
  0x2a   : > { %2247 = shalt.err (!%p2244_p7)
}
  0x2b   : > { %s2400_s19 = smov 64   ;;  %s2401_s20 = smov 4  }
  0x2c   : > { %2052 = dma.hbm_to_vmem [thread:$0]  (!%p2502_p2), %s2894_s0, 8192, %s2494_s26, [#allocation3], %s2400_s19, %s2400_s19, %s2401_s20  }
  0x2d   : > { %s2248_s6 = scalar_lea.hbm %s2895_s1, 1152 }
  0x2e   : > { %p2249_p3 = scmp.ne.s32.totalorder %s2895_s1, %s2248_s6  ;;  %p2255_p9 = scmp.lt.u32.totalorder %s2248_s6, %s2895_s1 }
  0x30   : > { %p2251_p7 = pnand %p2249_p3, %p2222_p10 }
  0x32   : > { %p2252_p8 = pneg %p2251_p7 }
  0x34   : > { %p2257_p0 = pnand %p2255_p9, %p2252_p8 }
  0x36   : > { %2260 = shalt.err (!%p2257_p0)
}
  0x37   : > { %s2261_s26 = scalar_lea.vmem %s2512_s29, 1152  ;;  %p2269_p6 = scmp.lt.s32.totalorder %s2512_s29, %s2512_s29 }
  0x38   : > { %p2262_p13 = scmp.ne.s32.totalorder %s2512_s29, %s2261_s26  ;;  %p2270_p11 = scmp.lt.s32.totalorder %s2261_s26, %s2261_s26 }
  0x3a   : > { %p2264_p5 = pnand %p2262_p13, %p2222_p10  ;;  %p2271_p3 = por %p2270_p11, %p2269_p6 }
  0x3c   : > { %p2265_p1 = pneg %p2264_p5 }
  0x3e   : > { %p2272_p7 = pnand %p2271_p3, %p2265_p1 }
  0x40   : > { %2275 = shalt.err (!%p2272_p7)
}
  0x41   : > { %s2402_s11 = smov 128   ;;  %s2403_s19 = smov 8  }
  0x42   : > { %2055 = dma.hbm_to_vmem [thread:$0]  (!%p2502_p2), %s2895_s1, 1152, %s2512_s29, [#allocation6], %s2402_s11, %s2402_s11, %s2403_s19  }
  0x43   : > { %s177_s4 = sand.u32 1, %s2396_s17   ;;  %s30_s5 = sadd.s32 1, %s2392_s16 }
  0x44   : > { %s179_s6 = sand.u32 1, %s2384_s14   ;;  %p32_p10 = scmp.ge.s32.totalorder %s30_s5, 2 }
  0x45   : > { %s2032_s7 = smul.u32 96, %s179_s6  ;;  %s2589_s6 = scalar_lea.sflag [#allocation3], %s177_s4 }
  0x46   : > { %s2033_s8 = smul.u32 1536, %s2392_s16  ;;  %s2926_s5 = smov (%p32_p10, %s30_s5), 0 }
  0x47   : > { %s81_s29 = ssub.s32 %s2392_s16, %s2926_s5  ;;  %s181_s26 = scalar_lea.vmem [#allocation7], %s2032_s7 }
  0x48   : > { %s2579_s10 = scalar_lea.hbm %s2896_s2, %s2033_s8  ;;  %s188_s20 = sshll.u32 %s181_s26, 4  ;;  %s2587_s20 = int_to_ptr.vmem [resolvable:$true] %s188_s20 }
  0x49   : > { %p2583_p2 = scmp.eq.s32.totalorder %s81_s29, 0  ;;  %s2276_s28 = scalar_lea.hbm %s2579_s10, 1536 }
  0x4a   : > { %p2277_p8 = scmp.ne.s32.totalorder %s2579_s10, %s2276_s28  ;;  %p2278_p9 = pneg %p2508_p4 }
  0x4b   : > { %s2281_s7 = scalar_lea.hbm %s2896_s2, 3072  ;;  %p2282_p5 = scmp.lt.u32.totalorder %s2579_s10, %s2896_s2 }
  0x4c   : > { %p2279_p0 = pnand %p2278_p9, %p2277_p8  ;;  %p2283_p1 = scmp.lt.u32.totalorder %s2281_s7, %s2276_s28 }
  0x4d   : > { %p2285_p11 = scmp.lt.u32.totalorder %s2276_s28, %s2579_s10 }
  0x4e   : > { %p2280_p13 = pneg %p2279_p0  ;;  %p2284_p6 = por %p2283_p1, %p2282_p5 }
  0x50   : > { %p2286_p3 = por %p2285_p11, %p2284_p6 }
  0x52   : > { %p2287_p7 = pnand %p2286_p3, %p2280_p13 }
  0x54   : > { %2290 = shalt.err (!%p2287_p7)
}
  0x55   : > { %s2291_s4 = scalar_lea.vmem %s2587_s20, 1536  ;;  %s2404_s26 = smov [#allocation7]  }
  0x56   : > { %p2292_p10 = scmp.ne.s32.totalorder %s2587_s20, %s2291_s4  ;;  %s2296_s8 = sshll.u32 %s2404_s26, 4  ;;  %s2297_s8 = int_to_ptr.vmem [resolvable:$false] %s2296_s8 }
  0x57   : > { %s2298_s9 = scalar_lea.vmem %s2297_s8, 3072  ;;  %p2299_p12 = scmp.lt.s32.totalorder %s2587_s20, %s2297_s8 }
  0x58   : > { %p2294_p8 = pnand %p2292_p10, %p2278_p9  ;;  %p2300_p5 = scmp.lt.s32.totalorder %s2298_s9, %s2291_s4 }
  0x5a   : > { %p2295_p0 = pneg %p2294_p8  ;;  %p2301_p1 = por %p2300_p5, %p2299_p12 }
  0x5c   : > { %p2302_p6 = pnand %p2301_p1, %p2295_p0 }
  0x5e   : > { %2305 = shalt.err (!%p2302_p6)
}
  0x5f   : > { %2059 = dma.hbm_to_vmem [thread:$0]  (!%p2508_p4), %s2579_s10, 1536, %s2587_s20, %s2589_s6, %s2402_s11, %s2402_s11, %s2403_s19  }
  0x60   : > { %s2910_s28 = sadd.s32 1, %s2384_s14  ;;  %p2911_p12 = scmp.ne.s32.totalorder %s2906_s24, 0 }
  0x61   : > { %s2625_s7 = scalar_select %p2583_p2, %s2384_s14, %s2910_s28  }
  0x62   : > { %200 = sbr.rel (%p2911_p12) target bundleno = 534 (0x216), region = 32  ;;  %p2912_p9 = scmp.eq.s32.totalorder (!%p2911_p12), %s2460_s18, 0 }
  0x69   : > { %2359 = dma.done.wait (%p2912_p9), [#allocation3], 8192   ;;  %p2913_p13 = pmov %p2912_p9 }
  0x6a   : > { %p2914_p11 = pmov %p2912_p9 }
  0x6b   : > { %2361 = vsyncadd (%p2913_p13), [#allocation3], 4294959104 }
  0x6c   : > { %2363 = dma.done.wait (%p2914_p11), [#allocation6], 1152   ;;  %p2915_p3 = pmov %p2912_p9 }
  0x6d   : > { %s210_s30 = sand.u32 1, %s2460_s18   ;;  %s2639_s11 = sand.u32 1, %s2380_s13  }
  0x6e   : > { %2365 = vsyncadd (%p2915_p3), [#allocation6], 4294966144  ;;  %s2034_s24 = smul.u32 96, %s2639_s11  ;;  %s211_s19 = scalar_lea.sflag [#allocation3], %s210_s30 }
  0x6f   : > { %p2916_p4 = scmp.ne.s32.totalorder %s2903_s21, 0 }
  0x70   : > { %s2642_s10 = scalar_lea.vmem [#allocation7], %s2034_s24 }
  0x71   : > { %2367 = dma.done.wait (%p2916_p4), %s211_s19, 1536  }
  0x72   : > { %2369 = vsyncadd (%p2916_p4), %s211_s19, 4294965760  ;;  %v2405_v0 = vmov 0   ;;  %v2129_v1 = vld [vmem:[#allocation2 + $0xc0] sm:$0xff]   ;;  %v2133_v5 = vld [vmem:[#allocation2 + $0xc8] sm:$0xff]   ;;  %vm353_vm0 = vsmask.f32 7424 }
  0x73   : > { %2127 = vset.pattern.permute.xlu0 %v2405_v0  ;;  %2128 = vset.pattern.permute.xlu1 %v2405_v0  ;;  %v2130_v2 = vld [vmem:[#allocation2 + $0x40] sm:$0xff]   ;;  %v2134_v6 = vld [vmem:[#allocation2 + $0x48] sm:$0xff]   ;;  %v2137_v9 = vld [vmem:[#allocation2 + $0xd0] sm:$0xff]   ;;  %vm1177_vm1 = vcmask 1046528   ;;  %s2035_s18 = smul.u32 36, %s2639_s11  ;;  %s1588_s29 = scalar_lea.sflag [#allocation4], %s2639_s11 }
  0x74   : > { %1848 = vmatprep.subr.bf16.mxu0 %v2129_v1  ;;  %v2131_v3 = vld [vmem:[#allocation2 + $0x80] sm:$0xff]   ;;  %1894 = vmatprep.subr.bf16.mxu1 %v2130_v2  ;;  %v2135_v7 = vld [vmem:[#allocation2 + $0x88] sm:$0xff]   ;;  %v2138_v10 = vld [vmem:[#allocation2 + $0x50] sm:$0xff]   ;;  %s2036_s21 = smul.u32 576, %s2388_s15  ;;  %p2917_p7 = scmp.ne.s32.totalorder %s2904_s22, 0 }
  0x75   : > { %v2132_v4 = vld [vmem:[#allocation2] sm:$0xff]   ;;  %1849 = vmatpush3.bf16.msra.mxu0 %v2131_v3  ;;  %v2136_v8 = vld [vmem:[#allocation2 + $0x8] sm:$0xff]   ;;  %v2139_v11 = vld [vmem:[#allocation2 + $0x90] sm:$0xff]   ;;  %s2823_s20 = scalar_lea.vmem [#allocation8], %s2035_s18  ;;  %s2406_s26 = smov [#allocation8]  }
  0x76   : > { %1895 = vmatpush3.bf16.msra.mxu1 %v2132_v4  ;;  %1850 = vmatprep.subr.bf16.mxu0 %v2133_v5  ;;  %v2140_v12 = vld [vmem:[#allocation2 + $0x10] sm:$0xff]   ;;  %v2141_v13 = vld [vmem:[#allocation2 + $0xd8] sm:$0xff]   ;;  %v2145_v17 = vld [vmem:[#allocation2 + $0xe0] sm:$0xff]   ;;  %s1602_s25 = sshll.u32 %s2823_s20, 4  ;;  %s2838_s27 = scalar_lea.hbm %s2897_s3, %s2036_s21  ;;  %s2840_s25 = int_to_ptr.vmem [resolvable:$true] %s1602_s25 }
  0x77   : > { %1896 = vmatprep.subr.bf16.mxu1 %v2134_v6  ;;  %v2142_v14 = vld [vmem:[#allocation2 + $0x58] sm:$0xff]   ;;  %v2146_v18 = vld [vmem:[#allocation2 + $0x60] sm:$0xff]   ;;  %v2149_v21 = vld [vmem:[#allocation2 + $0xe8] sm:$0xff]   ;;  %s2306_s4 = scalar_lea.vmem %s2840_s25, 576  ;;  %s2310_s8 = sshll.u32 %s2406_s26, 4  ;;  %s2311_s8 = int_to_ptr.vmem [resolvable:$false] %s2310_s8 }
  0x78   : > { %v2143_v15 = vld [vmem:[#allocation2 + $0x98] sm:$0xff]   ;;  %v2147_v19 = vld [vmem:[#allocation2 + $0xa0] sm:$0xff]   ;;  %v2150_v22 = vld [vmem:[#allocation2 + $0x68] sm:$0xff]   ;;  %p2307_p2 = scmp.ne.s32.totalorder %s2840_s25, %s2306_s4  ;;  %s2312_s9 = scalar_lea.vmem %s2311_s8, 1152 }
  0x79   : > { %1851 = vmatpush3.bf16.msra.mxu0 %v2135_v7  ;;  %v2144_v16 = vld [vmem:[#allocation2 + $0x18] sm:$0xff]   ;;  %v2148_v20 = vld [vmem:[#allocation2 + $0x20] sm:$0xff]   ;;  %v2151_v23 = vld [vmem:[#allocation2 + $0xa8] sm:$0xff]   ;;  %p2313_p0 = scmp.lt.s32.totalorder %s2840_s25, %s2311_s8  ;;  %p2314_p5 = scmp.lt.s32.totalorder %s2312_s9, %s2306_s4 }
  0x7a   : > { %1897 = vmatpush3.bf16.msra.mxu1 %v2136_v8  ;;  %1852 = vmatprep.subr.bf16.mxu0 %v2137_v9  ;;  %v2152_v24 = vld [vmem:[#allocation2 + $0x28] sm:$0xff]   ;;  %v2153_v25 = vld [vmem:[#allocation2 + $0xf0] sm:$0xff]   ;;  %v2157_v29 = vld [vmem:[#allocation2 + $0xf8] sm:$0xff]   ;;  %p2308_p10 = pnand %p2307_p2, %p2917_p7 }
  0x7b   : > { %1898 = vmatprep.subr.bf16.mxu1 %v2138_v10  ;;  %v2154_v26 = vld [vmem:[#allocation2 + $0x70] sm:$0xff]   ;;  %v2158_v30 = vld [vmem:[#allocation2 + $0x78] sm:$0xff]   ;;  %v238_v33 = vld [vmem:[%s2642_s10] sm:$0xff]  ;;  %p2315_p1 = por %p2314_p5, %p2313_p0 }
  0x7c   : > { %v2155_v27 = vld [vmem:[#allocation2 + $0xb0] sm:$0xff]   ;;  %v2159_v31 = vld [vmem:[#allocation2 + $0xb8] sm:$0xff]   ;;  %v2656_v36 = vld [vmem:[%s2642_s10 + $0x18] sm:$0xff]  ;;  %p2309_p8 = pneg %p2308_p10 }
  0x7d   : > { %1853 = vmatpush3.bf16.msra.mxu0 %v2139_v11  ;;  %v2156_v28 = vld [vmem:[#allocation2 + $0x30] sm:$0xff]   ;;  %v2160_v32 = vld [vmem:[#allocation2 + $0x38] sm:$0xff]   ;;  %v2165_v41 = vld [vmem:[#allocation2 + $0x140] sm:$0xff]  }
  0x7e   : > { %1899 = vmatpush3.bf16.msra.mxu1 %v2140_v12  ;;  %1854 = vmatprep.subr.bf16.mxu0 %v2141_v13  ;;  %v2650_v34 = vld [vmem:[%s2642_s10 + $0x8] sm:$0xff]  ;;  %v2653_v35 = vld [vmem:[%s2642_s10 + $0x10] sm:$0xff]  ;;  %v2167_v46 = vld [vmem:[#allocation2 + $0x1c0] sm:$0xff]   ;;  %p2316_p6 = pnand %p2315_p1, %p2309_p8 }
  0x7f   : > { %1900 = vmatprep.subr.bf16.mxu1 %v2142_v14  ;;  %v1717_v37 = vcombine.high %v238_v33, %v2650_v34  ;;  %v1716_v38 = vcombine.low %v238_v33, %v2650_v34  ;;  %v1719_v39 = vcombine.high %v2653_v35, %v2656_v36  ;;  %v1718_v40 = vcombine.low %v2653_v35, %v2656_v36  ;;  %v2166_v53 = vld [vmem:[#allocation2 + $0x100] sm:$0xff]   ;;  %v2169_v57 = vld [vmem:[#allocation2 + $0x148] sm:$0xff]   ;;  %v2668_v59 = vld [vmem:[%s2642_s10 + $0x28] sm:$0xff] }
  0x80   : > { %v2168_v54 = vld [vmem:[#allocation2 + $0x180] sm:$0xff]   ;;  %v2665_v58 = vld [vmem:[%s2642_s10 + $0x20] sm:$0xff]  ;;  %v2175_v9 = vld [vmem:[#allocation2 + $0x150] sm:$0xff]  }
  0x81   : > { %1855 = vmatpush3.bf16.msra.mxu0 %v2143_v15  ;;  %v367_v42 = vshrl.u32 %v1717_v37, 16  ;;  %v369_v43 = vshll.u32 %v1717_v37, 16  ;;  %750 = vmatprep.mubr.bf16.mxu1 %v1717_v37  ;;  %v355_v44 = vshrl.u32 %v1716_v38, 16  ;;  %v357_v45 = vshll.u32 %v1716_v38, 16  ;;  %v2172_v1 = vld [vmem:[#allocation2 + $0x1c8] sm:$0xff]   ;;  %v2177_v12 = vld [vmem:[#allocation2 + $0x1d0] sm:$0xff]  }
  0x82   : > { %1901 = vmatpush3.bf16.msra.mxu1 %v2144_v16  ;;  %1856 = vmatprep.subr.bf16.mxu0 %v2145_v17  ;;  %v374_v47 = vshll.u32 %v1719_v39, 16  ;;  %v362_v48 = vshll.u32 %v1718_v40, 16  ;;  %v386_v60 = vshrl.u32 %v1719_v39, 16  ;;  %v378_v61 = vshrl.u32 %v1718_v40, 16  ;;  %v2170_v3 = vld [vmem:[#allocation2 + $0x108] sm:$0xff]   ;;  %v2178_v15 = vld [vmem:[#allocation2 + $0x190] sm:$0xff]  }
  0x83   : > { %1902 = vmatprep.subr.bf16.mxu1 %v2146_v18  ;;  %v371_v49 = vrot.slane %v369_v43, 1  ;;  %v359_v50 = vrot.slane %v357_v45, 1  ;;  %v1721_v0 = vcombine.high %v2665_v58, %v2668_v59  ;;  %v1720_v2 = vcombine.low %v2665_v58, %v2668_v59  ;;  %v2174_v4 = vld [vmem:[#allocation2 + $0x188] sm:$0xff]   ;;  %v2678_v16 = vld [vmem:[%s2642_s10 + $0x30] sm:$0xff]  ;;  %v2681_v17 = vld [vmem:[%s2642_s10 + $0x38] sm:$0xff] }
  0x84   : > { %v376_v51 = vrot.slane %v374_v47, 1  ;;  %v364_v52 = vrot.slane %v362_v48, 1  ;;  %v2185_v33 = vld [vmem:[#allocation2 + $0x160] sm:$0xff]   ;;  %v2690_v37 = vcombine.high %v2650_v34, %v2653_v35  ;;  %v279_v43 = vld [vmem:[%s2642_s10 + $0x48] sm:$0x11] }
  0x85   : > { %1857 = vmatpush3.bf16.msra.mxu0 %v2147_v19  ;;  %v372_v55 = vor.u32 %v371_v49, %v367_v42  ;;  %v360_v56 = vor.u32 %v359_v50, %v355_v44  ;;  %v390_v6 = vshll.u32 %v1721_v0, 16  ;;  %v382_v7 = vshll.u32 %v1720_v2, 16  ;;  %v2176_v19 = vld [vmem:[#allocation2 + $0x110] sm:$0xff]   ;;  %v2694_v42 = vld [vmem:[%s2642_s10 + $0x40] sm:$0xff] }
  0x86   : > { %1903 = vmatpush3.bf16.msra.mxu1 %v2148_v20  ;;  %1858 = vmatprep.subr.bf16.mxu0 %v2149_v21  ;;  %v388_v5 = vor.u32 %v386_v60, %v376_v51  ;;  %v380_v8 = vor.u32 %v378_v61, %v364_v52  ;;  %v402_v13 = vshrl.u32 %v1721_v0, 16  ;;  %v1723_v20 = vcombine.high %v2678_v16, %v2681_v17  ;;  %v2191_v49 = vld [vmem:[#allocation2 + $0x168] sm:$0xff]  }
  0x87   : > { %1904 = vmatprep.subr.bf16.mxu1 %v2150_v22  ;;  %v377_v62 = vsel %vm353_vm0, %v372_v55, %v376_v51  ;;  %v365_v63 = vsel %vm353_vm0, %v360_v56, %v364_v52  ;;  %v392_v10 = vrot.slane %v390_v6, 1  ;;  %v384_v11 = vrot.slane %v382_v7, 1  ;;  %v2192_v55 = vld [vmem:[#allocation2 + $0x128] sm:$0xff]   ;;  %v2199_v7 = vld [vmem:[#allocation2 + $0x1f0] sm:$0xff]  }
  0x88   : > { %570 = vmatprep.mubr.bf16.mxu0 %v377_v62  ;;  %v1722_v21 = vcombine.low %v2678_v16, %v2681_v17  ;;  %v394_v22 = vshrl.u32 %v1720_v2, 16  ;;  %v1725_v45 = vcombine.high %v2694_v42, %v279_v43  ;;  %v2700_v47 = vcombine.low %v2694_v42, %v279_v43  ;;  %v2193_v62 = vld [vmem:[#allocation2 + $0x1e8] sm:$0xff]  }
  0x89   : > { %1859 = vmatpush3.bf16.msra.mxu0 %v2151_v23  ;;  %v393_v14 = vsel %vm353_vm0, %v388_v5, %v392_v10  ;;  %v385_v18 = vsel %vm353_vm0, %v380_v8, %v384_v11  ;;  %v2180_v23 = vld [vmem:[#allocation2 + $0x158] sm:$0xff]   ;;  %v1743_v50 = vcombine.high %v2694_v42, %v2694_v42  ;;  %v888_v51 = vshll.u32 %v2690_v37, 16 }
  0x8a   : > { %1905 = vmatpush3.bf16.msra.mxu1 %v2152_v24  ;;  %1860 = vmatprep.subr.bf16.mxu0 %v2153_v25  ;;  %v404_v24 = vor.u32 %v402_v13, %v392_v10  ;;  %v406_v25 = vshll.u32 %v1723_v20, 16  ;;  %v410_v48 = vshrl.u32 %v1722_v21, 16  ;;  %v429_v56 = vshrl.u32 %v1725_v45, 16  ;;  %v2201_v13 = vld [vmem:[#allocation2 + $0x178] sm:$0xff]  }
  0x8b   : > { %1906 = vmatprep.subr.bf16.mxu1 %v2154_v26  ;;  %v398_v26 = vshll.u32 %v1722_v21, 16  ;;  %v1760_v8 = vcombine.low %v2650_v34, %v2653_v35  ;;  %v1742_v10 = vcombine.low %v2694_v42, %v2694_v42  ;;  %v2721_v34 = vcombine.low %v2656_v36, %v2665_v58 }
  0x8d   : > { %1861 = vmatpush3.bf16.msra.mxu0 %v2155_v27  ;;  %v2182_v27 = vld [vmem:[#allocation2 + $0x118] sm:$0xff]  }
  0x8e   : > { %1907 = vmatpush3.bf16.msra.mxu1 %v2156_v28  ;;  %1862 = vmatprep.subr.bf16.mxu0 %v2157_v29  ;;  %v2183_v28 = vld [vmem:[#allocation2 + $0x1d8] sm:$0xff]   ;;  %v408_v29 = vrot.slane %v406_v25, 1 }
  0x8f   : > { %1908 = vmatprep.subr.bf16.mxu1 %v2158_v30  ;;  %v396_v30 = vor.u32 %v394_v22, %v384_v11  ;;  %v2200_v11 = vld [vmem:[#allocation2 + $0x1b0] sm:$0xff]  }
  0x91   : > { %1863 = vmatpush3.bf16.msra.mxu0 %v2159_v31  ;;  %v400_v31 = vrot.slane %v398_v26, 1 }
  0x92   : > { %1909 = vmatpush3.bf16.msra.mxu1 %v2160_v32  ;;  %1940 = vmatprep.subr.bf16.mxu0 %v2165_v41  ;;  %v2184_v32 = vld [vmem:[#allocation2 + $0x198] sm:$0xff]   ;;  %v2187_v41 = vld [vmem:[#allocation2 + $0x1e0] sm:$0xff]  }
  0x93   : > { %1986 = vmatprep.subr.bf16.mxu1 %v2167_v46  ;;  %v401_v44 = vsel %vm353_vm0, %v396_v30, %v400_v31  ;;  %v2189_v46 = vld [vmem:[#allocation2 + $0x1a0] sm:$0xff]   ;;  %v412_v60 = vor.u32 %v410_v48, %v400_v31 }
  0x94   : > { %571 = vmatmul.mubr.bf16.vlgmr.msra.gmra.mrb[0].mxu0 %v365_v63  ;;  %v2194_v63 = vld [vmem:[#allocation2 + $0x1a8] sm:$0xff]  }
  0x95   : > { %751 = vmatmul.mubr.bf16.vlgmr.msra.gmra.mrb[0].mxu1 %v1716_v38  ;;  %1941 = vmatpush3.bf16.msra.mxu0 %v2166_v53  ;;  %v409_v38 = vsel %vm353_vm0, %v404_v24, %v408_v29  ;;  %v422_v53 = vshll.u32 %v1725_v45, 16  ;;  %v2726_v24 = vcombine.high %v2668_v59, %v2678_v16 }
  0x96   : > { %758 = vmatprep.mubr.bf16.mxu1 %v1719_v39  ;;  %1987 = vmatpush3.bf16.msra.mxu1 %v2168_v54  ;;  %v2186_v39 = vld [vmem:[#allocation2 + $0x120] sm:$0xff]   ;;  %v414_v54 = vshll.u32 %v2700_v47, 16 }
  0x97   : > { %1988 = vmatprep.subr.bf16.mxu1 %v2172_v1  ;;  %1942 = vmatprep.subr.bf16.mxu0 %v2169_v57  ;;  %v424_v57 = vrot.slane %v422_v53, 1  ;;  %v1186_v30 = vrot.slane %v2726_v24, 1  ;;  %v1387_v53 = vld [vmem:[#allocation5 + $0x20] sm:$0xff] }
  0x98   : > { %578 = vmatprep.mubr.bf16.mxu0 %v393_v14  ;;  %v416_v61 = vrot.slane %v414_v54, 1  ;;  %v426_v14 = vshrl.u32 %v2700_v47, 16 }
  0x99   : > { %1943 = vmatpush3.bf16.msra.mxu0 %v2170_v3  ;;  %v2197_v3 = vld [vmem:[#allocation2 + $0x130] sm:$0xff]   ;;  %v431_v6 = vor.u32 %v429_v56, %v424_v57  ;;  %v1388_v56 = vld [vmem:[#allocation5 + $0x28] sm:$0xff] }
  0x9a   : > { %1989 = vmatpush3.bf16.msra.mxu1 %v2174_v4  ;;  %1944 = vmatprep.subr.bf16.mxu0 %v2175_v9  ;;  %v886_v4 = vshrl.u32 %v2690_v37, 16  ;;  %v417_v5 = vsel %vm353_vm0, %v412_v60, %v416_v61  ;;  %v881_v37 = vshll.u32 %v2721_v34, 16  ;;  %v897_v60 = vshrl.u32 %v2721_v34, 16 }
  0x9b   : > { %1990 = vmatprep.subr.bf16.mxu1 %v2177_v12  ;;  %v890_v12 = vrot.slane %v888_v51, 1 }
  0x9c   : > { %579 = vmatmul.mubr.bf16.gmra.mrb[4].mxu0 %v385_v18  ;;  %v2203_v18 = vld [vmem:[#allocation2 + $0x1f8] sm:$0xff]   ;;  %v883_v48 = vrot.slane %v881_v37, 1 }
  0x9d   : > { %759 = vmatmul.mubr.bf16.gmra.mrb[4].mxu1 %v1718_v40  ;;  %1945 = vmatpush3.bf16.msra.mxu0 %v2176_v19  ;;  %v418_v40 = vshrl.u32 %v1723_v20, 16  ;;  %v876_v19 = vshll.u32 %v1760_v8, 16 }
  0x9e   : > { %766 = vmatprep.mubr.bf16.mxu1 %v1721_v0  ;;  %1991 = vmatpush3.bf16.msra.mxu1 %v2178_v15  ;;  %v2708_v0 = vcombine.high %v2656_v36, %v2665_v58  ;;  %v2202_v15 = vld [vmem:[#allocation2 + $0x138] sm:$0xff]   ;;  %v1179_v36 = vrot.slane %v2721_v34, 1  ;;  %v1383_v58 = vld [vmem:[#allocation5] sm:$0xff] }
  0x9f   : > { %1946 = vmatprep.subr.bf16.mxu0 %v2180_v23  ;;  %1992 = vmatprep.subr.bf16.mxu1 %v2183_v28  ;;  %v420_v52 = vor.u32 %v418_v40, %v408_v29  ;;  %v1138_v23 = vld [vmem:[%s2642_s10 + $0x8] sm:$0xee]  ;;  %v428_v28 = vor.u32 %v426_v14, %v416_v61  ;;  %v874_v29 = vshrl.u32 %v1760_v8, 16  ;;  %v1384_v40 = vld [vmem:[#allocation5 + $0x8] sm:$0xff] }
  0xa0   : > { %586 = vmatprep.mubr.bf16.mxu0 %v409_v38  ;;  %v893_v9 = vshll.u32 %v2708_v0, 16  ;;  %v1786_v25 = vcombine.low %v1138_v23, %v2653_v35  ;;  %v1787_v26 = vcombine.high %v1138_v23, %v2653_v35  ;;  %1394 = vperm.xlu0 %2127, %v1383_v58   ;;  %v905_v38 = vshrl.u32 %v2708_v0, 16  ;;  %v2215_v8 = vld [vmem:[%s2642_s10 + $0x4c] ss:$8 sps:$4 sm:$0x1f]  }
  0xa1   : > { %1947 = vmatpush3.bf16.msra.mxu0 %v2182_v27  ;;  %v425_v1 = vsel %vm353_vm0, %v420_v52, %v424_v57  ;;  %v1182_v27 = vrot.slane %v2708_v0, 1  ;;  %v1767_v52 = vcombine.high %v2681_v17, %v2694_v42 }
  0xa2   : > { %1993 = vmatpush3.bf16.msra.mxu1 %v2184_v32  ;;  %1948 = vmatprep.subr.bf16.mxu0 %v2185_v33  ;;  %v895_v22 = vrot.slane %v893_v9, 1  ;;  %v1178_v31 = vrot.slane %v1786_v25, 1  ;;  %v1181_v32 = vrot.slane %v1787_v26, 1  ;;  %v878_v33 = vrot.slane %v876_v19, 1  ;;  %v1391_v9 = vld [vmem:[#allocation5 + $0x40] sm:$0xff] }
  0xa3   : > { %1994 = vmatprep.subr.bf16.mxu1 %v2187_v41  ;;  %v1385_v41 = vld [vmem:[#allocation5 + $0x10] sm:$0xff]  ;;  %v1187_v45 = vsel %vm1177_vm1, %v1182_v27, %v1186_v30 }
  0xa4   : > { %587 = vmatmul.mubr.bf16.gmra.mrb[8].mxu0 %v401_v44  ;;  %v1183_v43 = vsel %vm1177_vm1, %v1181_v32, %v1182_v27  ;;  %v1180_v44 = vsel %vm1177_vm1, %v1178_v31, %v1179_v36  ;;  %1404 = vperm.xlu1 %2128, %v1385_v41   ;;  %v879_v47 = vor.u32 %v878_v33, %v874_v29 }
  0xa5   : > { %767 = vmatmul.mubr.bf16.gmra.mrb[8].mxu1 %v1720_v2  ;;  %1949 = vmatpush3.bf16.msra.mxu0 %v2186_v39  ;;  %v2195_v2 = vld [vmem:[#allocation2 + $0x170] sm:$0xff]   ;;  %v909_v39 = vshll.u32 %v2726_v24, 16 }
  0xa6   : > { %774 = vmatprep.mubr.bf16.mxu1 %v1723_v20  ;;  %1995 = vmatpush3.bf16.msra.mxu1 %v2189_v46  ;;  %v2204_v20 = vld [vmem:[#allocation2 + $0x1b8] sm:$0xff]   ;;  %v884_v57 = vsel %vm353_vm0, %v879_v47, %v883_v48 }
  0xa7   : > { %1950 = vmatprep.subr.bf16.mxu0 %v2191_v49  ;;  %1996 = vmatprep.subr.bf16.mxu1 %v2193_v62  ;;  %v1386_v46 = vld [vmem:[#allocation5 + $0x18] sm:$0xff]  ;;  %v1764_v49 = vcombine.low %v2668_v59, %v2678_v16  ;;  %v911_v51 = vrot.slane %v909_v39, 1  ;;  %v921_v16 = vshrl.u32 %v2726_v24, 16  ;;  %v925_v62 = vshll.u32 %v1767_v52, 16 }
  0xa8   : > { %594 = vmatprep.mubr.bf16.mxu0 %v425_v1  ;;  %1399 = vperm.xlu0 %2127, %v1384_v40  }
  0xa9   : > { %1951 = vmatpush3.bf16.msra.mxu0 %v2192_v55  ;;  %v1184_v54 = vrot.slane %v1764_v49, 1  ;;  %1409 = vperm.xlu1 %2128, %v1386_v46   ;;  %v1190_v55 = vrot.slane %v1767_v52, 1  ;;  %v901_v61 = vshll.u32 %v1764_v49, 16 }
  0xaa   : > { %1997 = vmatpush3.bf16.msra.mxu1 %v2194_v63  ;;  %1952 = vmatprep.subr.bf16.mxu0 %v2195_v2  ;;  %v1389_v63 = vld [vmem:[#allocation5 + $0x30] sm:$0xff]  ;;  %v1390_v2 = vld [vmem:[#allocation5 + $0x38] sm:$0xff] }
  0xab   : > { %1998 = vmatprep.subr.bf16.mxu1 %v2199_v7  ;;  %v1185_v0 = vsel %vm1177_vm1, %v1179_v36, %v1184_v54  ;;  %v1191_v1 = vsel %vm1177_vm1, %v1186_v30, %v1190_v55  ;;  %v927_v7 = vrot.slane %v925_v62, 1  ;;  %v948_v30 = vshrl.u32 %v2215_v8, 16 }
  0xac   : > { %595 = vmatmul.mubr.bf16.gmra.mrb[12].mxu0 %v417_v5  ;;  %1414 = vperm.xlu0 %2127, %v1387_v53   ;;  %v1766_v5 = vcombine.low %v2681_v17, %v2694_v42  ;;  %v941_v17 = vshll.u32 %v2215_v8, 16 }
  0xad   : > { %775 = vmatmul.mubr.bf16.gmra.mrb[12].mxu1 %v1722_v21  ;;  %602 = vmatprep.mubr.bf16.mxu0 %v431_v6  ;;  %v891_v21 = vor.u32 %v890_v12, %v886_v4  ;;  %v903_v4 = vrot.slane %v901_v61, 1  ;;  %v923_v6 = vor.u32 %v921_v16, %v911_v51 }
  0xae   : > { %782 = vmatprep.mubr.bf16.mxu1 %v1743_v50  ;;  %1999 = vmatpush3.bf16.msra.mxu1 %v2200_v11  ;;  %v907_v50 = vor.u32 %v905_v38, %v895_v22  ;;  %v1194_v11 = vrot.slane %v2215_v8, 1  ;;  %v917_v14 = vshll.u32 %v1766_v5, 16  ;;  %v943_v23 = vrot.slane %v941_v17, 1 }
  0xaf   : > { %1953 = vmatpush3.bf16.msra.mxu0 %v2197_v3  ;;  %2000 = vmatprep.subr.bf16.mxu1 %v2203_v18  ;;  %v896_v35 = vsel %vm353_vm0, %v891_v21, %v895_v22  ;;  %v899_v3 = vor.u32 %v897_v60, %v883_v48  ;;  %v937_v18 = vshrl.u32 %v1767_v52, 16  ;;  %v2217_v21 = vld [vmem:[%s2642_s10 + $0x48] ss:$8 sps:$4 sm:$0x1f]   ;;  %v929_v26 = vshrl.u32 %v1766_v5, 16 }
  0xb0   : > { %1954 = vmatprep.subr.bf16.mxu0 %v2201_v13  ;;  %v912_v59 = vsel %vm353_vm0, %v907_v50, %v911_v51  ;;  %1419 = vperm.xlu1 %2128, %v1388_v56   ;;  %v913_v13 = vshrl.u32 %v1764_v49, 16  ;;  %v1195_v34 = vsel %vm1177_vm1, %v1190_v55, %v1194_v11  ;;  %v1192_v24 = vrot.slane %v2217_v21, 1 }
  0xb1   : > { %1424 = vperm.xlu0 %2127, %v1389_v63   ;;  %v904_v12 = vsel %vm353_vm0, %v899_v3, %v903_v4  ;;  %v939_v22 = vor.u32 %v937_v18, %v927_v7  ;;  %v933_v27 = vshll.u32 %v2217_v21, 16  ;;  %v950_v32 = vor.u32 %v948_v30, %v943_v23 }
  0xb2   : > { %2001 = vmatpush3.bf16.msra.mxu1 %v2204_v20  ;;  %v915_v19 = vor.u32 %v913_v13, %v903_v4  ;;  %v919_v20 = vrot.slane %v917_v14, 1  ;;  %v945_v33 = vshrl.u32 %v2217_v21, 16 }
  0xb3   : > { %1955 = vmatpush3.bf16.msra.mxu0 %v2202_v15  ;;  %v928_v15 = vsel %vm353_vm0, %v923_v6, %v927_v7  ;;  %v944_v36 = vsel %vm353_vm0, %v939_v22, %v943_v23  ;;  %v935_v29 = vrot.slane %v933_v27, 1 }
  0xb4   : > { %603 = vmatmul.mubr.bf16.gmra.mrb[16].mxu0 %v428_v28  ;;  %1429 = vperm.xlu1 %2128, %v1390_v2   ;;  %v920_v25 = vsel %vm353_vm0, %v915_v19, %v919_v20  ;;  %v931_v28 = vor.u32 %v929_v26, %v919_v20 }
  0xb5   : > { %783 = vmatmul.mubr.bf16.gmra.mrb[16].mxu1 %v1742_v10  ;;  %1089 = vmatprep.mubr.bf16.mxu0 %v896_v35  ;;  %v1188_v10 = vrot.slane %v1766_v5, 1  ;;  %v947_v37 = vor.u32 %v945_v33, %v935_v29 }
  0xb6   : > { %1334 = vmatprep.mubr.bf16.mxu1 %v1183_v43  ;;  %1434 = vperm.xlu0 %2127, %v1391_v9   ;;  %v936_v31 = vsel %vm353_vm0, %v931_v28, %v935_v29 }
  0xb7   : > { %v1189_v42 = vsel %vm1177_vm1, %v1184_v54, %v1188_v10  ;;  %v1193_v58 = vsel %vm1177_vm1, %v1188_v10, %v1192_v24 }
  0xbc   : > { %1090 = vmatmul.mubr.bf16.vlgmr.msra.gmra.mrb[20].mxu0 %v884_v57 }
  0xbd   : > { %1335 = vmatmul.mubr.bf16.vlgmr.msra.gmra.mrb[20].mxu1 %v1180_v44  ;;  %1097 = vmatprep.mubr.bf16.mxu0 %v912_v59 }
  0xbe   : > { %1342 = vmatprep.mubr.bf16.mxu1 %v1187_v45 }
  0xc4   : > { %1098 = vmatmul.mubr.bf16.gmra.mrb[24].mxu0 %v904_v12 }
  0xc5   : > { %1343 = vmatmul.mubr.bf16.gmra.mrb[24].mxu1 %v1185_v0  ;;  %1105 = vmatprep.mubr.bf16.mxu0 %v928_v15 }
  0xc6   : > { %1350 = vmatprep.mubr.bf16.mxu1 %v1191_v1 }
  0xcc   : > { %1106 = vmatmul.mubr.bf16.gmra.mrb[28].mxu0 %v920_v25 }
  0xcd   : > { %1351 = vmatmul.mubr.bf16.gmra.mrb[28].mxu1 %v1189_v42  ;;  %1113 = vmatprep.mubr.bf16.mxu0 %v944_v36 }
  0xce   : > { %1358 = vmatprep.mubr.bf16.mxu1 %v1195_v34 }
  0xd4   : > { %1114 = vmatmul.mubr.bf16.gmra.mrb[32].mxu0 %v936_v31 }
  0xd5   : > { %1359 = vmatmul.mubr.bf16.gmra.mrb[32].mxu1 %v1193_v58  ;;  %1121 = vmatprep.mubr.bf16.mxu0 %v950_v32 }
  0xd6   : > { %1366 = vmatprep.mubr.bf16.mxu1 %v1194_v11 }
  0xdc   : > { %1122 = vmatmul.mubr.bf16.gmra.mrb[36].mxu0 %v947_v37 }
  0xdd   : > { %1367 = vmatmul.mubr.bf16.gmra.mrb[36].mxu1 %v1192_v24 }
 0x167   : > { %v1864_v44 = vpop.f32.mrb[0].mxu0 }
 0x168   : > { %v1910_v35 = vpop.f32.mrb[0].mxu1  ;;  %v1865_v45 = vpop.f32.mrb[1].mxu0 }
 0x169   : > { %v1911_v38 = vpop.f32.mrb[1].mxu1  ;;  %v1866_v47 = vadd.f32 %v1865_v45, %v1864_v44  ;;  %v1867_v48 = vpop.f32.mrb[2].mxu0 }
 0x16a   : > { %v1912_v39 = vadd.f32 %v1911_v38, %v1910_v35  ;;  %v1913_v40 = vpop.f32.mrb[2].mxu1  ;;  %v1868_v50 = vpop.f32.mrb[3].mxu0 }
 0x16b   : > { %v1914_v41 = vpop.f32.mrb[3].mxu1  ;;  %v1869_v54 = vadd.f32 %v1868_v50, %v1867_v48 }
 0x16c   : > { %v1915_v43 = vadd.f32 %v1914_v41, %v1913_v40  ;;  %v2762_v53 = vadd.f32 %v1912_v39, %v1866_v47 }
 0x16e   : > { %v2764_v57 = vadd.f32 %v1915_v43, %v1869_v54 }
 0x16f   : > { %v1870_v60 = vpop.f32.mrb[4].mxu0 }
 0x170   : > { %v1916_v46 = vpop.f32.mrb[4].mxu1  ;;  %v1871_v61 = vpop.f32.mrb[5].mxu0 }
 0x171   : > { %v1917_v49 = vpop.f32.mrb[5].mxu1  ;;  %v1872_v16 = vadd.f32 %v1871_v61, %v1870_v60  ;;  %v1873_v62 = vpop.f32.mrb[6].mxu0 }
 0x172   : > { %v1918_v51 = vadd.f32 %v1917_v49, %v1916_v46  ;;  %v1919_v52 = vpop.f32.mrb[6].mxu1  ;;  %v1874_v0 = vpop.f32.mrb[7].mxu0 }
 0x173   : > { %v1920_v55 = vpop.f32.mrb[7].mxu1  ;;  %v1875_v4 = vadd.f32 %v1874_v0, %v1873_v62  ;;  %v2780_v49 = vpop.permute.xlu0 %1394 }
 0x174   : > { %v1921_v56 = vadd.f32 %v1920_v55, %v1919_v52  ;;  %v2766_v3 = vadd.f32 %v1918_v51, %v1872_v16 }
 0x176   : > { %v2768_v7 = vadd.f32 %v1921_v56, %v1875_v4 }
 0x177   : > { %v1876_v8 = vpop.f32.mrb[8].mxu0 }
 0x178   : > { %v1922_v59 = vpop.f32.mrb[8].mxu1  ;;  %v1877_v9 = vpop.f32.mrb[9].mxu0 }
 0x179   : > { %v1923_v63 = vpop.f32.mrb[9].mxu1  ;;  %v1878_v11 = vadd.f32 %v1877_v9, %v1876_v8  ;;  %v1879_v12 = vpop.f32.mrb[10].mxu0 }
 0x17a   : > { %v1924_v1 = vadd.f32 %v1923_v63, %v1922_v59  ;;  %v1925_v2 = vpop.f32.mrb[10].mxu1  ;;  %v1880_v14 = vpop.f32.mrb[11].mxu0 }
 0x17b   : > { %v1926_v5 = vpop.f32.mrb[11].mxu1  ;;  %v1881_v42 = vadd.f32 %v1880_v14, %v1879_v12 }
 0x17c   : > { %v1927_v6 = vadd.f32 %v1926_v5, %v1925_v2  ;;  %v2770_v17 = vadd.f32 %v1924_v1, %v1878_v11  ;;  %v2786_v1 = vpop.permute.xlu0 %1399 }
 0x17e   : > { %v2772_v20 = vadd.f32 %v1927_v6, %v1881_v42  ;;  %v2790_v6 = vpop.permute.xlu1 %1404 }
 0x17f   : > { %v1882_v21 = vpop.f32.mrb[12].mxu0 }
 0x180   : > { %v1928_v10 = vpop.f32.mrb[12].mxu1  ;;  %v1883_v22 = vpop.f32.mrb[13].mxu0 }
 0x181   : > { %v1929_v13 = vpop.f32.mrb[13].mxu1  ;;  %v1884_v23 = vadd.f32 %v1883_v22, %v1882_v21  ;;  %v1885_v24 = vpop.f32.mrb[14].mxu0 }
 0x182   : > { %v1930_v15 = vadd.f32 %v1929_v13, %v1928_v10  ;;  %v1931_v18 = vpop.f32.mrb[14].mxu1  ;;  %v1886_v26 = vpop.f32.mrb[15].mxu0 }
 0x183   : > { %v1932_v34 = vpop.f32.mrb[15].mxu1  ;;  %v1887_v58 = vadd.f32 %v1886_v26, %v1885_v24 }
 0x184   : > { %v1933_v19 = vadd.f32 %v1932_v34, %v1931_v18  ;;  %v2774_v36 = vadd.f32 %v1930_v15, %v1884_v23  ;;  %v2800_v23 = vpop.permute.xlu1 %1409 }
 0x186   : > { %v2776_v31 = vadd.f32 %v1933_v19, %v1887_v58 }
 0x187   : > { %v1888_v32 = vpop.f32.mrb[16].mxu0 }
 0x188   : > { %v1934_v25 = vpop.f32.mrb[16].mxu1  ;;  %v1889_v33 = vpop.f32.mrb[17].mxu0 }
 0x189   : > { %v1935_v27 = vpop.f32.mrb[17].mxu1  ;;  %v1890_v37 = vadd.f32 %v1889_v33, %v1888_v32  ;;  %v1891_v35 = vpop.f32.mrb[18].mxu0 }
 0x18a   : > { %v1936_v28 = vadd.f32 %v1935_v27, %v1934_v25  ;;  %v1937_v29 = vpop.f32.mrb[18].mxu1  ;;  %v1892_v39 = vpop.f32.mrb[19].mxu0 }
 0x18b   : > { %v1938_v30 = vpop.f32.mrb[19].mxu1 }
 0x18c   : > { %v2778_v41 = vadd.f32 %v1936_v28, %v1890_v37 }
 0x18f   : > { %v1956_v47 = vpop.f32.mrb[20].mxu0 }
 0x190   : > { %v2002_v38 = vpop.f32.mrb[20].mxu1  ;;  %v1957_v48 = vpop.f32.mrb[21].mxu0 }
 0x191   : > { %v2003_v40 = vpop.f32.mrb[21].mxu1  ;;  %v1958_v50 = vadd.f32 %v1957_v48, %v1956_v47  ;;  %v1959_v51 = vpop.f32.mrb[22].mxu0 }
 0x192   : > { %v2004_v43 = vadd.f32 %v2003_v40, %v2002_v38  ;;  %v2005_v44 = vpop.f32.mrb[22].mxu1  ;;  %v1960_v54 = vpop.f32.mrb[23].mxu0 }
 0x193   : > { %v2006_v45 = vpop.f32.mrb[23].mxu1  ;;  %v1129_v56 = vadd.f32 %v1958_v50, %v2762_v53  ;;  %v1961_v60 = vadd.f32 %v1960_v54, %v1959_v51  ;;  %v1420_v51 = vpop.permute.xlu1 %1419 }
 0x194   : > { %v2007_v46 = vadd.f32 %v2006_v45, %v2005_v44 }
 0x195   : > { %v2783_v62 = vadd.f32 %v2004_v43, %v1129_v56  ;;  %v1130_v63 = vadd.f32 %v1961_v60, %v2764_v57 }
 0x197   : > { %v2788_v2 = vadd.f32 %v2007_v46, %v1130_v63  ;;  %v1962_v4 = vpop.f32.mrb[24].mxu0  ;;  %v1437_v53 = vmul.f32 %v2780_v49, %v2783_v62  ;;  %v1415_v46 = vpop.permute.xlu0 %1414 }
 0x198   : > { %v2008_v52 = vpop.f32.mrb[24].mxu1  ;;  %v1963_v5 = vpop.f32.mrb[25].mxu0 }
 0x199   : > { %v2009_v55 = vpop.f32.mrb[25].mxu1  ;;  %v1438_v8 = vmul.f32 %v2786_v1, %v2788_v2  ;;  %v1964_v9 = vadd.f32 %v1963_v5, %v1962_v4  ;;  %v1965_v10 = vpop.f32.mrb[26].mxu0 }
 0x19a   : > { %v2010_v61 = vadd.f32 %v2009_v55, %v2008_v52  ;;  %v2011_v59 = vpop.f32.mrb[26].mxu1  ;;  %v1966_v12 = vpop.f32.mrb[27].mxu0 }
 0x19b   : > { %v2012_v16 = vpop.f32.mrb[27].mxu1  ;;  %v1446_v13 = vadd.f32 %v1438_v8, %v1437_v53  ;;  %v1131_v14 = vadd.f32 %v1964_v9, %v2766_v3  ;;  %v1967_v15 = vadd.f32 %v1966_v12, %v1965_v10  ;;  %v1425_v9 = vpop.permute.xlu0 %1424 }
 0x19c   : > { %v2013_v0 = vadd.f32 %v2012_v16, %v2011_v59 }
 0x19d   : > { %v2797_v19 = vadd.f32 %v2010_v61, %v1131_v14  ;;  %v1132_v21 = vadd.f32 %v1967_v15, %v2768_v7 }
 0x19f   : > { %v2802_v24 = vadd.f32 %v2013_v0, %v1132_v21  ;;  %v1439_v25 = vmul.f32 %v2790_v6, %v2797_v19  ;;  %v1968_v26 = vpop.f32.mrb[28].mxu0 }
 0x1a0   : > { %v2014_v11 = vpop.f32.mrb[28].mxu1  ;;  %v1969_v27 = vpop.f32.mrb[29].mxu0 }
 0x1a1   : > { %v2015_v57 = vpop.f32.mrb[29].mxu1  ;;  %v1447_v58 = vadd.f32 %v1446_v13, %v1439_v25  ;;  %v1440_v3 = vmul.f32 %v2800_v23, %v2802_v24  ;;  %v1970_v28 = vadd.f32 %v1969_v27, %v1968_v26  ;;  %v1971_v29 = vpop.f32.mrb[30].mxu0 }
 0x1a2   : > { %v2016_v18 = vadd.f32 %v2015_v57, %v2014_v11  ;;  %v2017_v42 = vpop.f32.mrb[30].mxu1  ;;  %v1972_v32 = vpop.f32.mrb[31].mxu0 }
 0x1a3   : > { %v2018_v34 = vpop.f32.mrb[31].mxu1  ;;  %v1448_v7 = vadd.f32 %v1447_v58, %v1440_v3  ;;  %v1133_v37 = vadd.f32 %v1970_v28, %v2770_v17  ;;  %v1973_v35 = vadd.f32 %v1972_v32, %v1971_v29  ;;  %v1430_v57 = vpop.permute.xlu1 %1429 }
 0x1a4   : > { %v2019_v22 = vadd.f32 %v2018_v34, %v2017_v42  ;;  %v1435_v25 = vpop.permute.xlu0 %1434 }
 0x1a5   : > { %v1378_v43 = vadd.f32 %v2016_v18, %v1133_v37  ;;  %v1134_v44 = vadd.f32 %v1973_v35, %v2772_v20 }
 0x1a7   : > { %v1441_v47 = vmul.f32 %v1415_v46, %v1378_v43  ;;  %v1379_v48 = vadd.f32 %v2019_v22, %v1134_v44  ;;  %v1974_v50 = vpop.f32.mrb[32].mxu0 }
 0x1a8   : > { %v2020_v30 = vpop.f32.mrb[32].mxu1  ;;  %v1975_v52 = vpop.f32.mrb[33].mxu0 }
 0x1a9   : > { %v2021_v33 = vpop.f32.mrb[33].mxu1  ;;  %v1442_v54 = vmul.f32 %v1420_v51, %v1379_v48  ;;  %v1449_v55 = vadd.f32 %v1448_v7, %v1441_v47  ;;  %v1976_v56 = vadd.f32 %v1975_v52, %v1974_v50  ;;  %v1977_v60 = vpop.f32.mrb[34].mxu0 }
 0x1aa   : > { %v2022_v38 = vadd.f32 %v2021_v33, %v2020_v30  ;;  %v2023_v39 = vpop.f32.mrb[34].mxu1  ;;  %v1978_v17 = vpop.f32.mrb[35].mxu0 }
 0x1ab   : > { %v2024_v40 = vpop.f32.mrb[35].mxu1  ;;  %v1450_v16 = vadd.f32 %v1449_v55, %v1442_v54  ;;  %v1135_v63 = vadd.f32 %v1976_v56, %v2774_v36  ;;  %v1979_v0 = vadd.f32 %v1978_v17, %v1977_v60 }
 0x1ac   : > { %v2025_v45 = vadd.f32 %v2024_v40, %v2023_v39 }
 0x1ad   : > { %v1380_v53 = vadd.f32 %v2022_v38, %v1135_v63  ;;  %v1136_v8 = vadd.f32 %v1979_v0, %v2776_v31 }
 0x1af   : > { %v1443_v10 = vmul.f32 %v1425_v9, %v1380_v53  ;;  %v1381_v11 = vadd.f32 %v2025_v45, %v1136_v8  ;;  %v1980_v12 = vpop.f32.mrb[36].mxu0 }
 0x1b0   : > { %v2026_v61 = vpop.f32.mrb[36].mxu1  ;;  %v1981_v13 = vpop.f32.mrb[37].mxu0 }
 0x1b1   : > { %v2027_v59 = vpop.f32.mrb[37].mxu1  ;;  %v1451_v14 = vadd.f32 %v1450_v16, %v1443_v10  ;;  %v1444_v15 = vmul.f32 %v1430_v57, %v1381_v11  ;;  %v1982_v18 = vadd.f32 %v1981_v13, %v1980_v12  ;;  %v1983_v42 = vpop.f32.mrb[38].mxu0 }
 0x1b2   : > { %v2028_v4 = vadd.f32 %v2027_v59, %v2026_v61  ;;  %v2029_v20 = vpop.f32.mrb[38].mxu1  ;;  %v1984_v34 = vpop.f32.mrb[39].mxu0 }
 0x1b3   : > { %v2030_v5 = vpop.f32.mrb[39].mxu1  ;;  %v1452_v21 = vadd.f32 %v1451_v14, %v1444_v15  ;;  %v1137_v36 = vadd.f32 %v1982_v18, %v2778_v41 }
 0x1b5   : > { %v1382_v22 = vadd.f32 %v2028_v4, %v1137_v36 }
 0x1b7   : > { %v1445_v26 = vmul.f32 %v1435_v25, %v1382_v22 }
 0x1b9   : > { %v1453_v27 = vadd.f32 %v1452_v21, %v1445_v26 }
 0x1bb   : > { %v1454_v58 = vrot.slane %v1453_v27, 4 }
 0x1bd   : > { %v1455_v31 = vadd.f32 %v1454_v58, %v1453_v27 }
 0x1bf   : > { %v1456_v3 = vrot.slane %v1455_v31, 2 }
 0x1c1   : > { %v1457_v28 = vadd.f32 %v1456_v3, %v1455_v31 }
 0x1c3   : > { %v1458_v29 = vrot.slane %v1457_v28, 1 }
 0x1c5   : > { %v1459_v30 = vadd.f32 %v1458_v29, %v1457_v28 }
 0x1c7   : > { %v1460_v32 = vmul.f32 0.015625, %v1459_v30 }
 0x1c9   : > { %v1461_v33 = vsub.f32 %v2783_v62, %v1460_v32  ;;  %v1462_v7 = vsub.f32 %v2788_v2, %v1460_v32  ;;  %v1463_v37 = vsub.f32 %v2797_v19, %v1460_v32  ;;  %v1464_v35 = vsub.f32 %v2802_v24, %v1460_v32 }
 0x1ca   : > { %v1465_v41 = vsub.f32 %v1378_v43, %v1460_v32  ;;  %v1466_v38 = vsub.f32 %v1379_v48, %v1460_v32  ;;  %v1467_v39 = vsub.f32 %v1380_v53, %v1460_v32  ;;  %v1468_v40 = vsub.f32 %v1381_v11, %v1460_v32 }
 0x1cb   : > { %v1469_v44 = vsub.f32 %v1382_v22, %v1460_v32  ;;  %v1470_v45 = vmul.f32 %v1461_v33, %v2780_v49  ;;  %v1471_v47 = vmul.f32 %v1462_v7, %v2786_v1  ;;  %v1472_v50 = vmul.f32 %v1463_v37, %v2790_v6 }
 0x1cc   : > { %v1473_v52 = vmul.f32 %v1464_v35, %v2800_v23  ;;  %v1474_v2 = vmul.f32 %v1465_v41, %v1415_v46  ;;  %v1475_v56 = vmul.f32 %v1466_v38, %v1420_v51  ;;  %v1476_v48 = vmul.f32 %v1467_v39, %v1425_v9 }
 0x1cd   : > { %v1479_v62 = vmul.f32 %v1470_v45, %v1470_v45  ;;  %v1480_v54 = vmul.f32 %v1471_v47, %v1471_v47  ;;  %v1481_v55 = vmul.f32 %v1472_v50, %v1472_v50  ;;  %v1477_v17 = vmul.f32 %v1468_v40, %v1430_v57 }
 0x1ce   : > { %v1482_v24 = vmul.f32 %v1473_v52, %v1473_v52  ;;  %v1483_v60 = vmul.f32 %v1474_v2, %v1474_v2  ;;  %v1484_v59 = vmul.f32 %v1475_v56, %v1475_v56  ;;  %v1478_v16 = vmul.f32 %v1469_v44, %v1435_v25 }
 0x1cf   : > { %v1488_v19 = vadd.f32 %v1480_v54, %v1479_v62  ;;  %v1485_v1 = vmul.f32 %v1476_v48, %v1476_v48  ;;  %v1486_v63 = vmul.f32 %v1477_v17, %v1477_v17 }
 0x1d0   : > { %v1487_v0 = vmul.f32 %v1478_v16, %v1478_v16 }
 0x1d1   : > { %v1489_v43 = vadd.f32 %v1488_v19, %v1481_v55 }
 0x1d3   : > { %v1490_v61 = vadd.f32 %v1489_v43, %v1482_v24 }
 0x1d5   : > { %v1491_v49 = vadd.f32 %v1490_v61, %v1483_v60 }
 0x1d7   : > { %v1492_v6 = vadd.f32 %v1491_v49, %v1484_v59 }
 0x1d9   : > { %v1493_v23 = vadd.f32 %v1492_v6, %v1485_v1 }
 0x1db   : > { %v1494_v4 = vadd.f32 %v1493_v23, %v1486_v63 }
 0x1dd   : > { %v1495_v46 = vadd.f32 %v1494_v4, %v1487_v0 }
 0x1df   : > { %v1496_v20 = vrot.slane %v1495_v46, 4 }
 0x1e1   : > { %v1497_v5 = vadd.f32 %v1496_v20, %v1495_v46 }
 0x1e3   : > { %v1498_v51 = vrot.slane %v1497_v5, 2 }
 0x1e5   : > { %v1499_v53 = vadd.f32 %v1498_v51, %v1497_v5 }
 0x1e7   : > { %v1500_v8 = vrot.slane %v1499_v53, 1 }
 0x1e9   : > { %v1501_v9 = vadd.f32 %v1500_v8, %v1499_v53 }
 0x1eb   : > { %v1502_v10 = vmul.f32 0.015625, %v1501_v9 }
 0x1ed   : > { %v1503_v11 = vadd.f32 1e-05, %v1502_v10 }
 0x1ef   : > { %2218 = vrsqrt.f32 %v1503_v11 }
 0x1f9   : > { %v2219_v12 = vpop.eup %2218 }
 0x1fa   : > { %v1505_v57 = vmul.f32 %v2219_v12, %v1461_v33  ;;  %v1506_v13 = vmul.f32 %v2219_v12, %v1462_v7  ;;  %v1507_v14 = vmul.f32 %v2219_v12, %v1463_v37  ;;  %v1508_v15 = vmul.f32 %v2219_v12, %v1464_v35 }
 0x1fb   : > { %v1509_v18 = vmul.f32 %v2219_v12, %v1465_v41  ;;  %v1510_v42 = vmul.f32 %v2219_v12, %v1466_v38  ;;  %v1511_v34 = vmul.f32 %v2219_v12, %v1467_v39  ;;  %v1512_v21 = vmul.f32 %v2219_v12, %v1468_v40 }
 0x1fc   : > { %v1513_v36 = vmul.f32 %v2219_v12, %v1469_v44  ;;  %vm1514_vm2 = vcmp.ge.f32.partialorder %v1505_v57, 0.0  ;;  %vm1515_vm3 = vcmp.ge.f32.partialorder %v1506_v13, 0.0  ;;  %vm1516_vm4 = vcmp.ge.f32.partialorder %v1507_v14, 0.0 }
 0x1fd   : > { %vm1517_vm5 = vcmp.ge.f32.partialorder %v1508_v15, 0.0  ;;  %vm1518_vm6 = vcmp.ge.f32.partialorder %v1509_v18, 0.0  ;;  %vm1519_vm7 = vcmp.ge.f32.partialorder %v1510_v42, 0.0  ;;  %vm1520_vm8 = vcmp.ge.f32.partialorder %v1511_v34, 0.0 }
 0x1fe   : > { %vm1521_vm9 = vcmp.ge.f32.partialorder %v1512_v21, 0.0  ;;  %vm1522_vm10 = vcmp.ge.f32.partialorder %v1513_v36, 0.0  ;;  %v1523_v22 = vmul.f32 0.2, %v1505_v57  ;;  %v1524_v25 = vmul.f32 0.2, %v1506_v13 }
 0x1ff   : > { %v1525_v26 = vmul.f32 0.2, %v1507_v14  ;;  %v1526_v27 = vmul.f32 0.2, %v1508_v15  ;;  %v1527_v58 = vmul.f32 0.2, %v1509_v18 }
 0x200   : > { %v1528_v31 = vmul.f32 0.2, %v1510_v42  ;;  %v1529_v3 = vmul.f32 0.2, %v1511_v34  ;;  %v1530_v28 = vmul.f32 0.2, %v1512_v21  ;;  %v1532_v29 = vsel %vm1514_vm2, %v1505_v57, %v1523_v22 }
 0x201   : > { %v1531_v30 = vmul.f32 0.2, %v1513_v36  ;;  %v1533_v32 = vsel %vm1515_vm3, %v1506_v13, %v1524_v25  ;;  %v1534_v33 = vsel %vm1516_vm4, %v1507_v14, %v1525_v26  ;;  %v1535_v7 = vsel %vm1517_vm5, %v1508_v15, %v1526_v27 }
 0x202   : > { %v1536_v37 = vsel %vm1518_vm6, %v1509_v18, %v1527_v58  ;;  %v1537_v35 = vsel %vm1519_vm7, %v1510_v42, %v1528_v31  ;;  %v1538_v41 = vsel %vm1520_vm8, %v1511_v34, %v1529_v3  ;;  %v1539_v38 = vsel %vm1521_vm9, %v1512_v21, %v1530_v28 }
 0x203   : > { %v1540_v39 = vsel %vm1522_vm10, %v1513_v36, %v1531_v30  ;;  %v1833_v40 = vpack.c.bf16 %v1535_v7, %v1534_v33  ;;  %v1838_v44 = vpack.c.bf16 %v1537_v35, %v1536_v37  ;;  %v1843_v45 = vpack.c.bf16 %v1539_v38, %v1538_v41 }
 0x204   : > { %v1824_v47 = vpack.c.bf16 %v1540_v39, %v1540_v39  ;;  %v1828_v50 = vpack.c.bf16 %v1533_v32, %v1532_v29 }
 0x205   : > { %1847 = vst [vmem:[%s2823_s20 + $0x18] sm:$0xff] %v1843_v45   ;;  %1845 = vst [vmem:[%s2823_s20 + $0x8] sm:$0xff] %v1833_v40  }
 0x206   : > { %1846 = vst [vmem:[%s2823_s20 + $0x10] sm:$0xff] %v1838_v44   ;;  %1586 = vst [vmem:[%s2823_s20 + $0x20] sm:$0xf] %v1824_v47 }
 0x207   : > { %1829 = vst [vmem:[%s2823_s20] sm:$0xff] %v1828_v50  }
 0x208   : > { %2319 = shalt.err (!%p2316_p6)
}
 0x209   : > { %s2320_s28 = scalar_lea.hbm %s2838_s27, 576  ;;  %s2324_s19 = scalar_lea.hbm %s2897_s3, 1152 }
 0x20a   : > { %p2321_p12 = scmp.ne.s32.totalorder %s2838_s27, %s2320_s28  ;;  %p2325_p11 = scmp.lt.u32.totalorder %s2838_s27, %s2897_s3 }
 0x20b   : > { %p2326_p3 = scmp.lt.u32.totalorder %s2324_s19, %s2320_s28  ;;  %p2328_p2 = scmp.lt.u32.totalorder %s2320_s28, %s2838_s27 }
 0x20c   : > { %p2322_p9 = pnand %p2321_p12, %p2917_p7 }
 0x20d   : > { %p2327_p4 = por %p2326_p3, %p2325_p11 }
 0x20e   : > { %p2323_p13 = pneg %p2322_p9 }
 0x20f   : > { %p2329_p10 = por %p2328_p2, %p2327_p4 }
 0x211   : > { %p2330_p8 = pnand %p2329_p10, %p2323_p13 }
 0x213   : > { %2333 = shalt.err (!%p2330_p8)
}
 0x214   : > { %s2407_s21 = smov 64   ;;  %s2408_s20 = smov 4  }
 0x215   : > { %2047 = dma.vmem_to_hbm [thread:$0]  (%p2917_p7), %s2840_s25, 576, %s2838_s27, %s1588_s29, %s2407_s21, %s2407_s21, %s2408_s20  }
 0x216 PF: > { %s1617_s15 = sand.u32 1, %s2376_s12   ;;  %p2918_p0 = scmp.ne.s32.totalorder %s2905_s23, 0 }
 0x217   : > { %p2919_p5 = scmp.ge.s32.totalorder %s2396_s17, 2  ;;  %s1618_s6 = scalar_lea.sflag [#allocation4], %s1617_s15 }
 0x219   : > { %p2061_p1 = pnand %p2919_p5, %p2918_p0 }
 0x21b   : > { %2371 = dma.done.wait (!%p2061_p1), %s1618_s6, 576  }
 0x21c   : > { %2373 = vsyncadd (!%p2061_p1), %s1618_s6, 4294966720  ;;  %s18_s17 = sadd.s32 1, %s2396_s17   ;;  %s2920_s12 = smov %s2380_s13 }
 0x21d   : > { %p15_p6 = scmp.ge.s32.totalorder %s18_s17, 4   ;;  %s2921_s13 = smov %s2384_s14 }
 0x21e   : > { %s2922_s14 = smov %s2625_s7  ;;  %s2923_s15 = smov %s2392_s16 }
 0x21f   : > { %s2924_s16 = smov %s2926_s5  ;;  %17 = sbr.rel (!%p15_p6) target bundleno = 6 (0x6), region = 88 }
 0x226   :  { %1623 = vsyncpa [#allocation3], 1 }
 0x227   :  { %1625 = vsyncpa [#allocation3 + $0x1], 1 }
 0x228   :  { %1626 = vsyncpa [#allocation6], 1 }
 0x229   :  { %1627 = vsyncpa [#allocation4], 1 }
 0x22a   :  { %1629 = vsyncpa [#allocation4 + $0x1], 1 }

// kernel: discriminator_forward.7
= control target key start
LH: loop header
LB: loop body
LE: loop exit
PB: predicated region body
PF: predicated region fallthrough
CT: control target
= control target key end

     0   :  { %s3951_s0 = inlined_call_operand.hbm [shape: bf16[4,512,256], index: 0, kind: input, shape index: {}]   ;;  %s3952_s1 = inlined_call_operand.hbm [shape: f32[20,1], index: 1, kind: input, shape index: {}]   ;;  %s3953_s2 = inlined_call_operand.hbm [shape: bf16[2,30,512], index: 2, kind: input, shape index: {}]   ;;  %s3954_s3 = inlined_call_operand.hbm [shape: bf16[2,20,256], index: 3, kind: output, shape index: {}]  }
   0x1   :  { %3969 = sst [smem:[#allocation18_spill]] %s3951_s0 }
   0x2   :  { %3970 = sst [smem:[#allocation19_spill]] %s3952_s1 }
   0x3   :  { %3971 = sst [smem:[#allocation20_spill]] %s3954_s3 }
   0x4   :  { %8 = vsyncpa [#allocation3], 0 }
   0x5   :  { %10 = vsyncpa [#allocation3 + $0x1], 0 }
   0x6   :  { %11 = vsyncpa [#allocation6], 0 }
   0x7   :  { %12 = vsyncpa [#allocation4], 0 }
   0x8   :  { %14 = vsyncpa [#allocation4 + $0x1], 0  ;;  %s3344_s12 = smov 0   ;;  %s3346_s13 = smov 0  }
   0x9   :  { %s3348_s14 = smov 0   ;;  %s3350_s15 = smov 0  }
   0xa   :  { %s3352_s16 = smov 0   ;;  %s3354_s17 = smov 0  }
   0xb   :  { %s3356_s18 = smov 0   ;;  %s3358_s19 = smov 0  }
   0xc   :  { %s3360_s20 = smov 0   ;;  %s3362_s21 = smov 0  }
   0xd   :  { %s3364_s22 = smov 0   ;;  %s3366_s23 = smov 0  }
   0xe   :  { %s3368_s24 = smov 0   ;;  %s3370_s25 = smov 0  }
   0xf LB: > { %3972 = sst [smem:[#allocation13_spill]] %s3288_s20  ;;  %s29_s26 = sadd.s32 1, %s3300_s23  ;;  %s3308_s25 = sphi %s3370_s25, %s20_s25   ;;  %s3304_s24 = sphi %s3368_s24, %s4020_s24   ;;  %s3300_s23 = sphi %s3366_s23, %s4010_s23   ;;  %s3296_s22 = sphi %s3364_s22, %s4019_s22   ;;  %s3292_s21 = sphi %s3362_s21, %s4009_s21   ;;  %s3288_s20 = sphi %s3360_s20, %s4008_s20   ;;  %s3284_s19 = sphi %s3358_s19, %s4018_s19   ;;  %s3280_s18 = sphi %s3356_s18, %s4017_s18   ;;  %s3276_s17 = sphi %s3354_s17, %s4016_s17   ;;  %s3272_s16 = sphi %s3352_s16, %s4015_s16   ;;  %s3268_s15 = sphi %s3350_s15, %s4014_s15   ;;  %s3264_s14 = sphi %s3348_s14, %s4013_s14   ;;  %s3260_s13 = sphi %s3346_s13, %s4012_s13   ;;  %s3256_s12 = sphi %s3344_s12, %s4011_s12  }
  0x10   : > { %3973 = sst [smem:[#allocation14_spill]] %s3300_s23  ;;  %s39_s27 = sadd.s32 1, %s3288_s20 }
  0x11   : > { %p3416_p0 = scmp.ge.s32.totalorder %s29_s26, 2  ;;  %p46_p1 = scmp.ne.s32.totalorder %s3288_s20, %s3284_s19 }
  0x12   : > { %p3958_p2 = scmp.eq.s32.totalorder %s3308_s25, 0  ;;  %p3957_p4 = scmp.lt.s32.totalorder %s3308_s25, 4 }
  0x13   : > { %s3974_s28 = scalar_select %p3416_p0, 1, 0 }
  0x14   : > { %s4022_s26 = smov (%p3416_p0, %s29_s26), 0  ;;  %p48_p3 = por %p3958_p2, %p46_p1 }
  0x15   : > { %3975 = sst [smem:[#allocation15_spill]] %s4022_s26  ;;  %s3431_s29 = ssub.s32 %s3300_s23, %s4022_s26 }
  0x16   : > { %p37_p5 = scmp.eq.s32.totalorder %s3431_s29, 0  ;;  %s164_s30 = sand.u32 1, %s3308_s25  }
  0x17   : > { %s166_s4 = sand.u32 1, %s3288_s20   ;;  %s2161_s7 = sshll.u32 %s3300_s23, 6 }
  0x18   : > { %s3438_s5 = scalar_select %p37_p5, %s3288_s20, %s39_s27  }
  0x19   : > { %s2160_s6 = sshll.u32 %s166_s4, 10  ;;  %s3977_s0 = sld [smem:[#allocation18_spill]] }
  0x1a   : > { %3976 = sst [smem:[#allocation16_spill]] %s3438_s5  ;;  %s168_s11 = scalar_lea.vmem [#allocation2], %s2160_s6 }
  0x1b   : > { %s174_s26 = sshll.u32 %s168_s11, 4  ;;  %p3448_p6 = pnand %p3957_p4, %p48_p3  ;;  %s3452_s26 = int_to_ptr.vmem [resolvable:$true] %s174_s26 }
  0x1c   : > { %s3454_s27 = scalar_lea.sflag [#allocation3], %s164_s30 }
  0x1d   : > { %p3068_p8 = pneg %p3448_p6 }
  0x1f   : > { %s3444_s10 = scalar_lea.hbm %s3977_s0, %s2161_s7  ;;  %s3071_s8 = scalar_lea.hbm %s3977_s0, 32768 }
  0x20   : > { %s3066_s4 = scalar_lea.hbm %s3444_s10, 16384  ;;  %p3072_p11 = scmp.lt.u32.totalorder %s3444_s10, %s3977_s0 }
  0x21   : > { %p3067_p7 = scmp.ne.s32.totalorder %s3444_s10, %s3066_s4  ;;  %p3073_p12 = scmp.lt.u32.totalorder %s3071_s8, %s3066_s4 }
  0x22   : > { %p3075_p1 = scmp.lt.u32.totalorder %s3066_s4, %s3444_s10 }
  0x23   : > { %p3069_p9 = pnand %p3068_p8, %p3067_p7  ;;  %p3074_p13 = por %p3073_p12, %p3072_p11 }
  0x25   : > { %p3070_p10 = pneg %p3069_p9  ;;  %p3076_p3 = por %p3075_p1, %p3074_p13 }
  0x27   : > { %p3077_p5 = pnand %p3076_p3, %p3070_p10 }
  0x29   : > { %3080 = shalt.err (!%p3077_p5)
}
  0x2a   : > { %s3081_s30 = scalar_lea.vmem %s3452_s26, 16384  ;;  %s3310_s6 = smov [#allocation2]  }
  0x2b   : > { %p3082_p7 = scmp.ne.s32.totalorder %s3452_s26, %s3081_s30  ;;  %s3086_s7 = sshll.u32 %s3310_s6, 4  ;;  %s3087_s7 = int_to_ptr.vmem [resolvable:$false] %s3086_s7 }
  0x2c   : > { %s3088_s9 = scalar_lea.vmem %s3087_s7, 32768  ;;  %p3089_p2 = scmp.lt.s32.totalorder %s3452_s26, %s3087_s7 }
  0x2d   : > { %p3084_p9 = pnand %p3082_p7, %p3068_p8  ;;  %p3090_p11 = scmp.lt.s32.totalorder %s3088_s9, %s3081_s30 }
  0x2f   : > { %p3085_p4 = pneg %p3084_p9  ;;  %p3091_p12 = por %p3090_p11, %p3089_p2 }
  0x31   : > { %p3092_p13 = pnand %p3091_p12, %p3085_p4 }
  0x33   : > { %3095 = shalt.err (!%p3092_p13)
}
  0x34   : > { %s3959_s4 = smov 128   ;;  %s3312_s8 = smov 64  }
  0x35   : > { %s3313_s11 = smov 4   ;;  %s3484_s30 = sadd.s32 4294967295, %s3308_s25  }
  0x36   : > { %2771 = dma.hbm_to_vmem [thread:$0]  (!%p3448_p6), %s3444_s10, 16384, %s3452_s26, %s3454_s27, %s3959_s4, %s3312_s8, %s3313_s11  }
  0x37   : > { %s2156_s6 = sadd.s32 4294967294, %s3308_s25   ;;  %p52_p2 = scmp.ne.s32.totalorder %s3284_s19, %s3280_s18 }
  0x38   : > { %p3963_p4 = scmp.eq.s32.totalorder %s3484_s30, 0  ;;  %p99_p8 = scmp.ne.s32.totalorder %s3272_s16, %s3268_s15 }
  0x39   : > { %p124_p6 = scmp.ne.s32.totalorder %s3264_s14, %s3260_s13  ;;  %p125_p3 = scmp.eq.s32.totalorder %s3484_s30, 3 }
  0x3a   : > { %p3495_p10 = por %p3963_p4, %p52_p2  ;;  %p3503_p1 = por %p99_p8, %p3963_p4 }
  0x3b   : > { %p130_p5 = scmp.ne.s32.totalorder %s3260_s13, %s3256_s12  ;;  %p131_p7 = scmp.eq.s32.totalorder %s2156_s6, 3 }
  0x3c   : > { %s3979_s9 = scalar_select %p3495_p10, 1, 0 }
  0x3d   : > { %s3980_s3 = scalar_select %p3503_p1, 1, 0 }
  0x3e   : > { %p3510_p9 = por %p125_p3, %p124_p6  ;;  %p2157_p11 = scmp.ge.s32.totalorder %s3308_s25, 1 }
  0x3f   : > { %p3515_p12 = por %p131_p7, %p130_p5  ;;  %p138_p13 = scmp.lt.s32.totalorder %s3308_s25, 5 }
  0x40   : > { %s3981_s15 = scalar_select %p3510_p9, 1, 0 }
  0x41   : > { %s3982_s18 = scalar_select %p3515_p12, 1, 0 }
  0x42   : > { %p3520_p2 = pnand %p2157_p11, %p138_p13  ;;  %s3314_s10 = smov [#allocation5]  }
  0x43   : > { %3983 = sst [smem:[#allocation17_spill]] %s3982_s18  ;;  %s150_s8 = sshll.u32 %s3314_s10, 4  ;;  %s151_s8 = int_to_ptr.vmem [resolvable:$true] %s150_s8 }
  0x44   : > { %s3984_s26 = scalar_select %p3520_p2, 1, 0 }
  0x45   : > { %p2764_p8 = pneg %p3520_p2  ;;  %s32_s6 = sadd.s32 1, %s3304_s24 }
  0x46   : > { %s3986_s1 = sld [smem:[#allocation19_spill]] }
  0x47   : > { %p3528_p6 = pnand %p2764_p8, %p3963_p4 }
  0x49   : > { %p3098_p7 = pneg %p3528_p6 }
  0x4c   : > { %s3096_s23 = scalar_lea.hbm %s3986_s1, 384 }
  0x4d   : > { %p3097_p5 = scmp.ne.s32.totalorder %s3986_s1, %s3096_s23  ;;  %p3103_p8 = scmp.lt.u32.totalorder %s3096_s23, %s3986_s1 }
  0x4f   : > { %p3099_p11 = pnand %p3098_p7, %p3097_p5 }
  0x51   : > { %p3100_p13 = pneg %p3099_p11 }
  0x53   : > { %p3105_p4 = pnand %p3103_p8, %p3100_p13 }
  0x55   : > { %3108 = shalt.err (!%p3105_p4)
}
  0x56   : > { %s3109_s7 = scalar_lea.vmem %s151_s8, 384  ;;  %p3117_p1 = scmp.lt.s32.totalorder %s151_s8, %s151_s8 }
  0x57   : > { %p3110_p3 = scmp.ne.s32.totalorder %s151_s8, %s3109_s7  ;;  %p3118_p10 = scmp.lt.s32.totalorder %s3109_s7, %s3109_s7 }
  0x59   : > { %p3112_p12 = pnand %p3110_p3, %p3098_p7  ;;  %p3119_p2 = por %p3118_p10, %p3117_p1 }
  0x5b   : > { %p3113_p9 = pneg %p3112_p12 }
  0x5d   : > { %p3120_p0 = pnand %p3119_p2, %p3113_p9 }
  0x5f   : > { %3123 = shalt.err (!%p3120_p0)
}
  0x60   : > { %s3315_s0 = smov 8   ;;  %s3987_s20 = smov 128  }
  0x61   : > { %2767 = dma.hbm_to_vmem [thread:$0]  (!%p3528_p6), %s3986_s1, 384, %s151_s8, [#allocation6], %s3987_s20, %s3987_s20, %s3315_s0  }
  0x62   : > { %p3988_p4 = scmp.ne.s32.totalorder %s3974_s28, 0  ;;  %p3989_p0 = scmp.eq.s32.totalorder %s3308_s25, 0 }
  0x63   : > { %p3990_p10 = scmp.ne.s32.totalorder %s3276_s17, %s3272_s16  ;;  %s186_s7 = sand.u32 1, %s3276_s17  }
  0x64   : > { %s4024_s6 = smov (!%p3988_p4, %s32_s6), %s3304_s24  ;;  %s2162_s18 = sshll.u32 %s186_s7, 6 }
  0x65   : > { %p3562_p1 = por %p3990_p10, %p3989_p0  ;;  %p34_p9 = scmp.ge.s32.totalorder %s4024_s6, 2 }
  0x66   : > { %s2519_s11 = sshll.u32 %s3304_s24, 10  ;;  %s188_s0 = scalar_lea.vmem [#allocation7], %s2162_s18 }
  0x67   : > { %s4026_s6 = smov (%p34_p9, %s4024_s6), 0  ;;  %s3573_s10 = scalar_lea.hbm %s3953_s2, %s2519_s11 }
  0x68   : > { %s195_s20 = sshll.u32 %s188_s0, 4  ;;  %s83_s5 = ssub.s32 %s3304_s24, %s4026_s6  ;;  %s3577_s20 = int_to_ptr.vmem [resolvable:$true] %s195_s20 }
  0x69   : > { %p84_p12 = scmp.eq.s32.totalorder %s83_s5, 0  ;;  %s111_s4 = sor.u32 %s83_s5, %s3431_s29 }
  0x6a   : > { %p112_p2 = scmp.eq.s32.totalorder %s111_s4, 0  ;;  %p3992_p6 = scmp.lt.s32.totalorder %s3308_s25, 4 }
  0x6b   : > { %s3994_s11 = sadd.s32 1, %s3276_s17  ;;  %s3995_s18 = sadd.s32 1, %s3264_s14 }
  0x6c   : > { %p3584_p3 = pnand %p3992_p6, %p3562_p1  ;;  %s3124_s0 = scalar_lea.hbm %s3573_s10, 1024 }
  0x6d   : > { %s3591_s28 = scalar_select %p84_p12, %s3276_s17, %s3994_s11  }
  0x6e   : > { %s3596_s8 = scalar_select %p112_p2, %s3264_s14, %s3995_s18  }
  0x6f   : > { %p3125_p5 = scmp.ne.s32.totalorder %s3573_s10, %s3124_s0  ;;  %p3126_p7 = pneg %p3584_p3 }
  0x70   : > { %s3129_s5 = scalar_lea.hbm %s3953_s2, 2048  ;;  %p3130_p8 = scmp.lt.u32.totalorder %s3573_s10, %s3953_s2 }
  0x71   : > { %p3127_p11 = pnand %p3126_p7, %p3125_p5  ;;  %p3131_p4 = scmp.lt.u32.totalorder %s3129_s5, %s3124_s0 }
  0x72   : > { %p3133_p10 = scmp.lt.u32.totalorder %s3124_s0, %s3573_s10 }
  0x73   : > { %p3128_p13 = pneg %p3127_p11  ;;  %p3132_p0 = por %p3131_p4, %p3130_p8 }
  0x75   : > { %p3134_p1 = por %p3133_p10, %p3132_p0 }
  0x77   : > { %p3135_p9 = pnand %p3134_p1, %p3128_p13 }
  0x79   : > { %3138 = shalt.err (!%p3135_p9)
}
  0x7a   : > { %s3139_s11 = scalar_lea.vmem %s3577_s20, 1024  ;;  %s3316_s18 = smov [#allocation7]  }
  0x7b   : > { %p3140_p12 = scmp.ne.s32.totalorder %s3577_s20, %s3139_s11  ;;  %s3144_s29 = sshll.u32 %s3316_s18, 4  ;;  %s3145_s29 = int_to_ptr.vmem [resolvable:$false] %s3144_s29 }
  0x7c   : > { %s3146_s1 = scalar_lea.vmem %s3145_s29, 2048  ;;  %p3147_p5 = scmp.lt.s32.totalorder %s3577_s20, %s3145_s29 }
  0x7d   : > { %p3142_p2 = pnand %p3140_p12, %p3126_p7  ;;  %p3148_p11 = scmp.lt.s32.totalorder %s3146_s1, %s3139_s11 }
  0x7f   : > { %p3143_p6 = pneg %p3142_p2  ;;  %p3149_p8 = por %p3148_p11, %p3147_p5 }
  0x81   : > { %p3150_p4 = pnand %p3149_p8, %p3143_p6 }
  0x83   : > { %3153 = shalt.err (!%p3150_p4)
}
  0x84   : > { %s3317_s0 = smov 256   ;;  %s3318_s23 = smov 16  }
  0x85   : > { %2774 = dma.hbm_to_vmem [thread:$0]  (!%p3584_p3), %s3573_s10, 1024, %s3577_s20, %s3454_s27, %s3317_s0, %s3317_s0, %s3318_s23  }
  0x86   : > { %p3996_p7 = scmp.ne.s32.totalorder %s3984_s26, 0 }
  0x87   : > { %s209_s5 = sand.u32 (!%p3996_p7), 1, %s3484_s30   ;;  %s211_s4 = sand.u32 (!%p3996_p7), 1, %s3284_s19  }
  0x88   : > { %207 = sbr.rel (%p3996_p7) target bundleno = 590 (0x24e), region = 32  ;;  %s2166_s11 = sshll.u32 (!%p3996_p7), %s211_s4, 10 }
  0x89   : > { %s210_s18 = scalar_lea.sflag (!%p3996_p7), [#allocation3], %s209_s5  ;;  %s3628_s29 = scalar_lea.vmem (!%p3996_p7), [#allocation2], %s2166_s11 }
  0x8a   : > { %p3997_p13 = scmp.ne.s32.totalorder (!%p3996_p7), %s3979_s9, 0 }
  0x8f   : > { %3239 = dma.done.wait (%p3997_p13), %s210_s18, 16384  }
  0x90   : > { %3241 = vsyncadd (%p3997_p13), %s210_s18, 4294950912  ;;  %p3998_p0 = scmp.eq.s32.totalorder %s3484_s30, 0 }
  0x92   : > { %3243 = dma.done.wait (%p3998_p0), [#allocation6], 384   ;;  %p3999_p3 = pmov %p3998_p0 }
  0x93   : > { %s224_s27 = sand.u32 1, %s3272_s16   ;;  %p4000_p10 = scmp.ne.s32.totalorder %s3980_s3, 0 }
  0x94   : > { %3245 = vsyncadd (%p3999_p3), [#allocation6], 4294966912  ;;  %s2168_s26 = sshll.u32 %s224_s27, 6 }
  0x95   : > { %s3639_s10 = scalar_lea.vmem [#allocation7], %s2168_s26 }
  0x96   : > { %3247 = dma.done.wait (%p4000_p10), %s210_s18, 1024  }
  0x97   : > { %3249 = vsyncadd (%p4000_p10), %s210_s18, 4294966272  ;;  %v2908_v0 = vld [vmem:[%s3628_s29 + $0x140] sm:$0xff]   ;;  %v2912_v4 = vld [vmem:[%s3628_s29 + $0x148] sm:$0xff]   ;;  %vm418_vm0 = vsmask.f32 7424  ;;  %v3319_v47 = vmov 0  }
  0x98   : > { %v2909_v1 = vld [vmem:[%s3628_s29 + $0x1c0] sm:$0xff]   ;;  %2528 = vmatprep.subr.bf16.mxu0 %v2908_v0  ;;  %v2913_v5 = vld [vmem:[%s3628_s29 + $0x1c8] sm:$0xff]   ;;  %v2916_v8 = vld [vmem:[%s3628_s29 + $0x150] sm:$0xff]   ;;  %2906 = vset.pattern.permute.xlu0 %v3319_v47  ;;  %vm1186_vm1 = vsmask.f32 5376  ;;  %vm1631_vm2 = vcmask 1044480  }
  0x99   : > { %v2910_v2 = vld [vmem:[%s3628_s29 + $0x100] sm:$0xff]   ;;  %2556 = vmatprep.subr.bf16.mxu1 %v2909_v1  ;;  %v2914_v6 = vld [vmem:[%s3628_s29 + $0x108] sm:$0xff]   ;;  %v2917_v9 = vld [vmem:[%s3628_s29 + $0x1d0] sm:$0xff]   ;;  %2907 = vset.pattern.permute.xlu1 %v3319_v47  ;;  %vm1965_vm3 = vcmask 1043456   ;;  %s251_s30 = sand.u32 1, %s3260_s13   ;;  %s2753_s3 = smul.u32 6, %s3296_s22 }
  0x9a   : > { %v2911_v3 = vld [vmem:[%s3628_s29 + $0x180] sm:$0xff]   ;;  %2529 = vmatpush3.bf16.msra.mxu0 %v2910_v2  ;;  %v2915_v7 = vld [vmem:[%s3628_s29 + $0x188] sm:$0xff]   ;;  %v2918_v10 = vld [vmem:[%s3628_s29 + $0x110] sm:$0xff]   ;;  %s2752_s9 = smul.u32 12, %s251_s30  ;;  %s4001_s23 = sld [smem:[#allocation20_spill]] }
  0x9b   : > { %2557 = vmatpush3.bf16.msra.mxu1 %v2911_v3  ;;  %2530 = vmatprep.subr.bf16.mxu0 %v2912_v4  ;;  %v2919_v11 = vld [vmem:[%s3628_s29 + $0x190] sm:$0xff]   ;;  %v2920_v12 = vld [vmem:[%s3628_s29 + $0x158] sm:$0xff]   ;;  %v2924_v16 = vld [vmem:[%s3628_s29 + $0x160] sm:$0xff]   ;;  %s2036_s20 = sadd.s32 %s3292_s21, %s2753_s3  ;;  %s3875_s11 = scalar_lea.sflag [#allocation4], %s251_s30 }
  0x9c   : > { %2558 = vmatprep.subr.bf16.mxu1 %v2913_v5  ;;  %v2921_v13 = vld [vmem:[%s3628_s29 + $0x1d8] sm:$0xff]   ;;  %v2925_v17 = vld [vmem:[%s3628_s29 + $0x1e0] sm:$0xff]   ;;  %v2928_v20 = vld [vmem:[%s3628_s29 + $0x168] sm:$0xff]   ;;  %s253_s7 = scalar_lea.vmem [#allocation8], %s2752_s9  ;;  %s2516_s0 = sshll.u32 %s2036_s20, 6 }
  0x9d   : > { %v2922_v14 = vld [vmem:[%s3628_s29 + $0x118] sm:$0xff]   ;;  %v2926_v18 = vld [vmem:[%s3628_s29 + $0x120] sm:$0xff]   ;;  %v2929_v21 = vld [vmem:[%s3628_s29 + $0x1e8] sm:$0xff]   ;;  %s2039_s1 = sshll.u32 %s253_s7, 4  ;;  %p4003_p9 = scmp.ne.s32.totalorder %s3981_s15, 0  ;;  %s3868_s1 = int_to_ptr.vmem [resolvable:$true] %s2039_s1 }
  0x9e   : > { %2531 = vmatpush3.bf16.msra.mxu0 %v2914_v6  ;;  %v2923_v15 = vld [vmem:[%s3628_s29 + $0x198] sm:$0xff]   ;;  %v2927_v19 = vld [vmem:[%s3628_s29 + $0x1a0] sm:$0xff]   ;;  %v2930_v22 = vld [vmem:[%s3628_s29 + $0x128] sm:$0xff]   ;;  %s3154_s18 = scalar_lea.vmem %s3868_s1, 192 }
  0x9f   : > { %2559 = vmatpush3.bf16.msra.mxu1 %v2915_v7  ;;  %2532 = vmatprep.subr.bf16.mxu0 %v2916_v8  ;;  %v2931_v23 = vld [vmem:[%s3628_s29 + $0x1a8] sm:$0xff]   ;;  %v2932_v24 = vld [vmem:[%s3628_s29 + $0x170] sm:$0xff]   ;;  %v2936_v28 = vld [vmem:[%s3628_s29 + $0x178] sm:$0xff]   ;;  %p3155_p1 = scmp.ne.s32.totalorder %s3868_s1, %s3154_s18 }
  0xa0   : > { %2560 = vmatprep.subr.bf16.mxu1 %v2917_v9  ;;  %v2933_v25 = vld [vmem:[%s3628_s29 + $0x1f0] sm:$0xff]   ;;  %v2937_v29 = vld [vmem:[%s3628_s29 + $0x1f8] sm:$0xff]   ;;  %v3679_v33 = vld [vmem:[%s3639_s10 + $0x10] sm:$0xff]  ;;  %s4002_s5 = smov %s4001_s23  ;;  %s3873_s4 = scalar_lea.hbm %s4001_s23, %s2516_s0 }
  0xa1   : > { %v2934_v26 = vld [vmem:[%s3628_s29 + $0x130] sm:$0xff]   ;;  %v2938_v30 = vld [vmem:[%s3628_s29 + $0x138] sm:$0xff]   ;;  %v256_v37 = vld [vmem:[%s3639_s10 + $0x8] sm:$0xff]  ;;  %p3156_p12 = pnand %p3155_p1, %p4003_p9 }
  0xa2   : > { %2533 = vmatpush3.bf16.msra.mxu0 %v2918_v10  ;;  %v2935_v27 = vld [vmem:[%s3628_s29 + $0x1b0] sm:$0xff]   ;;  %v2939_v31 = vld [vmem:[%s3628_s29 + $0x1b8] sm:$0xff]   ;;  %v326_v39 = vld [vmem:[%s3639_s10 + $0x28] sm:$0x77] }
  0xa3   : > { %2561 = vmatpush3.bf16.msra.mxu1 %v2919_v11  ;;  %2534 = vmatprep.subr.bf16.mxu0 %v2920_v12  ;;  %v255_v32 = vld [vmem:[%s3639_s10] sm:$0xff]  ;;  %v3687_v38 = vld [vmem:[%s3639_s10 + $0x18] sm:$0xff]  ;;  %v2240_v43 = vcombine.high %v326_v39, %v326_v39  ;;  %v3701_v45 = vcombine.low %v326_v39, %v326_v39  ;;  %v2948_v46 = vld [vmem:[%s3628_s29 + $0x40] sm:$0xff]   ;;  %p3157_p2 = pneg %p3156_p12 }
  0xa4   : > { %2562 = vmatprep.subr.bf16.mxu1 %v2921_v13  ;;  %v325_v34 = vld [vmem:[%s3639_s10 + $0x20] sm:$0x77]  ;;  %v3683_v35 = vcombine.high %v255_v32, %v3679_v33  ;;  %v3691_v40 = vcombine.low %v255_v32, %v3679_v33  ;;  %v3696_v42 = vcombine.high %v256_v37, %v3687_v38  ;;  %v3699_v44 = vcombine.low %v256_v37, %v3687_v38  ;;  %v2949_v60 = vld [vmem:[%s3628_s29 + $0xc0] sm:$0xff]   ;;  %v2952_v11 = vld [vmem:[%s3628_s29 + $0x48] sm:$0xff]  }
  0xa5   : > { %v2238_v36 = vcombine.high %v325_v34, %v325_v34  ;;  %v3693_v41 = vcombine.low %v325_v34, %v325_v34  ;;  %v463_v54 = vshll.u32 %v2240_v43, 16  ;;  %v2950_v1 = vld [vmem:[%s3628_s29] sm:$0xff]   ;;  %v451_v4 = vshll.u32 %v3701_v45, 16  ;;  %v2961_v32 = vld [vmem:[%s3628_s29 + $0xd8] sm:$0xff]   ;;  %v2971_v47 = vld [vmem:[%s3628_s29 + $0xa8] sm:$0xff]  }
  0xa6   : > { %2535 = vmatpush3.bf16.msra.mxu0 %v2922_v14  ;;  %v432_v48 = vshrl.u32 %v3683_v35, 16  ;;  %v434_v49 = vshll.u32 %v3683_v35, 16  ;;  %v420_v51 = vshrl.u32 %v3691_v40, 16  ;;  %v456_v52 = vshrl.u32 %v3696_v42, 16  ;;  %v2951_v8 = vld [vmem:[%s3628_s29 + $0x80] sm:$0xff]   ;;  %v2962_v34 = vld [vmem:[%s3628_s29 + $0x18] sm:$0xff]  }
  0xa7   : > { %2563 = vmatpush3.bf16.msra.mxu1 %v2923_v15  ;;  %2536 = vmatprep.subr.bf16.mxu0 %v2924_v16  ;;  %v439_v50 = vshll.u32 %v2238_v36, 16  ;;  %v458_v53 = vshll.u32 %v3696_v42, 16  ;;  %v422_v55 = vshll.u32 %v3691_v40, 16  ;;  %v427_v58 = vshll.u32 %v3693_v41, 16  ;;  %v2953_v15 = vld [vmem:[%s3628_s29 + $0xc8] sm:$0xff]   ;;  %v2964_v37 = vld [vmem:[%s3628_s29 + $0x60] sm:$0xff]  }
  0xa8   : > { %2564 = vmatprep.subr.bf16.mxu1 %v2925_v17  ;;  %v436_v56 = vrot.slane %v434_v49, 1  ;;  %v444_v59 = vshrl.u32 %v3699_v44, 16  ;;  %v465_v62 = vrot.slane %v463_v54, 1  ;;  %v446_v0 = vshll.u32 %v3699_v44, 16  ;;  %v2954_v17 = vld [vmem:[%s3628_s29 + $0x8] sm:$0xff]   ;;  %v2965_v39 = vld [vmem:[%s3628_s29 + $0xe0] sm:$0xff]  }
  0xa9   : > { %v441_v57 = vrot.slane %v439_v50, 1  ;;  %v460_v61 = vrot.slane %v458_v53, 1  ;;  %v424_v63 = vrot.slane %v422_v55, 1  ;;  %v429_v3 = vrot.slane %v427_v58, 1  ;;  %v2974_v49 = vld [vmem:[%s3628_s29 + $0x30] sm:$0xff]   ;;  %v2978_v53 = vld [vmem:[%s3628_s29 + $0x38] sm:$0xff]  }
  0xaa   : > { %2537 = vmatpush3.bf16.msra.mxu0 %v2926_v18  ;;  %v437_v2 = vor.u32 %v436_v56, %v432_v48  ;;  %v448_v7 = vrot.slane %v446_v0, 1  ;;  %v453_v10 = vrot.slane %v451_v4, 1  ;;  %v470_v16 = vshrl.u32 %v2238_v36, 16  ;;  %v2963_v36 = vld [vmem:[%s3628_s29 + $0x98] sm:$0xff]   ;;  %v2973_v48 = vld [vmem:[%s3628_s29 + $0xf0] sm:$0xff]   ;;  %v2980_v55 = vld [vmem:[%s3628_s29 + $0x240] sm:$0xff]  }
  0xab   : > { %2565 = vmatpush3.bf16.msra.mxu1 %v2927_v19  ;;  %2538 = vmatprep.subr.bf16.mxu0 %v2928_v20  ;;  %v461_v5 = vor.u32 %v460_v61, %v456_v52  ;;  %v425_v6 = vor.u32 %v424_v63, %v420_v51  ;;  %v476_v18 = vshrl.u32 %v2240_v43, 16  ;;  %v2955_v20 = vld [vmem:[%s3628_s29 + $0x88] sm:$0xff]   ;;  %v2967_v43 = vld [vmem:[%s3628_s29 + $0xa0] sm:$0xff]   ;;  %v2975_v50 = vld [vmem:[%s3628_s29 + $0xb0] sm:$0xff]  }
  0xac   : > { %2566 = vmatprep.subr.bf16.mxu1 %v2929_v21  ;;  %v442_v9 = vsel %vm418_vm0, %v437_v2, %v441_v57  ;;  %v449_v14 = vor.u32 %v448_v7, %v444_v59  ;;  %v472_v21 = vor.u32 %v470_v16, %v441_v57  ;;  %v2976_v51 = vld [vmem:[%s3628_s29 + $0x78] sm:$0xff]   ;;  %v2981_v56 = vld [vmem:[%s3628_s29 + $0x2c0] sm:$0xff]   ;;  %v2984_v59 = vld [vmem:[%s3628_s29 + $0x248] sm:$0xff]  }
  0xad   : > { %711 = vmatprep.mubr.bf16.mxu0 %v442_v9  ;;  %v466_v12 = vsel %vm418_vm0, %v461_v5, %v465_v62  ;;  %v430_v13 = vsel %vm418_vm0, %v425_v6, %v429_v3  ;;  %v2977_v52 = vld [vmem:[%s3628_s29 + $0xf8] sm:$0xff]   ;;  %v2982_v57 = vld [vmem:[%s3628_s29 + $0x200] sm:$0xff]   ;;  %v2986_v61 = vld [vmem:[%s3628_s29 + $0x208] sm:$0xff]  }
  0xae   : > { %2539 = vmatpush3.bf16.msra.mxu0 %v2930_v22  ;;  %759 = vmatprep.mubr.bf16.mxu1 %v466_v12  ;;  %v454_v19 = vsel %vm418_vm0, %v449_v14, %v453_v10  ;;  %v467_v22 = vshrl.u32 %v3693_v41, 16  ;;  %v2966_v41 = vld [vmem:[%s3628_s29 + $0x20] sm:$0xff]   ;;  %v2979_v54 = vld [vmem:[%s3628_s29 + $0xb8] sm:$0xff]   ;;  %v2991_v2 = vld [vmem:[%s3628_s29 + $0x2d0] sm:$0xff]  }
  0xaf   : > { %2567 = vmatpush3.bf16.msra.mxu1 %v2931_v23  ;;  %2540 = vmatprep.subr.bf16.mxu0 %v2932_v24  ;;  %v2956_v23 = vld [vmem:[%s3628_s29 + $0x50] sm:$0xff]   ;;  %v478_v24 = vor.u32 %v476_v18, %v465_v62  ;;  %v2983_v58 = vld [vmem:[%s3628_s29 + $0x280] sm:$0xff]   ;;  %v2987_v62 = vld [vmem:[%s3628_s29 + $0x288] sm:$0xff]  }
  0xb0   : > { %2568 = vmatprep.subr.bf16.mxu1 %v2933_v25  ;;  %v473_v25 = vshrl.u32 %v3701_v45, 16  ;;  %v2968_v45 = vld [vmem:[%s3628_s29 + $0x68] sm:$0xff]   ;;  %v259_v63 = vld [vmem:[%s3639_s10 + $0x20] sm:$0x33]  ;;  %v2993_v5 = vld [vmem:[%s3628_s29 + $0x210] sm:$0xff]  }
  0xb1   : > { %v2274_v0 = vcombine.high %v259_v63, %v259_v63  ;;  %v2994_v6 = vld [vmem:[%s3628_s29 + $0x290] sm:$0xff]   ;;  %v2996_v7 = vld [vmem:[%s3628_s29 + $0x258] sm:$0xff]   ;;  %v3001_v12 = vld [vmem:[%s3628_s29 + $0x2e0] sm:$0xff]  }
  0xb2   : > { %2541 = vmatpush3.bf16.msra.mxu0 %v2934_v26  ;;  %v2957_v26 = vld [vmem:[%s3628_s29 + $0xd0] sm:$0xff]   ;;  %v2998_v9 = vld [vmem:[%s3628_s29 + $0x218] sm:$0xff]   ;;  %v3003_v14 = vld [vmem:[%s3628_s29 + $0x2a0] sm:$0xff]  }
  0xb3   : > { %2569 = vmatpush3.bf16.msra.mxu1 %v2935_v27  ;;  %2542 = vmatprep.subr.bf16.mxu0 %v2936_v28  ;;  %v2958_v27 = vld [vmem:[%s3628_s29 + $0x10] sm:$0xff]   ;;  %v469_v28 = vor.u32 %v467_v22, %v429_v3  ;;  %v260_v3 = vld [vmem:[%s3639_s10 + $0x28] sm:$0x33]  ;;  %v3005_v16 = vld [vmem:[%s3628_s29 + $0x2e8] sm:$0xff]  }
  0xb4   : > { %2570 = vmatprep.subr.bf16.mxu1 %v2937_v29  ;;  %v2959_v29 = vld [vmem:[%s3628_s29 + $0x90] sm:$0xff]   ;;  %v2276_v4 = vcombine.high %v260_v3, %v260_v3  ;;  %v3007_v18 = vld [vmem:[%s3628_s29 + $0x2a8] sm:$0xff]  }
  0xb5   : > { %v3011_v22 = vld [vmem:[%s3628_s29 + $0x2b0] sm:$0xff]  }
  0xb6   : > { %2543 = vmatpush3.bf16.msra.mxu0 %v2938_v30  ;;  %v2960_v30 = vld [vmem:[%s3628_s29 + $0x58] sm:$0xff]  }
  0xb7   : > { %2571 = vmatpush3.bf16.msra.mxu1 %v2939_v31  ;;  %2584 = vmatprep.subr.bf16.mxu0 %v2948_v46  ;;  %v475_v31 = vor.u32 %v473_v25, %v453_v10  ;;  %v2970_v46 = vld [vmem:[%s3628_s29 + $0x28] sm:$0xff]   ;;  %v2999_v10 = vld [vmem:[%s3628_s29 + $0x298] sm:$0xff]  }
  0xb8   : > { %2612 = vmatprep.subr.bf16.mxu1 %v2949_v60  ;;  %v2985_v60 = vld [vmem:[%s3628_s29 + $0x2c8] sm:$0xff]   ;;  %v3014_v25 = vld [vmem:[%s3628_s29 + $0x238] sm:$0xff]  }
  0xb9   : > { %712 = vmatmul.mubr.bf16.vlgmr.msra.gmra.mrb[0].mxu0 %v430_v13  ;;  %v3002_v13 = vld [vmem:[%s3628_s29 + $0x220] sm:$0xff]  }
  0xba   : > { %2585 = vmatpush3.bf16.msra.mxu0 %v2950_v1  ;;  %760 = vmatmul.mubr.bf16.vlgmr.msra.gmra.mrb[0].mxu1 %v454_v19  ;;  %v2990_v1 = vld [vmem:[%s3628_s29 + $0x250] sm:$0xff]  }
  0xbb   : > { %2586 = vmatprep.subr.bf16.mxu0 %v2952_v11  ;;  %2613 = vmatpush3.bf16.msra.mxu1 %v2951_v8  ;;  %v2997_v8 = vld [vmem:[%s3628_s29 + $0x2d8] sm:$0xff]   ;;  %v3000_v11 = vld [vmem:[%s3628_s29 + $0x260] sm:$0xff]   ;;  %v3008_v19 = vld [vmem:[%s3628_s29 + $0x270] sm:$0xff]  }
  0xbc   : > { %719 = vmatprep.mubr.bf16.mxu0 %v472_v21  ;;  %2614 = vmatprep.subr.bf16.mxu1 %v2953_v15  ;;  %v3004_v15 = vld [vmem:[%s3628_s29 + $0x268] sm:$0xff]   ;;  %v3010_v21 = vld [vmem:[%s3628_s29 + $0x230] sm:$0xff]  }
  0xbd   : > { %767 = vmatprep.mubr.bf16.mxu1 %v478_v24  ;;  %v3013_v24 = vld [vmem:[%s3628_s29 + $0x2f8] sm:$0xff]  }
  0xbe   : > { %2587 = vmatpush3.bf16.msra.mxu0 %v2954_v17  ;;  %v3006_v17 = vld [vmem:[%s3628_s29 + $0x228] sm:$0xff]  }
  0xbf   : > { %2588 = vmatprep.subr.bf16.mxu0 %v2956_v23  ;;  %2615 = vmatpush3.bf16.msra.mxu1 %v2955_v20  ;;  %v3009_v20 = vld [vmem:[%s3628_s29 + $0x2f0] sm:$0xff]   ;;  %v3012_v23 = vld [vmem:[%s3628_s29 + $0x278] sm:$0xff]  }
  0xc0   : > { %2616 = vmatprep.subr.bf16.mxu1 %v2957_v26  ;;  %v1081_v26 = vld [vmem:[%s3639_s10] sm:$0xcc] }
  0xc1   : > { %720 = vmatmul.mubr.bf16.gmra.mrb[4].mxu0 %v469_v28  ;;  %v2373_v28 = vcombine.low %v1081_v26, %v3679_v33 }
  0xc2   : > { %2589 = vmatpush3.bf16.msra.mxu0 %v2958_v27  ;;  %1017 = vmatprep.mubr.bf16.mxu0 %v3683_v35  ;;  %v2969_v35 = vld [vmem:[%s3628_s29 + $0xe8] sm:$0xff]   ;;  %v3015_v27 = vld [vmem:[%s3628_s29 + $0x2b8] sm:$0xff]  }
  0xc3   : > { %2590 = vmatprep.subr.bf16.mxu0 %v2960_v30  ;;  %768 = vmatmul.mubr.bf16.gmra.mrb[4].mxu1 %v475_v31  ;;  %v3793_v30 = vld [vmem:[%s3639_s10 + $0x24] ss:$16 sps:$4 sm:$0x1f]   ;;  %v1082_v31 = vld [vmem:[%s3639_s10 + $0x8] sm:$0xcc] }
  0xc4   : > { %2617 = vmatpush3.bf16.msra.mxu1 %v2959_v29  ;;  %1065 = vmatprep.mubr.bf16.mxu1 %v3696_v42  ;;  %v2972_v42 = vld [vmem:[%s3628_s29 + $0x70] sm:$0xff]   ;;  %v2374_v29 = vcombine.high %v1081_v26, %v3679_v33  ;;  %v1188_v33 = vshrl.u32 %v2373_v28, 16 }
  0xc5   : > { %2618 = vmatprep.subr.bf16.mxu1 %v2961_v32  ;;  %v3026_v32 = vld [vmem:[%s3628_s29 + $0x340] sm:$0xff]   ;;  %v3035_v26 = vld [vmem:[%s3628_s29 + $0x3d0] sm:$0xff]  }
  0xc6   : > { %2591 = vmatpush3.bf16.msra.mxu0 %v2962_v34  ;;  %v1205_v34 = vshrl.u32 %v2374_v29, 16 }
  0xc7   : > { %2592 = vmatprep.subr.bf16.mxu0 %v2964_v37  ;;  %v2376_v37 = vcombine.high %v1082_v31, %v3687_v38 }
  0xc8   : > { %2619 = vmatpush3.bf16.msra.mxu1 %v2963_v36  ;;  %v1208_v36 = vshll.u32 %v2374_v29, 16  ;;  %v3037_v29 = vld [vmem:[%s3628_s29 + $0x390] sm:$0xff]  }
  0xc9   : > { %2620 = vmatprep.subr.bf16.mxu1 %v2965_v39  ;;  %v3799_v39 = vld [vmem:[%s3639_s10 + $0x20] ss:$16 sps:$4 sm:$0x1f]  }
  0xca   : > { %2593 = vmatpush3.bf16.msra.mxu0 %v2966_v41  ;;  %v1213_v41 = vshrl.u32 %v3793_v30, 16 }
  0xcb   : > { %2594 = vmatprep.subr.bf16.mxu0 %v2968_v45  ;;  %v1207_v45 = vrot.slane %v1205_v34, 2  ;;  %v3042_v34 = vld [vmem:[%s3628_s29 + $0x360] sm:$0xff]  }
  0xcc   : > { %2621 = vmatpush3.bf16.msra.mxu1 %v2967_v43  ;;  %v1216_v43 = vshll.u32 %v3793_v30, 16 }
  0xcd   : > { %2622 = vmatprep.subr.bf16.mxu1 %v2969_v35  ;;  %v1210_v35 = vrot.slane %v1208_v36, 3  ;;  %v3041_v36 = vld [vmem:[%s3628_s29 + $0x398] sm:$0xff]  }
  0xce   : > { %2595 = vmatpush3.bf16.msra.mxu0 %v2970_v46  ;;  %v2375_v46 = vcombine.low %v1082_v31, %v3687_v38  ;;  %v1196_v38 = vshrl.u32 %v3799_v39, 16  ;;  %v3039_v31 = vld [vmem:[%s3628_s29 + $0x3d8] sm:$0xff]  }
  0xcf   : > { %2596 = vmatprep.subr.bf16.mxu0 %v2972_v42  ;;  %v1239_v42 = vshrl.u32 %v2376_v37, 16 }
  0xd0   : > { %2623 = vmatpush3.bf16.msra.mxu1 %v2971_v47  ;;  %v3805_v47 = vld [vmem:[%s3639_s10 + $0x2c] ss:$16 sps:$4 sm:$0x1f]  }
  0xd1   : > { %2624 = vmatprep.subr.bf16.mxu1 %v2973_v48  ;;  %v1215_v48 = vrot.slane %v1213_v41, 2  ;;  %v3044_v41 = vld [vmem:[%s3628_s29 + $0x320] sm:$0xff]  }
  0xd2   : > { %2597 = vmatpush3.bf16.msra.mxu0 %v2974_v49  ;;  %v1218_v49 = vrot.slane %v1216_v43, 3  ;;  %v3046_v43 = vld [vmem:[%s3628_s29 + $0x368] sm:$0xff]  }
  0xd3   : > { %2598 = vmatprep.subr.bf16.mxu0 %v2976_v51  ;;  %v1242_v51 = vshll.u32 %v2376_v37, 16  ;;  %v3043_v37 = vld [vmem:[%s3628_s29 + $0x3e0] sm:$0xff]  }
  0xd4   : > { %2625 = vmatpush3.bf16.msra.mxu1 %v2975_v50  ;;  %v3808_v50 = vld [vmem:[%s3639_s10 + $0x28] ss:$16 sps:$4 sm:$0x1f]  }
  0xd5   : > { %2626 = vmatprep.subr.bf16.mxu1 %v2977_v52  ;;  %v1190_v52 = vrot.slane %v1188_v33, 2  ;;  %v3045_v33 = vld [vmem:[%s3628_s29 + $0x3a0] sm:$0xff]  }
  0xd6   : > { %2599 = vmatpush3.bf16.msra.mxu0 %v2978_v53  ;;  %v1211_v53 = vor.u32 %v1210_v35, %v1207_v45  ;;  %v3047_v45 = vld [vmem:[%s3628_s29 + $0x3e8] sm:$0xff]  }
  0xd7   : > { %2640 = vmatprep.subr.bf16.mxu0 %v2980_v55  ;;  %v1247_v55 = vshrl.u32 %v3805_v47, 16  ;;  %v3048_v35 = vld [vmem:[%s3628_s29 + $0x328] sm:$0xff]  }
  0xd8   : > { %2627 = vmatpush3.bf16.msra.mxu1 %v2979_v54  ;;  %v1241_v54 = vrot.slane %v1239_v42, 2  ;;  %v3049_v42 = vld [vmem:[%s3628_s29 + $0x3a8] sm:$0xff]  }
  0xd9   : > { %1018 = vmatmul.mubr.bf16.vlgmr.msra.gmra.mrb[8].mxu0 %v3691_v40  ;;  %2668 = vmatprep.subr.bf16.mxu1 %v2981_v56  ;;  %v2273_v40 = vcombine.low %v259_v63, %v259_v63  ;;  %v1250_v56 = vshll.u32 %v3805_v47, 16  ;;  %v1199_v63 = vshll.u32 %v3799_v39, 16 }
  0xda   : > { %2641 = vmatpush3.bf16.msra.mxu0 %v2982_v57  ;;  %1025 = vmatprep.mubr.bf16.mxu0 %v2274_v0  ;;  %v3027_v57 = vld [vmem:[%s3628_s29 + $0x3c0] sm:$0xff]   ;;  %v1222_v0 = vshrl.u32 %v2375_v46, 16 }
  0xdb   : > { %1066 = vmatmul.mubr.bf16.vlgmr.msra.gmra.mrb[8].mxu1 %v3699_v44  ;;  %2642 = vmatprep.subr.bf16.mxu0 %v2984_v59  ;;  %v2275_v44 = vcombine.low %v260_v3, %v260_v3  ;;  %v1244_v59 = vrot.slane %v1242_v51, 3  ;;  %v1198_v3 = vrot.slane %v1196_v38, 2  ;;  %v3054_v51 = vld [vmem:[%s3628_s29 + $0x378] sm:$0xff]   ;;  %v3065_v38 = vld [vmem:[%s3639_s10 + $0x18] sm:$0xff] }
  0xdc   : > { %2669 = vmatpush3.bf16.msra.mxu1 %v2983_v58  ;;  %1073 = vmatprep.mubr.bf16.mxu1 %v2276_v4  ;;  %v1219_v58 = vor.u32 %v1218_v49, %v1215_v48  ;;  %v3051_v48 = vld [vmem:[%s3628_s29 + $0x3f0] sm:$0xff]  }
  0xdd   : > { %2670 = vmatprep.subr.bf16.mxu1 %v2985_v60  ;;  %v1191_v60 = vshll.u32 %v2373_v28, 16  ;;  %v3038_v28 = vld [vmem:[%s3628_s29 + $0x358] sm:$0xff]   ;;  %v3052_v49 = vld [vmem:[%s3628_s29 + $0x330] sm:$0xff]  }
  0xde   : > { %2643 = vmatpush3.bf16.msra.mxu0 %v2986_v61  ;;  %v1249_v61 = vrot.slane %v1247_v55, 2  ;;  %v1636_v55 = vrot.slane %v3793_v30, 3 }
  0xdf   : > { %2644 = vmatprep.subr.bf16.mxu0 %v2990_v1  ;;  %v1220_v1 = vsel %vm1186_vm1, %v1211_v53, %v1219_v58  ;;  %v3055_v53 = vld [vmem:[%s3628_s29 + $0x3f8] sm:$0xff]  }
  0xe0   : > { %2671 = vmatpush3.bf16.msra.mxu1 %v2987_v62  ;;  %v1252_v62 = vrot.slane %v1250_v56, 3  ;;  %v1555_v56 = vld [vmem:[%s3639_s10 + $0x8] sm:$0x88] }
  0xe1   : > { %1026 = vmatmul.mubr.bf16.gmra.mrb[12].mxu0 %v2273_v40  ;;  %2672 = vmatprep.subr.bf16.mxu1 %v2991_v2  ;;  %v1245_v2 = vor.u32 %v1244_v59, %v1241_v54  ;;  %v1193_v40 = vrot.slane %v1191_v60, 3  ;;  %v1554_v54 = vld [vmem:[%s3639_s10] sm:$0x88] }
  0xe2   : > { %2645 = vmatpush3.bf16.msra.mxu0 %v2993_v5  ;;  %1487 = vmatprep.mubr.bf16.mxu0 %v1220_v1  ;;  %v1253_v4 = vor.u32 %v1252_v62, %v1249_v61  ;;  %v1201_v5 = vrot.slane %v1199_v63, 3  ;;  %v2479_v61 = vcombine.low %v1555_v56, %v3065_v38  ;;  %v1633_v62 = vrot.slane %v3799_v39, 3  ;;  %v1943_v63 = vld [vmem:[#allocation5] sm:$0xff] }
  0xe3   : > { %1074 = vmatmul.mubr.bf16.gmra.mrb[12].mxu1 %v2275_v44  ;;  %2646 = vmatprep.subr.bf16.mxu0 %v2996_v7  ;;  %v1225_v44 = vshll.u32 %v2375_v46, 16  ;;  %v1194_v7 = vor.u32 %v1193_v40, %v1190_v52  ;;  %v3050_v46 = vld [vmem:[%s3628_s29 + $0x370] sm:$0xff]   ;;  %v2480_v1 = vcombine.high %v1555_v56, %v3065_v38 }
  0xe4   : > { %2673 = vmatpush3.bf16.msra.mxu1 %v2994_v6  ;;  %v1224_v6 = vrot.slane %v1222_v0, 2  ;;  %v3053_v52 = vld [vmem:[%s3628_s29 + $0x3b0] sm:$0xff]   ;;  %1948 = vperm.xlu0 %2906, %v1943_v63  }
  0xe5   : > { %2674 = vmatprep.subr.bf16.mxu1 %v2997_v8  ;;  %v1230_v8 = vshrl.u32 %v3808_v50, 16  ;;  %v1945_v0 = vld [vmem:[#allocation5 + $0x10] sm:$0xf] }
  0xe6   : > { %2647 = vmatpush3.bf16.msra.mxu0 %v2998_v9  ;;  %v1233_v9 = vshll.u32 %v3808_v50, 16  ;;  %1958 = vperm.xlu1 %2907, %v1945_v0  }
  0xe7   : > { %2648 = vmatprep.subr.bf16.mxu0 %v3000_v11  ;;  %v1202_v11 = vor.u32 %v1201_v5, %v1198_v3  ;;  %v1944_v3 = vld [vmem:[#allocation5 + $0x8] sm:$0xff]  ;;  %v1638_v5 = vrot.slane %v2479_v61, 3 }
  0xe8   : > { %2675 = vmatpush3.bf16.msra.mxu1 %v2999_v10  ;;  %v1254_v10 = vsel %vm1186_vm1, %v1245_v2, %v1253_v4  ;;  %v1642_v2 = vrot.slane %v3805_v47, 3  ;;  %1953 = vperm.xlu0 %2906, %v1944_v3  }
  0xe9   : > { %2676 = vmatprep.subr.bf16.mxu1 %v3001_v12  ;;  %v1227_v12 = vrot.slane %v1225_v44, 3  ;;  %1535 = vmatprep.mubr.bf16.mxu1 %v1254_v10  ;;  %v1639_v44 = vrot.slane %v3808_v50, 3 }
  0xea   : > { %2649 = vmatpush3.bf16.msra.mxu0 %v3002_v13  ;;  %v3028_v13 = vld [vmem:[%s3628_s29 + $0x300] sm:$0xff]  }
  0xeb   : > { %2650 = vmatprep.subr.bf16.mxu0 %v3004_v15  ;;  %v1235_v15 = vrot.slane %v1233_v9, 3 }
  0xec   : > { %2677 = vmatpush3.bf16.msra.mxu1 %v3003_v14  ;;  %v1232_v14 = vrot.slane %v1230_v8, 2  ;;  %v1640_v8 = vsel %vm1631_vm2, %v1638_v5, %v1639_v44 }
  0xed   : > { %2678 = vmatprep.subr.bf16.mxu1 %v3005_v16  ;;  %v3029_v16 = vld [vmem:[%s3628_s29 + $0x380] sm:$0xff]  }
  0xee   : > { %2651 = vmatpush3.bf16.msra.mxu0 %v3006_v17  ;;  %v3030_v17 = vld [vmem:[%s3628_s29 + $0x348] sm:$0xff]  }
  0xef   : > { %2652 = vmatprep.subr.bf16.mxu0 %v3008_v19  ;;  %v1228_v19 = vor.u32 %v1227_v12, %v1224_v6  ;;  %v1641_v6 = vrot.slane %v2480_v1, 3 }
  0xf0   : > { %2679 = vmatpush3.bf16.msra.mxu1 %v3007_v18  ;;  %v1203_v18 = vsel %vm1186_vm1, %v1194_v7, %v1202_v11 }
  0xf1   : > { %2680 = vmatprep.subr.bf16.mxu1 %v3009_v20  ;;  %v1236_v20 = vor.u32 %v1235_v15, %v1232_v14  ;;  %v1643_v47 = vsel %vm1631_vm2, %v1641_v6, %v1642_v2 }
  0xf2   : > { %2653 = vmatpush3.bf16.msra.mxu0 %v3010_v21  ;;  %v3031_v21 = vld [vmem:[%s3628_s29 + $0x3c8] sm:$0xff]  }
  0xf3   : > { %2654 = vmatprep.subr.bf16.mxu0 %v3012_v23  ;;  %v1237_v23 = vsel %vm1186_vm1, %v1228_v19, %v1236_v20 }
  0xf4   : > { %2681 = vmatpush3.bf16.msra.mxu1 %v3011_v22  ;;  %v3032_v22 = vld [vmem:[%s3628_s29 + $0x308] sm:$0xff]  }
  0xf5   : > { %2682 = vmatprep.subr.bf16.mxu1 %v3013_v24  ;;  %v3034_v24 = vld [vmem:[%s3628_s29 + $0x350] sm:$0xff]  }
  0xf6   : > { %2655 = vmatpush3.bf16.msra.mxu0 %v3014_v25  ;;  %v3033_v25 = vld [vmem:[%s3628_s29 + $0x388] sm:$0xff]  }
  0xf7   : > { %2696 = vmatprep.subr.bf16.mxu0 %v3026_v32  ;;  %v3040_v32 = vld [vmem:[%s3628_s29 + $0x318] sm:$0xff]  }
  0xf8   : > { %2683 = vmatpush3.bf16.msra.mxu1 %v3015_v27  ;;  %v3036_v27 = vld [vmem:[%s3628_s29 + $0x310] sm:$0xff]  }
  0xf9   : > { %2724 = vmatprep.subr.bf16.mxu1 %v3027_v57  ;;  %1488 = vmatmul.mubr.bf16.vlgmr.msra.gmra.mrb[16].mxu0 %v1203_v18  ;;  %v3056_v57 = vld [vmem:[%s3628_s29 + $0x338] sm:$0xff]  }
  0xfa   : > { %2697 = vmatpush3.bf16.msra.mxu0 %v3028_v13  ;;  %1495 = vmatprep.mubr.bf16.mxu0 %v1219_v58  ;;  %v3064_v58 = vld [vmem:[%s3639_s10 + $0x10] sm:$0xff] }
  0xfb   : > { %2698 = vmatprep.subr.bf16.mxu0 %v3030_v17  ;;  %1536 = vmatmul.mubr.bf16.vlgmr.msra.gmra.mrb[16].mxu1 %v1237_v23  ;;  %v2477_v59 = vcombine.low %v1554_v54, %v3064_v58  ;;  %v2478_v60 = vcombine.high %v1554_v54, %v3064_v58 }
  0xfc   : > { %2725 = vmatpush3.bf16.msra.mxu1 %v3029_v16  ;;  %1543 = vmatprep.mubr.bf16.mxu1 %v1253_v4  ;;  %v3057_v4 = vld [vmem:[%s3628_s29 + $0x3b8] sm:$0xff]   ;;  %s3320_s29 = smov [#allocation8]  }
  0xfd   : > { %2726 = vmatprep.subr.bf16.mxu1 %v3031_v21  ;;  %v1632_v30 = vrot.slane %v2477_v59, 3  ;;  %v1635_v40 = vrot.slane %v2478_v60, 3  ;;  %s3158_s27 = sshll.u32 %s3320_s29, 4  ;;  %s3159_s27 = int_to_ptr.vmem [resolvable:$false] %s3158_s27 }
  0xfe   : > { %2699 = vmatpush3.bf16.msra.mxu0 %v3032_v22  ;;  %s3160_s26 = scalar_lea.vmem %s3159_s27, 384  ;;  %p3161_p6 = scmp.lt.s32.totalorder %s3868_s1, %s3159_s27 }
  0xff   : > { %2700 = vmatprep.subr.bf16.mxu0 %v3034_v24  ;;  %v1637_v39 = vsel %vm1631_vm2, %v1635_v40, %v1636_v55  ;;  %v1634_v7 = vsel %vm1631_vm2, %v1632_v30, %v1633_v62  ;;  %p3162_p5 = scmp.lt.s32.totalorder %s3160_s26, %s3154_s18 }
 0x100   : > { %2727 = vmatpush3.bf16.msra.mxu1 %v3033_v25 }
 0x101   : > { %1496 = vmatmul.mubr.bf16.gmra.mrb[20].mxu0 %v1202_v11  ;;  %2728 = vmatprep.subr.bf16.mxu1 %v3035_v26  ;;  %p3163_p11 = por %p3162_p5, %p3161_p6 }
 0x102   : > { %2701 = vmatpush3.bf16.msra.mxu0 %v3036_v27  ;;  %1876 = vmatprep.mubr.bf16.mxu0 %v1637_v39 }
 0x103   : > { %2702 = vmatprep.subr.bf16.mxu0 %v3038_v28  ;;  %1544 = vmatmul.mubr.bf16.gmra.mrb[20].mxu1 %v1236_v20  ;;  %p3164_p8 = pnand %p3163_p11, %p3157_p2 }
 0x104   : > { %2729 = vmatpush3.bf16.msra.mxu1 %v3037_v29  ;;  %1924 = vmatprep.mubr.bf16.mxu1 %v1643_v47 }
 0x105   : > { %2730 = vmatprep.subr.bf16.mxu1 %v3039_v31 }
 0x106   : > { %2703 = vmatpush3.bf16.msra.mxu0 %v3040_v32 }
 0x107   : > { %2704 = vmatprep.subr.bf16.mxu0 %v3042_v34 }
 0x108   : > { %2731 = vmatpush3.bf16.msra.mxu1 %v3041_v36 }
 0x109   : > { %2732 = vmatprep.subr.bf16.mxu1 %v3043_v37 }
 0x10a   : > { %2705 = vmatpush3.bf16.msra.mxu0 %v3044_v41 }
 0x10b   : > { %2706 = vmatprep.subr.bf16.mxu0 %v3046_v43 }
 0x10c   : > { %2733 = vmatpush3.bf16.msra.mxu1 %v3045_v33 }
 0x10d   : > { %2734 = vmatprep.subr.bf16.mxu1 %v3047_v45 }
 0x10e   : > { %2707 = vmatpush3.bf16.msra.mxu0 %v3048_v35 }
 0x10f   : > { %2708 = vmatprep.subr.bf16.mxu0 %v3050_v46 }
 0x110   : > { %2735 = vmatpush3.bf16.msra.mxu1 %v3049_v42 }
 0x111   : > { %2736 = vmatprep.subr.bf16.mxu1 %v3051_v48 }
 0x112   : > { %2709 = vmatpush3.bf16.msra.mxu0 %v3052_v49 }
 0x113   : > { %2710 = vmatprep.subr.bf16.mxu0 %v3054_v51 }
 0x114   : > { %2737 = vmatpush3.bf16.msra.mxu1 %v3053_v52 }
 0x115   : > { %2738 = vmatprep.subr.bf16.mxu1 %v3055_v53 }
 0x116   : > { %2711 = vmatpush3.bf16.msra.mxu0 %v3056_v57 }
 0x118   : > { %2739 = vmatpush3.bf16.msra.mxu1 %v3057_v4 }
 0x119   : > { %1877 = vmatmul.mubr.bf16.vlgmr.msra.gmra.mrb[24].mxu0 %v1634_v7 }
 0x11a   : > { %1884 = vmatprep.mubr.bf16.mxu0 %v1636_v55 }
 0x11b   : > { %1925 = vmatmul.mubr.bf16.vlgmr.msra.gmra.mrb[24].mxu1 %v1640_v8 }
 0x11c   : > { %1932 = vmatprep.mubr.bf16.mxu1 %v1642_v2 }
 0x121   : > { %1885 = vmatmul.mubr.bf16.gmra.mrb[28].mxu0 %v1633_v62 }
 0x123   : > { %1933 = vmatmul.mubr.bf16.gmra.mrb[28].mxu1 %v1639_v44 }
 0x18c   : > { %v2544_v50 = vpop.f32.mrb[0].mxu0 }
 0x18d   : > { %v2545_v9 = vpop.f32.mrb[1].mxu0  ;;  %v2572_v10 = vpop.f32.mrb[0].mxu1 }
 0x18e   : > { %v2546_v11 = vadd.f32 %v2545_v9, %v2544_v50  ;;  %v2547_v12 = vpop.f32.mrb[2].mxu0  ;;  %v2573_v13 = vpop.f32.mrb[1].mxu1 }
 0x18f   : > { %v2548_v14 = vpop.f32.mrb[3].mxu0  ;;  %v2574_v15 = vadd.f32 %v2573_v13, %v2572_v10  ;;  %v2575_v16 = vpop.f32.mrb[2].mxu1 }
 0x190   : > { %v2549_v17 = vadd.f32 %v2548_v14, %v2547_v12  ;;  %v2576_v18 = vpop.f32.mrb[3].mxu1 }
 0x191   : > { %v762_v19 = vadd.f32 %v2574_v15, %v2546_v11  ;;  %v2577_v20 = vadd.f32 %v2576_v18, %v2575_v16 }
 0x193   : > { %v765_v21 = vadd.f32 %v2577_v20, %v2549_v17 }
 0x194   : > { %v2550_v22 = vpop.f32.mrb[4].mxu0 }
 0x195   : > { %v2551_v23 = vpop.f32.mrb[5].mxu0 }
 0x196   : > { %v2578_v24 = vpop.f32.mrb[4].mxu1  ;;  %v2552_v25 = vadd.f32 %v2551_v23, %v2550_v22  ;;  %v2553_v26 = vpop.f32.mrb[6].mxu0 }
 0x197   : > { %v2579_v27 = vpop.f32.mrb[5].mxu1  ;;  %v2554_v28 = vpop.f32.mrb[7].mxu0 }
 0x198   : > { %v2580_v29 = vadd.f32 %v2579_v27, %v2578_v24  ;;  %v2581_v31 = vpop.f32.mrb[6].mxu1 }
 0x199   : > { %v2582_v32 = vpop.f32.mrb[7].mxu1 }
 0x19a   : > { %v770_v34 = vadd.f32 %v2580_v29, %v2552_v25 }
 0x1ac   : > { %v2600_v36 = vpop.f32.mrb[8].mxu0 }
 0x1ad   : > { %v2601_v37 = vpop.f32.mrb[9].mxu0 }
 0x1ae   : > { %v2628_v41 = vpop.f32.mrb[8].mxu1  ;;  %v2602_v43 = vadd.f32 %v2601_v37, %v2600_v36  ;;  %v2603_v33 = vpop.f32.mrb[10].mxu0 }
 0x1af   : > { %v2629_v45 = vpop.f32.mrb[9].mxu1  ;;  %v2604_v35 = vpop.f32.mrb[11].mxu0 }
 0x1b0   : > { %v1020_v46 = vadd.f32 %v2602_v43, %v762_v19  ;;  %v2630_v42 = vadd.f32 %v2629_v45, %v2628_v41  ;;  %v2631_v48 = vpop.f32.mrb[10].mxu1  ;;  %v2605_v49 = vadd.f32 %v2604_v35, %v2603_v33  ;;  %v1949_v36 = vpop.permute.xlu0 %1948 }
 0x1b1   : > { %v2632_v51 = vpop.f32.mrb[11].mxu1 }
 0x1b2   : > { %v1068_v52 = vadd.f32 %v2630_v42, %v1020_v46  ;;  %v1023_v53 = vadd.f32 %v2605_v49, %v765_v21  ;;  %v2633_v54 = vadd.f32 %v2632_v51, %v2631_v48 }
 0x1b4   : > { %v1071_v55 = vadd.f32 %v2633_v54, %v1023_v53  ;;  %v2606_v56 = vpop.f32.mrb[12].mxu0  ;;  %v1954_v49 = vpop.permute.xlu0 %1953 }
 0x1b5   : > { %v2607_v57 = vpop.f32.mrb[13].mxu0 }
 0x1b6   : > { %v2608_v58 = vadd.f32 %v2607_v57, %v2606_v56  ;;  %v2634_v59 = vpop.f32.mrb[12].mxu1  ;;  %v2609_v60 = vpop.f32.mrb[14].mxu0 }
 0x1b7   : > { %v2635_v38 = vpop.f32.mrb[13].mxu1  ;;  %v2610_v61 = vpop.f32.mrb[15].mxu0 }
 0x1b8   : > { %v1028_v62 = vadd.f32 %v2608_v58, %v770_v34  ;;  %v2636_v63 = vadd.f32 %v2635_v38, %v2634_v59  ;;  %v2637_v0 = vpop.f32.mrb[14].mxu1 }
 0x1b9   : > { %v2638_v1 = vpop.f32.mrb[15].mxu1 }
 0x1ba   : > { %v1076_v2 = vadd.f32 %v2636_v63, %v1028_v62  ;;  %v1959_v63 = vpop.permute.xlu1 %1958 }
 0x1cc   : > { %v2656_v30 = vpop.f32.mrb[16].mxu0 }
 0x1cd   : > { %v2657_v40 = vpop.f32.mrb[17].mxu0 }
 0x1ce   : > { %v2658_v3 = vadd.f32 %v2657_v40, %v2656_v30  ;;  %v2659_v4 = vpop.f32.mrb[18].mxu0  ;;  %v2684_v5 = vpop.f32.mrb[16].mxu1 }
 0x1cf   : > { %v2660_v6 = vpop.f32.mrb[19].mxu0  ;;  %v2685_v44 = vpop.f32.mrb[17].mxu1 }
 0x1d0   : > { %v2661_v39 = vadd.f32 %v2660_v6, %v2659_v4  ;;  %v2686_v7 = vadd.f32 %v2685_v44, %v2684_v5  ;;  %v2687_v47 = vpop.f32.mrb[18].mxu1 }
 0x1d1   : > { %v2688_v8 = vpop.f32.mrb[19].mxu1 }
 0x1d2   : > { %v1538_v50 = vadd.f32 %v2686_v7, %v2658_v3  ;;  %v2689_v9 = vadd.f32 %v2688_v8, %v2687_v47 }
 0x1d4   : > { %v2662_v10 = vpop.f32.mrb[20].mxu0  ;;  %v1551_v11 = vadd.f32 %v1538_v50, %v1068_v52  ;;  %v1541_v12 = vadd.f32 %v2689_v9, %v2661_v39 }
 0x1d5   : > { %v2663_v13 = vpop.f32.mrb[21].mxu0 }
 0x1d6   : > { %v2664_v14 = vadd.f32 %v2663_v13, %v2662_v10  ;;  %v2665_v15 = vpop.f32.mrb[22].mxu0  ;;  %v2690_v16 = vpop.f32.mrb[20].mxu1  ;;  %v1552_v18 = vadd.f32 %v1541_v12, %v1071_v55 }
 0x1d7   : > { %v2666_v17 = vpop.f32.mrb[23].mxu0  ;;  %v2691_v19 = vpop.f32.mrb[21].mxu1 }
 0x1d8   : > { %v2692_v20 = vadd.f32 %v2691_v19, %v2690_v16  ;;  %v2693_v21 = vpop.f32.mrb[22].mxu1 }
 0x1d9   : > { %v2694_v22 = vpop.f32.mrb[23].mxu1 }
 0x1da   : > { %v1546_v23 = vadd.f32 %v2692_v20, %v2664_v14 }
 0x1dc   : > { %v1553_v24 = vadd.f32 %v1546_v23, %v1076_v2 }
 0x1ec   : > { %v2712_v25 = vpop.f32.mrb[24].mxu0 }
 0x1ed   : > { %v2713_v26 = vpop.f32.mrb[25].mxu0 }
 0x1ee   : > { %v2714_v27 = vadd.f32 %v2713_v26, %v2712_v25  ;;  %v2715_v28 = vpop.f32.mrb[26].mxu0  ;;  %v2740_v29 = vpop.f32.mrb[24].mxu1 }
 0x1ef   : > { %v2716_v31 = vpop.f32.mrb[27].mxu0  ;;  %v2741_v32 = vpop.f32.mrb[25].mxu1 }
 0x1f0   : > { %v2717_v34 = vadd.f32 %v2716_v31, %v2715_v28  ;;  %v2742_v37 = vadd.f32 %v2741_v32, %v2740_v29  ;;  %v2743_v41 = vpop.f32.mrb[26].mxu1 }
 0x1f1   : > { %v2744_v43 = vpop.f32.mrb[27].mxu1 }
 0x1f2   : > { %v1927_v33 = vadd.f32 %v2742_v37, %v2714_v27  ;;  %v2745_v45 = vadd.f32 %v2744_v43, %v2743_v41 }
 0x1f4   : > { %v2718_v35 = vpop.f32.mrb[28].mxu0  ;;  %v1930_v46 = vadd.f32 %v2745_v45, %v2717_v34  ;;  %v1940_v42 = vadd.f32 %v1927_v33, %v1551_v11 }
 0x1f5   : > { %v2719_v48 = vpop.f32.mrb[29].mxu0 }
 0x1f6   : > { %v2720_v51 = vadd.f32 %v2719_v48, %v2718_v35  ;;  %v2721_v52 = vpop.f32.mrb[30].mxu0  ;;  %v2746_v53 = vpop.f32.mrb[28].mxu1  ;;  %v1941_v54 = vadd.f32 %v1930_v46, %v1552_v18  ;;  %v1961_v57 = vmul.f32 %v1949_v36, %v1940_v42 }
 0x1f7   : > { %v2722_v55 = vpop.f32.mrb[31].mxu0  ;;  %v2747_v56 = vpop.f32.mrb[29].mxu1 }
 0x1f8   : > { %v1962_v58 = vmul.f32 %v1954_v49, %v1941_v54  ;;  %v2748_v59 = vadd.f32 %v2747_v56, %v2746_v53  ;;  %v2749_v60 = vpop.f32.mrb[30].mxu1 }
 0x1f9   : > { %v2750_v38 = vpop.f32.mrb[31].mxu1 }
 0x1fa   : > { %v1964_v61 = vadd.f32 %v1962_v58, %v1961_v57  ;;  %v1935_v62 = vadd.f32 %v2748_v59, %v2720_v51 }
 0x1fc   : > { %v1942_v0 = vadd.f32 %v1935_v62, %v1553_v24 }
 0x1fe   : > { %v1963_v1 = vmul.f32 %v1959_v63, %v1942_v0 }
 0x200   : > { %v1966_v2 = vsel %vm1965_vm3, %v1963_v1, 0.0 }
 0x201   : > { %v1967_v30 = vadd.f32 %v1966_v2, %v1964_v61 }
 0x203   : > { %v1968_v40 = vrot.slane %v1967_v30, 4 }
 0x205   : > { %v1969_v3 = vadd.f32 %v1968_v40, %v1967_v30 }
 0x207   : > { %v1970_v4 = vrot.slane %v1969_v3, 2 }
 0x209   : > { %v1971_v5 = vadd.f32 %v1970_v4, %v1969_v3 }
 0x20b   : > { %v1972_v6 = vrot.slane %v1971_v5, 1 }
 0x20d   : > { %v1973_v44 = vadd.f32 %v1972_v6, %v1971_v5 }
 0x20f   : > { %v1974_v39 = vmul.f32 0.0625, %v1973_v44 }
 0x211   : > { %v1975_v7 = vsub.f32 %v1940_v42, %v1974_v39  ;;  %v1976_v47 = vsub.f32 %v1941_v54, %v1974_v39  ;;  %v1977_v8 = vsub.f32 %v1942_v0, %v1974_v39 }
 0x213   : > { %v1978_v50 = vmul.f32 %v1975_v7, %v1949_v36  ;;  %v1979_v9 = vmul.f32 %v1976_v47, %v1954_v49  ;;  %v1980_v10 = vmul.f32 %v1977_v8, %v1959_v63 }
 0x215   : > { %v1981_v11 = vmul.f32 %v1978_v50, %v1978_v50  ;;  %v1982_v12 = vmul.f32 %v1979_v9, %v1979_v9  ;;  %v1983_v13 = vmul.f32 %v1980_v10, %v1980_v10 }
 0x217   : > { %v1984_v14 = vadd.f32 %v1982_v12, %v1981_v11  ;;  %v1985_v15 = vsel %vm1965_vm3, %v1983_v13, 0.0 }
 0x219   : > { %v1986_v16 = vadd.f32 %v1985_v15, %v1984_v14 }
 0x21b   : > { %v1987_v17 = vrot.slane %v1986_v16, 4 }
 0x21d   : > { %v1988_v18 = vadd.f32 %v1987_v17, %v1986_v16 }
 0x21f   : > { %v1989_v19 = vrot.slane %v1988_v18, 2 }
 0x221   : > { %v1990_v20 = vadd.f32 %v1989_v19, %v1988_v18 }
 0x223   : > { %v1991_v21 = vrot.slane %v1990_v20, 1 }
 0x225   : > { %v1992_v22 = vadd.f32 %v1991_v21, %v1990_v20 }
 0x227   : > { %v1993_v23 = vmul.f32 0.0625, %v1992_v22 }
 0x229   : > { %v1994_v24 = vadd.f32 1e-05, %v1993_v23 }
 0x22b   : > { %3062 = vrsqrt.f32 %v1994_v24 }
 0x235   : > { %v3063_v25 = vpop.eup %3062 }
 0x236   : > { %v1996_v26 = vmul.f32 %v3063_v25, %v1975_v7  ;;  %v1997_v27 = vmul.f32 %v3063_v25, %v1976_v47  ;;  %v1998_v28 = vmul.f32 %v3063_v25, %v1977_v8 }
 0x238   : > { %vm1999_vm4 = vcmp.ge.f32.partialorder %v1996_v26, 0.0  ;;  %vm2000_vm5 = vcmp.ge.f32.partialorder %v1997_v27, 0.0  ;;  %vm2001_vm6 = vcmp.ge.f32.partialorder %v1998_v28, 0.0  ;;  %v2002_v29 = vmul.f32 0.2, %v1996_v26 }
 0x239   : > { %v2003_v31 = vmul.f32 0.2, %v1997_v27  ;;  %v2004_v32 = vmul.f32 0.2, %v1998_v28 }
 0x23a   : > { %v2005_v34 = vsel %vm1999_vm4, %v1996_v26, %v2002_v29 }
 0x23b   : > { %v2006_v36 = vsel %vm2000_vm5, %v1997_v27, %v2003_v31  ;;  %v2007_v37 = vsel %vm2001_vm6, %v1998_v28, %v2004_v32 }
 0x23c   : > { %v2522_v41 = vpack.c.bf16 %v2007_v37, %v2007_v37  ;;  %v2526_v43 = vpack.c.bf16 %v2006_v36, %v2005_v34 }
 0x23e   : > { %2527 = vst [vmem:[%s253_s7] sm:$0xff] %v2526_v43   ;;  %2023 = vst [vmem:[%s253_s7 + $0x8] sm:$0x3] %v2522_v41 }
 0x23f   : > { %3167 = shalt.err (!%p3164_p8)
}
 0x240   : > { %s3168_s10 = scalar_lea.hbm %s3873_s4, 192  ;;  %s3172_s3 = scalar_lea.hbm %s4002_s5, 768 }
 0x241   : > { %p3169_p4 = scmp.ne.s32.totalorder %s3873_s4, %s3168_s10  ;;  %p3173_p0 = scmp.lt.u32.totalorder %s3873_s4, %s4002_s5 }
 0x242   : > { %p3174_p3 = scmp.lt.u32.totalorder %s3172_s3, %s3168_s10  ;;  %p3176_p1 = scmp.lt.u32.totalorder %s3168_s10, %s3873_s4 }
 0x243   : > { %p3170_p7 = pnand %p3169_p4, %p4003_p9 }
 0x244   : > { %p3175_p10 = por %p3174_p3, %p3173_p0 }
 0x245   : > { %p3171_p13 = pneg %p3170_p7 }
 0x246   : > { %p3177_p12 = por %p3176_p1, %p3175_p10 }
 0x248   : > { %p3178_p2 = pnand %p3177_p12, %p3171_p13 }
 0x24a   : > { %3181 = shalt.err (!%p3178_p2)
}
 0x24b   : > { %s3321_s0 = smov 64   ;;  %s3322_s21 = smov 128  }
 0x24c   : > { %s3323_s22 = smov 4  }
 0x24d   : > { %2762 = dma.vmem_to_hbm [thread:$0]  (%p4003_p9), %s3868_s1, 192, %s3873_s4, %s3875_s11, %s3321_s0, %s3322_s21, %s3323_s22  }
 0x24e PF: > { %s4004_s23 = sld [smem:[#allocation17_spill]]  ;;  %p2782_p6 = scmp.ge.s32.totalorder %s3308_s25, 2 }
 0x24f   : > { %s2054_s18 = sand.u32 1, %s3256_s12  }
 0x250   : > { %s2055_s29 = scalar_lea.sflag [#allocation4], %s2054_s18 }
 0x254   : > { %p4005_p5 = scmp.ne.s32.totalorder %s4004_s23, 0 }
 0x256   : > { %p2776_p11 = pnand %p2782_p6, %p4005_p5 }
 0x258   : > { %3251 = dma.done.wait (!%p2776_p11), %s2055_s29, 192  }
 0x259   : > { %3253 = vsyncadd (!%p2776_p11), %s2055_s29, 4294967104  ;;  %s20_s25 = sadd.s32 1, %s3308_s25   ;;  %s4007_s1 = sld [smem:[#allocation13_spill]] }
 0x25a   : > { %p3904_p8 = scmp.ge.s32.totalorder %s20_s25, 6   ;;  %s4008_s20 = sld [smem:[#allocation16_spill]] }
 0x25b   : > { %s4009_s21 = sld [smem:[#allocation14_spill]]  ;;  %s4010_s23 = sld [smem:[#allocation15_spill]] }
 0x25c   : > { %s4011_s12 = smov %s3260_s13  ;;  %s4012_s13 = smov %s3264_s14 }
 0x25d   : > { %s4013_s14 = smov %s3596_s8  ;;  %s4014_s15 = smov %s3272_s16 }
 0x25e   : > { %s4015_s16 = smov %s3276_s17  ;;  %s4016_s17 = smov %s3591_s28 }
 0x25f   : > { %s4017_s18 = smov %s3284_s19  ;;  %s4018_s19 = smov %s4007_s1 }
 0x260   : > { %s4019_s22 = smov %s3304_s24  ;;  %s4020_s24 = smov %s4026_s6 }
 0x261   :  { %19 = sbr.rel (!%p3904_p8) target bundleno = 15 (0xf), region = 95 }
 0x268   :  { %2060 = vsyncpa [#allocation3], 1 }
 0x269   :  { %2062 = vsyncpa [#allocation3 + $0x1], 1 }
 0x26a   :  { %2063 = vsyncpa [#allocation6], 1 }
 0x26b   :  { %2064 = vsyncpa [#allocation4], 1 }
 0x26c   :  { %2066 = vsyncpa [#allocation4 + $0x1], 1 }

// kernel: discriminator_forward.9
= control target key start
LH: loop header
LB: loop body
LE: loop exit
PB: predicated region body
PF: predicated region fallthrough
CT: control target
= control target key end

     0   :  { %s3439_s0 = inlined_call_operand.hbm [shape: bf16[16,512], index: 0, kind: input, shape index: {}]   ;;  %s3440_s1 = inlined_call_operand.<no memory space> [shape: f32[1,1], index: 1, kind: input, shape index: {}]   ;;  %s3441_s2 = inlined_call_operand.hbm [shape: f32[10,1], index: 2, kind: input, shape index: {}]   ;;  %s3442_s3 = inlined_call_operand.hbm [shape: bf16[2,30,512], index: 3, kind: input, shape index: {}]   ;;  %s3443_s4 = inlined_call_operand.hbm [shape: f32[2,1,1], index: 4, kind: output, shape index: {}]  }
   0x1   :  { %v9_v0 = vstv %s3440_s1 }
   0x2   :  { %10 = vst [vmem:[#allocation2] sm:$0x1] %v9_v0 }
   0x3   :  { %11 = vsyncpa [#allocation4], 0 }
   0x4   :  { %12 = vsyncpa [#allocation7], 0 }
   0x5   :  { %13 = vsyncpa [#allocation5], 0 }
   0x6   :  { %15 = vsyncpa [#allocation5 + $0x1], 0  ;;  %s2187_s17 = smov 0   ;;  %s2189_s18 = smov 0  }
   0x7   :  { %s2191_s19 = smov 0   ;;  %s2193_s20 = smov 0  }
   0x8 LB: > { %s2208_s1 = sadd.s32 4294967295, %s2148_s20   ;;  %s1899_s21 = sadd.s32 4294967294, %s2148_s20   ;;  %s2148_s20 = sphi %s2193_s20, %s3597_s20   ;;  %s2144_s19 = sphi %s2191_s19, %s3596_s19   ;;  %s2140_s18 = sphi %s2189_s18, %s3595_s18   ;;  %s2136_s17 = sphi %s2187_s17, %s3594_s17  }
   0x9   : > { %s2212_s22 = sadd.s32 1, %s2148_s20   ;;  %s91_s23 = sadd.s32 1, %s2144_s19 }
   0xa   : > { %s88_s24 = ssub.s32 %s2148_s20, %s2212_s22  ;;  %p98_p0 = scmp.ne.s32.totalorder %s2144_s19, %s2140_s18 }
   0xb   : > { %p89_p1 = scmp.eq.s32.totalorder %s88_s24, 0  ;;  %p99_p2 = scmp.eq.s32.totalorder %s2148_s20, 0 }
   0xc   : > { %p104_p3 = scmp.ne.s32.totalorder %s2140_s18, %s2136_s17  ;;  %p3444_p4 = scmp.eq.s32.totalorder %s2208_s1, 0 }
   0xd   : > { %s2224_s25 = scalar_select %p89_p1, %s2144_s19, %s91_s23  }
   0xe   : > { %p2226_p5 = por %p99_p2, %p98_p0  ;;  %p2232_p6 = por %p3444_p4, %p104_p3 }
   0xf   : > { %p128_p7 = scmp.eq.s32.totalorder %s2208_s1, 1  ;;  %p134_p8 = scmp.eq.s32.totalorder %s1899_s21, 1 }
  0x10   : > { %s3475_s26 = scalar_select %p2226_p5, 1, 0 }
  0x11   : > { %s3476_s27 = scalar_select %p2232_p6, 1, 0 }
  0x12   : > { %p1900_p9 = scmp.ge.s32.totalorder %s2148_s20, 1  ;;  %p141_p10 = scmp.lt.s32.totalorder %s2148_s20, 3 }
  0x13   : > { %p2239_p11 = por %p128_p7, %p98_p0  ;;  %p2243_p12 = por %p134_p8, %p104_p3 }
  0x14   : > { %p2247_p13 = pnand %p1900_p9, %p141_p10  ;;  %s2150_s5 = smov [#allocation3]  }
  0x15   : > { %s3477_s28 = scalar_select %p2239_p11, 1, 0 }
  0x16   : > { %s3478_s29 = scalar_select %p2243_p12, 1, 0 }
  0x17   : > { %s3479_s30 = scalar_select %p2247_p13, 1, 0 }
  0x18   : > { %p1927_p1 = pneg %p2247_p13  ;;  %s153_s6 = sshll.u32 %s2150_s5, 4  ;;  %s154_s6 = int_to_ptr.vmem [resolvable:$true] %s153_s6 }
  0x19   : > { %s2151_s8 = smov [#allocation6]   ;;  %s1988_s12 = scalar_lea.hbm %s3439_s0, 512 }
  0x1a   : > { %p2255_p2 = pnand %p1927_p1, %p3444_p4  ;;  %s169_s9 = sshll.u32 %s2151_s8, 4  ;;  %s170_s9 = int_to_ptr.vmem [resolvable:$true] %s169_s9 }
  0x1b   : > { %p1989_p7 = scmp.ne.s32.totalorder %s3439_s0, %s1988_s12  ;;  %p1995_p1 = scmp.lt.u32.totalorder %s1988_s12, %s3439_s0 }
  0x1c   : > { %p1990_p8 = pneg %p2255_p2 }
  0x1e   : > { %p1991_p9 = pnand %p1990_p8, %p1989_p7 }
  0x20   : > { %p1992_p10 = pneg %p1991_p9 }
  0x22   : > { %p1997_p0 = pnand %p1995_p1, %p1992_p10 }
  0x24   : > { %2000 = shalt.err (!%p1997_p0)
}
  0x25   : > { %s2001_s21 = scalar_lea.vmem %s154_s6, 512  ;;  %p2009_p11 = scmp.lt.s32.totalorder %s154_s6, %s154_s6 }
  0x26   : > { %p2002_p4 = scmp.ne.s32.totalorder %s154_s6, %s2001_s21  ;;  %p2010_p6 = scmp.lt.s32.totalorder %s2001_s21, %s2001_s21 }
  0x28   : > { %p2004_p3 = pnand %p2002_p4, %p1990_p8  ;;  %p2011_p13 = por %p2010_p6, %p2009_p11 }
  0x2a   : > { %p2005_p12 = pneg %p2004_p3 }
  0x2c   : > { %p2012_p5 = pnand %p2011_p13, %p2005_p12 }
  0x2e   : > { %2015 = shalt.err (!%p2012_p5)
}
  0x2f   : > { %s3449_s23 = smov 256   ;;  %s3450_s24 = smov 16  }
  0x30   : > { %1930 = dma.hbm_to_vmem [thread:$0]  (!%p2255_p2), %s3439_s0, 512, %s154_s6, [#allocation4], %s3449_s23, %s3449_s23, %s3450_s24  }
  0x31   : > { %p3481_p4 = scmp.ne.s32.totalorder %s3475_s26, 0  ;;  %p3482_p0 = scmp.lt.s32.totalorder %s2148_s20, 2 }
  0x32   : > { %s183_s11 = sand.u32 1, %s2148_s20   ;;  %s2016_s14 = scalar_lea.hbm %s3441_s2, 256 }
  0x33   : > { %p2290_p6 = pnand %p3482_p0, %p3481_p4  ;;  %p2017_p5 = scmp.ne.s32.totalorder %s3441_s2, %s2016_s14 }
  0x34   : > { %p2023_p13 = scmp.lt.u32.totalorder %s2016_s14, %s3441_s2 }
  0x35   : > { %s3483_s10 = scalar_select %p2290_p6, 1, 0 }
  0x36   : > { %p2019_p11 = pnand %p2017_p5, %p1990_p8 }
  0x38   : > { %p2020_p12 = pneg %p2019_p11 }
  0x3a   : > { %p2025_p3 = pnand %p2023_p13, %p2020_p12 }
  0x3c   : > { %2028 = shalt.err (!%p2025_p3)
}
  0x3d   : > { %s2029_s21 = scalar_lea.vmem %s170_s9, 256  ;;  %p2037_p1 = scmp.lt.s32.totalorder %s170_s9, %s170_s9 }
  0x3e   : > { %p2030_p7 = scmp.ne.s32.totalorder %s170_s9, %s2029_s21  ;;  %p2038_p4 = scmp.lt.s32.totalorder %s2029_s21, %s2029_s21 }
  0x40   : > { %p2032_p9 = pnand %p2030_p7, %p1990_p8  ;;  %p2039_p0 = por %p2038_p4, %p2037_p1 }
  0x42   : > { %p2033_p10 = pneg %p2032_p9 }
  0x44   : > { %p2040_p6 = pnand %p2039_p0, %p2033_p10 }
  0x46   : > { %2043 = shalt.err (!%p2040_p6)
}
  0x47   : > { %s2154_s5 = smov 128   ;;  %s2155_s8 = smov 8  }
  0x48   : > { %1933 = dma.hbm_to_vmem [thread:$0]  (!%p2255_p2), %s3441_s2, 256, %s170_s9, [#allocation7], %s2154_s5, %s2154_s5, %s2155_s8  }
  0x49   : > { %s185_s14 = sand.u32 1, %s2144_s19   ;;  %s1914_s16 = sshll.u32 %s2148_s20, 10 }
  0x4a   : > { %s1904_s15 = sshll.u32 %s185_s14, 6  ;;  %s2320_s21 = scalar_lea.hbm %s3442_s3, %s1914_s16 }
  0x4b   : > { %s187_s23 = scalar_lea.vmem [#allocation8], %s1904_s15  ;;  %s2324_s7 = scalar_lea.sflag [#allocation4], %s183_s11 }
  0x4c   : > { %s194_s24 = sshll.u32 %s187_s23, 4  ;;  %s2044_s12 = scalar_lea.hbm %s2320_s21, 1024  ;;  %s2322_s24 = int_to_ptr.vmem [resolvable:$true] %s194_s24 }
  0x4d   : > { %p2045_p2 = scmp.ne.s32.totalorder %s2320_s21, %s2044_s12  ;;  %p3484_p8 = scmp.ne.s32.totalorder %s3483_s10, 0 }
  0x4e   : > { %s2049_s8 = scalar_lea.hbm %s3442_s3, 2048  ;;  %p2050_p12 = scmp.lt.u32.totalorder %s2320_s21, %s3442_s3 }
  0x4f   : > { %p2046_p6 = pneg %p3484_p8  ;;  %p2051_p13 = scmp.lt.u32.totalorder %s2049_s8, %s2044_s12 }
  0x50   : > { %p2053_p7 = scmp.lt.u32.totalorder %s2044_s12, %s2320_s21 }
  0x51   : > { %p2047_p5 = pnand %p2046_p6, %p2045_p2  ;;  %p2052_p3 = por %p2051_p13, %p2050_p12 }
  0x53   : > { %p2048_p11 = pneg %p2047_p5  ;;  %p2054_p9 = por %p2053_p7, %p2052_p3 }
  0x55   : > { %p2055_p10 = pnand %p2054_p9, %p2048_p11 }
  0x57   : > { %2058 = shalt.err (!%p2055_p10)
}
  0x58   : > { %s2059_s23 = scalar_lea.vmem %s2322_s24, 1024  ;;  %s2156_s11 = smov [#allocation8]  }
  0x59   : > { %p2060_p1 = scmp.ne.s32.totalorder %s2322_s24, %s2059_s23  ;;  %s2064_s15 = sshll.u32 %s2156_s11, 4  ;;  %s2065_s15 = int_to_ptr.vmem [resolvable:$false] %s2064_s15 }
  0x5a   : > { %s2066_s16 = scalar_lea.vmem %s2065_s15, 2048  ;;  %p2067_p2 = scmp.lt.s32.totalorder %s2322_s24, %s2065_s15 }
  0x5b   : > { %p2062_p4 = pnand %p2060_p1, %p2046_p6  ;;  %p2068_p5 = scmp.lt.s32.totalorder %s2066_s16, %s2059_s23 }
  0x5d   : > { %p2063_p0 = pneg %p2062_p4  ;;  %p2069_p12 = por %p2068_p5, %p2067_p2 }
  0x5f   : > { %p2070_p13 = pnand %p2069_p12, %p2063_p0 }
  0x61   : > { %2073 = shalt.err (!%p2070_p13)
}
  0x62   : > { %s3485_s26 = smov 16   ;;  %s3486_s6 = smov 256  }
  0x63   : > { %1937 = dma.hbm_to_vmem [thread:$0]  (!%p3484_p8), %s2320_s21, 1024, %s2322_s24, %s2324_s7, %s3486_s6, %s3486_s6, %s3485_s26  }
  0x64   : > { %p3487_p6 = scmp.ne.s32.totalorder %s3479_s30, 0 }
  0x66   : > { %206 = sbr.rel (%p3487_p6) target bundleno = 710 (0x2c6), region = 36 }
  0x6d   : > { %p3488_p11 = scmp.eq.s32.totalorder %s2208_s1, 0 }
  0x6f   : > { %2119 = dma.done.wait (%p3488_p11), [#allocation4], 512   ;;  %p3489_p3 = pmov %p3488_p11 }
  0x71   : > { %2121 = vsyncadd (%p3489_p3), [#allocation4], 4294966784  ;;  %p3490_p7 = pmov %p3489_p3 }
  0x72   : > { %p3491_p9 = pmov %p3489_p3 }
  0x73   : > { %2123 = dma.done.wait (%p3490_p7), [#allocation7], 256  }
  0x74   : > { %2125 = vsyncadd (%p3491_p9), [#allocation7], 4294967040  ;;  %s216_s10 = sand.u32 1, %s2208_s1   ;;  %s2367_s24 = sand.u32 1, %s2140_s18  }
  0x75   : > { %s1910_s30 = sshll.u32 %s2367_s24, 6  ;;  %s217_s21 = scalar_lea.sflag [#allocation4], %s216_s10 }
  0x76   : > { %s2370_s7 = scalar_lea.vmem [#allocation8], %s1910_s30  ;;  %p3492_p8 = scmp.ne.s32.totalorder %s3476_s27, 0 }
  0x78   : > { %2127 = dma.done.wait (%p3492_p8), %s217_s21, 1024  }
  0x79   : > { %2129 = vsyncadd (%p3492_p8), %s217_s21, 4294966272  ;;  %v2157_v1 = vmov 0   ;;  %v244_v2 = vld [vmem:[#allocation6] sm:$0xff]  ;;  %v245_v3 = vld [vmem:[#allocation6 + $0x8] sm:$0x3]  ;;  %vm276_vm0 = vcmask 1041408  }
  0x7a   : > { %1987 = vset.pattern.permute.xlu0 %v2157_v1  ;;  %v2377_v4 = vld [vmem:[%s2370_s7] sm:$0xff]  ;;  %v2380_v5 = vld [vmem:[%s2370_s7 + $0x8] sm:$0xff]  ;;  %v2383_v6 = vld [vmem:[%s2370_s7 + $0x10] sm:$0x11]  ;;  %vm329_vm1 = vcmask 1040384   ;;  %vm351_vm2 = vcmask 1046528  }
  0x7b   : > { %260 = vperm.xlu0 %1987, %v244_v2   ;;  %v2386_v7 = vld [vmem:[%s2370_s7 + $0x18] sm:$0x11]  ;;  %v2389_v8 = vld [vmem:[%s2370_s7 + $0x10] sm:$0x33]  ;;  %v250_v9 = vunpack.c.l.bf16 %v2377_v4  ;;  %v2396_v11 = vld [vmem:[%s2370_s7] sm:$0xee]  ;;  %v251_v12 = vunpack.c.h.bf16 %v2377_v4  ;;  %v252_v13 = vunpack.c.l.bf16 %v2380_v5  ;;  %v253_v14 = vunpack.c.h.bf16 %v2380_v5 }
  0x7c   : > { %v2393_v10 = vld [vmem:[%s2370_s7 + $0x18] sm:$0x33]  ;;  %v254_v15 = vunpack.c.l.bf16 %v2383_v6  ;;  %v2402_v16 = vld [vmem:[#allocation3] sm:$0x11]  ;;  %v2405_v17 = vld [vmem:[%s2370_s7 + $0x8] sm:$0xee]  ;;  %v255_v18 = vunpack.c.h.bf16 %v2383_v6  ;;  %v256_v19 = vunpack.c.l.bf16 %v2386_v7  ;;  %v257_v20 = vunpack.c.h.bf16 %v2386_v7 }
  0x7d   : > { %v2410_v21 = vld [vmem:[#allocation3 + $0x8] sm:$0x11]  ;;  %v325_v22 = vunpack.c.l.bf16 %v2389_v8  ;;  %v2414_v23 = vld [vmem:[%s2370_s7 + $0x10] sm:$0x77]  ;;  %v326_v24 = vunpack.c.h.bf16 %v2389_v8  ;;  %v3452_v25 = vunpack.c.l.bf16 %v2393_v10  ;;  %v3451_v26 = vunpack.c.h.bf16 %v2393_v10  ;;  %v2429_v34 = vld [vmem:[%s2370_s7] sm:$0xcc] }
  0x7e   : > { %v3453_v27 = vunpack.c.l.bf16 %v2396_v11  ;;  %v2421_v28 = vld [vmem:[%s2370_s7 + $0x18] sm:$0x77]  ;;  %v633_v29 = vld [vmem:[%s2370_s7 + $0x10] sm:$0xff]  ;;  %v2439_v41 = vld [vmem:[%s2370_s7 + $0x8] sm:$0xcc]  ;;  %vm451_vm3 = vcmask 1045504   ;;  %v3506_v8 = vunpack.c.h.bf16 %v2393_v10 }
  0x7f   : > { %265 = vperm.xlu0 %1987, %v245_v3   ;;  %v634_v35 = vld [vmem:[%s2370_s7 + $0x18] sm:$0xff]  ;;  %v2435_v39 = vld [vmem:[#allocation3] sm:$0x22]  ;;  %v2446_v46 = vunpack.c.l.bf16 %v633_v29  ;;  %v2449_v47 = vld [vmem:[%s2370_s7] sm:$0x88]  ;;  %v2452_v49 = vunpack.c.h.bf16 %v633_v29  ;;  %vm536_vm4 = vcmask 1042432  }
  0x80   : > { %v2441_v42 = vld [vmem:[#allocation3 + $0x8] sm:$0x22]  ;;  %v2454_v50 = vunpack.c.l.bf16 %v634_v35  ;;  %v2456_v51 = vunpack.c.h.bf16 %v634_v35  ;;  %v2459_v52 = vld [vmem:[%s2370_s7 + $0x8] sm:$0x88]  ;;  %v2462_v53 = vld [vmem:[%s2370_s7 + $0x20] sm:$0x11] }
  0x81   : > { %v2468_v58 = vld [vmem:[#allocation3] sm:$0x44]  ;;  %v2471_v59 = vld [vmem:[%s2370_s7 + $0x28] sm:$0x11]  ;;  %v2478_v0 = vld [vmem:[#allocation3 + $0x8] sm:$0x44] }
  0x82   : > { %v2482_v2 = vld [vmem:[%s2370_s7 + $0x10] sm:$0xee]  ;;  %v2489_v56 = vld [vmem:[%s2370_s7 + $0x18] sm:$0xee]  ;;  %vm558_vm5 = vcmask 1044480   ;;  %vm1217_vm6 = vcmask 1043456  }
  0x83   : > { %3493 = vst [vmem:[#allocation14_spill] sm:$0xff] %v2482_v2  ;;  %3494 = vst [vmem:[#allocation15_spill] sm:$0xff] %v2489_v56  ;;  %v2572_v31 = vld [vmem:[#allocation3] sm:$0x88]  ;;  %s1911_s27 = sshll.u32 %s2208_s1, 4  ;;  %s243_s12 = scalar_lea.vmem [#allocation9], %s2367_s24 }
  0x84   : > { %3499 = vst [vmem:[#allocation20_spill] sm:$0xff] %v2572_v31  ;;  %s1814_s9 = sshll.u32 %s243_s12, 4  ;;  %vm1799_vm7 = vcmask 0   ;;  %s3395_s13 = scalar_lea.hbm %s3443_s4, %s1911_s27  ;;  %s3397_s9 = int_to_ptr.vmem [resolvable:$true] %s1814_s9 }
  0x85   : > { %s1802_s14 = scalar_lea.sflag [#allocation5], %s2367_s24  ;;  %s2074_s23 = scalar_lea.vmem %s3397_s9, 16 }
  0x86   : > { %p2075_p10 = scmp.ne.s32.totalorder %s3397_s9, %s2074_s23  ;;  %p3591_p1 = scmp.ne.s32.totalorder %s3477_s28, 0 }
  0x87   : > { %s2158_s1 = smov [#allocation9]  }
  0x88   : > { %p2076_p4 = pnand %p2075_p10, %p3591_p1  ;;  %s2078_s11 = sshll.u32 %s2158_s1, 4  ;;  %s2079_s11 = int_to_ptr.vmem [resolvable:$false] %s2078_s11 }
  0x89   : > { %s2080_s15 = scalar_lea.vmem %s2079_s11, 32  ;;  %p2081_p2 = scmp.lt.s32.totalorder %s3397_s9, %s2079_s11 }
  0x8a   : > { %p2077_p0 = pneg %p2076_p4  ;;  %p2082_p5 = scmp.lt.s32.totalorder %s2080_s15, %s2074_s23 }
  0x8c   : > { %p2083_p12 = por %p2082_p5, %p2081_p2 }
  0x8e   : > { %p2084_p13 = pnand %p2083_p12, %p2077_p0 }
  0xfa   : > { %v2473_v60 = vpop.permute.xlu0 %260 }
  0xfb   : > { %v268_v57 = vmul.f32 %v2473_v60, %v250_v9  ;;  %v2505_v63 = vrot.slane %v2473_v60, 7  ;;  %v269_v1 = vmul.f32 %v2473_v60, %v251_v12  ;;  %v271_v6 = vmul.f32 %v2473_v60, %v253_v14 }
  0xfd   : > { %3495 = vst [vmem:[#allocation16_spill] sm:$0xff] %v2505_v63  ;;  %v335_v38 = vmul.f32 %v2505_v63, %v250_v9  ;;  %v336_v37 = vmul.f32 %v2505_v63, %v251_v12 }
  0xfe   : > { %v2499_v48 = vpop.permute.xlu0 %265 }
  0xff   : > { %v272_v3 = vmul.f32 %v2499_v48, %v254_v15  ;;  %v273_v35 = vmul.f32 %v2499_v48, %v255_v18  ;;  %v274_v29 = vmul.f32 %v2499_v48, %v256_v19  ;;  %v275_v55 = vmul.f32 %v2499_v48, %v257_v20 }
 0x100   : > { %v270_v15 = vmul.f32 %v2473_v60, %v252_v13  ;;  %v331_v18 = vrot.slane %v2499_v48, 7 }
 0x101   : > { %v277_v19 = vsel %vm276_vm0, %v272_v3, 0.0  ;;  %v285_v7 = vsel %vm276_vm0, %v273_v35, 0.0  ;;  %v293_v20 = vsel %vm276_vm0, %v274_v29, 0.0  ;;  %v301_v61 = vsel %vm276_vm0, %v275_v55, 0.0 }
 0x102   : > { %v278_v62 = vadd.f32 %v277_v19, %v268_v57  ;;  %v286_v54 = vadd.f32 %v285_v7, %v269_v1  ;;  %v2543_v3 = vsel %vm329_vm1, %v2505_v63, %v331_v18  ;;  %v337_v55 = vmul.f32 %v2505_v63, %v252_v13  ;;  %v2552_v1 = vld [vmem:[%s2370_s7 + $0x20] sm:$0x33] }
 0x103   : > { %3496 = vst [vmem:[#allocation17_spill] sm:$0xff] %v2543_v3  ;;  %v338_v57 = vmul.f32 %v2505_v63, %v253_v14  ;;  %3497 = vst [vmem:[#allocation18_spill] sm:$0xff] %v2552_v1  ;;  %v294_v12 = vadd.f32 %v293_v20, %v270_v15  ;;  %v302_v35 = vadd.f32 %v301_v61, %v271_v6  ;;  %v352_v19 = vrot.slane %v335_v38, 1  ;;  %v2568_v15 = vld [vmem:[%s2370_s7 + $0x28] sm:$0x33] }
 0x104   : > { %v279_v4 = vrot.slane %v278_v62, 4  ;;  %v287_v29 = vrot.slane %v286_v54, 4  ;;  %v339_v18 = vmul.f32 %v2543_v3, %v325_v22  ;;  %v340_v13 = vmul.f32 %v2543_v3, %v326_v24  ;;  %3498 = vst [vmem:[#allocation19_spill] sm:$0xff] %v2568_v15 }
 0x105   : > { %v341_v5 = vmul.f32 %v2543_v3, %v3452_v25  ;;  %v342_v14 = vmul.f32 %v2543_v3, %v3451_v26  ;;  %v355_v7 = vrot.slane %v336_v37, 1  ;;  %v295_v43 = vrot.slane %v294_v12, 4  ;;  %v2586_v37 = vld [vmem:[#allocation3 + $0x8] sm:$0x88] }
 0x106   : > { %v353_v20 = vrot.slane %v339_v18, 1  ;;  %v356_v9 = vrot.slane %v340_v13, 1  ;;  %v303_v40 = vrot.slane %v302_v35, 4  ;;  %v358_v36 = vrot.slane %v337_v55, 1  ;;  %3500 = vst [vmem:[#allocation21_spill] sm:$0xff] %v2586_v37 }
 0x107   : > { %v359_v45 = vrot.slane %v341_v5, 1  ;;  %v362_v44 = vrot.slane %v342_v14, 1  ;;  %v361_v30 = vrot.slane %v338_v57, 1  ;;  %v280_v33 = vadd.f32 %v279_v4, %v278_v62 }
 0x108   : > { %v288_v32 = vadd.f32 %v287_v29, %v286_v54  ;;  %v354_v61 = vsel %vm351_vm2, %v352_v19, %v353_v20  ;;  %v357_v6 = vsel %vm351_vm2, %v355_v7, %v356_v9  ;;  %v372_v5 = vsel %vm276_vm0, %v353_v20, 0.0 }
 0x109   : > { %v360_v18 = vsel %vm351_vm2, %v358_v36, %v359_v45  ;;  %v363_v13 = vsel %vm351_vm2, %v361_v30, %v362_v44  ;;  %v380_v55 = vsel %vm276_vm0, %v356_v9, 0.0  ;;  %v388_v54 = vsel %vm276_vm0, %v359_v45, 0.0 }
 0x10a   : > { %v396_v62 = vsel %vm276_vm0, %v362_v44, 0.0  ;;  %v296_v57 = vadd.f32 %v295_v43, %v294_v12  ;;  %v304_v4 = vadd.f32 %v303_v40, %v302_v35  ;;  %v373_v19 = vadd.f32 %v372_v5, %v354_v61 }
 0x10b   : > { %v381_v7 = vadd.f32 %v380_v55, %v357_v6  ;;  %v389_v38 = vadd.f32 %v388_v54, %v360_v18  ;;  %v397_v36 = vadd.f32 %v396_v62, %v363_v13  ;;  %v281_v30 = vrot.slane %v280_v33, 2 }
 0x10c   : > { %v289_v20 = vrot.slane %v288_v32, 2  ;;  %v2589_v9 = vrot.slane %v2473_v60, 6  ;;  %v431_v45 = vrot.slane %v2499_v48, 6  ;;  %v374_v44 = vrot.slane %v373_v19, 4 }
 0x10d   : > { %v382_v43 = vrot.slane %v381_v7, 4  ;;  %v390_v40 = vrot.slane %v389_v38, 4  ;;  %v398_v12 = vrot.slane %v397_v36, 4  ;;  %v297_v35 = vrot.slane %v296_v57, 2 }
 0x10e   : > { %3501 = vst [vmem:[#allocation22_spill] sm:$0xff] %v2589_v9  ;;  %v2593_v61 = vrot.slane %v2473_v60, 5  ;;  %v305_v13 = vrot.slane %v304_v4, 2  ;;  %v375_v5 = vadd.f32 %v374_v44, %v373_v19  ;;  %v2598_v55 = vrot.slane %v2473_v60, 3 }
 0x10f   : > { %v2601_v54 = vrot.slane %v2473_v60, 2  ;;  %v383_v62 = vadd.f32 %v382_v43, %v381_v7  ;;  %v391_v14 = vadd.f32 %v390_v40, %v389_v38  ;;  %v2605_v29 = vsel %vm276_vm0, %v2589_v9, %v431_v45 }
 0x110   : > { %3502 = vst [vmem:[#allocation23_spill] sm:$0xff] %v2605_v29  ;;  %v2608_v26 = vrot.slane %v2473_v60, 1  ;;  %v282_v6 = vadd.f32 %v281_v30, %v280_v33  ;;  %v290_v25 = vadd.f32 %v289_v20, %v288_v32  ;;  %v399_v18 = vadd.f32 %v398_v12, %v397_v36 }
 0x111   : > { %v435_v19 = vmul.f32 %v2589_v9, %v3453_v27  ;;  %v298_v44 = vadd.f32 %v297_v35, %v296_v57  ;;  %v439_v7 = vmul.f32 %v2605_v29, %v325_v22  ;;  %v440_v38 = vmul.f32 %v2605_v29, %v326_v24 }
 0x112   : > { %v3503_v45 = vunpack.c.l.bf16 %v2393_v10  ;;  %v306_v33 = vadd.f32 %v305_v13, %v304_v4  ;;  %v376_v32 = vrot.slane %v375_v5, 2  ;;  %v3504_v36 = vunpack.c.h.bf16 %v2396_v11 }
 0x113   : > { %v3505_v57 = vunpack.c.l.bf16 %v2405_v17  ;;  %v384_v40 = vrot.slane %v383_v62, 2  ;;  %v392_v22 = vrot.slane %v391_v14, 2  ;;  %v442_v24 = vmul.f32 %v2605_v29, %v3506_v8 }
 0x114   : > { %v441_v43 = vmul.f32 %v2605_v29, %v3503_v45  ;;  %v436_v30 = vmul.f32 %v2589_v9, %v3504_v36  ;;  %v453_v12 = vrot.slane %v439_v7, 2  ;;  %v400_v35 = vrot.slane %v399_v18, 2 }
 0x115   : > { %v437_v20 = vmul.f32 %v2589_v9, %v3505_v57  ;;  %v3507_v45 = vunpack.c.h.bf16 %v2405_v17  ;;  %v452_v13 = vrot.slane %v435_v19, 2  ;;  %v456_v27 = vrot.slane %v440_v38, 2 }
 0x116   : > { %v283_v3 = vrot.slane %v282_v6, 1  ;;  %v291_v36 = vrot.slane %v290_v25, 1  ;;  %v299_v63 = vrot.slane %v298_v44, 1  ;;  %v459_v56 = vrot.slane %v441_v43, 2 }
 0x117   : > { %v438_v4 = vmul.f32 %v2589_v9, %v3507_v45  ;;  %v377_v57 = vadd.f32 %v376_v32, %v375_v5  ;;  %v454_v15 = vsel %vm451_vm3, %v452_v13, %v453_v12  ;;  %v455_v1 = vrot.slane %v436_v30, 2 }
 0x118   : > { %v458_v10 = vrot.slane %v437_v20, 2  ;;  %v385_v37 = vadd.f32 %v384_v40, %v383_v62  ;;  %v393_v8 = vadd.f32 %v392_v22, %v391_v14  ;;  %v462_v7 = vrot.slane %v442_v24, 2 }
 0x119   : > { %v472_v29 = vsel %vm276_vm0, %v453_v12, 0.0  ;;  %v401_v31 = vadd.f32 %v400_v35, %v399_v18  ;;  %v457_v45 = vsel %vm451_vm3, %v455_v1, %v456_v27  ;;  %v461_v38 = vrot.slane %v438_v4, 2 }
 0x11a   : > { %v460_v19 = vsel %vm451_vm3, %v458_v10, %v459_v56  ;;  %v307_v2 = vrot.slane %v306_v33, 1  ;;  %v473_v9 = vadd.f32 %v472_v29, %v454_v15  ;;  %v480_v43 = vsel %vm276_vm0, %v456_v27, 0.0 }
 0x11b   : > { %v488_v5 = vsel %vm276_vm0, %v459_v56, 0.0  ;;  %v284_v32 = vadd.f32 %v283_v3, %v282_v6  ;;  %v292_v30 = vadd.f32 %v291_v36, %v290_v25  ;;  %v378_v20 = vrot.slane %v377_v57, 1 }
 0x11c   : > { %v463_v14 = vsel %vm451_vm3, %v461_v38, %v462_v7  ;;  %v474_v62 = vrot.slane %v473_v9, 4  ;;  %v481_v40 = vadd.f32 %v480_v43, %v457_v45  ;;  %v489_v22 = vadd.f32 %v488_v5, %v460_v19 }
 0x11d   : > { %v496_v18 = vsel %vm276_vm0, %v462_v7, 0.0  ;;  %v386_v1 = vrot.slane %v385_v37, 1  ;;  %v394_v24 = vrot.slane %v393_v8, 1  ;;  %v402_v12 = vrot.slane %v401_v31, 1 }
 0x11e   : > { %v2644_v15 = vmul.f32 %v2446_v46, %v2473_v60  ;;  %v475_v27 = vadd.f32 %v474_v62, %v473_v9  ;;  %v482_v29 = vrot.slane %v481_v40, 4  ;;  %v490_v56 = vrot.slane %v489_v22, 4 }
 0x11f   : > { %v497_v3 = vadd.f32 %v496_v18, %v463_v14  ;;  %v300_v25 = vadd.f32 %v299_v63, %v298_v44  ;;  %v2646_v6 = vadd.f32 %v307_v2, %v306_v33  ;;  %v3508_v35 = vunpack.c.l.bf16 %v2402_v16 }
 0x120   : > { %v538_v13 = vrot.slane %v2499_v48, 5  ;;  %v3509_v36 = vunpack.c.h.bf16 %v2402_v16  ;;  %v379_v7 = vadd.f32 %v378_v20, %v377_v57  ;;  %v483_v45 = vadd.f32 %v482_v29, %v481_v40 }
 0x121   : > { %v2650_v4 = vmul.f32 %v3508_v35, %v284_v32  ;;  %v498_v9 = vrot.slane %v497_v3, 4  ;;  %v387_v19 = vadd.f32 %v386_v1, %v385_v37  ;;  %v395_v38 = vadd.f32 %v394_v24, %v393_v8 }
 0x122   : > { %v2655_v10 = vmul.f32 %v3509_v36, %v292_v30  ;;  %v491_v43 = vadd.f32 %v490_v56, %v489_v22  ;;  %v2659_v63 = vsel %vm536_vm4, %v2593_v61, %v538_v13  ;;  %v403_v2 = vadd.f32 %v402_v12, %v401_v31 }
 0x123   : > { %v476_v44 = vrot.slane %v475_v27, 2  ;;  %v3510_v33 = vunpack.c.l.bf16 %v2396_v11  ;;  %v3511_v32 = vunpack.c.h.bf16 %v2396_v11  ;;  %v484_v57 = vrot.slane %v483_v45, 2 }
 0x124   : > { %v3512_v20 = vunpack.c.l.bf16 %v2414_v23  ;;  %v3513_v8 = vunpack.c.h.bf16 %v2414_v23  ;;  %v3514_v31 = vunpack.c.l.bf16 %v2421_v28  ;;  %v3515_v40 = vmov %v3508_v35 }
 0x125   : > { %v542_v5 = vmul.f32 %v2593_v61, %v3510_v33  ;;  %v543_v30 = vmul.f32 %v2593_v61, %v3511_v32  ;;  %v404_v22 = vmul.f32 %v379_v7, %v3515_v40  ;;  %v499_v18 = vadd.f32 %v498_v9, %v497_v3 }
 0x126   : > { %v546_v37 = vmul.f32 %v2659_v63, %v3512_v20  ;;  %v547_v14 = vmul.f32 %v2659_v63, %v3513_v8  ;;  %v548_v62 = vmul.f32 %v2659_v63, %v3514_v31  ;;  %v3516_v11 = vunpack.c.l.bf16 %v2405_v17 }
 0x127   : > { %v3517_v24 = vunpack.c.h.bf16 %v2405_v17  ;;  %v492_v29 = vrot.slane %v491_v43, 2  ;;  %v3518_v23 = vunpack.c.h.bf16 %v2421_v28  ;;  %v477_v36 = vadd.f32 %v476_v44, %v475_v27 }
 0x128   : > { %v544_v1 = vmul.f32 %v2593_v61, %v3516_v11  ;;  %v560_v35 = vrot.slane %v546_v37, 3  ;;  %v563_v13 = vrot.slane %v547_v14, 3  ;;  %v559_v33 = vrot.slane %v542_v5, 3 }
 0x129   : > { %v545_v12 = vmul.f32 %v2593_v61, %v3517_v24  ;;  %v549_v56 = vmul.f32 %v2659_v63, %v3518_v23  ;;  %v562_v32 = vrot.slane %v543_v30, 3  ;;  %v566_v7 = vrot.slane %v548_v62, 3 }
 0x12a   : > { %v3519_v3 = vunpack.c.h.bf16 %v2402_v16  ;;  %v3520_v20 = vunpack.c.l.bf16 %v2410_v21  ;;  %v3521_v17 = vunpack.c.h.bf16 %v2410_v21  ;;  %v485_v40 = vadd.f32 %v484_v57, %v483_v45 }
 0x12b   : > { %v500_v11 = vrot.slane %v499_v18, 2  ;;  %v561_v28 = vsel %vm558_vm5, %v559_v33, %v560_v35  ;;  %v564_v37 = vsel %vm558_vm5, %v562_v32, %v563_v13  ;;  %v565_v14 = vrot.slane %v544_v1, 3 }
 0x12c   : > { %v405_v9 = vmul.f32 %v387_v19, %v3519_v3  ;;  %v406_v8 = vmul.f32 %v395_v38, %v3520_v20  ;;  %v407_v31 = vmul.f32 %v403_v2, %v3521_v17  ;;  %v493_v27 = vadd.f32 %v492_v29, %v491_v43 }
 0x12d   : > { %v569_v44 = vrot.slane %v549_v56, 3  ;;  %v579_v5 = vsel %vm276_vm0, %v560_v35, 0.0  ;;  %v587_v16 = vsel %vm276_vm0, %v563_v13, 0.0  ;;  %v478_v19 = vrot.slane %v477_v36, 1 }
 0x12e   : > { %v567_v30 = vsel %vm558_vm5, %v565_v14, %v566_v7  ;;  %v568_v38 = vrot.slane %v545_v12, 3  ;;  %v595_v62 = vsel %vm276_vm0, %v566_v7, 0.0  ;;  %v412_v2 = vrot.slane %v404_v22, 1 }
 0x12f   : > { %v413_v45 = vrot.slane %v405_v9, 1  ;;  %v580_v57 = vadd.f32 %v579_v5, %v561_v28  ;;  %v588_v24 = vadd.f32 %v587_v16, %v564_v37  ;;  %v414_v23 = vrot.slane %v406_v8, 1 }
 0x130   : > { %v486_v33 = vrot.slane %v485_v40, 1  ;;  %v501_v32 = vadd.f32 %v500_v11, %v499_v18  ;;  %v570_v43 = vsel %vm558_vm5, %v568_v38, %v569_v44  ;;  %v415_v1 = vrot.slane %v407_v31, 1 }
 0x131   : > { %v494_v29 = vrot.slane %v493_v27, 1  ;;  %v596_v56 = vadd.f32 %v595_v62, %v567_v30  ;;  %v603_v35 = vsel %vm276_vm0, %v569_v44, 0.0  ;;  %v3522_v13 = vmov %v3520_v20 }
 0x132   : > { %v317_v3 = vmul.f32 %v3522_v13, %v300_v25  ;;  %v479_v12 = vadd.f32 %v478_v19, %v477_v36  ;;  %v581_v20 = vrot.slane %v580_v57, 4  ;;  %v589_v7 = vrot.slane %v588_v24, 4 }
 0x133   : > { %v3523_v22 = vmov %v3521_v17  ;;  %v420_v8 = vadd.f32 %v412_v2, %v2650_v4  ;;  %v604_v18 = vadd.f32 %v603_v35, %v570_v43  ;;  %v644_v17 = vrot.slane %v2499_v48, 3 }
 0x134   : > { %v318_v9 = vmul.f32 %v3523_v22, %v2646_v6  ;;  %v421_v31 = vadd.f32 %v413_v45, %v2655_v10  ;;  %v422_v11 = vadd.f32 %v414_v23, %v317_v3  ;;  %v487_v28 = vadd.f32 %v486_v33, %v485_v40 }
 0x135   : > { %v502_v37 = vrot.slane %v501_v32, 1  ;;  %v495_v25 = vadd.f32 %v494_v29, %v493_v27  ;;  %v597_v36 = vrot.slane %v596_v56, 4  ;;  %v2713_v44 = vsel %vm558_vm5, %v2598_v55, %v644_v17 }
 0x136   : > { %v2709_v14 = vadd.f32 %v415_v1, %v318_v9  ;;  %v3524_v21 = vunpack.c.l.bf16 %v2435_v39  ;;  %v582_v4 = vadd.f32 %v581_v20, %v580_v57  ;;  %v590_v5 = vadd.f32 %v589_v7, %v588_v24 }
 0x137   : > { %v652_v16 = vmul.f32 %v2713_v44, %v2446_v46  ;;  %v605_v10 = vrot.slane %v604_v18, 4  ;;  %v3525_v40 = vunpack.c.l.bf16 %v2429_v34  ;;  %v3526_v27 = vunpack.c.h.bf16 %v2429_v34 }
 0x138   : > { %v510_v6 = vmul.f32 %v3524_v21, %v479_v12  ;;  %v653_v38 = vmul.f32 %v2713_v44, %v2452_v49  ;;  %v503_v62 = vadd.f32 %v502_v37, %v501_v32  ;;  %v3527_v2 = vunpack.c.h.bf16 %v2435_v39 }
 0x139   : > { %v648_v19 = vmul.f32 %v2598_v55, %v3525_v40  ;;  %v649_v30 = vmul.f32 %v2598_v55, %v3526_v27  ;;  %v3528_v57 = vunpack.c.l.bf16 %v2439_v41  ;;  %v654_v23 = vmul.f32 %v2713_v44, %v2454_v50 }
 0x13a   : > { %v511_v45 = vmul.f32 %v3527_v2, %v487_v28  ;;  %v3529_v33 = vunpack.c.l.bf16 %v2441_v42  ;;  %v598_v34 = vadd.f32 %v597_v36, %v596_v56  ;;  %v655_v1 = vmul.f32 %v2713_v44, %v2456_v51 }
 0x13b   : > { %v650_v24 = vmul.f32 %v2598_v55, %v3528_v57  ;;  %v665_v29 = vrot.slane %v652_v16, 5  ;;  %v518_v35 = vrot.slane %v510_v6, 2  ;;  %v583_v32 = vrot.slane %v582_v4, 2 }
 0x13c   : > { %v512_v43 = vmul.f32 %v3529_v33, %v495_v25  ;;  %v3530_v13 = vunpack.c.h.bf16 %v2439_v41  ;;  %v668_v12 = vrot.slane %v653_v38, 5  ;;  %v591_v20 = vrot.slane %v590_v5, 2 }
 0x13d   : > { %v606_v7 = vadd.f32 %v605_v10, %v604_v18  ;;  %v664_v22 = vrot.slane %v648_v19, 5  ;;  %v667_v9 = vrot.slane %v649_v30, 5  ;;  %v3531_v17 = vunpack.c.h.bf16 %v2441_v42 }
 0x13e   : > { %v651_v3 = vmul.f32 %v2598_v55, %v3530_v13  ;;  %v519_v37 = vrot.slane %v511_v45, 2  ;;  %v670_v56 = vrot.slane %v650_v24, 5  ;;  %v671_v25 = vrot.slane %v654_v23, 5 }
 0x13f   : > { %v513_v28 = vmul.f32 %v3531_v17, %v503_v62  ;;  %v599_v36 = vrot.slane %v598_v34, 2  ;;  %v666_v21 = vsel %vm536_vm4, %v664_v22, %v665_v29  ;;  %v669_v6 = vsel %vm536_vm4, %v667_v9, %v668_v12 }
 0x140   : > { %v674_v16 = vrot.slane %v655_v1, 5  ;;  %v672_v41 = vsel %vm536_vm4, %v670_v56, %v671_v25  ;;  %v673_v40 = vrot.slane %v651_v3, 5  ;;  %v684_v27 = vsel %vm276_vm0, %v665_v29, 0.0 }
 0x141   : > { %v692_v18 = vsel %vm276_vm0, %v668_v12, 0.0  ;;  %v520_v10 = vrot.slane %v512_v43, 2  ;;  %v584_v19 = vadd.f32 %v583_v32, %v582_v4  ;;  %v592_v30 = vadd.f32 %v591_v20, %v590_v5 }
 0x142   : > { %v607_v38 = vrot.slane %v606_v7, 2  ;;  %v675_v62 = vsel %vm536_vm4, %v673_v40, %v674_v16  ;;  %v685_v2 = vadd.f32 %v684_v27, %v666_v21  ;;  %v693_v45 = vadd.f32 %v692_v18, %v669_v6 }
 0x143   : > { %v700_v57 = vsel %vm276_vm0, %v671_v25, 0.0  ;;  %v521_v24 = vrot.slane %v513_v28, 2  ;;  %v2750_v23 = vadd.f32 %v518_v35, %v420_v8  ;;  %v2752_v33 = vadd.f32 %v519_v37, %v421_v31 }
 0x144   : > { %v701_v1 = vadd.f32 %v700_v57, %v672_v41  ;;  %v600_v13 = vadd.f32 %v599_v36, %v598_v34  ;;  %v686_v29 = vrot.slane %v685_v2, 4  ;;  %v694_v3 = vrot.slane %v693_v45, 4 }
 0x145   : > { %v708_v43 = vsel %vm276_vm0, %v674_v16, 0.0  ;;  %v2755_v4 = vadd.f32 %v520_v10, %v422_v11  ;;  %v749_v12 = vrot.slane %v2499_v48, 2  ;;  %v585_v20 = vrot.slane %v584_v19, 1 }
 0x146   : > { %v702_v5 = vrot.slane %v701_v1, 4  ;;  %v709_v32 = vadd.f32 %v708_v43, %v675_v62  ;;  %v593_v22 = vrot.slane %v592_v30, 1  ;;  %v608_v9 = vadd.f32 %v607_v38, %v606_v7 }
 0x147   : > { %v687_v17 = vadd.f32 %v686_v29, %v685_v2  ;;  %v2759_v8 = vadd.f32 %v521_v24, %v2709_v14  ;;  %v695_v31 = vadd.f32 %v694_v3, %v693_v45  ;;  %v750_v34 = vsel %vm451_vm3, %v2601_v54, %v749_v12 }
 0x148   : > { %v703_v35 = vadd.f32 %v702_v5, %v701_v1  ;;  %v601_v28 = vrot.slane %v600_v13, 1  ;;  %v710_v37 = vrot.slane %v709_v32, 4  ;;  %v3532_v11 = vunpack.c.l.bf16 %v2449_v47 }
 0x149   : > { %v757_v25 = vmul.f32 %v750_v34, %v2446_v46  ;;  %v688_v36 = vrot.slane %v687_v17, 2  ;;  %v3533_v7 = vunpack.c.h.bf16 %v2449_v47  ;;  %v758_v14 = vmul.f32 %v750_v34, %v2452_v49 }
 0x14a   : > { %v753_v56 = vmul.f32 %v2601_v54, %v3532_v11  ;;  %v759_v6 = vmul.f32 %v750_v34, %v2454_v50  ;;  %v586_v16 = vadd.f32 %v585_v20, %v584_v19  ;;  %v594_v41 = vadd.f32 %v593_v22, %v592_v30 }
 0x14b   : > { %v754_v21 = vmul.f32 %v2601_v54, %v3533_v7  ;;  %v609_v40 = vrot.slane %v608_v9, 1  ;;  %v3534_v27 = vunpack.c.l.bf16 %v2459_v52  ;;  %v696_v10 = vrot.slane %v695_v31, 2 }
 0x14c   : > { %v704_v38 = vrot.slane %v703_v35, 2  ;;  %v760_v62 = vmul.f32 %v750_v34, %v2456_v51  ;;  %v770_v2 = vrot.slane %v757_v25, 6  ;;  %v602_v45 = vadd.f32 %v601_v28, %v600_v13 }
 0x14d   : > { %v755_v18 = vmul.f32 %v2601_v54, %v3534_v27  ;;  %v711_v57 = vadd.f32 %v710_v37, %v709_v32  ;;  %v769_v24 = vrot.slane %v753_v56, 6  ;;  %v773_v1 = vrot.slane %v758_v14, 6 }
 0x14e   : > { %v689_v29 = vadd.f32 %v688_v36, %v687_v17  ;;  %v3535_v3 = vunpack.c.h.bf16 %v2459_v52  ;;  %v772_v30 = vrot.slane %v754_v21, 6  ;;  %v776_v43 = vrot.slane %v759_v6, 6 }
 0x14f   : > { %v610_v5 = vadd.f32 %v609_v40, %v608_v9  ;;  %v3536_v12 = vunpack.c.l.bf16 %v2435_v39  ;;  %v771_v22 = vsel %vm276_vm0, %v769_v24, %v770_v2  ;;  %v775_v11 = vrot.slane %v755_v18, 6 }
 0x150   : > { %v756_v19 = vmul.f32 %v2601_v54, %v3535_v3  ;;  %v697_v34 = vadd.f32 %v696_v10, %v695_v31  ;;  %v705_v25 = vadd.f32 %v704_v38, %v703_v35  ;;  %v774_v13 = vsel %vm276_vm0, %v772_v30, %v773_v1 }
 0x151   : > { %v611_v20 = vmul.f32 %v586_v16, %v3536_v12  ;;  %v779_v32 = vrot.slane %v760_v62, 6  ;;  %v712_v28 = vrot.slane %v711_v57, 2  ;;  %v777_v17 = vsel %vm276_vm0, %v775_v11, %v776_v43 }
 0x152   : > { %v789_v37 = vsel %vm276_vm0, %v770_v2, 0.0  ;;  %v797_v54 = vsel %vm276_vm0, %v773_v1, 0.0  ;;  %v3537_v9 = vunpack.c.h.bf16 %v2435_v39  ;;  %v690_v36 = vrot.slane %v689_v29, 1 }
 0x153   : > { %v778_v7 = vrot.slane %v756_v19, 6  ;;  %v790_v21 = vadd.f32 %v789_v37, %v771_v22  ;;  %v3538_v14 = vunpack.c.l.bf16 %v2441_v42  ;;  %v3539_v35 = vunpack.c.h.bf16 %v2441_v42 }
 0x154   : > { %v612_v56 = vmul.f32 %v594_v41, %v3537_v9  ;;  %v798_v16 = vadd.f32 %v797_v54, %v774_v13  ;;  %v805_v40 = vsel %vm276_vm0, %v776_v43, 0.0  ;;  %v698_v27 = vrot.slane %v697_v34, 1 }
 0x155   : > { %v613_v31 = vmul.f32 %v602_v45, %v3538_v14  ;;  %v614_v6 = vmul.f32 %v610_v5, %v3539_v35  ;;  %v780_v18 = vsel %vm276_vm0, %v778_v7, %v779_v32  ;;  %v791_v10 = vrot.slane %v790_v21, 4 }
 0x156   : > { %v806_v38 = vadd.f32 %v805_v40, %v777_v17  ;;  %v706_v62 = vrot.slane %v705_v25, 1  ;;  %v713_v39 = vadd.f32 %v712_v28, %v711_v57  ;;  %v799_v41 = vrot.slane %v798_v16, 4 }
 0x157   : > { %v813_v2 = vsel %vm276_vm0, %v779_v32, 0.0  ;;  %v619_v24 = vrot.slane %v611_v20, 3  ;;  %v691_v1 = vadd.f32 %v690_v36, %v689_v29  ;;  %v792_v3 = vadd.f32 %v791_v10, %v790_v21 }
 0x158   : > { %v807_v45 = vrot.slane %v806_v38, 4  ;;  %v620_v19 = vrot.slane %v612_v56, 3  ;;  %v800_v42 = vadd.f32 %v799_v41, %v798_v16  ;;  %v814_v30 = vadd.f32 %v813_v2, %v780_v18 }
 0x159   : > { %v2796_v5 = vrot.slane %v2499_v48, 1  ;;  %v621_v43 = vrot.slane %v613_v31, 3  ;;  %v699_v12 = vadd.f32 %v698_v27, %v697_v34  ;;  %v793_v22 = vrot.slane %v792_v3, 2 }
 0x15a   : > { %v808_v11 = vadd.f32 %v807_v45, %v806_v38  ;;  %v622_v13 = vrot.slane %v614_v6, 3  ;;  %v707_v17 = vadd.f32 %v706_v62, %v705_v25  ;;  %v714_v57 = vrot.slane %v713_v39, 1 }
 0x15b   : > { %v815_v28 = vrot.slane %v814_v30, 4  ;;  %v3540_v32 = vunpack.c.l.bf16 %v2468_v58  ;;  %v794_v29 = vadd.f32 %v793_v22, %v792_v3  ;;  %v801_v37 = vrot.slane %v800_v42, 2 }
 0x15c   : > { %v2805_v54 = vsel %vm351_vm2, %v2608_v26, %v2796_v5  ;;  %v2808_v9 = vadd.f32 %v619_v24, %v2750_v23  ;;  %v2811_v34 = vadd.f32 %v620_v19, %v2752_v33  ;;  %v809_v25 = vrot.slane %v808_v11, 2 }
 0x15d   : > { %v2800_v20 = vmul.f32 %v3540_v32, %v691_v1  ;;  %v2815_v56 = vmul.f32 %v2452_v49, %v2473_v60  ;;  %v2818_v36 = vadd.f32 %v621_v43, %v2755_v4  ;;  %v2821_v7 = vadd.f32 %v622_v13, %v2759_v8 }
 0x15e   : > { %v3541_v21 = vunpack.c.h.bf16 %v2468_v58  ;;  %v816_v23 = vadd.f32 %v815_v28, %v814_v30  ;;  %v2827_v31 = vadd.f32 %v714_v57, %v713_v39  ;;  %v3542_v33 = vunpack.c.l.bf16 %v2478_v0 }
 0x15f   : > { %v857_v6 = vmul.f32 %v2805_v54, %v2446_v46  ;;  %v858_v4 = vmul.f32 %v2805_v54, %v2452_v49  ;;  %v730_v8 = vrot.slane %v2800_v20, 4  ;;  %v795_v16 = vrot.slane %v794_v29, 1 }
 0x160   : > { %v2825_v14 = vmul.f32 %v3541_v21, %v699_v12  ;;  %v2831_v35 = vmul.f32 %v3542_v33, %v707_v17  ;;  %v2838_v40 = vadd.f32 %v801_v37, %v800_v42  ;;  %v859_v27 = vmul.f32 %v2805_v54, %v2454_v50 }
 0x161   : > { %v2842_v18 = vadd.f32 %v809_v25, %v808_v11  ;;  %v3543_v10 = vunpack.c.l.bf16 %v2449_v47  ;;  %v3544_v62 = vunpack.c.h.bf16 %v2449_v47  ;;  %v860_v49 = vmul.f32 %v2805_v54, %v2456_v51 }
 0x162   : > { %v817_v39 = vrot.slane %v816_v23, 2  ;;  %v3545_v41 = vunpack.c.l.bf16 %v2459_v52  ;;  %v3546_v24 = vunpack.c.l.bf16 %v2462_v53  ;;  %v3547_v3 = vunpack.c.h.bf16 %v2462_v53 }
 0x163   : > { %v853_v38 = vmul.f32 %v2608_v26, %v3543_v10  ;;  %v854_v46 = vmul.f32 %v2608_v26, %v3544_v62  ;;  %v3548_v47 = vunpack.c.h.bf16 %v2459_v52  ;;  %v3549_v42 = vunpack.c.l.bf16 %v2471_v59 }
 0x164   : > { %v855_v2 = vmul.f32 %v2608_v26, %v3545_v41  ;;  %v861_v1 = vmul.f32 %v2796_v5, %v3546_v24  ;;  %v862_v45 = vmul.f32 %v2796_v5, %v3547_v3  ;;  %v878_v43 = vrot.slane %v857_v6, 7 }
 0x165   : > { %v856_v19 = vmul.f32 %v2608_v26, %v3548_v47  ;;  %v863_v30 = vmul.f32 %v2796_v5, %v3549_v42  ;;  %v881_v12 = vrot.slane %v858_v4, 7  ;;  %v2867_v22 = vadd.f32 %v795_v16, %v794_v29 }
 0x166   : > { %v803_v11 = vrot.slane %v2838_v40, 1  ;;  %v3550_v13 = vunpack.c.h.bf16 %v2471_v59  ;;  %v884_v57 = vrot.slane %v859_v27, 7  ;;  %v811_v28 = vrot.slane %v2842_v18, 1 }
 0x167   : > { %v877_v52 = vrot.slane %v853_v38, 7  ;;  %v880_v32 = vrot.slane %v854_v46, 7  ;;  %v887_v37 = vrot.slane %v860_v49, 7  ;;  %v818_v25 = vadd.f32 %v817_v39, %v816_v23 }
 0x168   : > { %v864_v17 = vmul.f32 %v2796_v5, %v3550_v13  ;;  %v883_v21 = vrot.slane %v855_v2, 7  ;;  %v889_v33 = vrot.slane %v861_v1, 7  ;;  %v891_v10 = vrot.slane %v862_v45, 7 }
 0x169   : > { %v879_v6 = vsel %vm329_vm1, %v877_v52, %v878_v43  ;;  %v882_v29 = vsel %vm329_vm1, %v880_v32, %v881_v12  ;;  %v886_v4 = vrot.slane %v856_v19, 7  ;;  %v893_v16 = vrot.slane %v863_v30, 7 }
 0x16a   : > { %v885_v62 = vsel %vm329_vm1, %v883_v21, %v884_v57  ;;  %v890_v41 = vsel %vm329_vm1, %v878_v43, %v889_v33  ;;  %v892_v27 = vsel %vm329_vm1, %v881_v12, %v891_v10  ;;  %v895_v24 = vrot.slane %v864_v17, 7 }
 0x16b   : > { %v888_v38 = vsel %vm329_vm1, %v886_v4, %v887_v37  ;;  %v894_v23 = vsel %vm329_vm1, %v884_v57, %v893_v16  ;;  %v905_v46 = vsel %vm276_vm0, %v890_v41, 0.0  ;;  %v913_v49 = vsel %vm276_vm0, %v892_v27, 0.0 }
 0x16c   : > { %v896_v39 = vsel %vm329_vm1, %v887_v37, %v895_v24  ;;  %v906_v2 = vadd.f32 %v905_v46, %v879_v6  ;;  %v914_v1 = vadd.f32 %v913_v49, %v882_v29  ;;  %v921_v3 = vsel %vm276_vm0, %v894_v23, 0.0 }
 0x16d   : > { %v819_v45 = vrot.slane %v818_v25, 1  ;;  %v922_v47 = vadd.f32 %v921_v3, %v885_v62  ;;  %v929_v19 = vsel %vm276_vm0, %v896_v39, 0.0  ;;  %v965_v42 = vmul.f32 %v2454_v50, %v2473_v60 }
 0x16e   : > { %v907_v30 = vrot.slane %v906_v2, 4  ;;  %v915_v43 = vrot.slane %v914_v1, 4  ;;  %v930_v12 = vadd.f32 %v929_v19, %v888_v38  ;;  %v966_v13 = vmul.f32 %v2456_v51, %v2473_v60 }
 0x16f   : > { %v923_v17 = vrot.slane %v922_v47, 4  ;;  %v3551_v57 = vunpack.c.l.bf16 %v2462_v53  ;;  %v3552_v32 = vunpack.c.h.bf16 %v2462_v53  ;;  %v3553_v21 = vunpack.c.l.bf16 %v2471_v59 }
 0x170   : > { %v908_v50 = vadd.f32 %v907_v30, %v906_v2  ;;  %v916_v10 = vadd.f32 %v915_v43, %v914_v1  ;;  %v931_v6 = vrot.slane %v930_v12, 4  ;;  %v3554_v29 = vunpack.c.h.bf16 %v2471_v59 }
 0x171   : > { %v967_v52 = vmul.f32 %v3551_v57, %v2499_v48  ;;  %v968_v37 = vmul.f32 %v3552_v32, %v2499_v48  ;;  %v969_v33 = vmul.f32 %v3553_v21, %v2499_v48  ;;  %v924_v4 = vadd.f32 %v923_v17, %v922_v47 }
 0x172   : > { %v970_v51 = vmul.f32 %v3554_v29, %v2499_v48  ;;  %v909_v53 = vrot.slane %v908_v50, 2  ;;  %v917_v27 = vrot.slane %v916_v10, 2  ;;  %v932_v24 = vadd.f32 %v931_v6, %v930_v12 }
 0x173   : > { %v971_v16 = vsel %vm276_vm0, %v967_v52, 0.0  ;;  %v979_v62 = vsel %vm276_vm0, %v968_v37, 0.0  ;;  %v987_v41 = vsel %vm276_vm0, %v969_v33, 0.0  ;;  %v925_v23 = vrot.slane %v924_v4, 2 }
 0x174   : > { %v972_v38 = vadd.f32 %v971_v16, %v2644_v15  ;;  %v980_v46 = vadd.f32 %v979_v62, %v2815_v56  ;;  %v988_v49 = vadd.f32 %v987_v41, %v965_v42  ;;  %v995_v39 = vsel %vm276_vm0, %v970_v51, 0.0 }
 0x175   : > { %v910_v59 = vadd.f32 %v909_v53, %v908_v50  ;;  %v918_v2 = vadd.f32 %v917_v27, %v916_v10  ;;  %v933_v1 = vrot.slane %v932_v24, 2  ;;  %v926_v47 = vadd.f32 %v925_v23, %v924_v4 }
 0x176   : > { %v973_v3 = vrot.slane %v972_v38, 4  ;;  %v981_v19 = vrot.slane %v980_v46, 4  ;;  %v989_v30 = vrot.slane %v988_v49, 4  ;;  %v996_v43 = vadd.f32 %v995_v39, %v966_v13 }
 0x177   : > { %v3555_v17 = vunpack.c.h.bf16 %v2478_v0  ;;  %v804_v15 = vadd.f32 %v803_v11, %v2838_v40  ;;  %v812_v56 = vadd.f32 %v811_v28, %v2842_v18  ;;  %v820_v57 = vadd.f32 %v819_v45, %v818_v25 }
 0x178   : > { %v974_v42 = vadd.f32 %v973_v3, %v972_v38  ;;  %v934_v52 = vadd.f32 %v933_v1, %v932_v24  ;;  %v982_v32 = vadd.f32 %v981_v19, %v980_v46  ;;  %v990_v37 = vadd.f32 %v989_v30, %v988_v49  ;;  %v3560_v30 = vld [vmem:[#allocation22_spill] sm:$0xff] }
 0x179   : > { %v725_v12 = vmul.f32 %v3555_v17, %v2827_v31  ;;  %v731_v21 = vrot.slane %v2825_v14, 4  ;;  %v732_v33 = vrot.slane %v2831_v35, 4  ;;  %v3556_v13 = vunpack.c.l.bf16 %v2468_v58 }
 0x17a   : > { %v997_v31 = vrot.slane %v996_v43, 4  ;;  %v738_v40 = vadd.f32 %v730_v8, %v2808_v9  ;;  %v911_v11 = vrot.slane %v910_v59, 1  ;;  %v919_v18 = vrot.slane %v918_v2, 1 }
 0x17b   : > { %v821_v50 = vmul.f32 %v2867_v22, %v3556_v13  ;;  %v927_v28 = vrot.slane %v926_v47, 1  ;;  %v733_v25 = vrot.slane %v725_v12, 4  ;;  %v3557_v45 = vunpack.c.h.bf16 %v2468_v58 }
 0x17c   : > { %v3558_v14 = vunpack.c.l.bf16 %v2478_v0  ;;  %v975_v35 = vrot.slane %v974_v42, 2  ;;  %v3559_v29 = vmov %v3555_v17  ;;  %v935_v22 = vrot.slane %v934_v52, 1 }
 0x17d   : > { %v822_v10 = vmul.f32 %v804_v15, %v3557_v45  ;;  %v824_v51 = vmul.f32 %v820_v57, %v3559_v29  ;;  %v983_v4 = vrot.slane %v982_v32, 2  ;;  %v991_v16 = vrot.slane %v990_v37, 2  ;;  %v3574_v45 = vld [vmem:[#allocation19_spill] sm:$0xff] }
 0x17e   : > { %v823_v6 = vmul.f32 %v812_v56, %v3558_v14  ;;  %v739_v20 = vadd.f32 %v731_v21, %v2811_v34  ;;  %v740_v9 = vadd.f32 %v732_v33, %v2818_v36  ;;  %v829_v8 = vrot.slane %v821_v50, 5  ;;  %v3561_v36 = vld [vmem:[#allocation14_spill] sm:$0xff]  ;;  %v3566_v56 = vld [vmem:[#allocation21_spill] sm:$0xff]  ;;  %v3569_v21 = vld [vmem:[#allocation23_spill] sm:$0xff] }
 0x17f   : > { %v998_v62 = vadd.f32 %v997_v31, %v996_v43  ;;  %v741_v41 = vadd.f32 %v733_v25, %v2821_v7  ;;  %v912_v58 = vadd.f32 %v911_v11, %v910_v59  ;;  %v920_v53 = vadd.f32 %v919_v18, %v918_v2  ;;  %v3563_v7 = vld [vmem:[#allocation20_spill] sm:$0xff]  ;;  %v3570_v33 = vld [vmem:[#allocation18_spill] sm:$0xff] }
 0x180   : > { %v928_v27 = vadd.f32 %v927_v28, %v926_v47  ;;  %v830_v24 = vrot.slane %v822_v10, 5  ;;  %v831_v38 = vrot.slane %v823_v6, 5  ;;  %v837_v23 = vadd.f32 %v829_v8, %v738_v40 }
 0x181   : > { %v976_v46 = vadd.f32 %v975_v35, %v974_v42  ;;  %v832_v0 = vrot.slane %v824_v51, 5  ;;  %v936_v49 = vadd.f32 %v935_v22, %v934_v52  ;;  %v984_v39 = vadd.f32 %v983_v4, %v982_v32 }
 0x182   : > { %v992_v1 = vadd.f32 %v991_v16, %v990_v37  ;;  %v838_v3 = vadd.f32 %v830_v24, %v739_v20  ;;  %v839_v19 = vadd.f32 %v831_v38, %v740_v9  ;;  %v999_v34 = vrot.slane %v998_v62, 2  ;;  %v3577_v20 = vld [vmem:[#allocation15_spill] sm:$0xff] }
 0x183   : > { %v3562_v17 = vunpack.c.l.bf16 %v3561_v36  ;;  %v840_v12 = vadd.f32 %v832_v0, %v741_v41  ;;  %v3564_v59 = vunpack.c.l.bf16 %v3563_v7  ;;  %v3565_v47 = vunpack.c.h.bf16 %v3563_v7 }
 0x184   : > { %v3567_v42 = vunpack.c.l.bf16 %v3566_v56  ;;  %v977_v52 = vrot.slane %v976_v46, 1  ;;  %v3568_v32 = vunpack.c.h.bf16 %v3561_v36  ;;  %v3571_v13 = vunpack.c.l.bf16 %v3570_v33 }
 0x185   : > { %v1035_v43 = vmul.f32 %v3562_v17, %v3560_v30  ;;  %v943_v2 = vmul.f32 %v3564_v59, %v912_v58  ;;  %v944_v15 = vmul.f32 %v3565_v47, %v920_v53  ;;  %v3572_v31 = vunpack.c.h.bf16 %v3570_v33 }
 0x186   : > { %v945_v57 = vmul.f32 %v3567_v42, %v928_v27  ;;  %v1036_v37 = vmul.f32 %v3568_v32, %v3560_v30  ;;  %v1039_v50 = vmul.f32 %v3571_v13, %v3569_v21  ;;  %v3573_v11 = vunpack.c.h.bf16 %v3566_v56 }
 0x187   : > { %v1040_v40 = vmul.f32 %v3572_v31, %v3569_v21  ;;  %v985_v28 = vrot.slane %v984_v39, 1  ;;  %v993_v25 = vrot.slane %v992_v1, 1  ;;  %v3575_v10 = vunpack.c.l.bf16 %v3574_v45 }
 0x188   : > { %v946_v18 = vmul.f32 %v3573_v11, %v936_v49  ;;  %v1000_v6 = vadd.f32 %v999_v34, %v998_v62  ;;  %v3576_v35 = vunpack.c.h.bf16 %v3574_v45  ;;  %v1051_v51 = vrot.slane %v1035_v43, 2 }
 0x189   : > { %v1041_v14 = vmul.f32 %v3575_v10, %v3569_v21  ;;  %v1052_v22 = vrot.slane %v1039_v50, 2  ;;  %v951_v4 = vrot.slane %v943_v2, 6  ;;  %v952_v16 = vrot.slane %v944_v15, 6  ;;  %v2974_v50 = vld [vmem:[%s2370_s7 + $0x28] sm:$0x77] }
 0x18a   : > { %v1042_v29 = vmul.f32 %v3576_v35, %v3569_v21  ;;  %v3578_v9 = vunpack.c.l.bf16 %v3577_v20  ;;  %v3579_v41 = vunpack.c.h.bf16 %v3577_v20  ;;  %v978_v53 = vadd.f32 %v977_v52, %v976_v46  ;;  %v2969_v52 = vld [vmem:[%s2370_s7 + $0x20] sm:$0x77] }
 0x18b   : > { %v1053_v62 = vsel %vm451_vm3, %v1051_v51, %v1052_v22  ;;  %v1054_v27 = vrot.slane %v1036_v37, 2  ;;  %v1055_v24 = vrot.slane %v1040_v40, 2  ;;  %v986_v38 = vadd.f32 %v985_v28, %v984_v39 }
 0x18c   : > { %v1037_v8 = vmul.f32 %v3578_v9, %v3560_v30  ;;  %v1038_v58 = vmul.f32 %v3579_v41, %v3560_v30  ;;  %v1058_v0 = vrot.slane %v1041_v14, 2  ;;  %v1061_v49 = vrot.slane %v1042_v29, 2 }
 0x18d   : > { %v1071_v34 = vsel %vm276_vm0, %v1052_v22, 0.0  ;;  %v994_v17 = vadd.f32 %v993_v25, %v992_v1  ;;  %v1001_v43 = vrot.slane %v1000_v6, 1  ;;  %v1056_v59 = vsel %vm451_vm3, %v1054_v27, %v1055_v24 }
 0x18e   : > { %v1079_v2 = vsel %vm276_vm0, %v1055_v24, 0.0  ;;  %v953_v47 = vrot.slane %v945_v57, 6  ;;  %v1057_v15 = vrot.slane %v1037_v8, 2  ;;  %v1060_v46 = vrot.slane %v1038_v58, 2 }
 0x18f   : > { %v1072_v42 = vadd.f32 %v1071_v34, %v1053_v62  ;;  %v954_v32 = vrot.slane %v946_v18, 6  ;;  %v959_v37 = vadd.f32 %v951_v4, %v837_v23  ;;  %v3580_v39 = vunpack.c.l.bf16 %v3563_v7 }
 0x190   : > { %v1080_v13 = vadd.f32 %v1079_v2, %v1056_v59  ;;  %v1059_v1 = vsel %vm451_vm3, %v1057_v15, %v1058_v0  ;;  %v1062_v31 = vsel %vm451_vm3, %v1060_v46, %v1061_v49  ;;  %v1087_v40 = vsel %vm276_vm0, %v1058_v0, 0.0 }
 0x191   : > { %v1003_v33 = vmul.f32 %v978_v53, %v3580_v39  ;;  %v1095_v57 = vsel %vm276_vm0, %v1061_v49, 0.0  ;;  %v1002_v11 = vadd.f32 %v1001_v43, %v1000_v6  ;;  %v3581_v28 = vunpack.c.h.bf16 %v3563_v7 }
 0x192   : > { %v3582_v23 = vunpack.c.l.bf16 %v3566_v56  ;;  %v1119_v45 = vunpack.c.l.bf16 %v2969_v52  ;;  %v960_v10 = vadd.f32 %v952_v16, %v838_v3  ;;  %v1073_v14 = vrot.slane %v1072_v42, 4 }
 0x193   : > { %v1004_v25 = vmul.f32 %v986_v38, %v3581_v28  ;;  %v1120_v35 = vunpack.c.h.bf16 %v2969_v52  ;;  %v1121_v29 = vunpack.c.l.bf16 %v2974_v50  ;;  %v961_v51 = vadd.f32 %v953_v47, %v839_v19 }
 0x194   : > { %v1005_v18 = vmul.f32 %v994_v17, %v3582_v23  ;;  %v1081_v22 = vrot.slane %v1080_v13, 4  ;;  %v1088_v4 = vadd.f32 %v1087_v40, %v1059_v1  ;;  %v1096_v9 = vadd.f32 %v1095_v57, %v1062_v31 }
 0x195   : > { %v962_v8 = vadd.f32 %v954_v32, %v840_v12  ;;  %v1011_v6 = vrot.slane %v1003_v33, 7  ;;  %v1122_v7 = vunpack.c.h.bf16 %v2974_v50  ;;  %v3583_v41 = vunpack.c.l.bf16 %v3561_v36 }
 0x196   : > { %v3584_v53 = vunpack.c.h.bf16 %v3566_v56  ;;  %v1012_v16 = vrot.slane %v1004_v25, 7  ;;  %v1013_v62 = vrot.slane %v1005_v18, 7  ;;  %v1127_v19 = vmul.f32 %v1119_v45, %v2659_v63 }
 0x197   : > { %v1123_v58 = vmul.f32 %v3583_v41, %v2593_v61  ;;  %v1074_v27 = vadd.f32 %v1073_v14, %v1072_v42  ;;  %v3585_v12 = vunpack.c.h.bf16 %v3561_v36  ;;  %v1128_v38 = vmul.f32 %v1120_v35, %v2659_v63 }
 0x198   : > { %v1006_v3 = vmul.f32 %v1002_v11, %v3584_v53  ;;  %v1129_v56 = vmul.f32 %v1121_v29, %v2659_v63  ;;  %v1082_v0 = vadd.f32 %v1081_v22, %v1080_v13  ;;  %v1089_v49 = vrot.slane %v1088_v4, 4  ;;  %v3021_v11 = vld [vmem:[#allocation3 + $0x10] sm:$0x11] }
 0x199   : > { %v1124_v24 = vmul.f32 %v3585_v12, %v2593_v61  ;;  %v1097_v34 = vrot.slane %v1096_v9, 4  ;;  %v3586_v17 = vunpack.c.l.bf16 %v3577_v20  ;;  %v1130_v36 = vmul.f32 %v1122_v7, %v2659_v63 }
 0x19a   : > { %v1139_v59 = vrot.slane %v1123_v58, 3  ;;  %v1140_v2 = vrot.slane %v1127_v19, 3  ;;  %v1143_v47 = vrot.slane %v1128_v38, 3  ;;  %v1014_v15 = vrot.slane %v1006_v3, 7  ;;  %v3036_v3 = vld [vmem:[%s2370_s7 + $0x10] sm:$0xcc] }
 0x19b   : > { %v1125_v43 = vmul.f32 %v3586_v17, %v2593_v61  ;;  %v3011_v46 = vadd.f32 %v1011_v6, %v959_v37  ;;  %v3013_v42 = vadd.f32 %v1012_v16, %v960_v10  ;;  %v3587_v32 = vunpack.c.h.bf16 %v3577_v20 }
 0x19c   : > { %v3018_v33 = vadd.f32 %v1013_v62, %v961_v51  ;;  %v1141_v13 = vsel %vm558_vm5, %v1139_v59, %v1140_v2  ;;  %v1142_v1 = vrot.slane %v1124_v24, 3  ;;  %v1146_v31 = vrot.slane %v1129_v56, 3  ;;  %v3028_v51 = vld [vmem:[#allocation3 + $0x18] sm:$0x11] }
 0x19d   : > { %v1126_v39 = vmul.f32 %v3587_v32, %v2593_v61  ;;  %v1075_v40 = vrot.slane %v1074_v27, 2  ;;  %v1090_v63 = vadd.f32 %v1089_v49, %v1088_v4  ;;  %v1098_v57 = vadd.f32 %v1097_v34, %v1096_v9  ;;  %v3042_v34 = vld [vmem:[%s2370_s7 + $0x18] sm:$0xcc] }
 0x19e   : > { %v1145_v28 = vrot.slane %v1125_v43, 3  ;;  %v1083_v37 = vrot.slane %v1082_v0, 2  ;;  %v1144_v25 = vsel %vm558_vm5, %v1142_v1, %v1143_v47  ;;  %v1149_v23 = vrot.slane %v1130_v36, 3 }
 0x19f   : > { %v1159_v20 = vsel %vm276_vm0, %v1140_v2, 0.0  ;;  %v3025_v61 = vadd.f32 %v1014_v15, %v962_v8  ;;  %v1148_v10 = vrot.slane %v1126_v39, 3  ;;  %v1105_v22 = vunpack.c.l.bf16 %v3021_v11 }
 0x1a0   : > { %v1147_v18 = vsel %vm558_vm5, %v1145_v28, %v1146_v31  ;;  %v1160_v14 = vadd.f32 %v1159_v20, %v1141_v13  ;;  %v1106_v4 = vunpack.c.h.bf16 %v3021_v11  ;;  %v1167_v9 = vsel %vm276_vm0, %v1143_v47, 0.0 }
 0x1a1   : > { %v1175_v6 = vsel %vm276_vm0, %v1146_v31, 0.0  ;;  %v1076_v41 = vadd.f32 %v1075_v40, %v1074_v27  ;;  %v1091_v58 = vrot.slane %v1090_v63, 2  ;;  %v1150_v8 = vsel %vm558_vm5, %v1148_v10, %v1149_v23 }
 0x1a2   : > { %v1168_v53 = vadd.f32 %v1167_v9, %v1144_v25  ;;  %v1084_v16 = vadd.f32 %v1083_v37, %v1082_v0  ;;  %v1099_v62 = vrot.slane %v1098_v57, 2  ;;  %v1176_v19 = vadd.f32 %v1175_v6, %v1147_v18 }
 0x1a3   : > { %v1183_v12 = vsel %vm276_vm0, %v1149_v23, 0.0  ;;  %v1107_v24 = vunpack.c.l.bf16 %v3028_v51  ;;  %v1108_v38 = vunpack.c.h.bf16 %v3028_v51  ;;  %v1161_v56 = vrot.slane %v1160_v14, 4 }
 0x1a4   : > { %v1169_v49 = vrot.slane %v1168_v53, 4  ;;  %v1184_v27 = vadd.f32 %v1183_v12, %v1150_v8  ;;  %v1213_v17 = vunpack.c.l.bf16 %v3036_v3  ;;  %v1218_v43 = vrot.slane %v2473_v60, 4 }
 0x1a5   : > { %v1092_v36 = vadd.f32 %v1091_v58, %v1090_v63  ;;  %v1177_v0 = vrot.slane %v1176_v19, 4  ;;  %v1214_v59 = vunpack.c.h.bf16 %v3036_v3  ;;  %v1219_v2 = vrot.slane %v2499_v48, 4 }
 0x1a6   : > { %v1077_v47 = vrot.slane %v1076_v41, 1  ;;  %v1085_v15 = vrot.slane %v1084_v16, 1  ;;  %v1100_v32 = vadd.f32 %v1099_v62, %v1098_v57  ;;  %v3474_v39 = vunpack.c.l.bf16 %v3042_v34 }
 0x1a7   : > { %v1162_v13 = vadd.f32 %v1161_v56, %v1160_v14  ;;  %v1170_v1 = vadd.f32 %v1169_v49, %v1168_v53  ;;  %v1216_v31 = vunpack.c.h.bf16 %v3042_v34  ;;  %v1220_v40 = vsel %vm1217_vm6, %v1218_v43, %v1219_v2 }
 0x1a8   : > { %v1185_v28 = vrot.slane %v1184_v27, 4  ;;  %v1223_v63 = vmul.f32 %v1218_v43, %v1213_v17  ;;  %v1227_v37 = vmul.f32 %v1220_v40, %v1119_v45  ;;  %v1228_v25 = vmul.f32 %v1220_v40, %v1120_v35 }
 0x1a9   : > { %v1093_v23 = vrot.slane %v1092_v36, 1  ;;  %v1178_v57 = vadd.f32 %v1177_v0, %v1176_v19  ;;  %v1224_v20 = vmul.f32 %v1218_v43, %v1214_v59  ;;  %v1229_v18 = vmul.f32 %v1220_v40, %v1121_v29 }
 0x1aa   : > { %v1101_v10 = vrot.slane %v1100_v32, 1  ;;  %v1225_v14 = vmul.f32 %v1218_v43, %v3474_v39  ;;  %v1230_v9 = vmul.f32 %v1220_v40, %v1122_v7  ;;  %v1240_v6 = vrot.slane %v1227_v37, 4 }
 0x1ab   : > { %v1078_v45 = vadd.f32 %v1077_v47, %v1076_v41  ;;  %v1163_v58 = vrot.slane %v1162_v13, 2  ;;  %v1171_v52 = vrot.slane %v1170_v1, 2  ;;  %v1226_v35 = vmul.f32 %v1218_v43, %v1216_v31 }
 0x1ac   : > { %v1086_v8 = vadd.f32 %v1085_v15, %v1084_v16  ;;  %v1186_v53 = vadd.f32 %v1185_v28, %v1184_v27  ;;  %v1239_v62 = vrot.slane %v1223_v63, 4  ;;  %v1243_v19 = vrot.slane %v1228_v25, 4 }
 0x1ad   : > { %v1094_v12 = vadd.f32 %v1093_v23, %v1092_v36  ;;  %v1179_v29 = vrot.slane %v1178_v57, 2  ;;  %v1242_v56 = vrot.slane %v1224_v20, 4  ;;  %v1246_v49 = vrot.slane %v1229_v18, 4 }
 0x1ae   : > { %v1102_v0 = vadd.f32 %v1101_v10, %v1100_v32  ;;  %v1241_v2 = vsel %vm1217_vm6, %v1239_v62, %v1240_v6  ;;  %v1245_v50 = vrot.slane %v1225_v14, 4  ;;  %v1249_v7 = vrot.slane %v1230_v9, 4 }
 0x1af   : > { %v1164_v40 = vadd.f32 %v1163_v58, %v1162_v13  ;;  %v1172_v41 = vadd.f32 %v1171_v52, %v1170_v1  ;;  %v1244_v47 = vsel %vm1217_vm6, %v1242_v56, %v1243_v19  ;;  %v1248_v37 = vrot.slane %v1226_v35, 4 }
 0x1b0   : > { %v1187_v39 = vrot.slane %v1186_v53, 2  ;;  %v1247_v16 = vsel %vm1217_vm6, %v1245_v50, %v1246_v49  ;;  %v1259_v27 = vsel %vm276_vm0, %v1240_v6, 0.0  ;;  %v1267_v43 = vsel %vm276_vm0, %v1243_v19, 0.0 }
 0x1b1   : > { %v1109_v36 = vmul.f32 %v1105_v22, %v1078_v45  ;;  %v1180_v15 = vadd.f32 %v1179_v29, %v1178_v57  ;;  %v1250_v32 = vsel %vm1217_vm6, %v1248_v37, %v1249_v7  ;;  %v1260_v28 = vadd.f32 %v1259_v27, %v1241_v2  ;;  %v1317_v29 = vld [vmem:[%s2370_s7 + $0x20] sm:$0xff] }
 0x1b2   : > { %v1110_v13 = vmul.f32 %v1106_v4, %v1086_v8  ;;  %v1268_v1 = vadd.f32 %v1267_v43, %v1244_v47  ;;  %v1275_v63 = vsel %vm276_vm0, %v1246_v49, 0.0  ;;  %v1283_v25 = vsel %vm276_vm0, %v1249_v7, 0.0 }
 0x1b3   : > { %v1111_v23 = vmul.f32 %v1107_v24, %v1094_v12  ;;  %v1165_v20 = vrot.slane %v1164_v40, 1  ;;  %v1261_v18 = vrot.slane %v1260_v28, 4  ;;  %v1276_v10 = vadd.f32 %v1275_v63, %v1247_v16 }
 0x1b4   : > { %v1173_v14 = vrot.slane %v1172_v41, 1  ;;  %v1188_v57 = vadd.f32 %v1187_v39, %v1186_v53  ;;  %v1269_v9 = vrot.slane %v1268_v1, 4  ;;  %v1284_v6 = vadd.f32 %v1283_v25, %v1250_v32 }
 0x1b5   : > { %v1112_v45 = vmul.f32 %v1108_v38, %v1102_v0  ;;  %v1181_v58 = vrot.slane %v1180_v15, 1  ;;  %v1262_v52 = vadd.f32 %v1261_v18, %v1260_v28  ;;  %v1277_v35 = vrot.slane %v1276_v10, 4  ;;  %v1318_v0 = vld [vmem:[%s2370_s7 + $0x28] sm:$0xff]  ;;  %v3126_v18 = vld [vmem:[#allocation3 + $0x10] sm:$0x22] }
 0x1b6   : > { %v3084_v8 = vadd.f32 %v1109_v36, %v3011_v46  ;;  %v3087_v62 = vadd.f32 %v1110_v13, %v3013_v42  ;;  %v1270_v19 = vadd.f32 %v1269_v9, %v1268_v1  ;;  %v1285_v12 = vrot.slane %v1284_v6, 4 }
 0x1b7   : > { %v3091_v39 = vadd.f32 %v1111_v23, %v3018_v33  ;;  %v3094_v53 = vadd.f32 %v1112_v45, %v3025_v61  ;;  %v1263_v56 = vrot.slane %v1262_v52, 2  ;;  %v1278_v49 = vadd.f32 %v1277_v35, %v1276_v10 }
 0x1b8   : > { %v1166_v2 = vadd.f32 %v1165_v20, %v1164_v40  ;;  %v1174_v50 = vadd.f32 %v1173_v14, %v1172_v41  ;;  %v1189_v7 = vrot.slane %v1188_v57, 1  ;;  %v1286_v46 = vadd.f32 %v1285_v12, %v1284_v6 }
 0x1b9   : > { %v1182_v47 = vadd.f32 %v1181_v58, %v1180_v15  ;;  %v1271_v37 = vrot.slane %v1270_v19, 2  ;;  %v3097_v42 = vunpack.c.l.bf16 %v1317_v29  ;;  %v3099_v16 = vunpack.c.h.bf16 %v1317_v29 }
 0x1ba   : > { %v1264_v27 = vadd.f32 %v1263_v56, %v1262_v52  ;;  %v3101_v43 = vunpack.c.l.bf16 %v1318_v0  ;;  %v3103_v33 = vunpack.c.h.bf16 %v1318_v0  ;;  %v1323_v61 = vmul.f32 %v1213_v17, %v2598_v55  ;;  %v3140_v56 = vld [vmem:[#allocation3 + $0x18] sm:$0x22] }
 0x1bb   : > { %v1279_v36 = vrot.slane %v1278_v49, 2  ;;  %v1287_v40 = vrot.slane %v1286_v46, 2  ;;  %v1327_v41 = vmul.f32 %v3097_v42, %v2713_v44  ;;  %v1328_v15 = vmul.f32 %v3099_v16, %v2713_v44 }
 0x1bc   : > { %v1191_v32 = vmul.f32 %v1166_v2, %v1105_v22  ;;  %v1324_v28 = vmul.f32 %v1214_v59, %v2598_v55  ;;  %v3588_v13 = vunpack.c.l.bf16 %v3042_v34  ;;  %v1329_v17 = vmul.f32 %v3101_v43, %v2713_v44 }
 0x1bd   : > { %v1190_v63 = vadd.f32 %v1189_v7, %v1188_v57  ;;  %v1272_v25 = vadd.f32 %v1271_v37, %v1270_v19  ;;  %v1330_v23 = vmul.f32 %v3103_v33, %v2713_v44  ;;  %v1340_v20 = vrot.slane %v1327_v41, 5 }
 0x1be   : > { %v1325_v1 = vmul.f32 %v3588_v13, %v2598_v55  ;;  %v1192_v22 = vmul.f32 %v1174_v50, %v1106_v4  ;;  %v1326_v3 = vmul.f32 %v1216_v31, %v2598_v55  ;;  %v1339_v59 = vrot.slane %v1323_v61, 5 }
 0x1bf   : > { %v1343_v10 = vrot.slane %v1328_v15, 5  ;;  %v1193_v14 = vmul.f32 %v1182_v47, %v1107_v24  ;;  %v1265_v57 = vrot.slane %v1264_v27, 1  ;;  %v1280_v9 = vadd.f32 %v1279_v36, %v1278_v49 }
 0x1c0   : > { %v1288_v6 = vadd.f32 %v1287_v40, %v1286_v46  ;;  %v1341_v44 = vsel %vm536_vm4, %v1339_v59, %v1340_v20  ;;  %v1342_v45 = vrot.slane %v1324_v28, 5  ;;  %v1345_v58 = vrot.slane %v1325_v1, 5 }
 0x1c1   : > { %v1346_v11 = vrot.slane %v1329_v17, 5  ;;  %v1194_v4 = vmul.f32 %v1190_v63, %v1108_v38  ;;  %v1273_v52 = vrot.slane %v1272_v25, 1  ;;  %v1293_v34 = vunpack.c.l.bf16 %v3126_v18 }
 0x1c2   : > { %v1349_v55 = vrot.slane %v1330_v23, 5  ;;  %v1344_v31 = vsel %vm536_vm4, %v1342_v45, %v1343_v10  ;;  %v1348_v24 = vrot.slane %v1326_v3, 5  ;;  %v1359_v19 = vsel %vm276_vm0, %v1340_v20, 0.0  ;;  %v3176_v45 = vld [vmem:[%s2370_s7 + $0x30] sm:$0x11] }
 0x1c3   : > { %v1347_v35 = vsel %vm536_vm4, %v1345_v58, %v1346_v11  ;;  %v1266_v12 = vadd.f32 %v1265_v57, %v1264_v27  ;;  %v1281_v29 = vrot.slane %v1280_v9, 1  ;;  %v1294_v49 = vunpack.c.h.bf16 %v3126_v18 }
 0x1c4   : > { %v1360_v0 = vadd.f32 %v1359_v19, %v1341_v44  ;;  %v1289_v51 = vrot.slane %v1288_v6, 1  ;;  %v1350_v38 = vsel %vm536_vm4, %v1348_v24, %v1349_v55  ;;  %v1367_v2 = vsel %vm276_vm0, %v1343_v10, 0.0  ;;  %v1411_v10 = vld [vmem:[%s2370_s7 + $0x10] sm:$0x88]  ;;  %v1412_v44 = vld [vmem:[%s2370_s7 + $0x18] sm:$0x88] }
 0x1c5   : > { %v1375_v50 = vsel %vm276_vm0, %v1346_v11, 0.0  ;;  %v1274_v7 = vadd.f32 %v1273_v52, %v1272_v25  ;;  %v1368_v47 = vadd.f32 %v1367_v2, %v1344_v31  ;;  %v1199_v61 = vrot.slane %v1191_v32, 1 }
 0x1c6   : > { %v1361_v46 = vrot.slane %v1360_v0, 4  ;;  %v1376_v37 = vadd.f32 %v1375_v50, %v1347_v35  ;;  %v1200_v36 = vrot.slane %v1192_v22, 1  ;;  %v1295_v27 = vunpack.c.l.bf16 %v3140_v56 }
 0x1c7   : > { %v1383_v40 = vsel %vm276_vm0, %v1349_v55, 0.0  ;;  %v1282_v41 = vadd.f32 %v1281_v29, %v1280_v9  ;;  %v1296_v15 = vunpack.c.h.bf16 %v3140_v56  ;;  %v1369_v28 = vrot.slane %v1368_v47, 4 }
 0x1c8   : > { %v1384_v13 = vadd.f32 %v1383_v40, %v1350_v38  ;;  %v1290_v1 = vadd.f32 %v1289_v51, %v1288_v6  ;;  %v3151_v17 = vmul.f32 %v1293_v34, %v1266_v12  ;;  %v1362_v63 = vadd.f32 %v1361_v46, %v1360_v0 }
 0x1c9   : > { %v1377_v32 = vrot.slane %v1376_v37, 4  ;;  %v1201_v25 = vrot.slane %v1193_v14, 1  ;;  %v1202_v23 = vrot.slane %v1194_v4, 1  ;;  %v3155_v20 = vmul.f32 %v1294_v49, %v1274_v7 }
 0x1ca   : > { %v1370_v22 = vadd.f32 %v1369_v28, %v1368_v47  ;;  %v3158_v3 = vadd.f32 %v1199_v61, %v3084_v8  ;;  %v1385_v59 = vrot.slane %v1384_v13, 4  ;;  %v3162_v57 = vadd.f32 %v1200_v36, %v3087_v62 }
 0x1cb   : > { %v3165_v9 = vadd.f32 %v1201_v25, %v3091_v39  ;;  %v3168_v14 = vadd.f32 %v1202_v23, %v3094_v53  ;;  %v3172_v6 = vmul.f32 %v1295_v27, %v1282_v41  ;;  %v3180_v8 = vmul.f32 %v1296_v15, %v1290_v1  ;;  %v3184_v39 = vld [vmem:[%s2370_s7 + $0x38] sm:$0x11] }
 0x1cc   : > { %v1305_v62 = vrot.slane %v3151_v17, 2  ;;  %v1363_v58 = vrot.slane %v1362_v63, 2  ;;  %v1378_v11 = vadd.f32 %v1377_v32, %v1376_v37  ;;  %v1306_v53 = vrot.slane %v3155_v20, 2 }
 0x1cd   : > { %v1371_v4 = vrot.slane %v1370_v22, 2  ;;  %v1415_v52 = vunpack.c.l.bf16 %v1411_v10  ;;  %v1416_v55 = vunpack.c.h.bf16 %v1411_v10  ;;  %v1386_v31 = vadd.f32 %v1385_v59, %v1384_v13 }
 0x1ce   : > { %v1417_v35 = vunpack.c.l.bf16 %v1412_v44  ;;  %v1418_v24 = vunpack.c.h.bf16 %v1412_v44  ;;  %v1419_v19 = vunpack.c.l.bf16 %v3176_v45  ;;  %v1420_v12 = vunpack.c.h.bf16 %v3176_v45 }
 0x1cf   : > { %v1421_v29 = vunpack.c.l.bf16 %v3184_v39  ;;  %v1427_v0 = vmul.f32 %v3097_v42, %v2805_v54  ;;  %v1428_v51 = vmul.f32 %v3099_v16, %v2805_v54  ;;  %v1364_v38 = vadd.f32 %v1363_v58, %v1362_v63 }
 0x1d0   : > { %v1379_v2 = vrot.slane %v1378_v11, 2  ;;  %v1422_v50 = vunpack.c.h.bf16 %v3184_v39  ;;  %v1429_v7 = vmul.f32 %v3101_v43, %v2805_v54  ;;  %v1372_v46 = vadd.f32 %v1371_v4, %v1370_v22 }
 0x1d1   : > { %v1423_v47 = vmul.f32 %v1415_v52, %v2608_v26  ;;  %v1424_v37 = vmul.f32 %v1416_v55, %v2608_v26  ;;  %v1430_v61 = vmul.f32 %v3103_v33, %v2805_v54  ;;  %v1387_v36 = vrot.slane %v1386_v31, 2 }
 0x1d2   : > { %v1425_v40 = vmul.f32 %v1417_v35, %v2608_v26  ;;  %v1431_v41 = vmul.f32 %v1419_v19, %v2796_v5  ;;  %v1432_v28 = vmul.f32 %v1420_v12, %v2796_v5  ;;  %v1426_v13 = vmul.f32 %v1418_v24, %v2608_v26 }
 0x1d3   : > { %v1433_v1 = vmul.f32 %v1421_v29, %v2796_v5  ;;  %v1448_v17 = vrot.slane %v1427_v0, 7  ;;  %v1451_v63 = vrot.slane %v1428_v51, 7  ;;  %v1365_v54 = vrot.slane %v1364_v38, 1 }
 0x1d4   : > { %v1380_v32 = vadd.f32 %v1379_v2, %v1378_v11  ;;  %v1434_v25 = vmul.f32 %v1422_v50, %v2796_v5  ;;  %v1454_v23 = vrot.slane %v1429_v7, 7  ;;  %v1373_v22 = vrot.slane %v1372_v46, 1 }
 0x1d5   : > { %v1447_v59 = vrot.slane %v1423_v47, 7  ;;  %v1450_v10 = vrot.slane %v1424_v37, 7  ;;  %v1457_v44 = vrot.slane %v1430_v61, 7  ;;  %v1388_v58 = vadd.f32 %v1387_v36, %v1386_v31 }
 0x1d6   : > { %v1453_v4 = vrot.slane %v1425_v40, 7  ;;  %v1459_v26 = vrot.slane %v1431_v41, 7  ;;  %v1461_v52 = vrot.slane %v1432_v28, 7  ;;  %v1456_v24 = vrot.slane %v1426_v13, 7 }
 0x1d7   : > { %v1449_v55 = vsel %vm329_vm1, %v1447_v59, %v1448_v17  ;;  %v1452_v35 = vsel %vm329_vm1, %v1450_v10, %v1451_v63  ;;  %v1463_v0 = vrot.slane %v1433_v1, 7  ;;  %v1465_v2 = vrot.slane %v1434_v25, 7 }
 0x1d8   : > { %v1455_v11 = vsel %vm329_vm1, %v1453_v4, %v1454_v23  ;;  %v1460_v51 = vsel %vm329_vm1, %v1448_v17, %v1459_v26  ;;  %v1462_v5 = vsel %vm329_vm1, %v1451_v63, %v1461_v52  ;;  %v1458_v7 = vsel %vm329_vm1, %v1456_v24, %v1457_v44 }
 0x1d9   : > { %v1464_v31 = vsel %vm329_vm1, %v1454_v23, %v1463_v0  ;;  %v1475_v47 = vsel %vm276_vm0, %v1460_v51, 0.0  ;;  %v1483_v37 = vsel %vm276_vm0, %v1462_v5, 0.0  ;;  %v1466_v61 = vsel %vm329_vm1, %v1457_v44, %v1465_v2 }
 0x1da   : > { %v1476_v36 = vadd.f32 %v1475_v47, %v1449_v55  ;;  %v1484_v40 = vadd.f32 %v1483_v37, %v1452_v35  ;;  %v1491_v41 = vsel %vm276_vm0, %v1464_v31, 0.0  ;;  %v1307_v28 = vrot.slane %v3172_v6, 2 }
 0x1db   : > { %v1313_v13 = vadd.f32 %v1305_v62, %v3158_v3  ;;  %v1492_v1 = vadd.f32 %v1491_v41, %v1455_v11  ;;  %v1499_v17 = vsel %vm276_vm0, %v1466_v61, 0.0  ;;  %v1381_v63 = vrot.slane %v1380_v32, 1 }
 0x1dc   : > { %v1477_v25 = vrot.slane %v1476_v36, 4  ;;  %v1485_v23 = vrot.slane %v1484_v40, 4  ;;  %v1500_v59 = vadd.f32 %v1499_v17, %v1458_v7  ;;  %v1308_v10 = vrot.slane %v3180_v8, 2 }
 0x1dd   : > { %v1366_v4 = vadd.f32 %v1365_v54, %v1364_v38  ;;  %v1389_v26 = vrot.slane %v1388_v58, 1  ;;  %v1493_v44 = vrot.slane %v1492_v1, 4  ;;  %v1374_v52 = vadd.f32 %v1373_v22, %v1372_v46 }
 0x1de   : > { %v1478_v55 = vadd.f32 %v1477_v25, %v1476_v36  ;;  %v1486_v35 = vadd.f32 %v1485_v23, %v1484_v40  ;;  %v1501_v24 = vrot.slane %v1500_v59, 4  ;;  %v1537_v3 = vmul.f32 %v1419_v19, %v2499_v48 }
 0x1df   : > { %v1494_v0 = vadd.f32 %v1493_v44, %v1492_v1  ;;  %v1538_v6 = vmul.f32 %v1420_v12, %v2499_v48  ;;  %v1539_v8 = vmul.f32 %v1421_v29, %v2499_v48  ;;  %v1382_v62 = vadd.f32 %v1381_v63, %v1380_v32  ;;  %v3275_v44 = vld [vmem:[#allocation3 + $0x18] sm:$0x44] }
 0x1e0   : > { %v1479_v38 = vrot.slane %v1478_v55, 2  ;;  %v1487_v54 = vrot.slane %v1486_v35, 2  ;;  %v1502_v46 = vadd.f32 %v1501_v24, %v1500_v59  ;;  %v1390_v22 = vadd.f32 %v1389_v26, %v1388_v58 }
 0x1e1   : > { %v1495_v11 = vrot.slane %v1494_v0, 2  ;;  %v1533_v51 = vmul.f32 %v3097_v42, %v2473_v60  ;;  %v1541_v5 = vsel %vm276_vm0, %v1537_v3, 0.0  ;;  %v1540_v45 = vmul.f32 %v1422_v50, %v2499_v48  ;;  %v3284_v3 = vld [vmem:[%s2370_s7 + $0x38] sm:$0x33] }
 0x1e2   : > { %v1503_v19 = vrot.slane %v1502_v46, 2  ;;  %v1549_v12 = vsel %vm276_vm0, %v1538_v6, 0.0  ;;  %v1557_v29 = vsel %vm276_vm0, %v1539_v8, 0.0  ;;  %v1480_v32 = vadd.f32 %v1479_v38, %v1478_v55 }
 0x1e3   : > { %v1488_v2 = vadd.f32 %v1487_v54, %v1486_v35  ;;  %v1534_v58 = vmul.f32 %v3099_v16, %v2473_v60  ;;  %v1535_v7 = vmul.f32 %v3101_v43, %v2473_v60  ;;  %v1391_v31 = vmul.f32 %v1366_v4, %v1293_v34 }
 0x1e4   : > { %v1392_v47 = vmul.f32 %v1374_v52, %v1294_v49  ;;  %v1496_v39 = vadd.f32 %v1495_v11, %v1494_v0  ;;  %v1542_v48 = vadd.f32 %v1541_v5, %v1533_v51  ;;  %v1314_v50 = vadd.f32 %v1306_v53, %v3162_v57  ;;  %v3278_v52 = vld [vmem:[%s2370_s7 + $0x30] sm:$0x33] }
 0x1e5   : > { %v1393_v37 = vmul.f32 %v1382_v62, %v1295_v27  ;;  %v1550_v61 = vadd.f32 %v1549_v12, %v1534_v58  ;;  %v1558_v36 = vadd.f32 %v1557_v29, %v1535_v7  ;;  %v1315_v40 = vadd.f32 %v1307_v28, %v3165_v9  ;;  %v3267_v9 = vld [vmem:[#allocation3 + $0x10] sm:$0x44] }
 0x1e6   : > { %v1394_v41 = vmul.f32 %v1390_v22, %v1296_v15  ;;  %v1504_v34 = vadd.f32 %v1503_v19, %v1502_v46  ;;  %v1565_v18 = vsel %vm276_vm0, %v1540_v45, 0.0  ;;  %v1316_v49 = vadd.f32 %v1308_v10, %v3168_v14 }
 0x1e7   : > { %v1481_v1 = vrot.slane %v1480_v32, 1  ;;  %v1489_v17 = vrot.slane %v1488_v2, 1  ;;  %v1536_v20 = vmul.f32 %v3103_v33, %v2473_v60  ;;  %v1399_v57 = vrot.slane %v1391_v31, 3 }
 0x1e8   : > { %v1400_v53 = vrot.slane %v1392_v47, 3  ;;  %v1497_v27 = vrot.slane %v1496_v39, 1  ;;  %v1543_v63 = vrot.slane %v1542_v48, 4  ;;  %v1401_v25 = vrot.slane %v1393_v37, 3 }
 0x1e9   : > { %v1551_v56 = vrot.slane %v1550_v61, 4  ;;  %v1559_v15 = vrot.slane %v1558_v36, 4  ;;  %v1566_v28 = vadd.f32 %v1565_v18, %v1536_v20  ;;  %v1402_v23 = vrot.slane %v1394_v41, 3 }
 0x1ea   : > { %v3269_v59 = vadd.f32 %v1399_v57, %v1313_v13  ;;  %v1505_v14 = vrot.slane %v1504_v34, 1  ;;  %v3271_v10 = vadd.f32 %v1400_v53, %v1314_v50  ;;  %v3273_v4 = vadd.f32 %v1401_v25, %v1315_v40  ;;  %v3590_v50 = vld [vmem:[#allocation17_spill] sm:$0xff] }
 0x1eb   : > { %v1482_v60 = vadd.f32 %v1481_v1, %v1480_v32  ;;  %v1490_v26 = vadd.f32 %v1489_v17, %v1488_v2  ;;  %v3280_v55 = vadd.f32 %v1402_v23, %v1316_v49  ;;  %v1498_v35 = vadd.f32 %v1497_v27, %v1496_v39  ;;  %v3589_v32 = vld [vmem:[#allocation16_spill] sm:$0xff] }
 0x1ec   : > { %v1509_v24 = vunpack.c.l.bf16 %v3267_v9  ;;  %v1544_v0 = vadd.f32 %v1543_v63, %v1542_v48  ;;  %v1510_v13 = vunpack.c.h.bf16 %v3267_v9  ;;  %v1552_v6 = vadd.f32 %v1551_v56, %v1550_v61 }
 0x1ed   : > { %v1560_v8 = vadd.f32 %v1559_v15, %v1558_v36  ;;  %v1567_v62 = vrot.slane %v1566_v28, 4  ;;  %v1506_v38 = vadd.f32 %v1505_v14, %v1504_v34  ;;  %v1511_v54 = vunpack.c.l.bf16 %v3275_v44 }
 0x1ee   : > { %v1595_v46 = vunpack.c.l.bf16 %v3278_v52  ;;  %v1596_v22 = vunpack.c.h.bf16 %v3278_v52  ;;  %v1512_v11 = vunpack.c.h.bf16 %v3275_v44  ;;  %v1513_v51 = vmul.f32 %v1509_v24, %v1482_v60 }
 0x1ef   : > { %v1514_v5 = vmul.f32 %v1510_v13, %v1490_v26  ;;  %v1597_v19 = vunpack.c.l.bf16 %v3284_v3  ;;  %v1515_v45 = vmul.f32 %v1511_v54, %v1498_v35  ;;  %v1545_v12 = vrot.slane %v1544_v0, 2 }
 0x1f0   : > { %v1598_v29 = vunpack.c.h.bf16 %v3284_v3  ;;  %v1599_v2 = vmul.f32 %v3097_v42, %v3589_v32  ;;  %v1553_v58 = vrot.slane %v1552_v6, 2  ;;  %v1561_v7 = vrot.slane %v1560_v8, 2 }
 0x1f1   : > { %v1568_v31 = vadd.f32 %v1567_v62, %v1566_v28  ;;  %v1600_v47 = vmul.f32 %v3099_v16, %v3589_v32  ;;  %v1516_v39 = vmul.f32 %v1512_v11, %v1506_v38  ;;  %v1601_v48 = vmul.f32 %v3101_v43, %v3589_v32 }
 0x1f2   : > { %v1603_v37 = vmul.f32 %v1595_v46, %v3590_v50  ;;  %v1604_v42 = vmul.f32 %v1596_v22, %v3590_v50  ;;  %v1521_v61 = vrot.slane %v1513_v51, 4  ;;  %v1522_v36 = vrot.slane %v1514_v5, 4 }
 0x1f3   : > { %v1602_v40 = vmul.f32 %v3103_v33, %v3589_v32  ;;  %v1605_v16 = vmul.f32 %v1597_v19, %v3590_v50  ;;  %v1546_v41 = vadd.f32 %v1545_v12, %v1544_v0  ;;  %v1606_v43 = vmul.f32 %v1598_v29, %v3590_v50 }
 0x1f4   : > { %v1615_v34 = vrot.slane %v1599_v2, 1  ;;  %v1616_v18 = vrot.slane %v1603_v37, 1  ;;  %v1523_v49 = vrot.slane %v1515_v45, 4  ;;  %v1554_v1 = vadd.f32 %v1553_v58, %v1552_v6  ;;  %v1694_v58 = vld [vmem:[%s2370_s7 + $0x28] sm:$0xee] }
 0x1f5   : > { %v1562_v17 = vadd.f32 %v1561_v7, %v1560_v8  ;;  %v1618_v20 = vrot.slane %v1600_v47, 1  ;;  %v1619_v53 = vrot.slane %v1604_v42, 1  ;;  %v1621_v33 = vrot.slane %v1601_v48, 1  ;;  %v1693_v8 = vld [vmem:[%s2370_s7 + $0x20] sm:$0xee] }
 0x1f6   : > { %v1617_v57 = vsel %vm351_vm2, %v1615_v34, %v1616_v18  ;;  %v1622_v27 = vrot.slane %v1605_v16, 1  ;;  %v1569_v63 = vrot.slane %v1568_v31, 2  ;;  %v1624_v25 = vrot.slane %v1602_v40, 1 }
 0x1f7   : > { %v1625_v56 = vrot.slane %v1606_v43, 1  ;;  %v1635_v15 = vsel %vm276_vm0, %v1616_v18, 0.0  ;;  %v1620_v28 = vsel %vm351_vm2, %v1618_v20, %v1619_v53  ;;  %v1643_v60 = vsel %vm276_vm0, %v1619_v53, 0.0 }
 0x1f8   : > { %v1623_v23 = vsel %vm351_vm2, %v1621_v33, %v1622_v27  ;;  %v1636_v14 = vadd.f32 %v1635_v15, %v1617_v57  ;;  %v1644_v35 = vadd.f32 %v1643_v60, %v1620_v28  ;;  %v1651_v0 = vsel %vm276_vm0, %v1622_v27, 0.0 }
 0x1f9   : > { %v1626_v26 = vsel %vm351_vm2, %v1624_v25, %v1625_v56  ;;  %v1659_v6 = vsel %vm276_vm0, %v1625_v56, 0.0  ;;  %v1524_v62 = vrot.slane %v1516_v39, 4  ;;  %v1652_v51 = vadd.f32 %v1651_v0, %v1623_v23  ;;  %v3366_v0 = vld [vmem:[#allocation3 + $0x10] sm:$0x88] }
 0x1fa   : > { %v1637_v38 = vrot.slane %v1636_v14, 4  ;;  %v1660_v5 = vadd.f32 %v1659_v6, %v1626_v26  ;;  %v3331_v45 = vadd.f32 %v1521_v61, %v3269_v59  ;;  %v1547_v12 = vrot.slane %v1546_v41, 1 }
 0x1fb   : > { %v1555_v32 = vrot.slane %v1554_v1, 1  ;;  %v1645_v2 = vrot.slane %v1644_v35, 4  ;;  %v1653_v47 = vrot.slane %v1652_v51, 4  ;;  %v1695_v50 = vunpack.c.l.bf16 %v1693_v8 }
 0x1fc   : > { %v1638_v7 = vadd.f32 %v1637_v38, %v1636_v14  ;;  %v1661_v48 = vrot.slane %v1660_v5, 4  ;;  %v3335_v37 = vadd.f32 %v1522_v36, %v3271_v10  ;;  %v3338_v42 = vadd.f32 %v1523_v49, %v3273_v4 }
 0x1fd   : > { %v1570_v39 = vadd.f32 %v1569_v63, %v1568_v31  ;;  %v1646_v40 = vadd.f32 %v1645_v2, %v1644_v35  ;;  %v1696_v43 = vunpack.c.h.bf16 %v1693_v8  ;;  %v1697_v59 = vunpack.c.l.bf16 %v1694_v58 }
 0x1fe   : > { %v1639_v16 = vrot.slane %v1638_v7, 2  ;;  %v1698_v61 = vunpack.c.h.bf16 %v1694_v58  ;;  %v3341_v34 = vadd.f32 %v1524_v62, %v3280_v55  ;;  %v1563_v18 = vrot.slane %v1562_v17, 1 }
 0x1ff   : > { %v1654_v20 = vadd.f32 %v1653_v47, %v1652_v51  ;;  %v1699_v57 = vmul.f32 %v1695_v50, %v3560_v30  ;;  %v1548_v53 = vadd.f32 %v1547_v12, %v1546_v41  ;;  %v1556_v33 = vadd.f32 %v1555_v32, %v1554_v1 }
 0x200   : > { %v1662_v10 = vadd.f32 %v1661_v48, %v1660_v5  ;;  %v1703_v4 = vmul.f32 %v1595_v46, %v3569_v21  ;;  %v1571_v31 = vrot.slane %v1570_v39, 1  ;;  %v1647_v36 = vrot.slane %v1646_v40, 2  ;;  %v1668_v48 = vld [vmem:[#allocation3 + $0x18] sm:$0x88] }
 0x201   : > { %v1704_v49 = vmul.f32 %v1596_v22, %v3569_v21  ;;  %v1705_v55 = vmul.f32 %v1597_v19, %v3569_v21  ;;  %v1640_v27 = vadd.f32 %v1639_v16, %v1638_v7  ;;  %v1700_v63 = vmul.f32 %v1696_v43, %v3560_v30 }
 0x202   : > { %v1701_v41 = vmul.f32 %v1697_v59, %v3560_v30  ;;  %v1702_v1 = vmul.f32 %v1698_v61, %v3560_v30  ;;  %v1655_v25 = vrot.slane %v1654_v20, 2  ;;  %v1706_v46 = vmul.f32 %v1598_v29, %v3569_v21 }
 0x203   : > { %v1715_v56 = vrot.slane %v1699_v57, 2  ;;  %v1716_v15 = vrot.slane %v1703_v4, 2  ;;  %v1564_v52 = vadd.f32 %v1563_v18, %v1562_v17  ;;  %v1573_v22 = vmul.f32 %v1548_v53, %v1509_v24 }
 0x204   : > { %v1663_v28 = vrot.slane %v1662_v10, 2  ;;  %v1719_v19 = vrot.slane %v1704_v49, 2  ;;  %v1572_v23 = vadd.f32 %v1571_v31, %v1570_v39  ;;  %v3363_v14 = vmul.f32 %v1556_v33, %v1510_v13 }
 0x205   : > { %v1717_v30 = vsel %vm451_vm3, %v1715_v56, %v1716_v15  ;;  %v1722_v60 = vrot.slane %v1705_v55, 2  ;;  %v1641_v26 = vrot.slane %v1640_v27, 1  ;;  %v1648_v35 = vadd.f32 %v1647_v36, %v1646_v40 }
 0x206   : > { %v1718_v3 = vrot.slane %v1700_v63, 2  ;;  %v1721_v21 = vrot.slane %v1701_v41, 2  ;;  %v1656_v29 = vadd.f32 %v1655_v25, %v1654_v20  ;;  %v1724_v17 = vrot.slane %v1702_v1, 2 }
 0x207   : > { %v1725_v6 = vrot.slane %v1706_v46, 2  ;;  %v1735_v24 = vsel %vm276_vm0, %v1716_v15, 0.0  ;;  %v1664_v8 = vadd.f32 %v1663_v28, %v1662_v10  ;;  %v1575_v38 = vmul.f32 %v1564_v52, %v1511_v54 }
 0x208   : > { %v1720_v62 = vsel %vm451_vm3, %v1718_v3, %v1719_v19  ;;  %v1723_v9 = vsel %vm451_vm3, %v1721_v21, %v1722_v60  ;;  %v1736_v13 = vadd.f32 %v1735_v24, %v1717_v30  ;;  %v1743_v5 = vsel %vm276_vm0, %v1719_v19, 0.0 }
 0x209   : > { %v1726_v51 = vsel %vm451_vm3, %v1724_v17, %v1725_v6  ;;  %v1751_v12 = vsel %vm276_vm0, %v1722_v60, 0.0  ;;  %v1581_v32 = vrot.slane %v1573_v22, 5  ;;  %v1649_v2 = vrot.slane %v1648_v35, 1 }
 0x20a   : > { %v1669_v58 = vunpack.c.l.bf16 %v3366_v0  ;;  %v1737_v7 = vrot.slane %v1736_v13, 4  ;;  %v1657_v47 = vrot.slane %v1656_v29, 1  ;;  %v1744_v50 = vadd.f32 %v1743_v5, %v1720_v62 }
 0x20b   : > { %v1752_v39 = vadd.f32 %v1751_v12, %v1723_v9  ;;  %v1759_v40 = vsel %vm276_vm0, %v1725_v6, 0.0  ;;  %v1642_v16 = vadd.f32 %v1641_v26, %v1640_v27  ;;  %v1665_v43 = vrot.slane %v1664_v8, 1 }
 0x20c   : > { %v1738_v54 = vadd.f32 %v1737_v7, %v1736_v13  ;;  %v1760_v59 = vadd.f32 %v1759_v40, %v1726_v51  ;;  %v1576_v61 = vmul.f32 %v1572_v23, %v1512_v11  ;;  %v1670_v18 = vunpack.c.h.bf16 %v3366_v0 }
 0x20d   : > { %v1745_v20 = vrot.slane %v1744_v50, 4  ;;  %v1753_v57 = vrot.slane %v1752_v39, 4  ;;  %v1671_v53 = vunpack.c.l.bf16 %v1668_v48  ;;  %v1672_v33 = vunpack.c.h.bf16 %v1668_v48 }
 0x20e   : > { %v1739_v10 = vrot.slane %v1738_v54, 2  ;;  %v1761_v4 = vrot.slane %v1760_v59, 4  ;;  %v1650_v31 = vadd.f32 %v1649_v2, %v1648_v35  ;;  %v1658_v36 = vadd.f32 %v1657_v47, %v1656_v29 }
 0x20f   : > { %v1746_v49 = vadd.f32 %v1745_v20, %v1744_v50  ;;  %v1754_v55 = vadd.f32 %v1753_v57, %v1752_v39  ;;  %v1666_v63 = vadd.f32 %v1665_v43, %v1664_v8  ;;  %v1673_v27 = vmul.f32 %v1669_v58, %v1642_v16 }
 0x210   : > { %v1740_v41 = vadd.f32 %v1739_v10, %v1738_v54  ;;  %v1762_v1 = vadd.f32 %v1761_v4, %v1760_v59  ;;  %v1582_v25 = vrot.slane %v3363_v14, 5  ;;  %v1583_v44 = vrot.slane %v1575_v38, 5 }
 0x211   : > { %v1747_v11 = vrot.slane %v1746_v49, 2  ;;  %v1755_v46 = vrot.slane %v1754_v55, 2  ;;  %v1584_v56 = vrot.slane %v1576_v61, 5  ;;  %v1589_v15 = vadd.f32 %v1581_v32, %v3331_v45 }
 0x212   : > { %v1741_v52 = vrot.slane %v1740_v41, 1  ;;  %v1763_v22 = vrot.slane %v1762_v1, 2  ;;  %v1674_v28 = vmul.f32 %v1670_v18, %v1650_v31  ;;  %v1675_v19 = vmul.f32 %v1671_v53, %v1658_v36 }
 0x213   : > { %v1748_v23 = vadd.f32 %v1747_v11, %v1746_v49  ;;  %v1756_v30 = vadd.f32 %v1755_v46, %v1754_v55  ;;  %v1676_v60 = vmul.f32 %v1672_v33, %v1666_v63  ;;  %v1681_v26 = vrot.slane %v1673_v27, 6 }
 0x214   : > { %v1742_v35 = vadd.f32 %v1741_v52, %v1740_v41  ;;  %v1764_v3 = vadd.f32 %v1763_v22, %v1762_v1  ;;  %v1590_v21 = vadd.f32 %v1582_v25, %v3335_v37  ;;  %v1591_v14 = vadd.f32 %v1583_v44, %v3338_v42 }
 0x215   : > { %v1749_v29 = vrot.slane %v1748_v23, 1  ;;  %v1757_v0 = vrot.slane %v1756_v30, 1  ;;  %v1592_v17 = vadd.f32 %v1584_v56, %v3341_v34  ;;  %v1689_v6 = vadd.f32 %v1681_v26, %v1589_v15 }
 0x216   : > { %v1765_v45 = vrot.slane %v1764_v3, 1  ;;  %v1767_v24 = vmul.f32 %v1742_v35, %v1669_v58  ;;  %v1682_v8 = vrot.slane %v1674_v28, 6  ;;  %v1683_v62 = vrot.slane %v1675_v19, 6 }
 0x217   : > { %v1750_v9 = vadd.f32 %v1749_v29, %v1748_v23  ;;  %v1758_v13 = vadd.f32 %v1757_v0, %v1756_v30  ;;  %v1684_v38 = vrot.slane %v1676_v60, 6 }
 0x218   : > { %v1766_v51 = vadd.f32 %v1765_v45, %v1764_v3  ;;  %v1775_v5 = vrot.slane %v1767_v24, 7  ;;  %v1690_v12 = vadd.f32 %v1682_v8, %v1590_v21  ;;  %v1691_v32 = vadd.f32 %v1683_v62, %v1591_v14 }
 0x219   : > { %v1768_v2 = vmul.f32 %v1750_v9, %v1670_v18  ;;  %v1769_v37 = vmul.f32 %v1758_v13, %v1671_v53  ;;  %v1692_v47 = vadd.f32 %v1684_v38, %v1592_v17  ;;  %v1797_v53 = vld [vmem:[#allocation2] sm:$0x1] }
 0x21a   : > { %v1770_v7 = vmul.f32 %v1766_v51, %v1672_v33  ;;  %v1783_v42 = vadd.f32 %v1775_v5, %v1689_v6 }
 0x21b   : > { %v1776_v48 = vrot.slane %v1768_v2, 7  ;;  %v1777_v34 = vrot.slane %v1769_v37, 7 }
 0x21c   : > { %v1778_v50 = vrot.slane %v1770_v7, 7  ;;  %v1787_v40 = vsel %vm329_vm1, %v1783_v42, 0.0 }
 0x21d   : > { %v1784_v58 = vadd.f32 %v1776_v48, %v1690_v12  ;;  %v1785_v39 = vadd.f32 %v1777_v34, %v1691_v32 }
 0x21e   : > { %v1786_v16 = vadd.f32 %v1778_v50, %v1692_v47 }
 0x21f   : > { %v1788_v43 = vsel %vm329_vm1, %v1784_v58, 0.0  ;;  %v1790_v59 = vsel %vm329_vm1, %v1785_v39, 0.0 }
 0x220   : > { %v1789_v54 = vadd.f32 %v1788_v43, %v1787_v40  ;;  %v1792_v18 = vsel %vm329_vm1, %v1786_v16, 0.0 }
 0x222   : > { %v1791_v61 = vadd.f32 %v1790_v59, %v1789_v54 }
 0x224   : > { %v1793_v20 = vadd.f32 %v1792_v18, %v1791_v61 }
 0x226   : > { %1794 = vadd.xlane.f32.xlu1 %v1793_v20 }
 0x2b3   : > { %v1795_v57 = vpop.xlane.xlu1 %1794 }
 0x2b4   : > { %v1796_v33 = vmul.f32 0.25, %v1795_v57 }
 0x2b6   : > { %v1798_v10 = vadd.f32 %v1797_v53, %v1796_v33 }
 0x2b8   : > { %1800 = vst.msk [vmem:[%s243_s12] sm:$0x1] %vm1799_vm7, %v1798_v10 }
 0x2b9   : > { %2087 = shalt.err (!%p2084_p13)
}
 0x2ba   : > { %s2088_s16 = scalar_lea.hbm %s3395_s13, 16  ;;  %s2092_s10 = scalar_lea.hbm %s3443_s4, 32 }
 0x2bb   : > { %p2089_p6 = scmp.ne.s32.totalorder %s3395_s13, %s2088_s16  ;;  %p2093_p7 = scmp.lt.u32.totalorder %s3395_s13, %s3443_s4 }
 0x2bc   : > { %p2094_p9 = scmp.lt.u32.totalorder %s2092_s10, %s2088_s16  ;;  %p2096_p10 = scmp.lt.u32.totalorder %s2088_s16, %s3395_s13 }
 0x2bd   : > { %p2090_p11 = pnand %p2089_p6, %p3591_p1 }
 0x2be   : > { %p2095_p8 = por %p2094_p9, %p2093_p7 }
 0x2bf   : > { %p2091_p3 = pneg %p2090_p11 }
 0x2c0   : > { %p2097_p4 = por %p2096_p10, %p2095_p8 }
 0x2c2   : > { %p2098_p0 = pnand %p2097_p4, %p2091_p3 }
 0x2c4   : > { %2101 = shalt.err (!%p2098_p0)
}
 0x2c5   : > { %1925 = dma.vmem_to_hbm [thread:$0]  (%p3591_p1), %s3397_s9, 16, %s3395_s13, %s1802_s14  }
 0x2c6 PF: > { %s1826_s21 = sand.u32 1, %s2136_s17   ;;  %p3592_p2 = scmp.ne.s32.totalorder %s3478_s29, 0 }
 0x2c7   : > { %p3593_p5 = scmp.ge.s32.totalorder %s2148_s20, 2  ;;  %s1827_s7 = scalar_lea.sflag [#allocation5], %s1826_s21 }
 0x2c9   : > { %p1939_p12 = pnand %p3593_p5, %p3592_p2 }
 0x2cb   : > { %2131 = dma.done.wait (!%p1939_p12), %s1827_s7, 16  }
 0x2cc   : > { %2133 = vsyncadd (!%p1939_p12), %s1827_s7, 4294967280  ;;  %p18_p13 = scmp.ge.s32.totalorder %s2212_s22, 4   ;;  %s3594_s17 = smov %s2140_s18 }
 0x2cd   : > { %s3595_s18 = smov %s2144_s19  ;;  %s3596_s19 = smov %s2224_s25 }
 0x2ce   : > { %s3597_s20 = smov %s2212_s22  ;;  %20 = sbr.rel (!%p18_p13) target bundleno = 8 (0x8), region = 88 }
 0x2d5   :  { %1831 = vsyncpa [#allocation4], 1 }
 0x2d6   :  { %1833 = vsyncpa [#allocation4 + $0x1], 1 }
 0x2d7   :  { %1834 = vsyncpa [#allocation7], 1 }
 0x2d8   :  { %1835 = vsyncpa [#allocation5], 1 }
 0x2d9   :  { %1837 = vsyncpa [#allocation5 + $0x1], 1 }

// kernel: discriminator_forward.8
= control target key start
LH: loop header
LB: loop body
LE: loop exit
PB: predicated region body
PF: predicated region fallthrough
CT: control target
= control target key end

     0   :  { %s8712_s0 = inlined_call_operand.hbm [shape: bf16[16,256,512], index: 0, kind: input, shape index: {}]   ;;  %s8713_s1 = inlined_call_operand.hbm [shape: f32[18,1], index: 1, kind: input, shape index: {}]   ;;  %s8714_s2 = inlined_call_operand.hbm [shape: bf16[2,42,256], index: 2, kind: input, shape index: {}]   ;;  %s8715_s3 = inlined_call_operand.hbm [shape: bf16[2,18,512], index: 3, kind: output, shape index: {}]  }
   0x1   :  { %8736 = sst [smem:[#allocation21_spill]] %s8712_s0 }
   0x2   :  { %8737 = sst [smem:[#allocation22_spill]] %s8713_s1 }
   0x3   :  { %8738 = sst [smem:[#allocation23_spill]] %s8715_s3 }
   0x4   :  { %8 = vsyncpa [#allocation3], 0 }
   0x5   :  { %10 = vsyncpa [#allocation3 + $0x1], 0 }
   0x6   :  { %11 = vsyncpa [#allocation6], 0 }
   0x7   :  { %12 = vsyncpa [#allocation4], 0 }
   0x8   :  { %14 = vsyncpa [#allocation4 + $0x1], 0  ;;  %s7467_s12 = smov 0   ;;  %s7469_s13 = smov 0  }
   0x9   :  { %s7471_s14 = smov 0   ;;  %s7473_s15 = smov 0  }
   0xa   :  { %s7475_s16 = smov 0   ;;  %s7477_s17 = smov 0  }
   0xb   :  { %s7479_s18 = smov 0   ;;  %s7481_s19 = smov 0  }
   0xc   :  { %s7483_s20 = smov 0   ;;  %s7485_s21 = smov 0  }
   0xd   :  { %s7487_s22 = smov 0   ;;  %s7489_s23 = smov 0  }
   0xe   :  { %s7491_s24 = smov 0   ;;  %s7493_s25 = smov 0  }
   0xf LB: > { %8739 = sst [smem:[#allocation13_spill]] %s7382_s12  ;;  %s29_s26 = sadd.s32 1, %s7426_s23  ;;  %s7434_s25 = sphi %s7493_s25, %s20_s25   ;;  %s7430_s24 = sphi %s7491_s24, %s8791_s24   ;;  %s7426_s23 = sphi %s7489_s23, %s8780_s23   ;;  %s7422_s22 = sphi %s7487_s22, %s8790_s22   ;;  %s7418_s21 = sphi %s7485_s21, %s8779_s21   ;;  %s7414_s20 = sphi %s7483_s20, %s8778_s20   ;;  %s7410_s19 = sphi %s7481_s19, %s8789_s19   ;;  %s7406_s18 = sphi %s7479_s18, %s8788_s18   ;;  %s7402_s17 = sphi %s7477_s17, %s8787_s17   ;;  %s7398_s16 = sphi %s7475_s16, %s8786_s16   ;;  %s7394_s15 = sphi %s7473_s15, %s8785_s15   ;;  %s7390_s14 = sphi %s7471_s14, %s8784_s14   ;;  %s7386_s13 = sphi %s7469_s13, %s8783_s13   ;;  %s7382_s12 = sphi %s7467_s12, %s8782_s12  }
  0x10   : > { %8740 = sst [smem:[#allocation14_spill]] %s7414_s20  ;;  %s39_s27 = sadd.s32 1, %s7414_s20 }
  0x11   : > { %8741 = sst [smem:[#allocation15_spill]] %s7426_s23  ;;  %p7539_p0 = scmp.ge.s32.totalorder %s29_s26, 2 }
  0x12   : > { %p46_p1 = scmp.ne.s32.totalorder %s7414_s20, %s7410_s19  ;;  %p8719_p2 = scmp.eq.s32.totalorder %s7434_s25, 0 }
  0x13   : > { %s8793_s26 = smov (%p7539_p0, %s29_s26), 0  ;;  %p8718_p5 = scmp.lt.s32.totalorder %s7434_s25, 4 }
  0x14   : > { %8743 = sst [smem:[#allocation16_spill]] %s8793_s26  ;;  %p7552_p3 = por %p8719_p2, %p46_p1 }
  0x15   : > { %s7558_s30 = ssub.s32 %s7426_s23, %s8793_s26  ;;  %s164_s4 = sand.u32 1, %s7434_s25  }
  0x16   : > { %p37_p4 = scmp.eq.s32.totalorder %s7558_s30, 0  ;;  %s166_s5 = sand.u32 1, %s7414_s20  }
  0x17   : > { %s5037_s7 = sshll.u32 %s166_s5, 12  ;;  %s6089_s8 = sshll.u32 %s7426_s23, 7 }
  0x18   : > { %s7565_s6 = scalar_select %p37_p4, %s7414_s20, %s39_s27  }
  0x19   : > { %s8746_s0 = sld [smem:[#allocation21_spill]]  ;;  %s168_s26 = scalar_lea.vmem [#allocation2], %s5037_s7 }
  0x1a   : > { %8745 = sst [smem:[#allocation17_spill]] %s7565_s6  ;;  %s175_s3 = sshll.u32 %s168_s26, 4  ;;  %s7573_s3 = int_to_ptr.vmem [resolvable:$true] %s175_s3 }
  0x1b   : > { %p7579_p6 = pnand %p8718_p5, %p7552_p3  ;;  %s7583_s5 = scalar_lea.sflag [#allocation3], %s164_s4 }
  0x1d   : > { %p7194_p8 = pneg %p7579_p6 }
  0x1f   : > { %s7571_s11 = scalar_lea.hbm %s8746_s0, %s6089_s8  ;;  %s7197_s29 = scalar_lea.hbm %s8746_s0, 131072 }
  0x20   : > { %s7192_s8 = scalar_lea.hbm %s7571_s11, 65536  ;;  %p7198_p11 = scmp.lt.u32.totalorder %s7571_s11, %s8746_s0 }
  0x21   : > { %p7193_p7 = scmp.ne.s32.totalorder %s7571_s11, %s7192_s8  ;;  %p7199_p12 = scmp.lt.u32.totalorder %s7197_s29, %s7192_s8 }
  0x22   : > { %p7201_p1 = scmp.lt.u32.totalorder %s7192_s8, %s7571_s11 }
  0x23   : > { %p7195_p9 = pnand %p7194_p8, %p7193_p7  ;;  %p7200_p13 = por %p7199_p12, %p7198_p11 }
  0x25   : > { %p7196_p10 = pneg %p7195_p9  ;;  %p7202_p3 = por %p7201_p1, %p7200_p13 }
  0x27   : > { %p7203_p4 = pnand %p7202_p3, %p7196_p10 }
  0x29   : > { %7206 = shalt.err (!%p7203_p4)
}
  0x2a   : > { %s7207_s4 = scalar_lea.vmem %s7573_s3, 65536  ;;  %s7436_s26 = smov [#allocation2]  }
  0x2b   : > { %p7208_p7 = scmp.ne.s32.totalorder %s7573_s3, %s7207_s4  ;;  %s7212_s7 = sshll.u32 %s7436_s26, 4  ;;  %s7213_s7 = int_to_ptr.vmem [resolvable:$false] %s7212_s7 }
  0x2c   : > { %s7214_s9 = scalar_lea.vmem %s7213_s7, 131072  ;;  %p7215_p2 = scmp.lt.s32.totalorder %s7573_s3, %s7213_s7 }
  0x2d   : > { %p7210_p9 = pnand %p7208_p7, %p7194_p8  ;;  %p7216_p11 = scmp.lt.s32.totalorder %s7214_s9, %s7207_s4 }
  0x2f   : > { %p7211_p5 = pneg %p7210_p9  ;;  %p7217_p12 = por %p7216_p11, %p7215_p2 }
  0x31   : > { %p7218_p13 = pnand %p7217_p12, %p7211_p5 }
  0x33   : > { %7221 = shalt.err (!%p7218_p13)
}
  0x34   : > { %s7437_s8 = smov 256   ;;  %s8720_s29 = smov 128  }
  0x35   : > { %s8722_s10 = smov 8   ;;  %s7614_s4 = sadd.s32 4294967295, %s7434_s25  }
  0x36   : > { %6233 = dma.hbm_to_vmem [thread:$0]  (!%p7579_p6), %s7571_s11, 65536, %s7573_s3, %s7583_s5, %s7437_s8, %s8720_s29, %s8722_s10  }
  0x37   : > { %s5033_s26 = sadd.s32 4294967294, %s7434_s25   ;;  %p52_p2 = scmp.ne.s32.totalorder %s7410_s19, %s7406_s18 }
  0x38   : > { %p8727_p5 = scmp.eq.s32.totalorder %s7614_s4, 0  ;;  %p99_p8 = scmp.ne.s32.totalorder %s7398_s16, %s7394_s15 }
  0x39   : > { %p124_p6 = scmp.ne.s32.totalorder %s7390_s14, %s7386_s13  ;;  %p125_p3 = scmp.eq.s32.totalorder %s7614_s4, 3 }
  0x3a   : > { %p7625_p10 = por %p8727_p5, %p52_p2  ;;  %p7633_p1 = por %p99_p8, %p8727_p5 }
  0x3b   : > { %p130_p4 = scmp.ne.s32.totalorder %s7386_s13, %s7382_s12  ;;  %p131_p7 = scmp.eq.s32.totalorder %s5033_s26, 3 }
  0x3c   : > { %s8748_s9 = scalar_select %p7625_p10, 1, 0 }
  0x3d   : > { %s8749_s3 = scalar_select %p7633_p1, 1, 0 }
  0x3e   : > { %p7640_p9 = por %p125_p3, %p124_p6  ;;  %p5034_p11 = scmp.ge.s32.totalorder %s7434_s25, 1 }
  0x3f   : > { %p7645_p12 = por %p131_p7, %p130_p4  ;;  %p138_p13 = scmp.lt.s32.totalorder %s7434_s25, 5 }
  0x40   : > { %s8750_s15 = scalar_select %p7640_p9, 1, 0 }
  0x41   : > { %s8752_s18 = scalar_select %p7645_p12, 1, 0 }
  0x42   : > { %8751 = sst [smem:[#allocation18_spill]] %s8750_s15  ;;  %p7650_p2 = pnand %p5034_p11, %p138_p13 }
  0x43   : > { %8753 = sst [smem:[#allocation19_spill]] %s8752_s18  ;;  %s7440_s27 = smov [#allocation5]  }
  0x44   : > { %s8754_s11 = scalar_select %p7650_p2, 1, 0 }
  0x45   : > { %s150_s8 = sshll.u32 %s7440_s27, 4  ;;  %p6226_p8 = pneg %p7650_p2  ;;  %s151_s8 = int_to_ptr.vmem [resolvable:$true] %s150_s8 }
  0x46   : > { %s32_s7 = sadd.s32 1, %s7430_s24  ;;  %s86_s29 = sadd.s32 1, %s7402_s17 }
  0x47   : > { %p7658_p6 = pnand %p6226_p8, %p8727_p5  ;;  %s8795_s7 = smov (!%p7539_p0, %s32_s7), %s7430_s24 }
  0x48   : > { %s8756_s1 = sld [smem:[#allocation22_spill]] }
  0x49   : > { %p7224_p4 = pneg %p7658_p6 }
  0x4e   : > { %s7222_s23 = scalar_lea.hbm %s8756_s1, 384 }
  0x4f   : > { %p7223_p3 = scmp.ne.s32.totalorder %s8756_s1, %s7222_s23  ;;  %p7229_p13 = scmp.lt.u32.totalorder %s7222_s23, %s8756_s1 }
  0x51   : > { %p7225_p7 = pnand %p7224_p4, %p7223_p3 }
  0x53   : > { %p7226_p11 = pneg %p7225_p7 }
  0x55   : > { %p7231_p8 = pnand %p7229_p13, %p7226_p11 }
  0x57   : > { %7234 = shalt.err (!%p7231_p8)
}
  0x58   : > { %s7235_s28 = scalar_lea.vmem %s151_s8, 384  ;;  %p7243_p9 = scmp.lt.s32.totalorder %s151_s8, %s151_s8 }
  0x59   : > { %p7236_p0 = scmp.ne.s32.totalorder %s151_s8, %s7235_s28  ;;  %p7244_p1 = scmp.lt.s32.totalorder %s7235_s28, %s7235_s28 }
  0x5b   : > { %p7238_p5 = pnand %p7236_p0, %p7224_p4  ;;  %p7245_p10 = por %p7244_p1, %p7243_p9 }
  0x5d   : > { %p7239_p12 = pneg %p7238_p5 }
  0x5f   : > { %p7246_p2 = pnand %p7245_p10, %p7239_p12 }
  0x61   : > { %7249 = shalt.err (!%p7246_p2)
}
  0x62   : > { %s8757_s0 = smov 8   ;;  %s8758_s20 = smov 128  }
  0x63   : > { %6229 = dma.hbm_to_vmem [thread:$0]  (!%p7658_p6), %s8756_s1, 384, %s151_s8, [#allocation6], %s8758_s20, %s8758_s20, %s8757_s0  }
  0x64   : > { %p34_p5 = scmp.ge.s32.totalorder %s8795_s7, 2  ;;  %p93_p10 = scmp.ne.s32.totalorder %s7402_s17, %s7398_s16 }
  0x65   : > { %s187_s23 = sand.u32 1, %s7402_s17   ;;  %s6212_s18 = smul.u32 768, %s7430_s24 }
  0x66   : > { %s8797_s7 = smov (%p34_p5, %s8795_s7), 0  ;;  %p8760_p1 = scmp.eq.s32.totalorder %s7434_s25, 0 }
  0x67   : > { %8759 = sst [smem:[#allocation20_spill]] %s8797_s7  ;;  %s6211_s26 = smul.u32 48, %s187_s23 }
  0x68   : > { %p95_p9 = por %p93_p10, %p8760_p1  ;;  %s83_s27 = ssub.s32 %s7430_s24, %s8797_s7 }
  0x69   : > { %s7699_s10 = scalar_lea.hbm %s8714_s2, %s6212_s18  ;;  %p84_p12 = scmp.eq.s32.totalorder %s83_s27, 0 }
  0x6a   : > { %s111_s8 = sor.u32 %s83_s27, %s7558_s30  ;;  %s8761_s12 = sadd.s32 1, %s7390_s14 }
  0x6b   : > { %p112_p2 = scmp.eq.s32.totalorder %s111_s8, 0  ;;  %s189_s23 = scalar_lea.vmem [#allocation7], %s6211_s26 }
  0x6c   : > { %s7705_s1 = scalar_select %p84_p12, %s7402_s17, %s86_s29  }
  0x6d   : > { %s7710_s15 = scalar_select %p112_p2, %s7390_s14, %s8761_s12  }
  0x6e   : > { %s196_s7 = sshll.u32 %s189_s23, 4  ;;  %p8762_p6 = scmp.lt.s32.totalorder %s7434_s25, 4  ;;  %s7718_s7 = int_to_ptr.vmem [resolvable:$true] %s196_s7 }
  0x6f   : > { %s7250_s30 = scalar_lea.hbm %s7699_s10, 768  ;;  %s7255_s18 = scalar_lea.hbm %s8714_s2, 1536 }
  0x70   : > { %p7714_p3 = pnand %p8762_p6, %p95_p9  ;;  %p7251_p4 = scmp.ne.s32.totalorder %s7699_s10, %s7250_s30 }
  0x71   : > { %p7256_p8 = scmp.lt.u32.totalorder %s7699_s10, %s8714_s2  ;;  %p7257_p0 = scmp.lt.u32.totalorder %s7255_s18, %s7250_s30 }
  0x72   : > { %p7252_p7 = pneg %p7714_p3  ;;  %p7259_p10 = scmp.lt.u32.totalorder %s7250_s30, %s7699_s10 }
  0x73   : > { %p7258_p5 = por %p7257_p0, %p7256_p8 }
  0x74   : > { %p7253_p11 = pnand %p7252_p7, %p7251_p4 }
  0x75   : > { %p7260_p1 = por %p7259_p10, %p7258_p5 }
  0x76   : > { %p7254_p13 = pneg %p7253_p11 }
  0x78   : > { %p7261_p9 = pnand %p7260_p1, %p7254_p13 }
  0x7a   : > { %7264 = shalt.err (!%p7261_p9)
}
  0x7b   : > { %s7265_s6 = scalar_lea.vmem %s7718_s7, 768  ;;  %s7441_s8 = smov [#allocation7]  }
  0x7c   : > { %p7266_p12 = scmp.ne.s32.totalorder %s7718_s7, %s7265_s6  ;;  %s7270_s23 = sshll.u32 %s7441_s8, 4  ;;  %s7271_s23 = int_to_ptr.vmem [resolvable:$false] %s7270_s23 }
  0x7d   : > { %s7272_s12 = scalar_lea.vmem %s7271_s23, 1536  ;;  %p7273_p4 = scmp.lt.s32.totalorder %s7718_s7, %s7271_s23 }
  0x7e   : > { %p7268_p2 = pnand %p7266_p12, %p7252_p7  ;;  %p7274_p11 = scmp.lt.s32.totalorder %s7272_s12, %s7265_s6 }
  0x80   : > { %p7269_p6 = pneg %p7268_p2  ;;  %p7275_p8 = por %p7274_p11, %p7273_p4 }
  0x82   : > { %p7276_p0 = pnand %p7275_p8, %p7269_p6 }
  0x84   : > { %7279 = shalt.err (!%p7276_p0)
}
  0x85   : > { %6236 = dma.hbm_to_vmem [thread:$0]  (!%p7714_p3), %s7699_s10, 768, %s7718_s7, %s7583_s5, %s8758_s20, %s8758_s20, %s8757_s0  }
  0x86   : > { %p8764_p7 = scmp.ne.s32.totalorder %s8754_s11, 0 }
  0x87   : > { %s210_s30 = sand.u32 (!%p8764_p7), 1, %s7614_s4   ;;  %s212_s29 = sand.u32 (!%p8764_p7), 1, %s7410_s19  }
  0x88   : > { %208 = sbr.rel (%p8764_p7) target bundleno = 970 (0x3ca), region = 32  ;;  %s5042_s18 = sshll.u32 (!%p8764_p7), %s212_s29, 12 }
  0x89   : > { %s211_s26 = scalar_lea.sflag (!%p8764_p7), [#allocation3], %s210_s30  ;;  %s7753_s27 = scalar_lea.vmem (!%p8764_p7), [#allocation2], %s5042_s18 }
  0x8a   : > { %p8765_p13 = scmp.ne.s32.totalorder (!%p8764_p7), %s8748_s9, 0 }
  0x8f   : > { %7365 = dma.done.wait (%p8765_p13), %s211_s26, 65536  }
  0x90   : > { %7367 = vsyncadd (%p8765_p13), %s211_s26, 4294901760  ;;  %p8766_p5 = scmp.eq.s32.totalorder %s7614_s4, 0 }
  0x92   : > { %7369 = dma.done.wait (%p8766_p5), [#allocation6], 384   ;;  %p8767_p3 = pmov %p8766_p5 }
  0x93   : > { %s225_s5 = sand.u32 1, %s7398_s16   ;;  %p8768_p10 = scmp.ne.s32.totalorder %s8749_s3, 0 }
  0x94   : > { %7371 = vsyncadd (%p8767_p3), [#allocation6], 4294966912  ;;  %s6213_s7 = smul.u32 48, %s225_s5 }
  0x96   : > { %s7764_s11 = scalar_lea.vmem [#allocation7], %s6213_s7 }
  0x97   : > { %7373 = dma.done.wait (%p8768_p10), %s211_s26, 768  }
  0x98   : > { %7375 = vsyncadd (%p8768_p10), %s211_s26, 4294966528  ;;  %v6367_v0 = vld [vmem:[%s7753_s27 + $0x104] ss:$8 sps:$4 sm:$0xff]   ;;  %v6371_v2 = vld [vmem:[%s7753_s27 + $0x100] ss:$8 sps:$4 sm:$0xff]   ;;  %vm2542_vm1 = vcmask 1045504  }
  0x99   : > { %v6369_v1 = vld [vmem:[%s7753_s27 + $0x804] ss:$8 sps:$4 sm:$0xff]   ;;  %534 = vmatprep.subr.bf16.mxu1 %v6367_v0  ;;  %v6372_v3 = vld [vmem:[%s7753_s27 + $0x800] ss:$8 sps:$4 sm:$0xff]   ;;  %v6373_v4 = vld [vmem:[%s7753_s27 + $0x114] ss:$8 sps:$4 sm:$0xff]  }
  0x9a   : > { %2713 = vmatprep.subr.bf16.mxu0 %v6369_v1  ;;  %535 = vmatpush1.bf16.msra.mxu1 %v6371_v2  ;;  %v6375_v5 = vld [vmem:[%s7753_s27 + $0x814] ss:$8 sps:$4 sm:$0xff]   ;;  %v6377_v6 = vld [vmem:[%s7753_s27 + $0x110] ss:$8 sps:$4 sm:$0xff]   ;;  %v6379_v8 = vld [vmem:[%s7753_s27 + $0x124] ss:$8 sps:$4 sm:$0xff]  }
  0x9b   : > { %2714 = vmatpush1.bf16.msra.mxu0 %v6372_v3  ;;  %536 = vmatprep.subr.bf16.mxu1 %v6373_v4  ;;  %v6378_v7 = vld [vmem:[%s7753_s27 + $0x810] ss:$8 sps:$4 sm:$0xff]   ;;  %v6381_v9 = vld [vmem:[%s7753_s27 + $0x824] ss:$8 sps:$4 sm:$0xff]   ;;  %v6383_v10 = vld [vmem:[%s7753_s27 + $0x120] ss:$8 sps:$4 sm:$0xff]  }
  0x9c   : > { %2715 = vmatprep.subr.bf16.mxu0 %v6375_v5  ;;  %v6384_v11 = vld [vmem:[%s7753_s27 + $0x820] ss:$8 sps:$4 sm:$0xff]   ;;  %v6385_v12 = vld [vmem:[%s7753_s27 + $0x134] ss:$8 sps:$4 sm:$0xff]   ;;  %v6389_v14 = vld [vmem:[%s7753_s27 + $0x130] ss:$8 sps:$4 sm:$0xff]  }
  0x9d   : > { %v6387_v13 = vld [vmem:[%s7753_s27 + $0x834] ss:$8 sps:$4 sm:$0xff]   ;;  %v6390_v15 = vld [vmem:[%s7753_s27 + $0x830] ss:$8 sps:$4 sm:$0xff]   ;;  %v6391_v16 = vld [vmem:[%s7753_s27 + $0x144] ss:$8 sps:$4 sm:$0xff]  }
  0x9e   : > { %537 = vmatpush1.bf16.msra.mxu1 %v6377_v6  ;;  %v6393_v17 = vld [vmem:[%s7753_s27 + $0x844] ss:$8 sps:$4 sm:$0xff]   ;;  %v6395_v18 = vld [vmem:[%s7753_s27 + $0x140] ss:$8 sps:$4 sm:$0xff]   ;;  %v6397_v20 = vld [vmem:[%s7753_s27 + $0x154] ss:$8 sps:$4 sm:$0xff]  }
  0x9f   : > { %2716 = vmatpush1.bf16.msra.mxu0 %v6378_v7  ;;  %538 = vmatprep.subr.bf16.mxu1 %v6379_v8  ;;  %v6396_v19 = vld [vmem:[%s7753_s27 + $0x840] ss:$8 sps:$4 sm:$0xff]   ;;  %v6399_v21 = vld [vmem:[%s7753_s27 + $0x854] ss:$8 sps:$4 sm:$0xff]   ;;  %v6401_v22 = vld [vmem:[%s7753_s27 + $0x150] ss:$8 sps:$4 sm:$0xff]  }
  0xa0   : > { %2717 = vmatprep.subr.bf16.mxu0 %v6381_v9  ;;  %v6402_v23 = vld [vmem:[%s7753_s27 + $0x850] ss:$8 sps:$4 sm:$0xff]   ;;  %v6403_v24 = vld [vmem:[%s7753_s27 + $0x164] ss:$8 sps:$4 sm:$0xff]   ;;  %v6407_v26 = vld [vmem:[%s7753_s27 + $0x160] ss:$8 sps:$4 sm:$0xff]  }
  0xa1   : > { %v6405_v25 = vld [vmem:[%s7753_s27 + $0x864] ss:$8 sps:$4 sm:$0xff]   ;;  %v6408_v27 = vld [vmem:[%s7753_s27 + $0x860] ss:$8 sps:$4 sm:$0xff]   ;;  %v6409_v28 = vld [vmem:[%s7753_s27 + $0x174] ss:$8 sps:$4 sm:$0xff]  }
  0xa2   : > { %539 = vmatpush1.bf16.msra.mxu1 %v6383_v10  ;;  %v6411_v29 = vld [vmem:[%s7753_s27 + $0x874] ss:$8 sps:$4 sm:$0xff]   ;;  %v6413_v30 = vld [vmem:[%s7753_s27 + $0x170] ss:$8 sps:$4 sm:$0xff]   ;;  %v6415_v32 = vld [vmem:[%s7753_s27 + $0x184] ss:$8 sps:$4 sm:$0xff]  }
  0xa3   : > { %2718 = vmatpush1.bf16.msra.mxu0 %v6384_v11  ;;  %540 = vmatprep.subr.bf16.mxu1 %v6385_v12  ;;  %v6414_v31 = vld [vmem:[%s7753_s27 + $0x870] ss:$8 sps:$4 sm:$0xff]   ;;  %v6417_v33 = vld [vmem:[%s7753_s27 + $0x884] ss:$8 sps:$4 sm:$0xff]   ;;  %v6419_v34 = vld [vmem:[%s7753_s27 + $0x180] ss:$8 sps:$4 sm:$0xff]  }
  0xa4   : > { %2719 = vmatprep.subr.bf16.mxu0 %v6387_v13  ;;  %v6420_v35 = vld [vmem:[%s7753_s27 + $0x880] ss:$8 sps:$4 sm:$0xff]   ;;  %v6421_v36 = vld [vmem:[%s7753_s27 + $0x194] ss:$8 sps:$4 sm:$0xff]   ;;  %v6425_v38 = vld [vmem:[%s7753_s27 + $0x190] ss:$8 sps:$4 sm:$0xff]  }
  0xa5   : > { %v6423_v37 = vld [vmem:[%s7753_s27 + $0x894] ss:$8 sps:$4 sm:$0xff]   ;;  %v6426_v39 = vld [vmem:[%s7753_s27 + $0x890] ss:$8 sps:$4 sm:$0xff]   ;;  %v6427_v40 = vld [vmem:[%s7753_s27 + $0x1a4] ss:$8 sps:$4 sm:$0xff]  }
  0xa6   : > { %541 = vmatpush1.bf16.msra.mxu1 %v6389_v14  ;;  %v6429_v41 = vld [vmem:[%s7753_s27 + $0x8a4] ss:$8 sps:$4 sm:$0xff]   ;;  %v6431_v42 = vld [vmem:[%s7753_s27 + $0x1a0] ss:$8 sps:$4 sm:$0xff]   ;;  %v6433_v44 = vld [vmem:[%s7753_s27 + $0x1b4] ss:$8 sps:$4 sm:$0xff]  }
  0xa7   : > { %2720 = vmatpush1.bf16.msra.mxu0 %v6390_v15  ;;  %542 = vmatprep.subr.bf16.mxu1 %v6391_v16  ;;  %v6432_v43 = vld [vmem:[%s7753_s27 + $0x8a0] ss:$8 sps:$4 sm:$0xff]   ;;  %v6435_v45 = vld [vmem:[%s7753_s27 + $0x8b4] ss:$8 sps:$4 sm:$0xff]   ;;  %v6437_v46 = vld [vmem:[%s7753_s27 + $0x1b0] ss:$8 sps:$4 sm:$0xff]  }
  0xa8   : > { %2721 = vmatprep.subr.bf16.mxu0 %v6393_v17  ;;  %v6438_v47 = vld [vmem:[%s7753_s27 + $0x8b0] ss:$8 sps:$4 sm:$0xff]   ;;  %vm339_vm0 = vsmask.f32 7424  ;;  %v6439_v51 = vld [vmem:[%s7753_s27 + $0x1c4] ss:$8 sps:$4 sm:$0xff]  }
  0xa9   : > { %v257_v48 = vld [vmem:[%s7764_s11] sm:$0xff]  ;;  %v7820_v49 = vld [vmem:[%s7764_s11 + $0x8] sm:$0xff]  ;;  %v292_v50 = vld [vmem:[%s7764_s11 + $0x10] sm:$0x33]  ;;  %vm2809_vm2 = vsmask.f32 5376 }
  0xaa   : > { %543 = vmatpush1.bf16.msra.mxu1 %v6395_v18  ;;  %v6441_v52 = vld [vmem:[%s7753_s27 + $0x8c4] ss:$8 sps:$4 sm:$0xff]   ;;  %v7826_v53 = vcombine.high %v257_v48, %v7820_v49  ;;  %v7828_v54 = vcombine.high %v292_v50, %v292_v50  ;;  %v6443_v62 = vld [vmem:[%s7753_s27 + $0x1c0] ss:$8 sps:$4 sm:$0xff]   ;;  %v7845_v4 = vcombine.low %v257_v48, %v7820_v49  ;;  %v6445_v5 = vld [vmem:[%s7753_s27 + $0x1d4] ss:$8 sps:$4 sm:$0xff]   ;;  %v7856_v13 = vcombine.low %v292_v50, %v292_v50 }
  0xab   : > { %2722 = vmatpush1.bf16.msra.mxu0 %v6396_v19  ;;  %544 = vmatprep.subr.bf16.mxu1 %v6397_v20  ;;  %v7831_v55 = vld [vmem:[%s7764_s11 + $0x10] sm:$0xff]  ;;  %v2497_v56 = vld [vmem:[%s7764_s11 + $0x8] sm:$0xcc]  ;;  %v2498_v57 = vld [vmem:[%s7764_s11 + $0x18] sm:$0x77]  ;;  %vm844_vm3 = vcmask 1046528  }
  0xac   : > { %2723 = vmatprep.subr.bf16.mxu0 %v6399_v21  ;;  %v353_v58 = vshrl.u32 %v7826_v53, 16  ;;  %v355_v59 = vshll.u32 %v7826_v53, 16  ;;  %v360_v60 = vshll.u32 %v7828_v54, 16  ;;  %v7839_v61 = vcombine.high %v2497_v56, %v7831_v55  ;;  %v6444_v63 = vld [vmem:[%s7753_s27 + $0x8c0] ss:$8 sps:$4 sm:$0xff]   ;;  %s252_s4 = sand.u32 1, %s7386_s13  }
  0xad   : > { %v5583_v0 = vcombine.high %v2498_v57, %v2498_v57  ;;  %v6447_v6 = vld [vmem:[%s7753_s27 + $0x8d4] ss:$8 sps:$4 sm:$0xff]   ;;  %v6449_v9 = vld [vmem:[%s7753_s27 + $0x1d0] ss:$8 sps:$4 sm:$0xff]   ;;  %v343_v14 = vshll.u32 %v7845_v4, 16  ;;  %v341_v18 = vshrl.u32 %v7845_v4, 16 }
  0xae   : > { %545 = vmatpush1.bf16.msra.mxu1 %v6401_v22  ;;  %v357_v1 = vrot.slane %v355_v59, 1  ;;  %v362_v2 = vrot.slane %v360_v60, 1  ;;  %v2546_v3 = vrot.slane %v7839_v61, 2  ;;  %v6450_v11 = vld [vmem:[%s7753_s27 + $0x8d0] ss:$8 sps:$4 sm:$0xff]   ;;  %v348_v21 = vshll.u32 %v7856_v13, 16 }
  0xaf   : > { %2724 = vmatpush1.bf16.msra.mxu0 %v6402_v23  ;;  %546 = vmatprep.subr.bf16.mxu1 %v6403_v24  ;;  %v7849_v7 = vrot.slane %v5583_v0, 2  ;;  %v6451_v15 = vld [vmem:[%s7753_s27 + $0x1e4] ss:$8 sps:$4 sm:$0xff]   ;;  %v6455_v17 = vld [vmem:[%s7753_s27 + $0x1e0] ss:$8 sps:$4 sm:$0xff]   ;;  %v345_v20 = vrot.slane %v343_v14, 1  ;;  %v7866_v22 = vcombine.low %v2497_v56, %v7831_v55  ;;  %v5582_v23 = vcombine.low %v2498_v57, %v2498_v57 }
  0xb0   : > { %2725 = vmatprep.subr.bf16.mxu0 %v6405_v25  ;;  %v358_v8 = vor.u32 %v357_v1, %v353_v58  ;;  %v6453_v16 = vld [vmem:[%s7753_s27 + $0x8e4] ss:$8 sps:$4 sm:$0xff]   ;;  %v6456_v19 = vld [vmem:[%s7753_s27 + $0x8e0] ss:$8 sps:$4 sm:$0xff]   ;;  %v6457_v24 = vld [vmem:[%s7753_s27 + $0x1f4] ss:$8 sps:$4 sm:$0xff]  }
  0xb1   : > { %v2548_v10 = vsel %vm2542_vm1, %v2546_v3, %v7849_v7  ;;  %v6459_v25 = vld [vmem:[%s7753_s27 + $0x8f4] ss:$8 sps:$4 sm:$0xff]   ;;  %v6486_v50 = vld [vmem:[%s7753_s27 + $0x920] ss:$8 sps:$4 sm:$0xff]   ;;  %v6489_v56 = vld [vmem:[%s7753_s27 + $0x30] ss:$8 sps:$4 sm:$0xff]  }
  0xb2   : > { %547 = vmatpush1.bf16.msra.mxu1 %v6407_v26  ;;  %v363_v12 = vsel %vm339_vm0, %v358_v8, %v362_v2  ;;  %2745 = vmatprep.mubr.bf16.mxu0 %v2548_v10  ;;  %v6461_v26 = vld [vmem:[%s7753_s27 + $0x1f0] ss:$8 sps:$4 sm:$0xff]   ;;  %v6497_v58 = vld [vmem:[%s7753_s27 + $0x44] ss:$8 sps:$4 sm:$0xff]   ;;  %v6495_v60 = vld [vmem:[%s7753_s27 + $0x40] ss:$8 sps:$4 sm:$0xff]  }
  0xb3   : > { %2726 = vmatpush1.bf16.msra.mxu0 %v6408_v27  ;;  %548 = vmatprep.subr.bf16.mxu1 %v6409_v28  ;;  %v6462_v27 = vld [vmem:[%s7753_s27 + $0x8f0] ss:$8 sps:$4 sm:$0xff]   ;;  %v346_v28 = vor.u32 %v345_v20, %v341_v18  ;;  %v6500_v59 = vld [vmem:[%s7753_s27 + $0x944] ss:$8 sps:$4 sm:$0xff]   ;;  %v6506_v0 = vld [vmem:[%s7753_s27 + $0x954] ss:$8 sps:$4 sm:$0xff]  }
  0xb4   : > { %2727 = vmatprep.subr.bf16.mxu0 %v6411_v29  ;;  %566 = vmatprep.mubr.bf16.mxu1 %v363_v12  ;;  %v350_v29 = vrot.slane %v348_v21, 1  ;;  %v6492_v57 = vld [vmem:[%s7753_s27 + $0x930] ss:$8 sps:$4 sm:$0xff]   ;;  %v6512_v3 = vld [vmem:[%s7753_s27 + $0x964] ss:$8 sps:$4 sm:$0xff]   ;;  %vm1412_vm4 = vcmask 1044480  }
  0xb5   : > { %v6501_v1 = vld [vmem:[%s7753_s27 + $0x50] ss:$8 sps:$4 sm:$0xff]   ;;  %v6510_v8 = vld [vmem:[%s7753_s27 + $0x960] ss:$8 sps:$4 sm:$0xff]   ;;  %v6518_v10 = vld [vmem:[%s7753_s27 + $0x974] ss:$8 sps:$4 sm:$0xff]  }
  0xb6   : > { %549 = vmatpush1.bf16.msra.mxu1 %v6413_v30  ;;  %v2543_v30 = vrot.slane %v7866_v22, 2  ;;  %v6524_v20 = vld [vmem:[%s7753_s27 + $0x984] ss:$8 sps:$4 sm:$0xff]   ;;  %vm1111_vm5 = vsmask.f32 6400  ;;  %vm4790_vm7 = vcmask 1041408  }
  0xb7   : > { %2728 = vmatpush1.bf16.msra.mxu0 %v6414_v31  ;;  %550 = vmatprep.subr.bf16.mxu1 %v6415_v32  ;;  %v2544_v31 = vrot.slane %v5582_v23, 2  ;;  %v6467_v32 = vld [vmem:[%s7753_s27 + $0x4] ss:$8 sps:$4 sm:$0xff]   ;;  %vm1693_vm6 = vsmask.f32 4352  ;;  %s6215_s9 = smul.u32 12, %s7422_s22 }
  0xb8   : > { %2729 = vmatprep.subr.bf16.mxu0 %v6417_v33  ;;  %v6472_v33 = vld [vmem:[%s7753_s27 + $0x904] ss:$8 sps:$4 sm:$0xff]   ;;  %s6214_s3 = smul.u32 24, %s252_s4  ;;  %s6085_s0 = sshll.u32 %s7418_s21, 1 }
  0xb9   : > { %s8622_s20 = sadd.s32 %s6215_s9, %s6085_s0  ;;  %s8769_s28 = sld [smem:[#allocation18_spill]] }
  0xba   : > { %551 = vmatpush1.bf16.msra.mxu1 %v6419_v34  ;;  %v367_v34 = vshrl.u32 %v7828_v54, 16  ;;  %s6086_s10 = sshll.u32 %s8622_s20, 6  ;;  %s254_s21 = scalar_lea.vmem [#allocation8], %s6214_s3 }
  0xbb   : > { %2730 = vmatpush1.bf16.msra.mxu0 %v6420_v35  ;;  %552 = vmatprep.subr.bf16.mxu1 %v6421_v36  ;;  %v6465_v35 = vld [vmem:[%s7753_s27] ss:$8 sps:$4 sm:$0xff]   ;;  %s4915_s22 = sshll.u32 %s254_s21, 4  ;;  %s8770_s23 = sld [smem:[#allocation23_spill]]  ;;  %s8632_s22 = int_to_ptr.vmem [resolvable:$true] %s4915_s22 }
  0xbc   : > { %2731 = vmatprep.subr.bf16.mxu0 %v6423_v37  ;;  %v6470_v36 = vld [vmem:[%s7753_s27 + $0x900] ss:$8 sps:$4 sm:$0xff]   ;;  %v351_v37 = vsel %vm339_vm0, %v346_v28, %v350_v29  ;;  %v6527_v28 = vld [vmem:[%s7753_s27 + $0x94] ss:$8 sps:$4 sm:$0xff]   ;;  %s8636_s29 = scalar_lea.sflag [#allocation4], %s252_s4  ;;  %s7280_s18 = scalar_lea.vmem %s8632_s22, 384 }
  0xbd   : > { %p7281_p1 = scmp.ne.s32.totalorder %s8632_s22, %s7280_s18  ;;  %s7443_s26 = smov [#allocation8]  }
  0xbe   : > { %553 = vmatpush1.bf16.msra.mxu1 %v6425_v38  ;;  %v2545_v38 = vsel %vm2542_vm1, %v2543_v30, %v2544_v31 }
  0xbf   : > { %2732 = vmatpush1.bf16.msra.mxu0 %v6426_v39  ;;  %554 = vmatprep.subr.bf16.mxu1 %v6427_v40  ;;  %v6479_v39 = vld [vmem:[%s7753_s27 + $0x14] ss:$8 sps:$4 sm:$0xff]   ;;  %p8772_p9 = scmp.ne.s32.totalorder %s8769_s28, 0 }
  0xc0   : > { %2733 = vmatprep.subr.bf16.mxu0 %v6429_v41  ;;  %v6482_v40 = vld [vmem:[%s7753_s27 + $0x914] ss:$8 sps:$4 sm:$0xff]   ;;  %v369_v41 = vor.u32 %v367_v34, %v362_v2  ;;  %v6504_v2 = vld [vmem:[%s7753_s27 + $0x950] ss:$8 sps:$4 sm:$0xff]   ;;  %v6536_v34 = vld [vmem:[%s7753_s27 + $0x9a4] ss:$8 sps:$4 sm:$0xff]  }
  0xc1   : > { %s8771_s30 = smov %s8770_s23  ;;  %s8630_s12 = scalar_lea.hbm %s8770_s23, %s6086_s10 }
  0xc2   : > { %555 = vmatpush1.bf16.msra.mxu1 %v6431_v42  ;;  %v6477_v42 = vld [vmem:[%s7753_s27 + $0x10] ss:$8 sps:$4 sm:$0xff]   ;;  %p7282_p12 = pnand %p7281_p1, %p8772_p9 }
  0xc3   : > { %2734 = vmatpush1.bf16.msra.mxu0 %v6432_v43  ;;  %556 = vmatprep.subr.bf16.mxu1 %v6433_v44  ;;  %v364_v43 = vshrl.u32 %v7856_v13, 16  ;;  %v6480_v44 = vld [vmem:[%s7753_s27 + $0x910] ss:$8 sps:$4 sm:$0xff]  }
  0xc4   : > { %2735 = vmatprep.subr.bf16.mxu0 %v6435_v45  ;;  %v6485_v45 = vld [vmem:[%s7753_s27 + $0x24] ss:$8 sps:$4 sm:$0xff]   ;;  %p7283_p2 = pneg %p7282_p12 }
  0xc5   : > { %v366_v48 = vor.u32 %v364_v43, %v350_v29  ;;  %v6530_v29 = vld [vmem:[%s7753_s27 + $0x994] ss:$8 sps:$4 sm:$0xff]   ;;  %v6543_v43 = vld [vmem:[%s7753_s27 + $0xc0] ss:$8 sps:$4 sm:$0xff]  }
  0xc6   : > { %557 = vmatpush1.bf16.msra.mxu1 %v6437_v46  ;;  %v6488_v46 = vld [vmem:[%s7753_s27 + $0x924] ss:$8 sps:$4 sm:$0xff]  }
  0xc7   : > { %2736 = vmatpush1.bf16.msra.mxu0 %v6438_v47  ;;  %558 = vmatprep.subr.bf16.mxu1 %v6439_v51  ;;  %v6483_v47 = vld [vmem:[%s7753_s27 + $0x20] ss:$8 sps:$4 sm:$0xff]   ;;  %v6491_v51 = vld [vmem:[%s7753_s27 + $0x34] ss:$8 sps:$4 sm:$0xff]  }
  0xc8   : > { %2737 = vmatprep.subr.bf16.mxu0 %v6441_v52  ;;  %v6494_v52 = vld [vmem:[%s7753_s27 + $0x934] ss:$8 sps:$4 sm:$0xff]  }
  0xca   : > { %559 = vmatpush1.bf16.msra.mxu1 %v6443_v62  ;;  %v6498_v62 = vld [vmem:[%s7753_s27 + $0x940] ss:$8 sps:$4 sm:$0xff]  }
  0xcb   : > { %2738 = vmatpush1.bf16.msra.mxu0 %v6444_v63  ;;  %560 = vmatprep.subr.bf16.mxu1 %v6445_v5  ;;  %v6503_v63 = vld [vmem:[%s7753_s27 + $0x54] ss:$8 sps:$4 sm:$0xff]   ;;  %v2828_v5 = vshrl.u32 %v7839_v61, 16 }
  0xcc   : > { %2739 = vmatprep.subr.bf16.mxu0 %v6447_v6  ;;  %v2831_v6 = vshll.u32 %v7839_v61, 16  ;;  %v6513_v61 = vld [vmem:[%s7753_s27 + $0x70] ss:$8 sps:$4 sm:$0xff]  }
  0xcd   : > { %v2830_v14 = vrot.slane %v2828_v5, 2  ;;  %v6564_v5 = vld [vmem:[%s7753_s27 + $0x9f0] ss:$8 sps:$4 sm:$0xff]  }
  0xce   : > { %561 = vmatpush1.bf16.msra.mxu1 %v6449_v9  ;;  %v6515_v9 = vld [vmem:[%s7753_s27 + $0x74] ss:$8 sps:$4 sm:$0xff]  }
  0xcf   : > { %2740 = vmatpush1.bf16.msra.mxu0 %v6450_v11  ;;  %562 = vmatprep.subr.bf16.mxu1 %v6451_v15  ;;  %v7912_v11 = vld [vmem:[%s7764_s11 + $0x18] sm:$0xff]  ;;  %v2833_v15 = vrot.slane %v2831_v6, 3 }
  0xd0   : > { %2741 = vmatprep.subr.bf16.mxu0 %v6453_v16  ;;  %v7916_v12 = vcombine.high %v7912_v11, %v7912_v11  ;;  %v6516_v16 = vld [vmem:[%s7753_s27 + $0x970] ss:$8 sps:$4 sm:$0xff]  }
  0xd1   : > { %v2834_v21 = vor.u32 %v2833_v15, %v2830_v14  ;;  %v259_v14 = vld [vmem:[%s7764_s11 + $0x10] sm:$0x11] }
  0xd2   : > { %563 = vmatpush1.bf16.msra.mxu1 %v6455_v17  ;;  %v6521_v17 = vld [vmem:[%s7753_s27 + $0x84] ss:$8 sps:$4 sm:$0xff]   ;;  %v2836_v18 = vshrl.u32 %v7916_v12, 16  ;;  %v6572_v15 = vld [vmem:[%s7753_s27 + $0xa00] ss:$8 sps:$4 sm:$0xff]  }
  0xd3   : > { %2742 = vmatpush1.bf16.msra.mxu0 %v6456_v19  ;;  %564 = vmatprep.subr.bf16.mxu1 %v6457_v24  ;;  %v2839_v19 = vshll.u32 %v7916_v12, 16 }
  0xd4   : > { %2743 = vmatprep.subr.bf16.mxu0 %v6459_v25  ;;  %v2838_v23 = vrot.slane %v2836_v18, 2  ;;  %v6519_v25 = vld [vmem:[%s7753_s27 + $0x80] ss:$8 sps:$4 sm:$0xff]   ;;  %v5113_v18 = vcombine.high %v259_v14, %v259_v14 }
  0xd5   : > { %v2841_v24 = vrot.slane %v2839_v19, 3  ;;  %v6575_v19 = vld [vmem:[%s7753_s27 + $0x210] ss:$8 sps:$4 sm:$0xff]  }
  0xd6   : > { %565 = vmatpush1.bf16.msra.mxu1 %v6461_v26  ;;  %v6522_v26 = vld [vmem:[%s7753_s27 + $0x980] ss:$8 sps:$4 sm:$0xff]  }
  0xd7   : > { %2744 = vmatpush1.bf16.msra.mxu0 %v6462_v27  ;;  %754 = vmatprep.subr.bf16.mxu1 %v6467_v32  ;;  %v7926_v27 = vor.u32 %v2841_v24, %v2838_v23  ;;  %v6528_v32 = vld [vmem:[%s7753_s27 + $0x990] ss:$8 sps:$4 sm:$0xff]   ;;  %v6586_v23 = vld [vmem:[%s7753_s27 + $0xa24] ss:$8 sps:$4 sm:$0xff]  }
  0xd8   : > { %3008 = vmatprep.subr.bf16.mxu0 %v6472_v33  ;;  %v6533_v33 = vld [vmem:[%s7753_s27 + $0xa4] ss:$8 sps:$4 sm:$0xff]  }
  0xd9   : > { %567 = vmatmul.mubr.bf16.vlgmr.msra.gmra.mrb[0].mxu1 %v351_v37  ;;  %v2843_v30 = vsel %vm2809_vm2, %v2834_v21, %v7926_v27  ;;  %v6539_v37 = vld [vmem:[%s7753_s27 + $0xb4] ss:$8 sps:$4 sm:$0xff]   ;;  %v6583_v21 = vld [vmem:[%s7753_s27 + $0x224] ss:$8 sps:$4 sm:$0xff]  }
  0xda   : > { %2746 = vmatmul.mubr.bf16.vlgmr.msra.gmra.mrb[0].mxu0 %v2545_v38  ;;  %755 = vmatpush1.bf16.msra.mxu1 %v6465_v35  ;;  %v6531_v35 = vld [vmem:[%s7753_s27 + $0xa0] ss:$8 sps:$4 sm:$0xff]   ;;  %v6542_v38 = vld [vmem:[%s7753_s27 + $0x9b4] ss:$8 sps:$4 sm:$0xff]  }
  0xdb   : > { %3009 = vmatpush1.bf16.msra.mxu0 %v6470_v36  ;;  %756 = vmatprep.subr.bf16.mxu1 %v6479_v39  ;;  %v6534_v36 = vld [vmem:[%s7753_s27 + $0x9a0] ss:$8 sps:$4 sm:$0xff]   ;;  %v6537_v39 = vld [vmem:[%s7753_s27 + $0xb0] ss:$8 sps:$4 sm:$0xff]  }
  0xdc   : > { %3010 = vmatprep.subr.bf16.mxu0 %v6482_v40  ;;  %576 = vmatprep.mubr.bf16.mxu1 %v369_v41  ;;  %v6540_v40 = vld [vmem:[%s7753_s27 + $0x9b0] ss:$8 sps:$4 sm:$0xff]   ;;  %v6545_v41 = vld [vmem:[%s7753_s27 + $0xc4] ss:$8 sps:$4 sm:$0xff]  }
  0xdd   : > { %2755 = vmatprep.mubr.bf16.mxu0 %v7849_v7  ;;  %v6507_v7 = vld [vmem:[%s7753_s27 + $0x60] ss:$8 sps:$4 sm:$0xff]  }
  0xde   : > { %757 = vmatpush1.bf16.msra.mxu1 %v6477_v42  ;;  %v6548_v42 = vld [vmem:[%s7753_s27 + $0x9c4] ss:$8 sps:$4 sm:$0xff]  }
  0xdf   : > { %3011 = vmatpush1.bf16.msra.mxu0 %v6480_v44  ;;  %758 = vmatprep.subr.bf16.mxu1 %v6485_v45  ;;  %v6546_v44 = vld [vmem:[%s7753_s27 + $0x9c0] ss:$8 sps:$4 sm:$0xff]   ;;  %v7948_v45 = vcombine.low %v7912_v11, %v7912_v11 }
  0xe0   : > { %3012 = vmatprep.subr.bf16.mxu0 %v6488_v46  ;;  %v6551_v46 = vld [vmem:[%s7753_s27 + $0xd4] ss:$8 sps:$4 sm:$0xff]  }
  0xe1   : > { %577 = vmatmul.mubr.bf16.gmra.mrb[4].mxu1 %v366_v48  ;;  %v6549_v48 = vld [vmem:[%s7753_s27 + $0xd0] ss:$8 sps:$4 sm:$0xff]  }
  0xe2   : > { %2756 = vmatmul.mubr.bf16.gmra.mrb[4].mxu0 %v2544_v31  ;;  %759 = vmatpush1.bf16.msra.mxu1 %v6483_v47  ;;  %v6525_v31 = vld [vmem:[%s7753_s27 + $0x90] ss:$8 sps:$4 sm:$0xff]   ;;  %v6554_v47 = vld [vmem:[%s7753_s27 + $0x9d4] ss:$8 sps:$4 sm:$0xff]  }
  0xe3   : > { %3013 = vmatpush1.bf16.msra.mxu0 %v6486_v50  ;;  %760 = vmatprep.subr.bf16.mxu1 %v6491_v51  ;;  %v2811_v50 = vshrl.u32 %v7866_v22, 16  ;;  %v6552_v51 = vld [vmem:[%s7753_s27 + $0x9d0] ss:$8 sps:$4 sm:$0xff]  }
  0xe4   : > { %3014 = vmatprep.subr.bf16.mxu0 %v6494_v52  ;;  %786 = vmatprep.mubr.bf16.mxu1 %v7826_v53  ;;  %v6509_v53 = vld [vmem:[%s7753_s27 + $0x64] ss:$8 sps:$4 sm:$0xff]   ;;  %v2814_v52 = vshll.u32 %v7866_v22, 16 }
  0xe5   : > { %3040 = vmatprep.mubr.bf16.mxu0 %v2843_v30  ;;  %v7980_v24 = vld [vmem:[%s7764_s11] sm:$0xee] }
  0xe6   : > { %761 = vmatpush1.bf16.msra.mxu1 %v6489_v56  ;;  %v2819_v56 = vshrl.u32 %v7948_v45, 16 }
  0xe7   : > { %3015 = vmatpush1.bf16.msra.mxu0 %v6492_v57  ;;  %762 = vmatprep.subr.bf16.mxu1 %v6497_v58  ;;  %v2822_v57 = vshll.u32 %v7948_v45, 16  ;;  %v6557_v58 = vld [vmem:[%s7753_s27 + $0xe4] ss:$8 sps:$4 sm:$0xff]  }
  0xe8   : > { %3016 = vmatprep.subr.bf16.mxu0 %v6500_v59  ;;  %v6560_v59 = vld [vmem:[%s7753_s27 + $0x9e4] ss:$8 sps:$4 sm:$0xff]   ;;  %v2821_v22 = vrot.slane %v2819_v56, 2  ;;  %v6616_v56 = vld [vmem:[%s7753_s27 + $0xa74] ss:$8 sps:$4 sm:$0xff]  }
  0xea   : > { %763 = vmatpush1.bf16.msra.mxu1 %v6495_v60  ;;  %v6555_v60 = vld [vmem:[%s7753_s27 + $0xe0] ss:$8 sps:$4 sm:$0xff]  }
  0xeb   : > { %3017 = vmatpush1.bf16.msra.mxu0 %v6498_v62  ;;  %764 = vmatprep.subr.bf16.mxu1 %v6503_v63  ;;  %v2813_v62 = vrot.slane %v2811_v50, 2  ;;  %v6558_v63 = vld [vmem:[%s7753_s27 + $0x9e0] ss:$8 sps:$4 sm:$0xff]  }
  0xec   : > { %3018 = vmatprep.subr.bf16.mxu0 %v6506_v0  ;;  %v2816_v0 = vrot.slane %v2814_v52, 3  ;;  %v6605_v50 = vld [vmem:[%s7753_s27 + $0x260] ss:$8 sps:$4 sm:$0xff]   ;;  %v6613_v52 = vld [vmem:[%s7753_s27 + $0x274] ss:$8 sps:$4 sm:$0xff]  }
  0xee   : > { %765 = vmatpush1.bf16.msra.mxu1 %v6501_v1  ;;  %v2824_v1 = vrot.slane %v2822_v57, 3  ;;  %v2817_v6 = vor.u32 %v2816_v0, %v2813_v62  ;;  %v6611_v57 = vld [vmem:[%s7753_s27 + $0x270] ss:$8 sps:$4 sm:$0xff]   ;;  %v6617_v62 = vld [vmem:[%s7753_s27 + $0x280] ss:$8 sps:$4 sm:$0xff]  }
  0xef   : > { %3019 = vmatpush1.bf16.msra.mxu0 %v6504_v2  ;;  %766 = vmatprep.subr.bf16.mxu1 %v6509_v53  ;;  %v6563_v2 = vld [vmem:[%s7753_s27 + $0xf4] ss:$8 sps:$4 sm:$0xff]  }
  0xf0   : > { %3020 = vmatprep.subr.bf16.mxu0 %v6512_v3  ;;  %v6566_v53 = vld [vmem:[%s7753_s27 + $0x9f4] ss:$8 sps:$4 sm:$0xff]   ;;  %v6561_v3 = vld [vmem:[%s7753_s27 + $0xf0] ss:$8 sps:$4 sm:$0xff]  }
  0xf1   : > { %v6625_v0 = vld [vmem:[%s7753_s27 + $0x294] ss:$8 sps:$4 sm:$0xff]  }
  0xf2   : > { %767 = vmatpush1.bf16.msra.mxu1 %v6507_v7  ;;  %v2825_v7 = vor.u32 %v2824_v1, %v2821_v22  ;;  %v6628_v22 = vld [vmem:[%s7753_s27 + $0xa94] ss:$8 sps:$4 sm:$0xff]   ;;  %v6623_v1 = vld [vmem:[%s7753_s27 + $0x290] ss:$8 sps:$4 sm:$0xff]  }
  0xf3   : > { %3021 = vmatpush1.bf16.msra.mxu0 %v6510_v8  ;;  %768 = vmatprep.subr.bf16.mxu1 %v6515_v9  ;;  %v6569_v8 = vld [vmem:[%s7753_s27 + $0x204] ss:$8 sps:$4 sm:$0xff]  }
  0xf4   : > { %3022 = vmatprep.subr.bf16.mxu0 %v6518_v10  ;;  %v6574_v9 = vld [vmem:[%s7753_s27 + $0xa04] ss:$8 sps:$4 sm:$0xff]   ;;  %v6567_v10 = vld [vmem:[%s7753_s27 + $0x200] ss:$8 sps:$4 sm:$0xff]  }
  0xf6   : > { %769 = vmatpush1.bf16.msra.mxu1 %v6513_v61  ;;  %v2826_v61 = vsel %vm2809_vm2, %v2817_v6, %v2825_v7  ;;  %v6632_v6 = vld [vmem:[%s7753_s27 + $0xaa0] ss:$8 sps:$4 sm:$0xff]  }
  0xf7   : > { %3023 = vmatpush1.bf16.msra.mxu0 %v6516_v16  ;;  %770 = vmatprep.subr.bf16.mxu1 %v6521_v17  ;;  %v6577_v16 = vld [vmem:[%s7753_s27 + $0x214] ss:$8 sps:$4 sm:$0xff]  }
  0xf8   : > { %3024 = vmatprep.subr.bf16.mxu0 %v6524_v20  ;;  %v6580_v17 = vld [vmem:[%s7753_s27 + $0xa14] ss:$8 sps:$4 sm:$0xff]   ;;  %v6578_v20 = vld [vmem:[%s7753_s27 + $0xa10] ss:$8 sps:$4 sm:$0xff]  }
  0xfa   : > { %771 = vmatpush1.bf16.msra.mxu1 %v6519_v25  ;;  %v7988_v25 = vld [vmem:[%s7764_s11 + $0x8] sm:$0x88] }
  0xfb   : > { %3025 = vmatpush1.bf16.msra.mxu0 %v6522_v26  ;;  %772 = vmatprep.subr.bf16.mxu1 %v6527_v28  ;;  %v6581_v26 = vld [vmem:[%s7753_s27 + $0x220] ss:$8 sps:$4 sm:$0xff]   ;;  %v5112_v28 = vcombine.low %v259_v14, %v259_v14  ;;  %v5715_v30 = vcombine.high %v7988_v25, %v7831_v55  ;;  %v6643_v14 = vld [vmem:[%s7753_s27 + $0x2c4] ss:$8 sps:$4 sm:$0xff]  }
  0xfc   : > { %3026 = vmatprep.subr.bf16.mxu0 %v6530_v29  ;;  %v849_v29 = vrot.slane %v7828_v54, 1  ;;  %v6691_v54 = vld [vmem:[%s7753_s27 + $0x334] ss:$8 sps:$4 sm:$0xff]  }
  0xfe   : > { %773 = vmatpush1.bf16.msra.mxu1 %v6525_v31  ;;  %v3108_v31 = vrot.slane %v7916_v12, 3  ;;  %v6694_v12 = vld [vmem:[%s7753_s27 + $0xb34] ss:$8 sps:$4 sm:$0xff]  }
  0xff   : > { %3027 = vmatpush1.bf16.msra.mxu0 %v6528_v32  ;;  %774 = vmatprep.subr.bf16.mxu1 %v6533_v33  ;;  %v6589_v32 = vld [vmem:[%s7753_s27 + $0x234] ss:$8 sps:$4 sm:$0xff]  }
 0x100   : > { %3028 = vmatprep.subr.bf16.mxu0 %v6536_v34  ;;  %v6592_v33 = vld [vmem:[%s7753_s27 + $0xa34] ss:$8 sps:$4 sm:$0xff]   ;;  %v3107_v34 = vrot.slane %v5715_v30, 3 }
 0x101   : > { %v6663_v30 = vld [vmem:[%s7753_s27 + $0x2f4] ss:$8 sps:$4 sm:$0xff]  }
 0x102   : > { %775 = vmatpush1.bf16.msra.mxu1 %v6531_v35  ;;  %v3109_v35 = vsel %vm1412_vm4, %v3107_v34, %v3108_v31  ;;  %v7186_v34 = vld [vmem:[%s7764_s11 + $0x10] sm:$0xff] }
 0x103   : > { %3029 = vmatpush1.bf16.msra.mxu0 %v6534_v36  ;;  %776 = vmatprep.subr.bf16.mxu1 %v6539_v37  ;;  %v6587_v36 = vld [vmem:[%s7753_s27 + $0x230] ss:$8 sps:$4 sm:$0xff]  }
 0x104   : > { %3030 = vmatprep.subr.bf16.mxu0 %v6542_v38  ;;  %v6590_v37 = vld [vmem:[%s7753_s27 + $0xa30] ss:$8 sps:$4 sm:$0xff]   ;;  %v6595_v38 = vld [vmem:[%s7753_s27 + $0x244] ss:$8 sps:$4 sm:$0xff]  }
 0x106   : > { %777 = vmatpush1.bf16.msra.mxu1 %v6537_v39  ;;  %v6598_v39 = vld [vmem:[%s7753_s27 + $0xa44] ss:$8 sps:$4 sm:$0xff]  }
 0x107   : > { %3031 = vmatpush1.bf16.msra.mxu0 %v6540_v40  ;;  %778 = vmatprep.subr.bf16.mxu1 %v6545_v41  ;;  %v6593_v40 = vld [vmem:[%s7753_s27 + $0x240] ss:$8 sps:$4 sm:$0xff]  }
 0x108   : > { %3032 = vmatprep.subr.bf16.mxu0 %v6548_v42  ;;  %v6596_v41 = vld [vmem:[%s7753_s27 + $0xa40] ss:$8 sps:$4 sm:$0xff]   ;;  %v6601_v42 = vld [vmem:[%s7753_s27 + $0x254] ss:$8 sps:$4 sm:$0xff]  }
 0x10a   : > { %779 = vmatpush1.bf16.msra.mxu1 %v6543_v43  ;;  %v6604_v43 = vld [vmem:[%s7753_s27 + $0xa54] ss:$8 sps:$4 sm:$0xff]  }
 0x10b   : > { %3033 = vmatpush1.bf16.msra.mxu0 %v6546_v44  ;;  %780 = vmatprep.subr.bf16.mxu1 %v6551_v46  ;;  %v6599_v44 = vld [vmem:[%s7753_s27 + $0x250] ss:$8 sps:$4 sm:$0xff]  }
 0x10c   : > { %3034 = vmatprep.subr.bf16.mxu0 %v6554_v47  ;;  %v6602_v46 = vld [vmem:[%s7753_s27 + $0xa50] ss:$8 sps:$4 sm:$0xff]   ;;  %v6607_v47 = vld [vmem:[%s7753_s27 + $0x264] ss:$8 sps:$4 sm:$0xff]  }
 0x10e   : > { %781 = vmatpush1.bf16.msra.mxu1 %v6549_v48  ;;  %v6610_v48 = vld [vmem:[%s7753_s27 + $0xa64] ss:$8 sps:$4 sm:$0xff]  }
 0x10f   : > { %3035 = vmatpush1.bf16.msra.mxu0 %v6552_v51  ;;  %782 = vmatprep.subr.bf16.mxu1 %v6557_v58  ;;  %v6608_v51 = vld [vmem:[%s7753_s27 + $0xa60] ss:$8 sps:$4 sm:$0xff]   ;;  %v6614_v58 = vld [vmem:[%s7753_s27 + $0xa70] ss:$8 sps:$4 sm:$0xff]  }
 0x110   : > { %3036 = vmatprep.subr.bf16.mxu0 %v6560_v59  ;;  %v6619_v59 = vld [vmem:[%s7753_s27 + $0x284] ss:$8 sps:$4 sm:$0xff]  }
 0x112   : > { %783 = vmatpush1.bf16.msra.mxu1 %v6555_v60  ;;  %v6622_v60 = vld [vmem:[%s7753_s27 + $0xa84] ss:$8 sps:$4 sm:$0xff]  }
 0x113   : > { %3037 = vmatpush1.bf16.msra.mxu0 %v6558_v63  ;;  %784 = vmatprep.subr.bf16.mxu1 %v6563_v2  ;;  %v6620_v63 = vld [vmem:[%s7753_s27 + $0xa80] ss:$8 sps:$4 sm:$0xff]   ;;  %v6626_v2 = vld [vmem:[%s7753_s27 + $0xa90] ss:$8 sps:$4 sm:$0xff]  }
 0x114   : > { %3038 = vmatprep.subr.bf16.mxu0 %v6566_v53  ;;  %v6631_v53 = vld [vmem:[%s7753_s27 + $0x2a4] ss:$8 sps:$4 sm:$0xff]  }
 0x116   : > { %785 = vmatpush1.bf16.msra.mxu1 %v6561_v3  ;;  %v6634_v3 = vld [vmem:[%s7753_s27 + $0xaa4] ss:$8 sps:$4 sm:$0xff]  }
 0x117   : > { %3039 = vmatpush1.bf16.msra.mxu0 %v6564_v5  ;;  %1015 = vmatprep.subr.bf16.mxu1 %v6569_v8  ;;  %v6629_v5 = vld [vmem:[%s7753_s27 + $0x2a0] ss:$8 sps:$4 sm:$0xff]   ;;  %v6640_v8 = vld [vmem:[%s7753_s27 + $0xab4] ss:$8 sps:$4 sm:$0xff]  }
 0x118   : > { %3274 = vmatprep.subr.bf16.mxu0 %v6574_v9  ;;  %v6635_v9 = vld [vmem:[%s7753_s27 + $0x2b0] ss:$8 sps:$4 sm:$0xff]  }
 0x119   : > { %787 = vmatmul.mubr.bf16.vlgmr.msra.gmra.mrb[0].mxu1 %v7845_v4  ;;  %v7985_v4 = vcombine.high %v7980_v24, %v7820_v49 }
 0x11a   : > { %3041 = vmatmul.mubr.bf16.vlgmr.msra.gmra.mrb[0].mxu0 %v2826_v61  ;;  %1016 = vmatpush1.bf16.msra.mxu1 %v6567_v10  ;;  %v6638_v10 = vld [vmem:[%s7753_s27 + $0xab0] ss:$8 sps:$4 sm:$0xff]   ;;  %v6641_v61 = vld [vmem:[%s7753_s27 + $0x2c0] ss:$8 sps:$4 sm:$0xff]  }
 0x11b   : > { %3275 = vmatpush1.bf16.msra.mxu0 %v6572_v15  ;;  %1017 = vmatprep.subr.bf16.mxu1 %v6577_v16  ;;  %v848_v49 = vrot.slane %v7985_v4, 1  ;;  %v6646_v15 = vld [vmem:[%s7753_s27 + $0xac4] ss:$8 sps:$4 sm:$0xff]   ;;  %v6644_v16 = vld [vmem:[%s7753_s27 + $0xac0] ss:$8 sps:$4 sm:$0xff]  }
 0x11c   : > { %3276 = vmatprep.subr.bf16.mxu0 %v6580_v17  ;;  %796 = vmatprep.mubr.bf16.mxu1 %v5113_v18  ;;  %v6649_v17 = vld [vmem:[%s7753_s27 + $0x2d4] ss:$8 sps:$4 sm:$0xff]  }
 0x11d   : > { %3050 = vmatprep.mubr.bf16.mxu0 %v7926_v27  ;;  %v6584_v27 = vld [vmem:[%s7753_s27 + $0xa20] ss:$8 sps:$4 sm:$0xff]   ;;  %v850_v55 = vsel %vm844_vm3, %v848_v49, %v849_v29  ;;  %v6652_v18 = vld [vmem:[%s7753_s27 + $0xad4] ss:$8 sps:$4 sm:$0xff]  }
 0x11e   : > { %1018 = vmatpush1.bf16.msra.mxu1 %v6575_v19  ;;  %v6647_v19 = vld [vmem:[%s7753_s27 + $0x2d0] ss:$8 sps:$4 sm:$0xff]  }
 0x11f   : > { %3277 = vmatpush1.bf16.msra.mxu0 %v6578_v20  ;;  %1019 = vmatprep.subr.bf16.mxu1 %v6583_v21  ;;  %v6650_v20 = vld [vmem:[%s7753_s27 + $0xad0] ss:$8 sps:$4 sm:$0xff]   ;;  %v6656_v21 = vld [vmem:[%s7753_s27 + $0x2e4] ss:$8 sps:$4 sm:$0xff]  }
 0x120   : > { %3278 = vmatprep.subr.bf16.mxu0 %v6586_v23  ;;  %v6659_v23 = vld [vmem:[%s7753_s27 + $0xae4] ss:$8 sps:$4 sm:$0xff]  }
 0x121   : > { %797 = vmatmul.mubr.bf16.gmra.mrb[4].mxu1 %v5112_v28  ;;  %v6657_v28 = vld [vmem:[%s7753_s27 + $0xae0] ss:$8 sps:$4 sm:$0xff]  }
 0x122   : > { %3051 = vmatmul.mubr.bf16.gmra.mrb[4].mxu0 %v2825_v7  ;;  %1020 = vmatpush1.bf16.msra.mxu1 %v6581_v26  ;;  %v6637_v7 = vld [vmem:[%s7753_s27 + $0x2b4] ss:$8 sps:$4 sm:$0xff]   ;;  %v6654_v26 = vld [vmem:[%s7753_s27 + $0x2e0] ss:$8 sps:$4 sm:$0xff]  }
 0x123   : > { %3279 = vmatpush1.bf16.msra.mxu0 %v6584_v27  ;;  %1021 = vmatprep.subr.bf16.mxu1 %v6589_v32  ;;  %v8053_v27 = vld [vmem:[%s7764_s11 + $0x10] sm:$0x77]  ;;  %v8056_v49 = vld [vmem:[%s7764_s11 + $0x8] sm:$0x88] }
 0x124   : > { %3280 = vmatprep.subr.bf16.mxu0 %v6592_v33  ;;  %1047 = vmatprep.mubr.bf16.mxu1 %v850_v55  ;;  %v8059_v32 = vld [vmem:[%s7764_s11 + $0x8] sm:$0xff]  ;;  %v5714_v55 = vcombine.low %v7988_v25, %v7186_v34 }
 0x125   : > { %3306 = vmatprep.mubr.bf16.mxu0 %v3109_v35  ;;  %v8063_v33 = vcombine.low %v7980_v24, %v8059_v32  ;;  %v8068_v35 = vld [vmem:[%s7764_s11 + $0x10] sm:$0xff]  ;;  %v846_v24 = vrot.slane %v7856_v13, 1 }
 0x126   : > { %1022 = vmatpush1.bf16.msra.mxu1 %v6587_v36  ;;  %v8071_v36 = vld [vmem:[%s7764_s11 + $0x20] sm:$0x11]  ;;  %v5781_v25 = vcombine.high %v8056_v49, %v8068_v35 }
 0x127   : > { %3281 = vmatpush1.bf16.msra.mxu0 %v6590_v37  ;;  %1023 = vmatprep.subr.bf16.mxu1 %v6595_v38  ;;  %v6666_v37 = vld [vmem:[%s7753_s27 + $0xaf4] ss:$8 sps:$4 sm:$0xff]   ;;  %v5245_v38 = vcombine.high %v8053_v27, %v8053_v27  ;;  %v6697_v13 = vld [vmem:[%s7753_s27 + $0x344] ss:$8 sps:$4 sm:$0xff]   ;;  %v6701_v34 = vld [vmem:[%s7753_s27 + $0x350] ss:$8 sps:$4 sm:$0xff]  }
 0x128   : > { %3282 = vmatprep.subr.bf16.mxu0 %v6598_v39  ;;  %v6661_v39 = vld [vmem:[%s7753_s27 + $0x2f0] ss:$8 sps:$4 sm:$0xff]  }
 0x12a   : > { %1024 = vmatpush1.bf16.msra.mxu1 %v6593_v40  ;;  %v3105_v40 = vrot.slane %v7948_v45, 3  ;;  %v6695_v45 = vld [vmem:[%s7753_s27 + $0x340] ss:$8 sps:$4 sm:$0xff]  }
 0x12b   : > { %3283 = vmatpush1.bf16.msra.mxu0 %v6596_v41  ;;  %1025 = vmatprep.subr.bf16.mxu1 %v6601_v42  ;;  %v5783_v41 = vcombine.high %v7912_v11, %v8071_v36  ;;  %v6664_v42 = vld [vmem:[%s7753_s27 + $0xaf0] ss:$8 sps:$4 sm:$0xff]   ;;  %v1138_v11 = vshrl.u32 %v5245_v38, 16 }
 0x12c   : > { %3284 = vmatprep.subr.bf16.mxu0 %v6604_v43  ;;  %v3104_v43 = vrot.slane %v5714_v55, 3  ;;  %v6704_v55 = vld [vmem:[%s7753_s27 + $0xb50] ss:$8 sps:$4 sm:$0xff]  }
 0x12e   : > { %1026 = vmatpush1.bf16.msra.mxu1 %v6599_v44  ;;  %v845_v44 = vrot.slane %v8063_v33, 1 }
 0x12f   : > { %3285 = vmatpush1.bf16.msra.mxu0 %v6602_v46  ;;  %1027 = vmatprep.subr.bf16.mxu1 %v6607_v47  ;;  %v6671_v46 = vld [vmem:[%s7753_s27 + $0x304] ss:$8 sps:$4 sm:$0xff]  }
 0x130   : > { %3286 = vmatprep.subr.bf16.mxu0 %v6610_v48  ;;  %v6676_v47 = vld [vmem:[%s7753_s27 + $0xb04] ss:$8 sps:$4 sm:$0xff]   ;;  %v6669_v48 = vld [vmem:[%s7753_s27 + $0x300] ss:$8 sps:$4 sm:$0xff]  }
 0x132   : > { %1028 = vmatpush1.bf16.msra.mxu1 %v6605_v50  ;;  %v1130_v50 = vshrl.u32 %v7985_v4, 16 }
 0x133   : > { %3287 = vmatpush1.bf16.msra.mxu0 %v6608_v51  ;;  %1029 = vmatprep.subr.bf16.mxu1 %v6613_v52  ;;  %v1133_v51 = vshll.u32 %v7985_v4, 16  ;;  %v1141_v52 = vshll.u32 %v5245_v38, 16  ;;  %v6679_v4 = vld [vmem:[%s7753_s27 + $0x314] ss:$8 sps:$4 sm:$0xff]   ;;  %v6712_v38 = vld [vmem:[%s7753_s27 + $0xb64] ss:$8 sps:$4 sm:$0xff]  }
 0x134   : > { %3288 = vmatprep.subr.bf16.mxu0 %v6616_v56  ;;  %v3402_v56 = vshrl.u32 %v5781_v25, 16 }
 0x136   : > { %1030 = vmatpush1.bf16.msra.mxu1 %v6611_v57  ;;  %v3405_v57 = vshll.u32 %v5781_v25, 16  ;;  %v6718_v25 = vld [vmem:[%s7753_s27 + $0xb74] ss:$8 sps:$4 sm:$0xff]  }
 0x137   : > { %3289 = vmatpush1.bf16.msra.mxu0 %v6614_v58  ;;  %1031 = vmatprep.subr.bf16.mxu1 %v6619_v59  ;;  %v3410_v58 = vshrl.u32 %v5783_v41, 16  ;;  %v3413_v59 = vshll.u32 %v5783_v41, 16  ;;  %v6713_v41 = vld [vmem:[%s7753_s27 + $0x370] ss:$8 sps:$4 sm:$0xff]  }
 0x138   : > { %3290 = vmatprep.subr.bf16.mxu0 %v6622_v60  ;;  %v6674_v60 = vld [vmem:[%s7753_s27 + $0xb00] ss:$8 sps:$4 sm:$0xff]  }
 0x13a   : > { %1032 = vmatpush1.bf16.msra.mxu1 %v6617_v62  ;;  %v847_v62 = vsel %vm844_vm3, %v845_v44, %v846_v24  ;;  %v6724_v44 = vld [vmem:[%s7753_s27 + $0xb84] ss:$8 sps:$4 sm:$0xff]  }
 0x13b   : > { %3291 = vmatpush1.bf16.msra.mxu0 %v6620_v63  ;;  %1033 = vmatprep.subr.bf16.mxu1 %v6625_v0  ;;  %v3106_v63 = vsel %vm1412_vm4, %v3104_v43, %v3105_v40  ;;  %v6682_v0 = vld [vmem:[%s7753_s27 + $0xb14] ss:$8 sps:$4 sm:$0xff]   ;;  %v6721_v43 = vld [vmem:[%s7753_s27 + $0x384] ss:$8 sps:$4 sm:$0xff]  }
 0x13c   : > { %3292 = vmatprep.subr.bf16.mxu0 %v6628_v22  ;;  %v6677_v22 = vld [vmem:[%s7753_s27 + $0x310] ss:$8 sps:$4 sm:$0xff]  }
 0x13e   : > { %1034 = vmatpush1.bf16.msra.mxu1 %v6623_v1  ;;  %v1132_v1 = vrot.slane %v1130_v50, 1  ;;  %v6730_v50 = vld [vmem:[%s7753_s27 + $0xb94] ss:$8 sps:$4 sm:$0xff]  }
 0x13f   : > { %3293 = vmatpush1.bf16.msra.mxu0 %v6626_v2  ;;  %1035 = vmatprep.subr.bf16.mxu1 %v6631_v53  ;;  %v1135_v2 = vrot.slane %v1133_v51, 2  ;;  %v1140_v53 = vrot.slane %v1138_v11, 1  ;;  %v6725_v51 = vld [vmem:[%s7753_s27 + $0x390] ss:$8 sps:$4 sm:$0xff]  }
 0x140   : > { %3294 = vmatprep.subr.bf16.mxu0 %v6634_v3  ;;  %v1143_v3 = vrot.slane %v1141_v52, 2  ;;  %v6728_v11 = vld [vmem:[%s7753_s27 + $0xb90] ss:$8 sps:$4 sm:$0xff]   ;;  %v6733_v52 = vld [vmem:[%s7753_s27 + $0x3a4] ss:$8 sps:$4 sm:$0xff]  }
 0x142   : > { %1036 = vmatpush1.bf16.msra.mxu1 %v6629_v5  ;;  %v3404_v5 = vrot.slane %v3402_v56, 3  ;;  %v6736_v56 = vld [vmem:[%s7753_s27 + $0xba4] ss:$8 sps:$4 sm:$0xff]  }
 0x143   : > { %3295 = vmatpush1.bf16.msra.mxu0 %v6632_v6  ;;  %1037 = vmatprep.subr.bf16.mxu1 %v6637_v7  ;;  %v3407_v6 = vrot.slane %v3405_v57, 4  ;;  %v3412_v7 = vrot.slane %v3410_v58, 3  ;;  %v6731_v57 = vld [vmem:[%s7753_s27 + $0x3a0] ss:$8 sps:$4 sm:$0xff]  }
 0x144   : > { %3296 = vmatprep.subr.bf16.mxu0 %v6640_v8  ;;  %v3415_v8 = vrot.slane %v3413_v59, 4  ;;  %v6734_v58 = vld [vmem:[%s7753_s27 + $0xba0] ss:$8 sps:$4 sm:$0xff]   ;;  %v6739_v59 = vld [vmem:[%s7753_s27 + $0x3b4] ss:$8 sps:$4 sm:$0xff]  }
 0x146   : > { %1038 = vmatpush1.bf16.msra.mxu1 %v6635_v9  ;;  %v6680_v9 = vld [vmem:[%s7753_s27 + $0xb10] ss:$8 sps:$4 sm:$0xff]  }
 0x147   : > { %3297 = vmatpush1.bf16.msra.mxu0 %v6638_v10  ;;  %1039 = vmatprep.subr.bf16.mxu1 %v6643_v14  ;;  %v6685_v10 = vld [vmem:[%s7753_s27 + $0x324] ss:$8 sps:$4 sm:$0xff]  }
 0x148   : > { %3298 = vmatprep.subr.bf16.mxu0 %v6646_v15  ;;  %v6688_v14 = vld [vmem:[%s7753_s27 + $0xb24] ss:$8 sps:$4 sm:$0xff]   ;;  %v6683_v15 = vld [vmem:[%s7753_s27 + $0x320] ss:$8 sps:$4 sm:$0xff]  }
 0x14a   : > { %1040 = vmatpush1.bf16.msra.mxu1 %v6641_v61  ;;  %v1136_v61 = vor.u32 %v1135_v2, %v1132_v1  ;;  %v5244_v1 = vcombine.low %v8053_v27, %v8053_v27  ;;  %v6746_v2 = vld [vmem:[%s7753_s27 + $0xbc0] ss:$8 sps:$4 sm:$0xff]   ;;  %v1113_v27 = vshrl.u32 %v8063_v33, 16 }
 0x14b   : > { %3299 = vmatpush1.bf16.msra.mxu0 %v6644_v16  ;;  %1041 = vmatprep.subr.bf16.mxu1 %v6649_v17  ;;  %v8108_v16 = vor.u32 %v1143_v3, %v1140_v53  ;;  %v3408_v17 = vor.u32 %v3407_v6, %v3404_v5  ;;  %v5780_v53 = vcombine.low %v8056_v49, %v8068_v35  ;;  %v8166_v3 = vld [vmem:[%s7764_s11 + $0x18] sm:$0xff] }
 0x14c   : > { %3300 = vmatprep.subr.bf16.mxu0 %v6652_v18  ;;  %v8110_v18 = vor.u32 %v3415_v8, %v3412_v7  ;;  %v5782_v5 = vcombine.low %v8166_v3, %v8071_v36  ;;  %v6751_v6 = vld [vmem:[%s7753_s27 + $0x3d4] ss:$8 sps:$4 sm:$0xff]   ;;  %v6749_v8 = vld [vmem:[%s7753_s27 + $0x3d0] ss:$8 sps:$4 sm:$0xff]   ;;  %v1121_v49 = vshrl.u32 %v5244_v1, 16 }
 0x14d   : > { %v6754_v7 = vld [vmem:[%s7753_s27 + $0xbd4] ss:$8 sps:$4 sm:$0xff]   ;;  %v3388_v36 = vshll.u32 %v5780_v53, 16 }
 0x14e   : > { %1042 = vmatpush1.bf16.msra.mxu1 %v6647_v19  ;;  %v6686_v19 = vld [vmem:[%s7753_s27 + $0xb20] ss:$8 sps:$4 sm:$0xff]  }
 0x14f   : > { %3301 = vmatpush1.bf16.msra.mxu0 %v6650_v20  ;;  %1043 = vmatprep.subr.bf16.mxu1 %v6656_v21  ;;  %v3417_v20 = vsel %vm1693_vm6, %v3408_v17, %v8110_v18  ;;  %v6692_v21 = vld [vmem:[%s7753_s27 + $0xb30] ss:$8 sps:$4 sm:$0xff]   ;;  %v3396_v17 = vshll.u32 %v5782_v5, 16 }
 0x150   : > { %3302 = vmatprep.subr.bf16.mxu0 %v6659_v23  ;;  %v6700_v23 = vld [vmem:[%s7753_s27 + $0xb44] ss:$8 sps:$4 sm:$0xff]  }
 0x152   : > { %1044 = vmatpush1.bf16.msra.mxu1 %v6654_v26  ;;  %v6698_v26 = vld [vmem:[%s7753_s27 + $0xb40] ss:$8 sps:$4 sm:$0xff]  }
 0x153   : > { %3303 = vmatpush1.bf16.msra.mxu0 %v6657_v28  ;;  %1045 = vmatprep.subr.bf16.mxu1 %v6663_v30  ;;  %v6703_v28 = vld [vmem:[%s7753_s27 + $0x354] ss:$8 sps:$4 sm:$0xff]  }
 0x154   : > { %3304 = vmatprep.subr.bf16.mxu0 %v6666_v37  ;;  %v6706_v30 = vld [vmem:[%s7753_s27 + $0xb54] ss:$8 sps:$4 sm:$0xff]   ;;  %v6709_v37 = vld [vmem:[%s7753_s27 + $0x364] ss:$8 sps:$4 sm:$0xff]  }
 0x156   : > { %1046 = vmatpush1.bf16.msra.mxu1 %v6661_v39  ;;  %v6707_v39 = vld [vmem:[%s7753_s27 + $0x360] ss:$8 sps:$4 sm:$0xff]  }
 0x157   : > { %3305 = vmatpush1.bf16.msra.mxu0 %v6664_v42  ;;  %1310 = vmatprep.subr.bf16.mxu1 %v6671_v46  ;;  %v6716_v42 = vld [vmem:[%s7753_s27 + $0xb70] ss:$8 sps:$4 sm:$0xff]   ;;  %v6719_v46 = vld [vmem:[%s7753_s27 + $0x380] ss:$8 sps:$4 sm:$0xff]  }
 0x158   : > { %3582 = vmatprep.subr.bf16.mxu0 %v6676_v47  ;;  %v6722_v47 = vld [vmem:[%s7753_s27 + $0xb80] ss:$8 sps:$4 sm:$0xff]  }
 0x159   : > { %1048 = vmatmul.mubr.bf16.vlgmr.msra.gmra.mrb[0].mxu1 %v847_v62  ;;  %v6737_v62 = vld [vmem:[%s7753_s27 + $0x3b0] ss:$8 sps:$4 sm:$0xff]  }
 0x15a   : > { %3307 = vmatmul.mubr.bf16.vlgmr.msra.gmra.mrb[0].mxu0 %v3106_v63  ;;  %1311 = vmatpush1.bf16.msra.mxu1 %v6669_v48  ;;  %v6727_v48 = vld [vmem:[%s7753_s27 + $0x394] ss:$8 sps:$4 sm:$0xff]   ;;  %v6740_v63 = vld [vmem:[%s7753_s27 + $0xbb0] ss:$8 sps:$4 sm:$0xff]  }
 0x15b   : > { %3583 = vmatpush1.bf16.msra.mxu0 %v6674_v60  ;;  %1312 = vmatprep.subr.bf16.mxu1 %v6679_v4  ;;  %v6742_v60 = vld [vmem:[%s7753_s27 + $0xbb4] ss:$8 sps:$4 sm:$0xff]   ;;  %v6745_v4 = vld [vmem:[%s7753_s27 + $0x3c4] ss:$8 sps:$4 sm:$0xff]  }
 0x15c   : > { %3584 = vmatprep.subr.bf16.mxu0 %v6682_v0  ;;  %1057 = vmatprep.mubr.bf16.mxu1 %v849_v29  ;;  %v6689_v29 = vld [vmem:[%s7753_s27 + $0x330] ss:$8 sps:$4 sm:$0xff]   ;;  %v6748_v0 = vld [vmem:[%s7753_s27 + $0xbc4] ss:$8 sps:$4 sm:$0xff]  }
 0x15d   : > { %3316 = vmatprep.mubr.bf16.mxu0 %v3108_v31  ;;  %v1145_v31 = vsel %vm1111_vm5, %v1136_v61, %v8108_v16  ;;  %v3393_v61 = vshrl.u32 %v5782_v5, 16  ;;  %v6794_v5 = vld [vmem:[%s7753_s27 + $0xc30] ss:$8 sps:$4 sm:$0xff]  }
 0x15e   : > { %1313 = vmatpush1.bf16.msra.mxu1 %v6677_v22  ;;  %v6743_v22 = vld [vmem:[%s7753_s27 + $0x3c0] ss:$8 sps:$4 sm:$0xff]  }
 0x15f   : > { %3585 = vmatpush1.bf16.msra.mxu0 %v6680_v9  ;;  %1314 = vmatprep.subr.bf16.mxu1 %v6685_v10  ;;  %v1116_v9 = vshll.u32 %v8063_v33, 16  ;;  %v6752_v10 = vld [vmem:[%s7753_s27 + $0xbd0] ss:$8 sps:$4 sm:$0xff]  }
 0x160   : > { %3586 = vmatprep.subr.bf16.mxu0 %v6688_v14  ;;  %v1124_v14 = vshll.u32 %v5244_v1, 16  ;;  %v6793_v1 = vld [vmem:[%s7753_s27 + $0x434] ss:$8 sps:$4 sm:$0xff]  }
 0x161   : > { %1058 = vmatmul.mubr.bf16.gmra.mrb[4].mxu1 %v846_v24  ;;  %v6710_v24 = vld [vmem:[%s7753_s27 + $0xb60] ss:$8 sps:$4 sm:$0xff]   ;;  %v1118_v33 = vrot.slane %v1116_v9, 2  ;;  %v6805_v9 = vld [vmem:[%s7753_s27 + $0x454] ss:$8 sps:$4 sm:$0xff]  }
 0x162   : > { %3317 = vmatmul.mubr.bf16.gmra.mrb[4].mxu0 %v3105_v40  ;;  %1315 = vmatpush1.bf16.msra.mxu1 %v6683_v15  ;;  %v6715_v40 = vld [vmem:[%s7753_s27 + $0x374] ss:$8 sps:$4 sm:$0xff]   ;;  %v3385_v15 = vshrl.u32 %v5780_v53, 16 }
 0x163   : > { %3587 = vmatpush1.bf16.msra.mxu0 %v6686_v19  ;;  %1316 = vmatprep.subr.bf16.mxu1 %v6691_v54  ;;  %v6757_v19 = vld [vmem:[%s7753_s27 + $0x3e4] ss:$8 sps:$4 sm:$0xff]  }
 0x164   : > { %3588 = vmatprep.subr.bf16.mxu0 %v6694_v12  ;;  %1342 = vmatprep.mubr.bf16.mxu1 %v1145_v31  ;;  %v6760_v54 = vld [vmem:[%s7753_s27 + $0xbe4] ss:$8 sps:$4 sm:$0xff]   ;;  %v6755_v12 = vld [vmem:[%s7753_s27 + $0x3e0] ss:$8 sps:$4 sm:$0xff]  }
 0x165   : > { %3614 = vmatprep.mubr.bf16.mxu0 %v3417_v20  ;;  %v6758_v31 = vld [vmem:[%s7753_s27 + $0xbe0] ss:$8 sps:$4 sm:$0xff]   ;;  %v1123_v20 = vrot.slane %v1121_v49, 1  ;;  %v6803_v49 = vld [vmem:[%s7753_s27 + $0x450] ss:$8 sps:$4 sm:$0xff]  }
 0x166   : > { %1317 = vmatpush1.bf16.msra.mxu1 %v6689_v29  ;;  %v1115_v29 = vrot.slane %v1113_v27, 1  ;;  %v6800_v27 = vld [vmem:[%s7753_s27 + $0xc40] ss:$8 sps:$4 sm:$0xff]  }
 0x167   : > { %3589 = vmatpush1.bf16.msra.mxu0 %v6692_v21  ;;  %1318 = vmatprep.subr.bf16.mxu1 %v6697_v13  ;;  %v1126_v21 = vrot.slane %v1124_v14, 2  ;;  %v3387_v13 = vrot.slane %v3385_v15, 3  ;;  %v6806_v14 = vld [vmem:[%s7753_s27 + $0xc50] ss:$8 sps:$4 sm:$0xff]   ;;  %v6811_v15 = vld [vmem:[%s7753_s27 + $0x464] ss:$8 sps:$4 sm:$0xff]  }
 0x168   : > { %3590 = vmatprep.subr.bf16.mxu0 %v6700_v23  ;;  %v3390_v23 = vrot.slane %v3388_v36, 4  ;;  %v6814_v36 = vld [vmem:[%s7753_s27 + $0xc64] ss:$8 sps:$4 sm:$0xff]  }
 0x16a   : > { %1319 = vmatpush1.bf16.msra.mxu1 %v6695_v45  ;;  %v3395_v45 = vrot.slane %v3393_v61, 3  ;;  %v6809_v61 = vld [vmem:[%s7753_s27 + $0x460] ss:$8 sps:$4 sm:$0xff]  }
 0x16b   : > { %3591 = vmatpush1.bf16.msra.mxu0 %v6698_v26  ;;  %1320 = vmatprep.subr.bf16.mxu1 %v6703_v28  ;;  %v3398_v26 = vrot.slane %v3396_v17, 4  ;;  %v6763_v28 = vld [vmem:[%s7753_s27 + $0x3f4] ss:$8 sps:$4 sm:$0xff]   ;;  %v6812_v17 = vld [vmem:[%s7753_s27 + $0xc60] ss:$8 sps:$4 sm:$0xff]  }
 0x16c   : > { %3592 = vmatprep.subr.bf16.mxu0 %v6706_v30  ;;  %v6766_v30 = vld [vmem:[%s7753_s27 + $0xbf4] ss:$8 sps:$4 sm:$0xff]  }
 0x16e   : > { %1321 = vmatpush1.bf16.msra.mxu1 %v6701_v34  ;;  %v6761_v34 = vld [vmem:[%s7753_s27 + $0x3f0] ss:$8 sps:$4 sm:$0xff]  }
 0x16f   : > { %3593 = vmatpush1.bf16.msra.mxu0 %v6704_v55  ;;  %1322 = vmatprep.subr.bf16.mxu1 %v6709_v37  ;;  %v1119_v55 = vor.u32 %v1118_v33, %v1115_v29  ;;  %v6764_v37 = vld [vmem:[%s7753_s27 + $0xbf0] ss:$8 sps:$4 sm:$0xff]   ;;  %v6823_v33 = vld [vmem:[%s7753_s27 + $0x484] ss:$8 sps:$4 sm:$0xff]  }
 0x170   : > { %3594 = vmatprep.subr.bf16.mxu0 %v6712_v38  ;;  %v1127_v38 = vor.u32 %v1126_v21, %v1123_v20  ;;  %v6818_v29 = vld [vmem:[%s7753_s27 + $0xc70] ss:$8 sps:$4 sm:$0xff]   ;;  %v6821_v20 = vld [vmem:[%s7753_s27 + $0x480] ss:$8 sps:$4 sm:$0xff]  }
 0x171   : > { %v6824_v21 = vld [vmem:[%s7753_s27 + $0xc80] ss:$8 sps:$4 sm:$0xff]  }
 0x172   : > { %1323 = vmatpush1.bf16.msra.mxu1 %v6707_v39  ;;  %v3391_v39 = vor.u32 %v3390_v23, %v3387_v13  ;;  %v6829_v13 = vld [vmem:[%s7753_s27 + $0x494] ss:$8 sps:$4 sm:$0xff]  }
 0x173   : > { %3595 = vmatpush1.bf16.msra.mxu0 %v6710_v24  ;;  %1324 = vmatprep.subr.bf16.mxu1 %v6715_v40  ;;  %v3399_v24 = vor.u32 %v3398_v26, %v3395_v45  ;;  %v6771_v40 = vld [vmem:[%s7753_s27 + $0x404] ss:$8 sps:$4 sm:$0xff]   ;;  %v6832_v23 = vld [vmem:[%s7753_s27 + $0xc94] ss:$8 sps:$4 sm:$0xff]   ;;  %v6827_v45 = vld [vmem:[%s7753_s27 + $0x490] ss:$8 sps:$4 sm:$0xff]  }
 0x174   : > { %3596 = vmatprep.subr.bf16.mxu0 %v6718_v25  ;;  %v6778_v25 = vld [vmem:[%s7753_s27 + $0xc04] ss:$8 sps:$4 sm:$0xff]   ;;  %v6830_v26 = vld [vmem:[%s7753_s27 + $0xc90] ss:$8 sps:$4 sm:$0xff]  }
 0x176   : > { %1325 = vmatpush1.bf16.msra.mxu1 %v6713_v41  ;;  %v6769_v41 = vld [vmem:[%s7753_s27 + $0x400] ss:$8 sps:$4 sm:$0xff]  }
 0x177   : > { %3597 = vmatpush1.bf16.msra.mxu0 %v6716_v42  ;;  %1326 = vmatprep.subr.bf16.mxu1 %v6721_v43  ;;  %v6776_v42 = vld [vmem:[%s7753_s27 + $0xc00] ss:$8 sps:$4 sm:$0xff]  }
 0x178   : > { %3598 = vmatprep.subr.bf16.mxu0 %v6724_v44  ;;  %v8189_v43 = vld [vmem:[%s7764_s11] sm:$0x88]  ;;  %v8192_v44 = vld [vmem:[%s7764_s11 + $0x10] sm:$0xee] }
 0x17a   : > { %1327 = vmatpush1.bf16.msra.mxu1 %v6719_v46  ;;  %v1128_v46 = vsel %vm1111_vm5, %v1119_v55, %v1127_v38  ;;  %v6836_v55 = vld [vmem:[%s7753_s27 + $0xca0] ss:$8 sps:$4 sm:$0xff]  }
 0x17b   : > { %3599 = vmatpush1.bf16.msra.mxu0 %v6722_v47  ;;  %1328 = vmatprep.subr.bf16.mxu1 %v6727_v48  ;;  %v3400_v47 = vsel %vm1693_vm6, %v3391_v39, %v3399_v24  ;;  %v8197_v48 = vld [vmem:[%s7764_s11 + $0x20] sm:$0x33] }
 0x17c   : > { %3600 = vmatprep.subr.bf16.mxu0 %v6730_v50  ;;  %v6781_v50 = vld [vmem:[%s7753_s27 + $0x414] ss:$8 sps:$4 sm:$0xff]   ;;  %v6839_v39 = vld [vmem:[%s7753_s27 + $0x4b0] ss:$8 sps:$4 sm:$0xff]  }
 0x17e   : > { %1329 = vmatpush1.bf16.msra.mxu1 %v6725_v51  ;;  %v6784_v51 = vld [vmem:[%s7753_s27 + $0xc14] ss:$8 sps:$4 sm:$0xff]  }
 0x17f   : > { %3601 = vmatpush1.bf16.msra.mxu0 %v6728_v11  ;;  %1330 = vmatprep.subr.bf16.mxu1 %v6733_v52  ;;  %v5313_v11 = vcombine.high %v8068_v35, %v8068_v35  ;;  %v6779_v52 = vld [vmem:[%s7753_s27 + $0x410] ss:$8 sps:$4 sm:$0xff]   ;;  %v6787_v35 = vld [vmem:[%s7753_s27 + $0x424] ss:$8 sps:$4 sm:$0xff]  }
 0x180   : > { %3602 = vmatprep.subr.bf16.mxu0 %v6736_v56  ;;  %v5311_v56 = vcombine.high %v8189_v43, %v8059_v32 }
 0x182   : > { %1331 = vmatpush1.bf16.msra.mxu1 %v6731_v57  ;;  %v8208_v57 = vcombine.high %v8192_v44, %v8166_v3  ;;  %v1416_v32 = vrot.slane %v5311_v56, 3  ;;  %v8275_v56 = vld [vmem:[%s7764_s11] sm:$0x88] }
 0x183   : > { %3603 = vmatpush1.bf16.msra.mxu0 %v6734_v58  ;;  %1332 = vmatprep.subr.bf16.mxu1 %v6739_v59  ;;  %v5851_v58 = vcombine.high %v8197_v48, %v8197_v48  ;;  %v6782_v59 = vld [vmem:[%s7753_s27 + $0xc10] ss:$8 sps:$4 sm:$0xff]  }
 0x184   : > { %3604 = vmatprep.subr.bf16.mxu0 %v6742_v60  ;;  %v6790_v60 = vld [vmem:[%s7753_s27 + $0xc24] ss:$8 sps:$4 sm:$0xff]  }
 0x186   : > { %1333 = vmatpush1.bf16.msra.mxu1 %v6737_v62  ;;  %v6785_v62 = vld [vmem:[%s7753_s27 + $0x420] ss:$8 sps:$4 sm:$0xff]  }
 0x187   : > { %3605 = vmatpush1.bf16.msra.mxu0 %v6740_v63  ;;  %1334 = vmatprep.subr.bf16.mxu1 %v6745_v4  ;;  %v8218_v63 = vrot.slane %v5313_v11, 3  ;;  %v3687_v4 = vrot.slane %v8208_v57, 1  ;;  %v6859_v11 = vld [vmem:[%s7753_s27 + $0x4e4] ss:$8 sps:$4 sm:$0xff]  }
 0x188   : > { %3606 = vmatprep.subr.bf16.mxu0 %v6748_v0  ;;  %v8221_v0 = vrot.slane %v5851_v58, 1  ;;  %v8278_v58 = vld [vmem:[%s7764_s11 + $0x8] sm:$0xff] }
 0x18a   : > { %1335 = vmatpush1.bf16.msra.mxu1 %v6743_v22  ;;  %v6788_v22 = vld [vmem:[%s7753_s27 + $0xc20] ss:$8 sps:$4 sm:$0xff]   ;;  %v3689_v53 = vsel %vm844_vm3, %v3687_v4, %v8221_v0 }
 0x18b   : > { %3607 = vmatpush1.bf16.msra.mxu0 %v6746_v2  ;;  %1336 = vmatprep.subr.bf16.mxu1 %v6751_v6  ;;  %v6791_v2 = vld [vmem:[%s7753_s27 + $0x430] ss:$8 sps:$4 sm:$0xff]   ;;  %v6799_v6 = vld [vmem:[%s7753_s27 + $0x444] ss:$8 sps:$4 sm:$0xff]  }
 0x18c   : > { %3608 = vmatprep.subr.bf16.mxu0 %v6754_v7  ;;  %v6802_v7 = vld [vmem:[%s7753_s27 + $0xc44] ss:$8 sps:$4 sm:$0xff]  }
 0x18d   : > { %v7189_v4 = vld [vmem:[%s7764_s11 + $0x8] sm:$0xff] }
 0x18e   : > { %1337 = vmatpush1.bf16.msra.mxu1 %v6749_v8  ;;  %v6797_v8 = vld [vmem:[%s7753_s27 + $0x440] ss:$8 sps:$4 sm:$0xff]  }
 0x18f   : > { %3609 = vmatpush1.bf16.msra.mxu0 %v6752_v10  ;;  %1338 = vmatprep.subr.bf16.mxu1 %v6757_v19  ;;  %v6808_v10 = vld [vmem:[%s7753_s27 + $0xc54] ss:$8 sps:$4 sm:$0xff]  }
 0x190   : > { %3610 = vmatprep.subr.bf16.mxu0 %v6760_v54  ;;  %v6817_v19 = vld [vmem:[%s7753_s27 + $0x474] ss:$8 sps:$4 sm:$0xff]  }
 0x191   : > { %v6820_v54 = vld [vmem:[%s7753_s27 + $0xc74] ss:$8 sps:$4 sm:$0xff]  }
 0x192   : > { %1339 = vmatpush1.bf16.msra.mxu1 %v6755_v12  ;;  %v6815_v12 = vld [vmem:[%s7753_s27 + $0x470] ss:$8 sps:$4 sm:$0xff]  }
 0x193   : > { %3611 = vmatpush1.bf16.msra.mxu0 %v6758_v31  ;;  %1340 = vmatprep.subr.bf16.mxu1 %v6763_v28  ;;  %v6826_v31 = vld [vmem:[%s7753_s27 + $0xc84] ss:$8 sps:$4 sm:$0xff]  }
 0x194   : > { %3612 = vmatprep.subr.bf16.mxu0 %v6766_v30  ;;  %v6835_v28 = vld [vmem:[%s7753_s27 + $0x4a4] ss:$8 sps:$4 sm:$0xff]  }
 0x195   : > { %v6838_v30 = vld [vmem:[%s7753_s27 + $0xca4] ss:$8 sps:$4 sm:$0xff]  }
 0x196   : > { %1341 = vmatpush1.bf16.msra.mxu1 %v6761_v34  ;;  %v6833_v34 = vld [vmem:[%s7753_s27 + $0x4a0] ss:$8 sps:$4 sm:$0xff]  }
 0x197   : > { %3613 = vmatpush1.bf16.msra.mxu0 %v6764_v37  ;;  %1583 = vmatprep.subr.bf16.mxu1 %v6771_v40  ;;  %v6841_v37 = vld [vmem:[%s7753_s27 + $0x4b4] ss:$8 sps:$4 sm:$0xff]   ;;  %v6847_v40 = vld [vmem:[%s7753_s27 + $0x4c4] ss:$8 sps:$4 sm:$0xff]  }
 0x198   : > { %3854 = vmatprep.subr.bf16.mxu0 %v6778_v25  ;;  %v6850_v25 = vld [vmem:[%s7753_s27 + $0xcc4] ss:$8 sps:$4 sm:$0xff]  }
 0x199   : > { %1343 = vmatmul.mubr.bf16.vlgmr.msra.gmra.mrb[0].mxu1 %v1128_v46  ;;  %v6853_v46 = vld [vmem:[%s7753_s27 + $0x4d4] ss:$8 sps:$4 sm:$0xff]  }
 0x19a   : > { %3615 = vmatmul.mubr.bf16.vlgmr.msra.gmra.mrb[0].mxu0 %v3400_v47  ;;  %1584 = vmatpush1.bf16.msra.mxu1 %v6769_v41  ;;  %v6845_v41 = vld [vmem:[%s7753_s27 + $0x4c0] ss:$8 sps:$4 sm:$0xff]   ;;  %v6856_v47 = vld [vmem:[%s7753_s27 + $0xcd4] ss:$8 sps:$4 sm:$0xff]  }
 0x19b   : > { %3855 = vmatpush1.bf16.msra.mxu0 %v6776_v42  ;;  %1585 = vmatprep.subr.bf16.mxu1 %v6781_v50  ;;  %v6848_v42 = vld [vmem:[%s7753_s27 + $0xcc0] ss:$8 sps:$4 sm:$0xff]   ;;  %v6851_v50 = vld [vmem:[%s7753_s27 + $0x4d0] ss:$8 sps:$4 sm:$0xff]  }
 0x19c   : > { %3856 = vmatprep.subr.bf16.mxu0 %v6784_v51  ;;  %1352 = vmatprep.mubr.bf16.mxu1 %v8108_v16  ;;  %v6796_v16 = vld [vmem:[%s7753_s27 + $0xc34] ss:$8 sps:$4 sm:$0xff]   ;;  %v6854_v51 = vld [vmem:[%s7753_s27 + $0xcd0] ss:$8 sps:$4 sm:$0xff]  }
 0x19d   : > { %3624 = vmatprep.mubr.bf16.mxu0 %v8110_v18  ;;  %v1418_v18 = vsel %vm1412_vm4, %v1416_v32, %v8218_v63  ;;  %v6860_v32 = vld [vmem:[%s7753_s27 + $0xce0] ss:$8 sps:$4 sm:$0xff]  }
 0x19e   : > { %1586 = vmatpush1.bf16.msra.mxu1 %v6779_v52  ;;  %v6862_v52 = vld [vmem:[%s7753_s27 + $0xce4] ss:$8 sps:$4 sm:$0xff]  }
 0x19f   : > { %3857 = vmatpush1.bf16.msra.mxu0 %v6782_v59  ;;  %1587 = vmatprep.subr.bf16.mxu1 %v6787_v35  ;;  %v8281_v59 = vld [vmem:[%s7764_s11 + $0x18] sm:$0x11] }
 0x1a0   : > { %3858 = vmatprep.subr.bf16.mxu0 %v6790_v60  ;;  %v6857_v35 = vld [vmem:[%s7753_s27 + $0x4e0] ss:$8 sps:$4 sm:$0xff]  }
 0x1a1   : > { %1353 = vmatmul.mubr.bf16.gmra.mrb[4].mxu1 %v1127_v38  ;;  %v6844_v38 = vld [vmem:[%s7753_s27 + $0xcb4] ss:$8 sps:$4 sm:$0xff]  }
 0x1a2   : > { %3625 = vmatmul.mubr.bf16.gmra.mrb[4].mxu0 %v3399_v24  ;;  %1588 = vmatpush1.bf16.msra.mxu1 %v6785_v62  ;;  %v6842_v24 = vld [vmem:[%s7753_s27 + $0xcb0] ss:$8 sps:$4 sm:$0xff]  }
 0x1a3   : > { %3859 = vmatpush1.bf16.msra.mxu0 %v6788_v22  ;;  %1589 = vmatprep.subr.bf16.mxu1 %v6793_v1  ;;  %v7188_v60 = vld [vmem:[%s7764_s11 + $0x10] sm:$0xff]  ;;  %v5310_v22 = vcombine.low %v8189_v43, %v7189_v4  ;;  %v8290_v1 = vcombine.low %v8192_v44, %v8166_v3  ;;  %v5379_v43 = vcombine.high %v8275_v56, %v8278_v58 }
 0x1a4   : > { %3860 = vmatprep.subr.bf16.mxu0 %v6796_v16  ;;  %1615 = vmatprep.mubr.bf16.mxu1 %v1418_v18  ;;  %v5312_v62 = vcombine.low %v7188_v60, %v7188_v60  ;;  %v5850_v16 = vcombine.low %v8197_v48, %v8197_v48  ;;  %v6865_v18 = vld [vmem:[%s7753_s27 + $0x4f4] ss:$8 sps:$4 sm:$0xff]   ;;  %v6906_v60 = vld [vmem:[%s7753_s27 + $0xd44] ss:$8 sps:$4 sm:$0xff]  }
 0x1a5   : > { %3886 = vmatprep.mubr.bf16.mxu0 %v3689_v53  ;;  %v6868_v53 = vld [vmem:[%s7753_s27 + $0xcf4] ss:$8 sps:$4 sm:$0xff]  }
 0x1a6   : > { %1590 = vmatpush1.bf16.msra.mxu1 %v6791_v2  ;;  %v8295_v2 = vld [vmem:[%s7764_s11 + $0x20] sm:$0x77]  ;;  %v1414_v44 = vrot.slane %v5312_v62, 3 }
 0x1a7   : > { %3861 = vmatpush1.bf16.msra.mxu0 %v6794_v5  ;;  %1591 = vmatprep.subr.bf16.mxu1 %v6799_v6  ;;  %v6863_v5 = vld [vmem:[%s7753_s27 + $0x4f0] ss:$8 sps:$4 sm:$0xff]   ;;  %v8309_v48 = vcombine.high %v8295_v2, %v8295_v2  ;;  %v6901_v62 = vld [vmem:[%s7753_s27 + $0x540] ss:$8 sps:$4 sm:$0xff]   ;;  %v6909_v4 = vld [vmem:[%s7753_s27 + $0x554] ss:$8 sps:$4 sm:$0xff]  }
 0x1a8   : > { %3862 = vmatprep.subr.bf16.mxu0 %v6802_v7  ;;  %v8303_v6 = vld [vmem:[%s7764_s11 + $0x10] sm:$0xff] }
 0x1a9   : > { %v5381_v3 = vcombine.high %v8303_v6, %v8281_v59  ;;  %v6866_v7 = vld [vmem:[%s7753_s27 + $0xcf0] ss:$8 sps:$4 sm:$0xff]  }
 0x1aa   : > { %1592 = vmatpush1.bf16.msra.mxu1 %v6797_v8  ;;  %v1413_v8 = vrot.slane %v5310_v22, 3  ;;  %v6912_v22 = vld [vmem:[%s7753_s27 + $0xd54] ss:$8 sps:$4 sm:$0xff]  }
 0x1ab   : > { %3863 = vmatpush1.bf16.msra.mxu0 %v6800_v27  ;;  %1593 = vmatprep.subr.bf16.mxu1 %v6805_v9  ;;  %v3685_v27 = vrot.slane %v5850_v16, 1  ;;  %v3684_v9 = vrot.slane %v8290_v1, 1  ;;  %v6907_v16 = vld [vmem:[%s7753_s27 + $0x550] ss:$8 sps:$4 sm:$0xff]  }
 0x1ac   : > { %3864 = vmatprep.subr.bf16.mxu0 %v6808_v10  ;;  %v6875_v10 = vld [vmem:[%s7753_s27 + $0x504] ss:$8 sps:$4 sm:$0xff]  }
 0x1ae   : > { %1594 = vmatpush1.bf16.msra.mxu1 %v6803_v49  ;;  %v6882_v49 = vld [vmem:[%s7753_s27 + $0xd04] ss:$8 sps:$4 sm:$0xff]  }
 0x1af   : > { %3865 = vmatpush1.bf16.msra.mxu0 %v6806_v14  ;;  %1595 = vmatprep.subr.bf16.mxu1 %v6811_v15  ;;  %v3968_v14 = vshrl.u32 %v8208_v57, 16  ;;  %v3971_v15 = vshll.u32 %v8208_v57, 16  ;;  %v6885_v57 = vld [vmem:[%s7753_s27 + $0x514] ss:$8 sps:$4 sm:$0xff]  }
 0x1b0   : > { %3866 = vmatprep.subr.bf16.mxu0 %v6814_v36  ;;  %v1712_v36 = vshrl.u32 %v5379_v43, 16 }
 0x1b2   : > { %1596 = vmatpush1.bf16.msra.mxu1 %v6809_v61  ;;  %v1715_v61 = vshll.u32 %v5379_v43, 16  ;;  %v6913_v43 = vld [vmem:[%s7753_s27 + $0x560] ss:$8 sps:$4 sm:$0xff]  }
 0x1b3   : > { %3867 = vmatpush1.bf16.msra.mxu0 %v6812_v17  ;;  %1597 = vmatprep.subr.bf16.mxu1 %v6817_v19  ;;  %v1720_v17 = vshrl.u32 %v5381_v3, 16  ;;  %v1723_v19 = vshll.u32 %v5381_v3, 16  ;;  %v6916_v3 = vld [vmem:[%s7753_s27 + $0xd60] ss:$8 sps:$4 sm:$0xff]  }
 0x1b4   : > { %3868 = vmatprep.subr.bf16.mxu0 %v6820_v54  ;;  %v3976_v54 = vshrl.u32 %v8309_v48, 16 }
 0x1b6   : > { %1598 = vmatpush1.bf16.msra.mxu1 %v6815_v12  ;;  %v3979_v12 = vshll.u32 %v8309_v48, 16 }
 0x1b7   : > { %3869 = vmatpush1.bf16.msra.mxu0 %v6818_v29  ;;  %1599 = vmatprep.subr.bf16.mxu1 %v6823_v33  ;;  %v6873_v29 = vld [vmem:[%s7753_s27 + $0x500] ss:$8 sps:$4 sm:$0xff]  }
 0x1b8   : > { %3870 = vmatprep.subr.bf16.mxu0 %v6826_v31  ;;  %v6880_v33 = vld [vmem:[%s7753_s27 + $0xd00] ss:$8 sps:$4 sm:$0xff]   ;;  %v1415_v31 = vsel %vm1412_vm4, %v1413_v8, %v1414_v44  ;;  %v6919_v8 = vld [vmem:[%s7753_s27 + $0x570] ss:$8 sps:$4 sm:$0xff]  }
 0x1ba   : > { %1600 = vmatpush1.bf16.msra.mxu1 %v6821_v20  ;;  %v3686_v20 = vsel %vm844_vm3, %v3684_v9, %v3685_v27  ;;  %v6927_v9 = vld [vmem:[%s7753_s27 + $0x584] ss:$8 sps:$4 sm:$0xff]  }
 0x1bb   : > { %3871 = vmatpush1.bf16.msra.mxu0 %v6824_v21  ;;  %1601 = vmatprep.subr.bf16.mxu1 %v6829_v13  ;;  %v6888_v21 = vld [vmem:[%s7753_s27 + $0xd14] ss:$8 sps:$4 sm:$0xff]   ;;  %v3970_v13 = vrot.slane %v3968_v14, 1  ;;  %v6928_v14 = vld [vmem:[%s7753_s27 + $0xd80] ss:$8 sps:$4 sm:$0xff]  }
 0x1bc   : > { %3872 = vmatprep.subr.bf16.mxu0 %v6832_v23  ;;  %v3973_v23 = vrot.slane %v3971_v15, 2  ;;  %v6933_v15 = vld [vmem:[%s7753_s27 + $0x594] ss:$8 sps:$4 sm:$0xff]  }
 0x1be   : > { %1602 = vmatpush1.bf16.msra.mxu1 %v6827_v45  ;;  %v1714_v45 = vrot.slane %v1712_v36, 3  ;;  %v6936_v36 = vld [vmem:[%s7753_s27 + $0xd94] ss:$8 sps:$4 sm:$0xff]  }
 0x1bf   : > { %3873 = vmatpush1.bf16.msra.mxu0 %v6830_v26  ;;  %1603 = vmatprep.subr.bf16.mxu1 %v6835_v28  ;;  %v1717_v26 = vrot.slane %v1715_v61, 4  ;;  %v1722_v28 = vrot.slane %v1720_v17, 3  ;;  %v6931_v61 = vld [vmem:[%s7753_s27 + $0x590] ss:$8 sps:$4 sm:$0xff]  }
 0x1c0   : > { %3874 = vmatprep.subr.bf16.mxu0 %v6838_v30  ;;  %v1725_v30 = vrot.slane %v1723_v19, 4  ;;  %v6934_v17 = vld [vmem:[%s7753_s27 + $0xd90] ss:$8 sps:$4 sm:$0xff]   ;;  %v6939_v19 = vld [vmem:[%s7753_s27 + $0x5a4] ss:$8 sps:$4 sm:$0xff]  }
 0x1c2   : > { %1604 = vmatpush1.bf16.msra.mxu1 %v6833_v34  ;;  %v3978_v34 = vrot.slane %v3976_v54, 1  ;;  %v6942_v54 = vld [vmem:[%s7753_s27 + $0xda4] ss:$8 sps:$4 sm:$0xff]  }
 0x1c3   : > { %3875 = vmatpush1.bf16.msra.mxu0 %v6836_v55  ;;  %1605 = vmatprep.subr.bf16.mxu1 %v6841_v37  ;;  %v3981_v55 = vrot.slane %v3979_v12, 2  ;;  %v6883_v37 = vld [vmem:[%s7753_s27 + $0x510] ss:$8 sps:$4 sm:$0xff]   ;;  %v6937_v12 = vld [vmem:[%s7753_s27 + $0x5a0] ss:$8 sps:$4 sm:$0xff]  }
 0x1c4   : > { %3876 = vmatprep.subr.bf16.mxu0 %v6844_v38  ;;  %v6886_v38 = vld [vmem:[%s7753_s27 + $0xd10] ss:$8 sps:$4 sm:$0xff]  }
 0x1c6   : > { %1606 = vmatpush1.bf16.msra.mxu1 %v6839_v39  ;;  %v6891_v39 = vld [vmem:[%s7753_s27 + $0x524] ss:$8 sps:$4 sm:$0xff]  }
 0x1c7   : > { %3877 = vmatpush1.bf16.msra.mxu0 %v6842_v24  ;;  %1607 = vmatprep.subr.bf16.mxu1 %v6847_v40  ;;  %v6894_v24 = vld [vmem:[%s7753_s27 + $0xd24] ss:$8 sps:$4 sm:$0xff]   ;;  %v1718_v40 = vor.u32 %v1717_v26, %v1714_v45  ;;  %v6949_v45 = vld [vmem:[%s7753_s27 + $0x5c0] ss:$8 sps:$4 sm:$0xff]  }
 0x1c8   : > { %3878 = vmatprep.subr.bf16.mxu0 %v6850_v25  ;;  %v8331_v25 = vor.u32 %v1725_v30, %v1722_v28  ;;  %v6952_v26 = vld [vmem:[%s7753_s27 + $0xdc0] ss:$8 sps:$4 sm:$0xff]   ;;  %v8385_v28 = vcombine.low %v8295_v2, %v8295_v2  ;;  %v5380_v30 = vcombine.low %v8303_v6, %v8281_v59  ;;  %v6958_v2 = vld [vmem:[%s7753_s27 + $0xdd0] ss:$8 sps:$4 sm:$0xff]  }
 0x1ca   : > { %1608 = vmatpush1.bf16.msra.mxu1 %v6845_v41  ;;  %v3974_v41 = vor.u32 %v3973_v23, %v3970_v13  ;;  %v6954_v13 = vld [vmem:[%s7753_s27 + $0xdc4] ss:$8 sps:$4 sm:$0xff]   ;;  %v5378_v23 = vcombine.low %v8275_v56, %v8278_v58 }
 0x1cb   : > { %3879 = vmatpush1.bf16.msra.mxu0 %v6848_v42  ;;  %1609 = vmatprep.subr.bf16.mxu1 %v6853_v46  ;;  %v8333_v42 = vor.u32 %v3981_v55, %v3978_v34  ;;  %v6889_v46 = vld [vmem:[%s7753_s27 + $0x520] ss:$8 sps:$4 sm:$0xff]   ;;  %v6957_v34 = vld [vmem:[%s7753_s27 + $0x5d4] ss:$8 sps:$4 sm:$0xff]  }
 0x1cc   : > { %3880 = vmatprep.subr.bf16.mxu0 %v6856_v47  ;;  %v6892_v47 = vld [vmem:[%s7753_s27 + $0xd20] ss:$8 sps:$4 sm:$0xff]   ;;  %v6960_v55 = vld [vmem:[%s7753_s27 + $0xdd4] ss:$8 sps:$4 sm:$0xff]   ;;  %v1695_v56 = vshrl.u32 %v5378_v23, 16 }
 0x1ce   : > { %1610 = vmatpush1.bf16.msra.mxu1 %v6851_v50  ;;  %v6897_v50 = vld [vmem:[%s7753_s27 + $0x534] ss:$8 sps:$4 sm:$0xff]  }
 0x1cf   : > { %3881 = vmatpush1.bf16.msra.mxu0 %v6854_v51  ;;  %1611 = vmatprep.subr.bf16.mxu1 %v6859_v11  ;;  %v3983_v51 = vsel %vm1111_vm5, %v3974_v41, %v8333_v42  ;;  %v6895_v11 = vld [vmem:[%s7753_s27 + $0x530] ss:$8 sps:$4 sm:$0xff]   ;;  %v1706_v41 = vshll.u32 %v5380_v30, 16 }
 0x1d0   : > { %3882 = vmatprep.subr.bf16.mxu0 %v6862_v52  ;;  %v6898_v52 = vld [vmem:[%s7753_s27 + $0xd30] ss:$8 sps:$4 sm:$0xff]  }
 0x1d2   : > { %1612 = vmatpush1.bf16.msra.mxu1 %v6857_v35  ;;  %v6903_v35 = vld [vmem:[%s7753_s27 + $0x544] ss:$8 sps:$4 sm:$0xff]  }
 0x1d3   : > { %3883 = vmatpush1.bf16.msra.mxu0 %v6860_v32  ;;  %1613 = vmatprep.subr.bf16.mxu1 %v6865_v18  ;;  %v6904_v32 = vld [vmem:[%s7753_s27 + $0xd40] ss:$8 sps:$4 sm:$0xff]   ;;  %v6910_v18 = vld [vmem:[%s7753_s27 + $0xd50] ss:$8 sps:$4 sm:$0xff]  }
 0x1d4   : > { %3884 = vmatprep.subr.bf16.mxu0 %v6868_v53  ;;  %v6915_v53 = vld [vmem:[%s7753_s27 + $0x564] ss:$8 sps:$4 sm:$0xff]  }
 0x1d6   : > { %1614 = vmatpush1.bf16.msra.mxu1 %v6863_v5  ;;  %v6918_v5 = vld [vmem:[%s7753_s27 + $0xd64] ss:$8 sps:$4 sm:$0xff]  }
 0x1d7   : > { %3885 = vmatpush1.bf16.msra.mxu0 %v6866_v7  ;;  %1892 = vmatprep.subr.bf16.mxu1 %v6875_v10  ;;  %v6924_v7 = vld [vmem:[%s7753_s27 + $0xd74] ss:$8 sps:$4 sm:$0xff]   ;;  %v6930_v10 = vld [vmem:[%s7753_s27 + $0xd84] ss:$8 sps:$4 sm:$0xff]  }
 0x1d8   : > { %4148 = vmatprep.subr.bf16.mxu0 %v6882_v49  ;;  %v6925_v49 = vld [vmem:[%s7753_s27 + $0x580] ss:$8 sps:$4 sm:$0xff]  }
 0x1d9   : > { %1616 = vmatmul.mubr.bf16.vlgmr.msra.gmra.mrb[0].mxu1 %v1415_v31  ;;  %v6948_v31 = vld [vmem:[%s7753_s27 + $0xdb4] ss:$8 sps:$4 sm:$0xff]  }
 0x1da   : > { %3887 = vmatmul.mubr.bf16.vlgmr.msra.gmra.mrb[0].mxu0 %v3686_v20  ;;  %1893 = vmatpush1.bf16.msra.mxu1 %v6873_v29  ;;  %v6940_v29 = vld [vmem:[%s7753_s27 + $0xda0] ss:$8 sps:$4 sm:$0xff]   ;;  %v6943_v20 = vld [vmem:[%s7753_s27 + $0x5b0] ss:$8 sps:$4 sm:$0xff]  }
 0x1db   : > { %4149 = vmatpush1.bf16.msra.mxu0 %v6880_v33  ;;  %1894 = vmatprep.subr.bf16.mxu1 %v6885_v57  ;;  %v6945_v33 = vld [vmem:[%s7753_s27 + $0x5b4] ss:$8 sps:$4 sm:$0xff]   ;;  %v6946_v57 = vld [vmem:[%s7753_s27 + $0xdb0] ss:$8 sps:$4 sm:$0xff]  }
 0x1dc   : > { %4150 = vmatprep.subr.bf16.mxu0 %v6888_v21  ;;  %1625 = vmatprep.mubr.bf16.mxu1 %v8218_v63  ;;  %v6900_v63 = vld [vmem:[%s7753_s27 + $0xd34] ss:$8 sps:$4 sm:$0xff]   ;;  %v6951_v21 = vld [vmem:[%s7753_s27 + $0x5c4] ss:$8 sps:$4 sm:$0xff]  }
 0x1dd   : > { %3896 = vmatprep.mubr.bf16.mxu0 %v8221_v0  ;;  %v1727_v0 = vsel %vm1693_vm6, %v1718_v40, %v8331_v25  ;;  %v1703_v40 = vshrl.u32 %v5380_v30, 16  ;;  %v7008_v30 = vld [vmem:[%s7753_s27 + $0xe44] ss:$8 sps:$4 sm:$0xff]  }
 0x1de   : > { %1895 = vmatpush1.bf16.msra.mxu1 %v6883_v37  ;;  %v6955_v37 = vld [vmem:[%s7753_s27 + $0x5d0] ss:$8 sps:$4 sm:$0xff]  }
 0x1df   : > { %4151 = vmatpush1.bf16.msra.mxu0 %v6886_v38  ;;  %1896 = vmatprep.subr.bf16.mxu1 %v6891_v39  ;;  %v1698_v38 = vshll.u32 %v5378_v23, 16  ;;  %v3951_v39 = vshrl.u32 %v8290_v1, 16  ;;  %v6997_v23 = vld [vmem:[%s7753_s27 + $0x630] ss:$8 sps:$4 sm:$0xff]  }
 0x1e0   : > { %4152 = vmatprep.subr.bf16.mxu0 %v6894_v24  ;;  %v3954_v24 = vshll.u32 %v8290_v1, 16 }
 0x1e1   : > { %1626 = vmatmul.mubr.bf16.gmra.mrb[4].mxu1 %v1414_v44  ;;  %v6921_v44 = vld [vmem:[%s7753_s27 + $0x574] ss:$8 sps:$4 sm:$0xff]   ;;  %v3953_v1 = vrot.slane %v3951_v39, 1 }
 0x1e2   : > { %3897 = vmatmul.mubr.bf16.gmra.mrb[4].mxu0 %v3685_v27  ;;  %1897 = vmatpush1.bf16.msra.mxu1 %v6889_v46  ;;  %v6922_v27 = vld [vmem:[%s7753_s27 + $0xd70] ss:$8 sps:$4 sm:$0xff]   ;;  %v3959_v46 = vshrl.u32 %v8385_v28, 16  ;;  %v7011_v39 = vld [vmem:[%s7753_s27 + $0x654] ss:$8 sps:$4 sm:$0xff]  }
 0x1e3   : > { %4153 = vmatpush1.bf16.msra.mxu0 %v6892_v47  ;;  %1898 = vmatprep.subr.bf16.mxu1 %v6897_v50  ;;  %v3962_v47 = vshll.u32 %v8385_v28, 16  ;;  %v6963_v50 = vld [vmem:[%s7753_s27 + $0x5e4] ss:$8 sps:$4 sm:$0xff]  }
 0x1e4   : > { %4154 = vmatprep.subr.bf16.mxu0 %v6900_v63  ;;  %1924 = vmatprep.mubr.bf16.mxu1 %v1727_v0  ;;  %v6966_v63 = vld [vmem:[%s7753_s27 + $0xde4] ss:$8 sps:$4 sm:$0xff]   ;;  %v6961_v0 = vld [vmem:[%s7753_s27 + $0x5e0] ss:$8 sps:$4 sm:$0xff]  }
 0x1e5   : > { %4180 = vmatprep.mubr.bf16.mxu0 %v3983_v51  ;;  %v1697_v51 = vrot.slane %v1695_v56, 3  ;;  %v7003_v56 = vld [vmem:[%s7753_s27 + $0x640] ss:$8 sps:$4 sm:$0xff]  }
 0x1e6   : > { %1899 = vmatpush1.bf16.msra.mxu1 %v6895_v11  ;;  %v1700_v11 = vrot.slane %v1698_v38, 4  ;;  %v7006_v38 = vld [vmem:[%s7753_s27 + $0xe40] ss:$8 sps:$4 sm:$0xff]  }
 0x1e7   : > { %4155 = vmatpush1.bf16.msra.mxu0 %v6898_v52  ;;  %1900 = vmatprep.subr.bf16.mxu1 %v6903_v35  ;;  %v3956_v52 = vrot.slane %v3954_v24, 2  ;;  %v6964_v35 = vld [vmem:[%s7753_s27 + $0xde0] ss:$8 sps:$4 sm:$0xff]   ;;  %v7014_v24 = vld [vmem:[%s7753_s27 + $0xe54] ss:$8 sps:$4 sm:$0xff]  }
 0x1e8   : > { %4156 = vmatprep.subr.bf16.mxu0 %v6906_v60  ;;  %v1705_v60 = vrot.slane %v1703_v40, 3  ;;  %v7009_v40 = vld [vmem:[%s7753_s27 + $0x650] ss:$8 sps:$4 sm:$0xff]  }
 0x1ea   : > { %1901 = vmatpush1.bf16.msra.mxu1 %v6901_v62  ;;  %v1708_v62 = vrot.slane %v1706_v41, 4  ;;  %v7012_v41 = vld [vmem:[%s7753_s27 + $0xe50] ss:$8 sps:$4 sm:$0xff]  }
 0x1eb   : > { %4157 = vmatpush1.bf16.msra.mxu0 %v6904_v32  ;;  %1902 = vmatprep.subr.bf16.mxu1 %v6909_v4  ;;  %v3961_v32 = vrot.slane %v3959_v46, 1  ;;  %v3964_v4 = vrot.slane %v3962_v47, 2  ;;  %v7017_v46 = vld [vmem:[%s7753_s27 + $0x664] ss:$8 sps:$4 sm:$0xff]  }
 0x1ec   : > { %4158 = vmatprep.subr.bf16.mxu0 %v6912_v22  ;;  %v6969_v22 = vld [vmem:[%s7753_s27 + $0x5f4] ss:$8 sps:$4 sm:$0xff]   ;;  %v7020_v47 = vld [vmem:[%s7753_s27 + $0xe64] ss:$8 sps:$4 sm:$0xff]  }
 0x1ee   : > { %1903 = vmatpush1.bf16.msra.mxu1 %v6907_v16  ;;  %v6972_v16 = vld [vmem:[%s7753_s27 + $0xdf4] ss:$8 sps:$4 sm:$0xff]  }
 0x1ef   : > { %4159 = vmatpush1.bf16.msra.mxu0 %v6910_v18  ;;  %1904 = vmatprep.subr.bf16.mxu1 %v6915_v53  ;;  %v3957_v18 = vor.u32 %v3956_v52, %v3953_v1  ;;  %v6967_v53 = vld [vmem:[%s7753_s27 + $0x5f0] ss:$8 sps:$4 sm:$0xff]   ;;  %v7029_v52 = vld [vmem:[%s7753_s27 + $0x684] ss:$8 sps:$4 sm:$0xff]  }
 0x1f0   : > { %4160 = vmatprep.subr.bf16.mxu0 %v6918_v5  ;;  %v6970_v5 = vld [vmem:[%s7753_s27 + $0xdf0] ss:$8 sps:$4 sm:$0xff]  }
 0x1f1   : > { %v7024_v1 = vld [vmem:[%s7753_s27 + $0xe70] ss:$8 sps:$4 sm:$0xff]  }
 0x1f2   : > { %1905 = vmatpush1.bf16.msra.mxu1 %v6913_v43  ;;  %v1701_v43 = vor.u32 %v1700_v11, %v1697_v51  ;;  %v7026_v51 = vld [vmem:[%s7753_s27 + $0xe74] ss:$8 sps:$4 sm:$0xff]   ;;  %v7021_v11 = vld [vmem:[%s7753_s27 + $0x670] ss:$8 sps:$4 sm:$0xff]  }
 0x1f3   : > { %4161 = vmatpush1.bf16.msra.mxu0 %v6916_v3  ;;  %1906 = vmatprep.subr.bf16.mxu1 %v6921_v44  ;;  %v1709_v3 = vor.u32 %v1708_v62, %v1705_v60  ;;  %v3965_v44 = vor.u32 %v3964_v4, %v3961_v32  ;;  %v7027_v60 = vld [vmem:[%s7753_s27 + $0x680] ss:$8 sps:$4 sm:$0xff]   ;;  %v7035_v32 = vld [vmem:[%s7753_s27 + $0x694] ss:$8 sps:$4 sm:$0xff]  }
 0x1f4   : > { %4162 = vmatprep.subr.bf16.mxu0 %v6924_v7  ;;  %v6978_v7 = vld [vmem:[%s7753_s27 + $0x604] ss:$8 sps:$4 sm:$0xff]   ;;  %v7030_v62 = vld [vmem:[%s7753_s27 + $0xe80] ss:$8 sps:$4 sm:$0xff]   ;;  %v7038_v4 = vld [vmem:[%s7753_s27 + $0xe94] ss:$8 sps:$4 sm:$0xff]  }
 0x1f6   : > { %1907 = vmatpush1.bf16.msra.mxu1 %v6919_v8  ;;  %v6983_v8 = vld [vmem:[%s7753_s27 + $0xe04] ss:$8 sps:$4 sm:$0xff]  }
 0x1f7   : > { %4163 = vmatpush1.bf16.msra.mxu0 %v6922_v27  ;;  %1908 = vmatprep.subr.bf16.mxu1 %v6927_v9  ;;  %v6976_v27 = vld [vmem:[%s7753_s27 + $0x600] ss:$8 sps:$4 sm:$0xff]  }
 0x1f8   : > { %4164 = vmatprep.subr.bf16.mxu0 %v6930_v10  ;;  %v6981_v9 = vld [vmem:[%s7753_s27 + $0xe00] ss:$8 sps:$4 sm:$0xff]   ;;  %v1710_v10 = vsel %vm1693_vm6, %v1701_v43, %v1709_v3 }
 0x1f9   : > { %v7042_v43 = vld [vmem:[%s7753_s27 + $0xea0] ss:$8 sps:$4 sm:$0xff]  }
 0x1fa   : > { %1909 = vmatpush1.bf16.msra.mxu1 %v6925_v49  ;;  %v3966_v49 = vsel %vm1111_vm5, %v3957_v18, %v3965_v44  ;;  %v7041_v18 = vld [vmem:[%s7753_s27 + $0x6a4] ss:$8 sps:$4 sm:$0xff]  }
 0x1fb   : > { %4165 = vmatpush1.bf16.msra.mxu0 %v6928_v14  ;;  %1910 = vmatprep.subr.bf16.mxu1 %v6933_v15  ;;  %v8412_v14 = vld [vmem:[%s7764_s11 + $0x10] sm:$0xcc] }
 0x1fc   : > { %4166 = vmatprep.subr.bf16.mxu0 %v6936_v36  ;;  %v6987_v15 = vld [vmem:[%s7753_s27 + $0x614] ss:$8 sps:$4 sm:$0xff]  }
 0x1fd   : > { %v6990_v36 = vld [vmem:[%s7753_s27 + $0xe14] ss:$8 sps:$4 sm:$0xff]  }
 0x1fe   : > { %1911 = vmatpush1.bf16.msra.mxu1 %v6931_v61  ;;  %v8417_v61 = vld [vmem:[%s7764_s11 + $0x18] sm:$0xff] }
 0x1ff   : > { %4167 = vmatpush1.bf16.msra.mxu0 %v6934_v17  ;;  %1912 = vmatprep.subr.bf16.mxu1 %v6939_v19  ;;  %v8421_v17 = vcombine.high %v8412_v14, %v8417_v61  ;;  %v6985_v19 = vld [vmem:[%s7753_s27 + $0x610] ss:$8 sps:$4 sm:$0xff]  }
 0x200   : > { %4168 = vmatprep.subr.bf16.mxu0 %v6942_v54  ;;  %v6988_v54 = vld [vmem:[%s7753_s27 + $0xe10] ss:$8 sps:$4 sm:$0xff]  }
 0x202   : > { %1913 = vmatpush1.bf16.msra.mxu1 %v6937_v12  ;;  %v6993_v12 = vld [vmem:[%s7753_s27 + $0x624] ss:$8 sps:$4 sm:$0xff]  }
 0x203   : > { %4169 = vmatpush1.bf16.msra.mxu0 %v6940_v29  ;;  %1914 = vmatprep.subr.bf16.mxu1 %v6945_v33  ;;  %v6996_v29 = vld [vmem:[%s7753_s27 + $0xe24] ss:$8 sps:$4 sm:$0xff]   ;;  %v4247_v33 = vrot.slane %v8421_v17, 2 }
 0x204   : > { %4170 = vmatprep.subr.bf16.mxu0 %v6948_v31  ;;  %v4248_v31 = vrot.slane %v8309_v48, 2  ;;  %v7099_v48 = vld [vmem:[%s7753_s27 + $0x734] ss:$8 sps:$4 sm:$0xff]  }
 0x206   : > { %1915 = vmatpush1.bf16.msra.mxu1 %v6943_v20  ;;  %v6991_v20 = vld [vmem:[%s7753_s27 + $0x620] ss:$8 sps:$4 sm:$0xff]  }
 0x207   : > { %4171 = vmatpush1.bf16.msra.mxu0 %v6946_v57  ;;  %1916 = vmatprep.subr.bf16.mxu1 %v6951_v21  ;;  %v6994_v57 = vld [vmem:[%s7753_s27 + $0xe20] ss:$8 sps:$4 sm:$0xff]   ;;  %v6999_v21 = vld [vmem:[%s7753_s27 + $0x634] ss:$8 sps:$4 sm:$0xff]  }
 0x208   : > { %4172 = vmatprep.subr.bf16.mxu0 %v6954_v13  ;;  %v7002_v13 = vld [vmem:[%s7753_s27 + $0xe34] ss:$8 sps:$4 sm:$0xff]  }
 0x20a   : > { %1917 = vmatpush1.bf16.msra.mxu1 %v6949_v45  ;;  %v7000_v45 = vld [vmem:[%s7753_s27 + $0xe30] ss:$8 sps:$4 sm:$0xff]  }
 0x20b   : > { %4173 = vmatpush1.bf16.msra.mxu0 %v6952_v26  ;;  %1918 = vmatprep.subr.bf16.mxu1 %v6957_v34  ;;  %v7005_v26 = vld [vmem:[%s7753_s27 + $0x644] ss:$8 sps:$4 sm:$0xff]   ;;  %v7442_v34 = vmov 0  }
 0x20c   : > { %4174 = vmatprep.subr.bf16.mxu0 %v6960_v55  ;;  %6365 = vset.pattern.permute.xlu0 %v7442_v34  ;;  %v4765_v55 = vld [vmem:[#allocation5] sm:$0xff] }
 0x20d   : > { %6366 = vset.pattern.permute.xlu1 %v7442_v34  ;;  %4770 = vperm.xlu0 %6365, %v4765_v55   ;;  %v7078_v34 = vld [vmem:[%s7753_s27 + $0x704] ss:$8 sps:$4 sm:$0xff]  }
 0x20e   : > { %1919 = vmatpush1.bf16.msra.mxu1 %v6955_v37  ;;  %v4767_v37 = vld [vmem:[#allocation5 + $0x10] sm:$0x3]  ;;  %v7083_v55 = vld [vmem:[%s7753_s27 + $0xf04] ss:$8 sps:$4 sm:$0xff]  }
 0x20f   : > { %4175 = vmatpush1.bf16.msra.mxu0 %v6958_v2  ;;  %1920 = vmatprep.subr.bf16.mxu1 %v6963_v50  ;;  %v4766_v2 = vld [vmem:[#allocation5 + $0x8] sm:$0xff] }
 0x210   : > { %4176 = vmatprep.subr.bf16.mxu0 %v6966_v63  ;;  %4780 = vperm.xlu1 %6366, %v4767_v37   ;;  %v7015_v50 = vld [vmem:[%s7753_s27 + $0x660] ss:$8 sps:$4 sm:$0xff]  }
 0x211   : > { %4775 = vperm.xlu0 %6365, %v4766_v2   ;;  %v7018_v63 = vld [vmem:[%s7753_s27 + $0xe60] ss:$8 sps:$4 sm:$0xff]  }
 0x212   : > { %1921 = vmatpush1.bf16.msra.mxu1 %v6961_v0  ;;  %v7023_v0 = vld [vmem:[%s7753_s27 + $0x674] ss:$8 sps:$4 sm:$0xff]  }
 0x213   : > { %4177 = vmatpush1.bf16.msra.mxu0 %v6964_v35  ;;  %1922 = vmatprep.subr.bf16.mxu1 %v6969_v22  ;;  %v7032_v35 = vld [vmem:[%s7753_s27 + $0xe84] ss:$8 sps:$4 sm:$0xff]   ;;  %v7033_v22 = vld [vmem:[%s7753_s27 + $0x690] ss:$8 sps:$4 sm:$0xff]  }
 0x214   : > { %4178 = vmatprep.subr.bf16.mxu0 %v6972_v16  ;;  %v7036_v16 = vld [vmem:[%s7753_s27 + $0xe90] ss:$8 sps:$4 sm:$0xff]  }
 0x216   : > { %1923 = vmatpush1.bf16.msra.mxu1 %v6967_v53  ;;  %v7044_v53 = vld [vmem:[%s7753_s27 + $0xea4] ss:$8 sps:$4 sm:$0xff]  }
 0x217   : > { %4179 = vmatpush1.bf16.msra.mxu0 %v6970_v5  ;;  %2150 = vmatprep.subr.bf16.mxu1 %v6978_v7  ;;  %v7039_v5 = vld [vmem:[%s7753_s27 + $0x6a0] ss:$8 sps:$4 sm:$0xff]   ;;  %v7045_v7 = vld [vmem:[%s7753_s27 + $0x6b0] ss:$8 sps:$4 sm:$0xff]  }
 0x218   : > { %4414 = vmatprep.subr.bf16.mxu0 %v6983_v8  ;;  %v7048_v8 = vld [vmem:[%s7753_s27 + $0xeb0] ss:$8 sps:$4 sm:$0xff]  }
 0x219   : > { %1925 = vmatmul.mubr.bf16.vlgmr.msra.gmra.mrb[0].mxu1 %v1710_v10  ;;  %v7051_v10 = vld [vmem:[%s7753_s27 + $0x6c0] ss:$8 sps:$4 sm:$0xff]  }
 0x21a   : > { %4181 = vmatmul.mubr.bf16.vlgmr.msra.gmra.mrb[0].mxu0 %v3966_v49  ;;  %2151 = vmatpush1.bf16.msra.mxu1 %v6976_v27  ;;  %v7053_v27 = vld [vmem:[%s7753_s27 + $0x6c4] ss:$8 sps:$4 sm:$0xff]   ;;  %v7054_v49 = vld [vmem:[%s7753_s27 + $0xec0] ss:$8 sps:$4 sm:$0xff]  }
 0x21b   : > { %4415 = vmatpush1.bf16.msra.mxu0 %v6981_v9  ;;  %2152 = vmatprep.subr.bf16.mxu1 %v6987_v15  ;;  %v7056_v9 = vld [vmem:[%s7753_s27 + $0xec4] ss:$8 sps:$4 sm:$0xff]   ;;  %v7059_v15 = vld [vmem:[%s7753_s27 + $0x6d4] ss:$8 sps:$4 sm:$0xff]  }
 0x21c   : > { %4416 = vmatprep.subr.bf16.mxu0 %v6990_v36  ;;  %1934 = vmatprep.mubr.bf16.mxu1 %v8331_v25  ;;  %v8437_v25 = vcombine.high %v8278_v58, %v8303_v6  ;;  %v7062_v36 = vld [vmem:[%s7753_s27 + $0xed4] ss:$8 sps:$4 sm:$0xff]  }
 0x21d   : > { %4190 = vmatprep.mubr.bf16.mxu0 %v8333_v42  ;;  %v4249_v42 = vsel %vm2542_vm1, %v4247_v33, %v4248_v31  ;;  %v7063_v33 = vld [vmem:[%s7753_s27 + $0x6e0] ss:$8 sps:$4 sm:$0xff]  }
 0x21e   : > { %2153 = vmatpush1.bf16.msra.mxu1 %v6985_v19  ;;  %v7057_v19 = vld [vmem:[%s7753_s27 + $0x6d0] ss:$8 sps:$4 sm:$0xff]   ;;  %v2261_v37 = vshll.u32 %v8437_v25, 16 }
 0x21f   : > { %4417 = vmatpush1.bf16.msra.mxu0 %v6988_v54  ;;  %2154 = vmatprep.subr.bf16.mxu1 %v6993_v12  ;;  %v7060_v54 = vld [vmem:[%s7753_s27 + $0xed0] ss:$8 sps:$4 sm:$0xff]   ;;  %v7065_v12 = vld [vmem:[%s7753_s27 + $0x6e4] ss:$8 sps:$4 sm:$0xff]  }
 0x220   : > { %4418 = vmatprep.subr.bf16.mxu0 %v6996_v29  ;;  %v7068_v29 = vld [vmem:[%s7753_s27 + $0xee4] ss:$8 sps:$4 sm:$0xff]  }
 0x221   : > { %1935 = vmatmul.mubr.bf16.gmra.mrb[4].mxu1 %v1709_v3  ;;  %v7047_v3 = vld [vmem:[%s7753_s27 + $0x6b4] ss:$8 sps:$4 sm:$0xff]  }
 0x222   : > { %4191 = vmatmul.mubr.bf16.gmra.mrb[4].mxu0 %v3965_v44  ;;  %2155 = vmatpush1.bf16.msra.mxu1 %v6991_v20  ;;  %v7050_v44 = vld [vmem:[%s7753_s27 + $0xeb4] ss:$8 sps:$4 sm:$0xff]   ;;  %v7066_v20 = vld [vmem:[%s7753_s27 + $0xee0] ss:$8 sps:$4 sm:$0xff]  }
 0x223   : > { %4419 = vmatpush1.bf16.msra.mxu0 %v6994_v57  ;;  %2156 = vmatprep.subr.bf16.mxu1 %v6999_v21  ;;  %v8491_v57 = vcombine.low %v8412_v14, %v8417_v61  ;;  %v8494_v21 = vld [vmem:[%s7764_s11 + $0x20] sm:$0xff]  ;;  %v4245_v61 = vrot.slane %v8385_v28, 2  ;;  %v4531_v28 = vshll.u32 %v8421_v17, 16 }
 0x224   : > { %4420 = vmatprep.subr.bf16.mxu0 %v7002_v13  ;;  %2182 = vmatprep.mubr.bf16.mxu1 %v8437_v25  ;;  %v7071_v13 = vld [vmem:[%s7753_s27 + $0x6f4] ss:$8 sps:$4 sm:$0xff]  }
 0x225   : > { %4446 = vmatprep.mubr.bf16.mxu0 %v4249_v42  ;;  %v7074_v42 = vld [vmem:[%s7753_s27 + $0xef4] ss:$8 sps:$4 sm:$0xff]   ;;  %v4244_v14 = vrot.slane %v8491_v57, 2 }
 0x226   : > { %2157 = vmatpush1.bf16.msra.mxu1 %v6997_v23  ;;  %v8499_v23 = vld [vmem:[%s7764_s11 + $0x18] sm:$0x33] }
 0x227   : > { %4421 = vmatpush1.bf16.msra.mxu0 %v7000_v45  ;;  %2158 = vmatprep.subr.bf16.mxu1 %v7005_v26  ;;  %v6049_v45 = vcombine.high %v8494_v21, %v8494_v21  ;;  %v7069_v26 = vld [vmem:[%s7753_s27 + $0x6f0] ss:$8 sps:$4 sm:$0xff]  }
 0x228   : > { %4422 = vmatprep.subr.bf16.mxu0 %v7008_v30  ;;  %v7072_v30 = vld [vmem:[%s7753_s27 + $0xef0] ss:$8 sps:$4 sm:$0xff]  }
 0x229   : > { %v4539_v2 = vshll.u32 %v6049_v45, 16 }
 0x22a   : > { %2159 = vmatpush1.bf16.msra.mxu1 %v7003_v56  ;;  %v8512_v56 = vcombine.low %v8278_v58, %v8303_v6  ;;  %v7087_v58 = vld [vmem:[%s7753_s27 + $0x714] ss:$8 sps:$4 sm:$0xff]  }
 0x22b   : > { %4423 = vmatpush1.bf16.msra.mxu0 %v7006_v38  ;;  %2160 = vmatprep.subr.bf16.mxu1 %v7011_v39  ;;  %v8516_v38 = vcombine.high %v8499_v23, %v8499_v23  ;;  %v4528_v39 = vshrl.u32 %v8421_v17, 16  ;;  %v7090_v6 = vld [vmem:[%s7753_s27 + $0xf14] ss:$8 sps:$4 sm:$0xff]   ;;  %v2259_v17 = vshrl.u32 %v8437_v25, 16  ;;  %v7093_v25 = vld [vmem:[%s7753_s27 + $0x724] ss:$8 sps:$4 sm:$0xff]  }
 0x22c   : > { %4424 = vmatprep.subr.bf16.mxu0 %v7014_v24  ;;  %v4536_v24 = vshrl.u32 %v6049_v45, 16  ;;  %v7132_v45 = vld [vmem:[%s7753_s27 + $0xf84] ss:$8 sps:$4 sm:$0xff]  }
 0x22e   : > { %2161 = vmatpush1.bf16.msra.mxu1 %v7009_v40  ;;  %v7076_v40 = vld [vmem:[%s7753_s27 + $0x700] ss:$8 sps:$4 sm:$0xff]  }
 0x22f   : > { %4425 = vmatpush1.bf16.msra.mxu0 %v7012_v41  ;;  %2162 = vmatprep.subr.bf16.mxu1 %v7017_v46  ;;  %v7081_v41 = vld [vmem:[%s7753_s27 + $0xf00] ss:$8 sps:$4 sm:$0xff]   ;;  %v4246_v46 = vsel %vm2542_vm1, %v4244_v14, %v4245_v61  ;;  %v7135_v14 = vld [vmem:[%s7753_s27 + $0x794] ss:$8 sps:$4 sm:$0xff]  }
 0x230   : > { %4426 = vmatprep.subr.bf16.mxu0 %v7020_v47  ;;  %v5449_v47 = vcombine.high %v8281_v59, %v8281_v59 }
 0x232   : > { %2163 = vmatpush1.bf16.msra.mxu1 %v7015_v50  ;;  %v2263_v50 = vrot.slane %v2261_v37, 1  ;;  %v7141_v37 = vld [vmem:[%s7753_s27 + $0x7a4] ss:$8 sps:$4 sm:$0xff]  }
 0x233   : > { %4427 = vmatpush1.bf16.msra.mxu0 %v7018_v63  ;;  %2164 = vmatprep.subr.bf16.mxu1 %v7023_v0  ;;  %v2266_v63 = vshll.u32 %v8516_v38, 16  ;;  %v4530_v0 = vrot.slane %v4528_v39, 2  ;;  %v7144_v39 = vld [vmem:[%s7753_s27 + $0xfa4] ss:$8 sps:$4 sm:$0xff]  }
 0x234   : > { %4428 = vmatprep.subr.bf16.mxu0 %v7026_v51  ;;  %v4533_v51 = vrot.slane %v4531_v28, 3  ;;  %v7139_v28 = vld [vmem:[%s7753_s27 + $0x7a0] ss:$8 sps:$4 sm:$0xff]  }
 0x236   : > { %2165 = vmatpush1.bf16.msra.mxu1 %v7021_v11  ;;  %v4538_v11 = vrot.slane %v4536_v24, 2  ;;  %v7142_v24 = vld [vmem:[%s7753_s27 + $0xfa0] ss:$8 sps:$4 sm:$0xff]  }
 0x237   : > { %4429 = vmatpush1.bf16.msra.mxu0 %v7024_v1  ;;  %2166 = vmatprep.subr.bf16.mxu1 %v7029_v52  ;;  %v4541_v1 = vrot.slane %v4539_v2, 3  ;;  %v7085_v52 = vld [vmem:[%s7753_s27 + $0x710] ss:$8 sps:$4 sm:$0xff]   ;;  %v7147_v2 = vld [vmem:[%s7753_s27 + $0x7b4] ss:$8 sps:$4 sm:$0xff]  }
 0x238   : > { %4430 = vmatprep.subr.bf16.mxu0 %v7032_v35  ;;  %v7088_v35 = vld [vmem:[%s7753_s27 + $0xf10] ss:$8 sps:$4 sm:$0xff]  }
 0x23a   : > { %2167 = vmatpush1.bf16.msra.mxu1 %v7027_v60  ;;  %v7096_v60 = vld [vmem:[%s7753_s27 + $0xf24] ss:$8 sps:$4 sm:$0xff]  }
 0x23b   : > { %4431 = vmatpush1.bf16.msra.mxu0 %v7030_v62  ;;  %2168 = vmatprep.subr.bf16.mxu1 %v7035_v32  ;;  %v5448_v62 = vcombine.low %v8281_v59, %v8281_v59  ;;  %v2264_v32 = vor.u32 %v2263_v50, %v2259_v17  ;;  %v7154_v17 = vld [vmem:[%s7753_s27 + $0xfc0] ss:$8 sps:$4 sm:$0xff]   ;;  %v6048_v50 = vcombine.low %v8494_v21, %v8494_v21  ;;  %v4514_v21 = vshll.u32 %v8491_v57, 16 }
 0x23c   : > { %4432 = vmatprep.subr.bf16.mxu0 %v7038_v4  ;;  %v8538_v4 = vrot.slane %v2266_v63, 1  ;;  %v7159_v63 = vld [vmem:[%s7753_s27 + $0x7d4] ss:$8 sps:$4 sm:$0xff]  }
 0x23e   : > { %2169 = vmatpush1.bf16.msra.mxu1 %v7033_v22  ;;  %v4534_v22 = vor.u32 %v4533_v51, %v4530_v0  ;;  %v2269_v59 = vsel %vm339_vm0, %v2264_v32, %v8538_v4  ;;  %v7162_v0 = vld [vmem:[%s7753_s27 + $0xfd4] ss:$8 sps:$4 sm:$0xff]   ;;  %v7157_v51 = vld [vmem:[%s7753_s27 + $0x7d0] ss:$8 sps:$4 sm:$0xff]   ;;  %v7170_v32 = vld [vmem:[%s7753_s27 + $0xfe4] ss:$8 sps:$4 sm:$0xff]  }
 0x23f   : > { %4433 = vmatpush1.bf16.msra.mxu0 %v7036_v16  ;;  %2170 = vmatprep.subr.bf16.mxu1 %v7041_v18  ;;  %v8540_v16 = vor.u32 %v4541_v1, %v4538_v11  ;;  %v7091_v18 = vld [vmem:[%s7753_s27 + $0x720] ss:$8 sps:$4 sm:$0xff]   ;;  %v5514_v11 = vcombine.low %v8499_v23, %v8499_v23  ;;  %v2249_v1 = vshll.u32 %v8512_v56, 16  ;;  %v2247_v23 = vshrl.u32 %v8512_v56, 16 }
 0x240   : > { %4434 = vmatprep.subr.bf16.mxu0 %v7044_v53  ;;  %v7094_v53 = vld [vmem:[%s7753_s27 + $0xf20] ss:$8 sps:$4 sm:$0xff]  }
 0x242   : > { %2171 = vmatpush1.bf16.msra.mxu1 %v7039_v5  ;;  %v4543_v5 = vsel %vm2809_vm2, %v4534_v22, %v8540_v16  ;;  %v7165_v22 = vld [vmem:[%s7753_s27 + $0x7e0] ss:$8 sps:$4 sm:$0xff]  }
 0x243   : > { %4435 = vmatpush1.bf16.msra.mxu0 %v7042_v43  ;;  %2172 = vmatprep.subr.bf16.mxu1 %v7047_v3  ;;  %v7097_v43 = vld [vmem:[%s7753_s27 + $0x730] ss:$8 sps:$4 sm:$0xff]  }
 0x244   : > { %4436 = vmatprep.subr.bf16.mxu0 %v7050_v44  ;;  %v7100_v3 = vld [vmem:[%s7753_s27 + $0xf30] ss:$8 sps:$4 sm:$0xff]   ;;  %v7105_v44 = vld [vmem:[%s7753_s27 + $0x744] ss:$8 sps:$4 sm:$0xff]  }
 0x246   : > { %2173 = vmatpush1.bf16.msra.mxu1 %v7045_v7  ;;  %v7108_v7 = vld [vmem:[%s7753_s27 + $0xf44] ss:$8 sps:$4 sm:$0xff]  }
 0x247   : > { %4437 = vmatpush1.bf16.msra.mxu0 %v7048_v8  ;;  %2174 = vmatprep.subr.bf16.mxu1 %v7053_v27  ;;  %v7103_v8 = vld [vmem:[%s7753_s27 + $0x740] ss:$8 sps:$4 sm:$0xff]  }
 0x248   : > { %4438 = vmatprep.subr.bf16.mxu0 %v7056_v9  ;;  %v7106_v27 = vld [vmem:[%s7753_s27 + $0xf40] ss:$8 sps:$4 sm:$0xff]   ;;  %v7111_v9 = vld [vmem:[%s7753_s27 + $0x754] ss:$8 sps:$4 sm:$0xff]  }
 0x24a   : > { %2175 = vmatpush1.bf16.msra.mxu1 %v7051_v10  ;;  %v7114_v10 = vld [vmem:[%s7753_s27 + $0xf54] ss:$8 sps:$4 sm:$0xff]  }
 0x24b   : > { %4439 = vmatpush1.bf16.msra.mxu0 %v7054_v49  ;;  %2176 = vmatprep.subr.bf16.mxu1 %v7059_v15  ;;  %v7109_v49 = vld [vmem:[%s7753_s27 + $0x750] ss:$8 sps:$4 sm:$0xff]  }
 0x24c   : > { %4440 = vmatprep.subr.bf16.mxu0 %v7062_v36  ;;  %v7112_v15 = vld [vmem:[%s7753_s27 + $0xf50] ss:$8 sps:$4 sm:$0xff]   ;;  %v7117_v36 = vld [vmem:[%s7753_s27 + $0x764] ss:$8 sps:$4 sm:$0xff]  }
 0x24e   : > { %2177 = vmatpush1.bf16.msra.mxu1 %v7057_v19  ;;  %v7120_v19 = vld [vmem:[%s7753_s27 + $0xf64] ss:$8 sps:$4 sm:$0xff]  }
 0x24f   : > { %4441 = vmatpush1.bf16.msra.mxu0 %v7060_v54  ;;  %2178 = vmatprep.subr.bf16.mxu1 %v7065_v12  ;;  %v7115_v54 = vld [vmem:[%s7753_s27 + $0x760] ss:$8 sps:$4 sm:$0xff]  }
 0x250   : > { %4442 = vmatprep.subr.bf16.mxu0 %v7068_v29  ;;  %v7118_v12 = vld [vmem:[%s7753_s27 + $0xf60] ss:$8 sps:$4 sm:$0xff]   ;;  %v7123_v29 = vld [vmem:[%s7753_s27 + $0x774] ss:$8 sps:$4 sm:$0xff]  }
 0x252   : > { %2179 = vmatpush1.bf16.msra.mxu1 %v7063_v33  ;;  %v7126_v33 = vld [vmem:[%s7753_s27 + $0xf74] ss:$8 sps:$4 sm:$0xff]  }
 0x253   : > { %4443 = vmatpush1.bf16.msra.mxu0 %v7066_v20  ;;  %2180 = vmatprep.subr.bf16.mxu1 %v7071_v13  ;;  %v7121_v20 = vld [vmem:[%s7753_s27 + $0x770] ss:$8 sps:$4 sm:$0xff]  }
 0x254   : > { %4444 = vmatprep.subr.bf16.mxu0 %v7074_v42  ;;  %v7124_v13 = vld [vmem:[%s7753_s27 + $0xf70] ss:$8 sps:$4 sm:$0xff]   ;;  %v7129_v42 = vld [vmem:[%s7753_s27 + $0x784] ss:$8 sps:$4 sm:$0xff]  }
 0x256   : > { %2181 = vmatpush1.bf16.msra.mxu1 %v7069_v26  ;;  %v7127_v26 = vld [vmem:[%s7753_s27 + $0x780] ss:$8 sps:$4 sm:$0xff]  }
 0x257   : > { %4445 = vmatpush1.bf16.msra.mxu0 %v7072_v30  ;;  %2440 = vmatprep.subr.bf16.mxu1 %v7078_v34  ;;  %v7130_v30 = vld [vmem:[%s7753_s27 + $0xf80] ss:$8 sps:$4 sm:$0xff]   ;;  %v7133_v34 = vld [vmem:[%s7753_s27 + $0x790] ss:$8 sps:$4 sm:$0xff]  }
 0x258   : > { %4708 = vmatprep.subr.bf16.mxu0 %v7083_v55  ;;  %v7136_v55 = vld [vmem:[%s7753_s27 + $0xf90] ss:$8 sps:$4 sm:$0xff]  }
 0x259   : > { %2183 = vmatmul.mubr.bf16.vlgmr.msra.gmra.mrb[0].mxu1 %v8512_v56  ;;  %v7174_v56 = vld [vmem:[%s7753_s27 + $0xff0] ss:$8 sps:$4 sm:$0xff]  }
 0x25a   : > { %4447 = vmatmul.mubr.bf16.vlgmr.msra.gmra.mrb[0].mxu0 %v4246_v46  ;;  %2441 = vmatpush1.bf16.msra.mxu1 %v7076_v40  ;;  %v7150_v40 = vld [vmem:[%s7753_s27 + $0xfb4] ss:$8 sps:$4 sm:$0xff]   ;;  %v7148_v46 = vld [vmem:[%s7753_s27 + $0xfb0] ss:$8 sps:$4 sm:$0xff]  }
 0x25b   : > { %4709 = vmatpush1.bf16.msra.mxu0 %v7081_v41  ;;  %2442 = vmatprep.subr.bf16.mxu1 %v7087_v58  ;;  %v7145_v41 = vld [vmem:[%s7753_s27 + $0x7b0] ss:$8 sps:$4 sm:$0xff]   ;;  %v7153_v58 = vld [vmem:[%s7753_s27 + $0x7c4] ss:$8 sps:$4 sm:$0xff]  }
 0x25c   : > { %4710 = vmatprep.subr.bf16.mxu0 %v7090_v6  ;;  %2192 = vmatprep.mubr.bf16.mxu1 %v5449_v47  ;;  %v7156_v6 = vld [vmem:[%s7753_s27 + $0xfc4] ss:$8 sps:$4 sm:$0xff]   ;;  %v7151_v47 = vld [vmem:[%s7753_s27 + $0x7c0] ss:$8 sps:$4 sm:$0xff]  }
 0x25d   : > { %4456 = vmatprep.mubr.bf16.mxu0 %v4248_v31  ;;  %v7102_v31 = vld [vmem:[%s7753_s27 + $0xf34] ss:$8 sps:$4 sm:$0xff]  }
 0x25e   : > { %2443 = vmatpush1.bf16.msra.mxu1 %v7085_v52  ;;  %v7160_v52 = vld [vmem:[%s7753_s27 + $0xfd0] ss:$8 sps:$4 sm:$0xff]  }
 0x25f   : > { %4711 = vmatpush1.bf16.msra.mxu0 %v7088_v35  ;;  %2444 = vmatprep.subr.bf16.mxu1 %v7093_v25  ;;  %v4511_v35 = vshrl.u32 %v8491_v57, 16  ;;  %v4519_v25 = vshrl.u32 %v6048_v50, 16  ;;  %v4516_v57 = vrot.slane %v4514_v21, 3 }
 0x260   : > { %4712 = vmatprep.subr.bf16.mxu0 %v7096_v60  ;;  %v4522_v60 = vshll.u32 %v6048_v50, 16 }
 0x261   : > { %2193 = vmatmul.mubr.bf16.gmra.mrb[4].mxu1 %v5448_v62  ;;  %v7167_v62 = vld [vmem:[%s7753_s27 + $0x7e4] ss:$8 sps:$4 sm:$0xff]  }
 0x262   : > { %4457 = vmatmul.mubr.bf16.gmra.mrb[4].mxu0 %v4245_v61  ;;  %2445 = vmatpush1.bf16.msra.mxu1 %v7091_v18  ;;  %v7138_v61 = vld [vmem:[%s7753_s27 + $0xf94] ss:$8 sps:$4 sm:$0xff]   ;;  %v2251_v18 = vrot.slane %v2249_v1, 1 }
 0x263   : > { %4713 = vmatpush1.bf16.msra.mxu0 %v7094_v53  ;;  %2446 = vmatprep.subr.bf16.mxu1 %v7099_v48  ;;  %v2254_v53 = vshll.u32 %v5514_v11, 16  ;;  %v7168_v48 = vld [vmem:[%s7753_s27 + $0xfe0] ss:$8 sps:$4 sm:$0xff]  }
 0x264   : > { %4714 = vmatprep.subr.bf16.mxu0 %v7102_v31  ;;  %2472 = vmatprep.mubr.bf16.mxu1 %v2269_v59  ;;  %v4513_v31 = vrot.slane %v4511_v35, 2  ;;  %v4521_v59 = vrot.slane %v4519_v25, 2 }
 0x265   : > { %4740 = vmatprep.mubr.bf16.mxu0 %v4543_v5  ;;  %v4524_v5 = vrot.slane %v4522_v60, 3 }
 0x266   : > { %2447 = vmatpush1.bf16.msra.mxu1 %v7097_v43  ;;  %v7173_v43 = vld [vmem:[%s7753_s27 + $0x7f4] ss:$8 sps:$4 sm:$0xff]  }
 0x267   : > { %4715 = vmatpush1.bf16.msra.mxu0 %v7100_v3  ;;  %2448 = vmatprep.subr.bf16.mxu1 %v7105_v44  ;;  %v7176_v3 = vld [vmem:[%s7753_s27 + $0xff4] ss:$8 sps:$4 sm:$0xff]   ;;  %v2252_v44 = vor.u32 %v2251_v18, %v2247_v23 }
 0x268   : > { %4716 = vmatprep.subr.bf16.mxu0 %v7108_v7  ;;  %v7171_v7 = vld [vmem:[%s7753_s27 + $0x7f0] ss:$8 sps:$4 sm:$0xff]   ;;  %s7284_s27 = sshll.u32 %s7443_s26, 4  ;;  %s7285_s27 = int_to_ptr.vmem [resolvable:$false] %s7284_s27 }
 0x269   : > { %s7286_s5 = scalar_lea.vmem %s7285_s27, 768  ;;  %p7287_p6 = scmp.lt.s32.totalorder %s8632_s22, %s7285_s27 }
 0x26a   : > { %2449 = vmatpush1.bf16.msra.mxu1 %v7103_v8  ;;  %v2256_v8 = vrot.slane %v2254_v53, 1  ;;  %p7288_p4 = scmp.lt.s32.totalorder %s7286_s5, %s7280_s18 }
 0x26b   : > { %4717 = vmatpush1.bf16.msra.mxu0 %v7106_v27  ;;  %2450 = vmatprep.subr.bf16.mxu1 %v7111_v9  ;;  %v4517_v27 = vor.u32 %v4516_v57, %v4513_v31  ;;  %v4525_v9 = vor.u32 %v4524_v5, %v4521_v59 }
 0x26c   : > { %4718 = vmatprep.subr.bf16.mxu0 %v7114_v10  ;;  %v2273_v10 = vshrl.u32 %v8516_v38, 16  ;;  %p7289_p11 = por %p7288_p4, %p7287_p6 }
 0x26e   : > { %2451 = vmatpush1.bf16.msra.mxu1 %v7109_v49  ;;  %v2257_v49 = vsel %vm339_vm0, %v2252_v44, %v2256_v8  ;;  %p7290_p8 = pnand %p7289_p11, %p7283_p2 }
 0x26f   : > { %4719 = vmatpush1.bf16.msra.mxu0 %v7112_v15  ;;  %2452 = vmatprep.subr.bf16.mxu1 %v7117_v36  ;;  %v4526_v15 = vsel %vm2809_vm2, %v4517_v27, %v4525_v9  ;;  %v2275_v36 = vor.u32 %v2273_v10, %v8538_v4 }
 0x270   : > { %4720 = vmatprep.subr.bf16.mxu0 %v7120_v19  ;;  %v2270_v19 = vshrl.u32 %v5514_v11, 16 }
 0x272   : > { %2453 = vmatpush1.bf16.msra.mxu1 %v7115_v54  ;;  %v2272_v54 = vor.u32 %v2270_v19, %v2256_v8 }
 0x273   : > { %4721 = vmatpush1.bf16.msra.mxu0 %v7118_v12  ;;  %2454 = vmatprep.subr.bf16.mxu1 %v7123_v29 }
 0x274   : > { %4722 = vmatprep.subr.bf16.mxu0 %v7126_v33 }
 0x276   : > { %2455 = vmatpush1.bf16.msra.mxu1 %v7121_v20 }
 0x277   : > { %4723 = vmatpush1.bf16.msra.mxu0 %v7124_v13  ;;  %2456 = vmatprep.subr.bf16.mxu1 %v7129_v42 }
 0x278   : > { %4724 = vmatprep.subr.bf16.mxu0 %v7132_v45 }
 0x27a   : > { %2457 = vmatpush1.bf16.msra.mxu1 %v7127_v26 }
 0x27b   : > { %4725 = vmatpush1.bf16.msra.mxu0 %v7130_v30  ;;  %2458 = vmatprep.subr.bf16.mxu1 %v7135_v14 }
 0x27c   : > { %4726 = vmatprep.subr.bf16.mxu0 %v7138_v61 }
 0x27e   : > { %2459 = vmatpush1.bf16.msra.mxu1 %v7133_v34 }
 0x27f   : > { %4727 = vmatpush1.bf16.msra.mxu0 %v7136_v55  ;;  %2460 = vmatprep.subr.bf16.mxu1 %v7141_v37 }
 0x280   : > { %4728 = vmatprep.subr.bf16.mxu0 %v7144_v39 }
 0x282   : > { %2461 = vmatpush1.bf16.msra.mxu1 %v7139_v28 }
 0x283   : > { %4729 = vmatpush1.bf16.msra.mxu0 %v7142_v24  ;;  %2462 = vmatprep.subr.bf16.mxu1 %v7147_v2 }
 0x284   : > { %4730 = vmatprep.subr.bf16.mxu0 %v7150_v40 }
 0x286   : > { %2463 = vmatpush1.bf16.msra.mxu1 %v7145_v41 }
 0x287   : > { %4731 = vmatpush1.bf16.msra.mxu0 %v7148_v46  ;;  %2464 = vmatprep.subr.bf16.mxu1 %v7153_v58 }
 0x288   : > { %4732 = vmatprep.subr.bf16.mxu0 %v7156_v6 }
 0x28a   : > { %2465 = vmatpush1.bf16.msra.mxu1 %v7151_v47 }
 0x28b   : > { %4733 = vmatpush1.bf16.msra.mxu0 %v7154_v17  ;;  %2466 = vmatprep.subr.bf16.mxu1 %v7159_v63 }
 0x28c   : > { %4734 = vmatprep.subr.bf16.mxu0 %v7162_v0  ;;  %v4771_v38 = vpop.permute.xlu0 %4770 }
 0x28e   : > { %2467 = vmatpush1.bf16.msra.mxu1 %v7157_v51 }
 0x28f   : > { %4735 = vmatpush1.bf16.msra.mxu0 %v7160_v52  ;;  %2468 = vmatprep.subr.bf16.mxu1 %v7167_v62  ;;  %v4781_v24 = vpop.permute.xlu1 %4780 }
 0x290   : > { %4736 = vmatprep.subr.bf16.mxu0 %v7170_v32  ;;  %v4776_v12 = vpop.permute.xlu0 %4775 }
 0x292   : > { %2469 = vmatpush1.bf16.msra.mxu1 %v7165_v22 }
 0x293   : > { %4737 = vmatpush1.bf16.msra.mxu0 %v7168_v48  ;;  %2470 = vmatprep.subr.bf16.mxu1 %v7173_v43 }
 0x294   : > { %4738 = vmatprep.subr.bf16.mxu0 %v7176_v3 }
 0x296   : > { %2471 = vmatpush1.bf16.msra.mxu1 %v7171_v7 }
 0x297   : > { %4739 = vmatpush1.bf16.msra.mxu0 %v7174_v56 }
 0x299   : > { %2473 = vmatmul.mubr.bf16.vlgmr.msra.gmra.mrb[0].mxu1 %v2257_v49 }
 0x29a   : > { %4741 = vmatmul.mubr.bf16.vlgmr.msra.gmra.mrb[0].mxu0 %v4526_v15  ;;  %2482 = vmatprep.mubr.bf16.mxu1 %v2275_v36 }
 0x29b   : > { %4750 = vmatprep.mubr.bf16.mxu0 %v8540_v16 }
 0x2a1   : > { %2483 = vmatmul.mubr.bf16.gmra.mrb[4].mxu1 %v2272_v54 }
 0x2a2   : > { %4751 = vmatmul.mubr.bf16.gmra.mrb[4].mxu0 %v4525_v9 }
 0x36c   : > { %v2474_v29 = vpop.f32.mrb[0].mxu1 }
 0x36d   : > { %v4742_v33 = vpop.f32.mrb[0].mxu0  ;;  %v2476_v13 = vpop.f32.mrb[1].mxu1 }
 0x36e   : > { %v6093_v20 = vadd.f32 %v4742_v33, %v2474_v29  ;;  %v4744_v42 = vpop.f32.mrb[1].mxu0  ;;  %v2478_v26 = vpop.f32.mrb[2].mxu1 }
 0x36f   : > { %v6094_v45 = vadd.f32 %v4744_v42, %v2476_v13  ;;  %v4746_v30 = vpop.f32.mrb[2].mxu0  ;;  %v2480_v14 = vpop.f32.mrb[3].mxu1 }
 0x370   : > { %v6095_v4 = vadd.f32 %v4746_v30, %v2478_v26  ;;  %v4748_v61 = vpop.f32.mrb[3].mxu0  ;;  %v4783_v55 = vmul.f32 %v6093_v20, %v4771_v38 }
 0x371   : > { %v6096_v34 = vadd.f32 %v4748_v61, %v2480_v14  ;;  %v4784_v16 = vmul.f32 %v6094_v45, %v4771_v38 }
 0x372   : > { %v4785_v37 = vmul.f32 %v6095_v4, %v4776_v12 }
 0x373   : > { %v4786_v39 = vmul.f32 %v6096_v34, %v4776_v12 }
 0x374   : > { %v4789_v28 = vadd.f32 %v4785_v37, %v4783_v55  ;;  %v2484_v40 = vpop.f32.mrb[4].mxu1 }
 0x375   : > { %v4799_v2 = vadd.f32 %v4786_v39, %v4784_v16  ;;  %v4752_v41 = vpop.f32.mrb[4].mxu0  ;;  %v2486_v58 = vpop.f32.mrb[5].mxu1 }
 0x376   : > { %v6097_v46 = vadd.f32 %v4752_v41, %v2484_v40  ;;  %v4754_v6 = vpop.f32.mrb[5].mxu0  ;;  %v2488_v17 = vpop.f32.mrb[6].mxu1 }
 0x377   : > { %v6098_v47 = vadd.f32 %v4754_v6, %v2486_v58  ;;  %v4756_v50 = vpop.f32.mrb[6].mxu0  ;;  %v2489_v0 = vpop.f32.mrb[7].mxu1 }
 0x378   : > { %v4787_v63 = vmul.f32 %v6097_v46, %v4781_v24  ;;  %v4757_v51 = vpop.f32.mrb[7].mxu0 }
 0x379   : > { %v4788_v11 = vmul.f32 %v6098_v47, %v4781_v24 }
 0x37a   : > { %v4791_v1 = vsel %vm4790_vm7, %v4787_v63, 0.0 }
 0x37b   : > { %v4792_v52 = vadd.f32 %v4791_v1, %v4789_v28  ;;  %v4800_v35 = vsel %vm4790_vm7, %v4788_v11, 0.0 }
 0x37c   : > { %v4801_v21 = vadd.f32 %v4800_v35, %v4799_v2 }
 0x37d   : > { %v4793_v25 = vrot.slane %v4792_v52, 4 }
 0x37e   : > { %v4802_v60 = vrot.slane %v4801_v21, 4 }
 0x37f   : > { %v4794_v62 = vadd.f32 %v4793_v25, %v4792_v52 }
 0x380   : > { %v4803_v32 = vadd.f32 %v4802_v60, %v4801_v21 }
 0x381   : > { %v4795_v22 = vrot.slane %v4794_v62, 2 }
 0x382   : > { %v4804_v23 = vrot.slane %v4803_v32, 2 }
 0x383   : > { %v4796_v18 = vadd.f32 %v4795_v22, %v4794_v62 }
 0x384   : > { %v4805_v53 = vadd.f32 %v4804_v23, %v4803_v32 }
 0x385   : > { %v4797_v48 = vrot.slane %v4796_v18, 1 }
 0x386   : > { %v4806_v31 = vrot.slane %v4805_v53, 1 }
 0x387   : > { %v4798_v57 = vadd.f32 %v4797_v48, %v4796_v18 }
 0x388   : > { %v4807_v59 = vadd.f32 %v4806_v31, %v4805_v53 }
 0x389   : > { %v4808_v5 = vmul.f32 0.11111111, %v4798_v57 }
 0x38a   : > { %v4809_v43 = vmul.f32 0.11111111, %v4807_v59 }
 0x38b   : > { %v4810_v3 = vsub.f32 %v6093_v20, %v4808_v5  ;;  %v4812_v44 = vsub.f32 %v6095_v4, %v4808_v5  ;;  %v4814_v7 = vsub.f32 %v6097_v46, %v4808_v5 }
 0x38c   : > { %v4811_v56 = vsub.f32 %v6094_v45, %v4809_v43  ;;  %v4813_v8 = vsub.f32 %v6096_v34, %v4809_v43  ;;  %v4815_v27 = vsub.f32 %v6098_v47, %v4809_v43 }
 0x38d   : > { %v4816_v9 = vmul.f32 %v4810_v3, %v4771_v38  ;;  %v4818_v10 = vmul.f32 %v4812_v44, %v4776_v12  ;;  %v4820_v49 = vmul.f32 %v4814_v7, %v4781_v24 }
 0x38e   : > { %v4817_v15 = vmul.f32 %v4811_v56, %v4771_v38  ;;  %v4819_v36 = vmul.f32 %v4813_v8, %v4776_v12  ;;  %v4821_v19 = vmul.f32 %v4815_v27, %v4781_v24 }
 0x38f   : > { %v4822_v54 = vmul.f32 %v4816_v9, %v4816_v9  ;;  %v4824_v29 = vmul.f32 %v4818_v10, %v4818_v10  ;;  %v4826_v33 = vmul.f32 %v4820_v49, %v4820_v49 }
 0x390   : > { %v4823_v13 = vmul.f32 %v4817_v15, %v4817_v15  ;;  %v4825_v42 = vmul.f32 %v4819_v36, %v4819_v36  ;;  %v4827_v26 = vmul.f32 %v4821_v19, %v4821_v19 }
 0x391   : > { %v4828_v30 = vadd.f32 %v4824_v29, %v4822_v54  ;;  %v4829_v20 = vsel %vm4790_vm7, %v4826_v33, 0.0 }
 0x392   : > { %v4837_v4 = vadd.f32 %v4825_v42, %v4823_v13  ;;  %v4838_v45 = vsel %vm4790_vm7, %v4827_v26, 0.0 }
 0x393   : > { %v4830_v14 = vadd.f32 %v4829_v20, %v4828_v30 }
 0x394   : > { %v4839_v61 = vadd.f32 %v4838_v45, %v4837_v4 }
 0x395   : > { %v4831_v34 = vrot.slane %v4830_v14, 4 }
 0x396   : > { %v4840_v55 = vrot.slane %v4839_v61, 4 }
 0x397   : > { %v4832_v37 = vadd.f32 %v4831_v34, %v4830_v14 }
 0x398   : > { %v4841_v38 = vadd.f32 %v4840_v55, %v4839_v61 }
 0x399   : > { %v4833_v12 = vrot.slane %v4832_v37, 2 }
 0x39a   : > { %v4842_v16 = vrot.slane %v4841_v38, 2 }
 0x39b   : > { %v4834_v39 = vadd.f32 %v4833_v12, %v4832_v37 }
 0x39c   : > { %v4843_v28 = vadd.f32 %v4842_v16, %v4841_v38 }
 0x39d   : > { %v4835_v24 = vrot.slane %v4834_v39, 1 }
 0x39e   : > { %v4844_v2 = vrot.slane %v4843_v28, 1 }
 0x39f   : > { %v4836_v40 = vadd.f32 %v4835_v24, %v4834_v39 }
 0x3a0   : > { %v4845_v41 = vadd.f32 %v4844_v2, %v4843_v28 }
 0x3a1   : > { %v4846_v46 = vmul.f32 0.11111111, %v4836_v40 }
 0x3a2   : > { %v4847_v58 = vmul.f32 0.11111111, %v4845_v41 }
 0x3a3   : > { %v4848_v6 = vadd.f32 1e-05, %v4846_v46 }
 0x3a4   : > { %v4849_v47 = vadd.f32 1e-05, %v4847_v58 }
 0x3a5   : > { %7181 = vrsqrt.f32 %v4848_v6 }
 0x3a6   : > { %7183 = vrsqrt.f32 %v4849_v47 }
 0x3af   : > { %v7182_v17 = vpop.eup %7181 }
 0x3b0   : > { %v7184_v50 = vpop.eup %7183  ;;  %v4852_v63 = vmul.f32 %v7182_v17, %v4810_v3  ;;  %v4854_v0 = vmul.f32 %v7182_v17, %v4812_v44  ;;  %v4856_v51 = vmul.f32 %v7182_v17, %v4814_v7 }
 0x3b1   : > { %v4853_v11 = vmul.f32 %v7184_v50, %v4811_v56  ;;  %v4855_v1 = vmul.f32 %v7184_v50, %v4813_v8  ;;  %v4857_v52 = vmul.f32 %v7184_v50, %v4815_v27 }
 0x3b2   : > { %vm4858_vm8 = vcmp.ge.f32.partialorder %v4852_v63, 0.0  ;;  %vm4860_vm9 = vcmp.ge.f32.partialorder %v4854_v0, 0.0  ;;  %vm4862_vm10 = vcmp.ge.f32.partialorder %v4856_v51, 0.0  ;;  %v4864_v35 = vmul.f32 0.2, %v4852_v63 }
 0x3b3   : > { %vm4859_vm11 = vcmp.ge.f32.partialorder %v4853_v11, 0.0  ;;  %vm4861_vm12 = vcmp.ge.f32.partialorder %v4855_v1, 0.0  ;;  %vm4863_vm13 = vcmp.ge.f32.partialorder %v4857_v52, 0.0  ;;  %v4865_v21 = vmul.f32 0.2, %v4853_v11 }
 0x3b4   : > { %v4866_v25 = vmul.f32 0.2, %v4854_v0  ;;  %v4867_v60 = vmul.f32 0.2, %v4855_v1  ;;  %v4868_v62 = vmul.f32 0.2, %v4856_v51  ;;  %v4870_v32 = vsel %vm4858_vm8, %v4852_v63, %v4864_v35 }
 0x3b5   : > { %v4869_v22 = vmul.f32 0.2, %v4857_v52  ;;  %v4871_v23 = vsel %vm4859_vm11, %v4853_v11, %v4865_v21 }
 0x3b6   : > { %v4872_v18 = vsel %vm4860_vm9, %v4854_v0, %v4866_v25  ;;  %v4873_v53 = vsel %vm4861_vm12, %v4855_v1, %v4867_v60  ;;  %v4874_v48 = vsel %vm4862_vm10, %v4856_v51, %v4868_v62  ;;  %v6090_v31 = vpack.c.bf16 %v4871_v23, %v4870_v32 }
 0x3b7   : > { %v4875_v57 = vsel %vm4863_vm13, %v4857_v52, %v4869_v22  ;;  %v6091_v59 = vpack.c.bf16 %v4873_v53, %v4872_v18 }
 0x3b8   : > { %v6092_v5 = vpack.c.bf16 %v4875_v57, %v4874_v48  ;;  %4896 = vst [vmem:[%s254_s21] sm:$0xff] %v6090_v31 }
 0x3b9   : > { %4897 = vst [vmem:[%s254_s21 + $0x8] sm:$0xff] %v6091_v59 }
 0x3ba   : > { %4898 = vst [vmem:[%s254_s21 + $0x10] sm:$0x11] %v6092_v5 }
 0x3bb   : > { %7293 = shalt.err (!%p7290_p8)
}
 0x3bc   : > { %s7294_s7 = scalar_lea.hbm %s8630_s12, 384  ;;  %s7298_s9 = scalar_lea.hbm %s8771_s30, 1536 }
 0x3bd   : > { %p7295_p0 = scmp.ne.s32.totalorder %s8630_s12, %s7294_s7  ;;  %p7299_p5 = scmp.lt.u32.totalorder %s8630_s12, %s8771_s30 }
 0x3be   : > { %p7300_p3 = scmp.lt.u32.totalorder %s7298_s9, %s7294_s7  ;;  %p7302_p1 = scmp.lt.u32.totalorder %s7294_s7, %s8630_s12 }
 0x3bf   : > { %p7296_p7 = pnand %p7295_p0, %p8772_p9 }
 0x3c0   : > { %p7301_p10 = por %p7300_p3, %p7299_p5 }
 0x3c1   : > { %p7297_p13 = pneg %p7296_p7 }
 0x3c2   : > { %p7303_p12 = por %p7302_p1, %p7301_p10 }
 0x3c4   : > { %p7304_p2 = pnand %p7303_p12, %p7297_p13 }
 0x3c6   : > { %7307 = shalt.err (!%p7304_p2)
}
 0x3c7   : > { %s7444_s20 = smov 128   ;;  %s7445_s10 = smov 256  }
 0x3c8   : > { %s7446_s21 = smov 8  }
 0x3c9   : > { %6224 = dma.vmem_to_hbm [thread:$0]  (%p8772_p9), %s8632_s22, 384, %s8630_s12, %s8636_s29, %s7444_s20, %s7445_s10, %s7446_s21  }
 0x3ca PF: > { %s8773_s6 = sld [smem:[#allocation13_spill]]  ;;  %s8774_s8 = sld [smem:[#allocation19_spill]] }
 0x3cb   : > { %p6244_p6 = scmp.ge.s32.totalorder %s7434_s25, 2 }
 0x3d0   : > { %s4930_s23 = sand.u32 1, %s8773_s6   ;;  %p8775_p4 = scmp.ne.s32.totalorder %s8774_s8, 0 }
 0x3d1   : > { %s4931_s18 = scalar_lea.sflag [#allocation4], %s4930_s23 }
 0x3d2   : > { %p6238_p11 = pnand %p6244_p6, %p8775_p4 }
 0x3d4   : > { %7377 = dma.done.wait (!%p6238_p11), %s4931_s18, 384  }
 0x3d5   : > { %7379 = vsyncadd (!%p6238_p11), %s4931_s18, 4294966912  ;;  %s20_s25 = sadd.s32 1, %s7434_s25   ;;  %s8777_s22 = sld [smem:[#allocation14_spill]] }
 0x3d6   : > { %p8665_p8 = scmp.ge.s32.totalorder %s20_s25, 6   ;;  %s8778_s20 = sld [smem:[#allocation17_spill]] }
 0x3d7   : > { %s8779_s21 = sld [smem:[#allocation15_spill]]  ;;  %s8780_s23 = sld [smem:[#allocation16_spill]] }
 0x3d8   : > { %s8781_s28 = sld [smem:[#allocation20_spill]]  ;;  %s8782_s12 = smov %s7386_s13 }
 0x3d9   : > { %s8783_s13 = smov %s7390_s14  ;;  %s8784_s14 = smov %s7710_s15 }
 0x3da   : > { %s8785_s15 = smov %s7398_s16  ;;  %s8786_s16 = smov %s7402_s17 }
 0x3db   : > { %s8787_s17 = smov %s7705_s1  ;;  %s8788_s18 = smov %s7410_s19 }
 0x3dc   : > { %s8789_s19 = smov %s8777_s22  ;;  %s8790_s22 = smov %s7430_s24 }
 0x3dd   :  { %19 = sbr.rel (!%p8665_p8) target bundleno = 15 (0xf), region = 107 }
 0x3de   : > { %s8791_s24 = smov %s8781_s28 }
 0x3e4   :  { %4936 = vsyncpa [#allocation3], 1 }
 0x3e5   :  { %4938 = vsyncpa [#allocation3 + $0x1], 1 }
 0x3e6   :  { %4939 = vsyncpa [#allocation6], 1 }
 0x3e7   :  { %4940 = vsyncpa [#allocation4], 1 }
 0x3e8   :  { %4942 = vsyncpa [#allocation4 + $0x1], 1 }

</bundles_post_ra>
